<compile_context>
chip_gen: v5e
topology: v5e:2x2
jax: 0.10.0
libtpu: 0.0.40
codegen_flags: <defaults>
</compile_context>

<pallas_src>
import functools

import numpy as np
import jax
import jax.numpy as jnp
from jax import lax
from jax.experimental import pallas as pl
from jax.experimental.pallas import tpu as pltpu


_CHUNK_COLS = 512            # lane-chunk width for large levels
_INTERP_TO_ID = {"nearest": 0, "linear": 1}


def _round_up(x, m):
    return (x + m - 1) // m * m


def _face_uv(x, y, z):
    """OpenGL-style cubemap face selection. Args are [TB, 1] f32.

    Returns face (f32 in {0..5}), u, v in [0,1], valid (f32 0/1).
    """
    ax, ay, az = jnp.abs(x), jnp.abs(y), jnp.abs(z)
    ma = jnp.maximum(jnp.maximum(ax, ay), az)
    valid = (ma > 0.0).astype(jnp.float32)
    safe_ma = jnp.where(ma > 0.0, ma, 1.0)

    is_x = (ax >= ay) & (ax >= az)
    is_y = jnp.logical_and(jnp.logical_not(is_x), ay >= az)

    face = jnp.where(
        is_x, jnp.where(x > 0, 0.0, 1.0),
        jnp.where(is_y, jnp.where(y > 0, 2.0, 3.0),
                  jnp.where(z > 0, 4.0, 5.0)))
    sc = jnp.where(is_x, jnp.where(x > 0, -z, z),
                   jnp.where(is_y, x, jnp.where(z > 0, x, -x)))
    tc = jnp.where(is_x, -y,
                   jnp.where(is_y, jnp.where(y > 0, z, -z), -y))

    u = 0.5 * (sc / safe_ma + 1.0)   # in [0, 1]
    v = 0.5 * (tc / safe_ma + 1.0)
    return face, u, v, valid


def _fused_cubemap_kernel(dirs_ref, *refs, Ls, C, interp_id, out_pad):
    """All mip levels fused into one grid step over a batch tile.

    refs layout: [E_0, S_0, xcol_0, ..., E_{n-1}, S_{n-1}, xcol_{n-1},
                  fail_pad, out, acc]
      E_l    : [6*L, L*C]  bf16  texels; row = face*L + y, col = x*C + c
      S_l    : [L*C, out_pad] bf16  reduces over x AND scatters channel c
                                    into the level's output column slice
      xcol_l : [1, L*C]  f32   x index of each column (col // C)
      fail   : [1, out_pad] f32  fail value broadcast per output column
      out    : [TB, out_pad] f32
      acc    : [TB, out_pad] f32 VMEM scratch accumulator
    """
    n = len(Ls)
    fail_ref = refs[3 * n]
    out_ref = refs[3 * n + 1]
    acc_ref = refs[3 * n + 2]

    d = dirs_ref[...]                        # [TB, 3]
    x = d[:, 0:1]
    y = d[:, 1:2]
    z = d[:, 2:3]
    face, u, v, valid = _face_uv(x, y, z)    # all [TB, 1], face f32 in {0..5}
    TB = d.shape[0]

    acc_ref[...] = jnp.zeros_like(acc_ref)

    for lvl, L in enumerate(Ls):
        emb_ref = refs[3 * lvl]
        s_ref = refs[3 * lvl + 1]
        xcol_ref = refs[3 * lvl + 2]
        NR = 6 * L
        NCOL = L * C

        # ---- row weights (independent of columns, shared by all chunks) ----
        riota = lax.broadcasted_iota(jnp.int32, (TB, NR), 1)
        rel = riota - (face * L).astype(jnp.int32)      # face*L hoisted, reused
        if interp_id == 0:
            # nearest
            yi = jnp.clip(jnp.floor(v * L), 0, L - 1).astype(jnp.int32)
            w_row = (rel == yi).astype(jnp.float32) * valid
            xi = jnp.clip(jnp.floor(u * L), 0, L - 1)            # stays f32
        else:
            # bilinear, texel centers at (i + 0.5)/L, clamp-to-edge
            fy = v * L - 0.5
            y0f = jnp.floor(fy)
            wy = fy - y0f
            y0 = jnp.clip(y0f, 0.0, L - 1.0).astype(jnp.int32)
            y1 = jnp.clip(y0f + 1.0, 0.0, L - 1.0).astype(jnp.int32)
            # duplicate (clamped) rows just add their weights -> correct edges
            w_row = ((rel == y0).astype(jnp.float32) * (1.0 - wy)
                     + (rel == y1).astype(jnp.float32) * wy) * valid

            fx = u * L - 0.5
            x0f = jnp.floor(fx)
            wx = fx - x0f
            x0 = jnp.clip(x0f, 0.0, L - 1.0)                      # stays f32
            x1 = jnp.clip(x0f + 1.0, 0.0, L - 1.0)
        # bf16 only for the MXU operand; the weight math above stays f32.
        w_row_bf = w_row.astype(jnp.bfloat16)

        def col_chunk(c0, cw):
            """Blend columns [c0, c0+cw) and scatter into the output slab."""
            if isinstance(c0, int) and c0 == 0 and cw == NCOL:
                xc = xcol_ref[...]                                # [1, cw] f32
                eb = emb_ref[...]                                 # [NR, cw] bf16
                sb = s_ref[...]                                   # [cw, out_pad]
            else:
                xc = xcol_ref[:, pl.ds(c0, cw)]
                eb = emb_ref[:, pl.ds(c0, cw)]
                sb = s_ref[pl.ds(c0, cw), :]
            if interp_id == 0:
                w_col = (xc == xi).astype(jnp.float32)            # [TB, cw]
            else:
                w_col = ((xc == x0).astype(jnp.float32) * (1.0 - wx)
                         + (xc == x1).astype(jnp.float32) * wx)   # [TB, cw]
            m = jnp.dot(w_row_bf, eb,
                        preferred_element_type=jnp.float32)       # [TB, cw] f32
            mw = (m * w_col).astype(jnp.bfloat16)
            return jnp.dot(mw, sb,
                           preferred_element_type=jnp.float32)    # [TB, out_pad]

        if NCOL <= _CHUNK_COLS:
            acc_ref[...] += col_chunk(0, NCOL)
        else:
            # Chunk the L*C column dimension to bound live ranges / spills.
            n_full = NCOL // _CHUNK_COLS

            def chunk_body(ci, carry):
                c0 = pl.multiple_of(ci * _CHUNK_COLS, _CHUNK_COLS)
                acc_ref[...] += col_chunk(c0, _CHUNK_COLS)
                return carry

            lax.fori_loop(0, n_full, chunk_body, 0, unroll=(n_full <= 4))
            tail = NCOL - n_full * _CHUNK_COLS
            if tail:
                acc_ref[...] += col_chunk(n_full * _CHUNK_COLS, tail)

    out_ref[...] = acc_ref[...] + (1.0 - valid) * fail_ref[...]


class MipCubemapEncoderPallas:
    """JAX/Pallas port of MipCubemapEncoder (forward only, synthetic init)."""

    def __init__(self, key, num_levels=4, level_dim=6, per_level_scale=4,
                 base_resolution=4, interpolation="linear", concat=True):
        self.input_dim = 3
        self.num_levels = num_levels
        self.level_dim = level_dim
        self.per_level_scale = per_level_scale
        self.base_resolution = base_resolution
        self.concat = concat
        self.output_dim = num_levels * level_dim if concat else level_dim
        self.interp_id = _INTERP_TO_ID[interpolation]
        self.seamless = 1
        self.out_pad = _round_up(self.output_dim, 128)   # lane-dense output slab

        std = 1e-4
        keys = jax.random.split(key, num_levels)
        self.params_list = []
        self.Ls = []
        L = float(base_resolution)
        for ii in range(num_levels):
            iL = int(np.ceil(L))
            p = jax.random.uniform(keys[ii], (6, level_dim, iL, iL),
                                   dtype=jnp.float32, minval=-std, maxval=std)
            self.params_list.append(p)
            self.Ls.append(iL)
            L = L * per_level_scale
        self.fail_value = jnp.zeros((level_dim,), jnp.float32)

        # --- precomputed kernel-side constants / repacked slabs -------------
        C = level_dim
        self._emb_slabs = []
        self._s_mats = []
        self._xcols = []
        for lvl, (p, Lr) in enumerate(zip(self.params_list, self.Ls)):
            # [6, C, L, L] -> [6, L(y), L(x), C] -> [6*L, L*C]  (lane-dense)
            slab = jnp.transpose(p, (0, 2, 3, 1)).reshape(6 * Lr, Lr * C)
            self._emb_slabs.append(slab.astype(jnp.bfloat16))     # MXU operand

            base_col = lvl * C if concat else 0
            s = np.zeros((Lr * C, self.out_pad), np.float32)
            rows = np.arange(Lr * C)
            s[rows, base_col + (rows % C)] = 1.0                  # 0/1: exact in bf16
            self._s_mats.append(jnp.asarray(s, dtype=jnp.bfloat16))

            xc = (np.arange(Lr * C) // C).astype(np.float32).reshape(1, -1)
            self._xcols.append(jnp.asarray(xc))                   # f32 column index

        # NOTE: for concat=False we fold num_levels*fail_value into the first C
        # columns; this relies on `valid` being shared across all levels (true
        # here — validity only depends on the input direction).
        fp = np.zeros((1, self.out_pad), np.float32)
        fv = np.asarray(self.fail_value)
        if concat:
            for lvl in range(num_levels):
                fp[0, lvl * C:(lvl + 1) * C] = fv
        else:
            fp[0, :C] = num_levels * fv
        self.fail_pad = jnp.asarray(fp)

    # ------------------------------------------------------------------ #
    def _vmem_limit_bytes(self, TB):
        """Explicit VMEM budget (constants + pipelined I/O + scratch + temps)."""
        def padded(rows, cols, itemsize, row_mult):
            return (_round_up(max(rows, 1), row_mult)
                    * _round_up(max(cols, 1), 128) * itemsize)

        const = 0
        for L in self.Ls:
            nr, nc = 6 * L, L * self.level_dim
            const += padded(nr, nc, 2, 16)              # emb slab (bf16)
            const += padded(nc, self.out_pad, 2, 16)    # S matrix (bf16)
            const += padded(1, nc, 4, 8)                # xcol (f32)
        const += padded(1, self.out_pad, 4, 8)          # fail_pad
        const *= 2          # stay safe even if constants end up double-buffered

        io = 2 * padded(TB, 3, 4, 8) + 2 * padded(TB, self.out_pad, 4, 8)
        scratch = padded(TB, self.out_pad, 4, 8)
        l_max = max(self.Ls)
        ncol_res = min(l_max * self.level_dim, _CHUNK_COLS)
        temps = TB * 6 * l_max * (4 + 2) + 4 * TB * max(ncol_res, 128) * 4

        est = int(1.4 * (const + io + scratch + temps)) + (4 << 20)
        return int(max(32 << 20, min(est, 100 << 20)))

    # ------------------------------------------------------------------ #
    def __call__(self, inputs, batch_tile=256):
        """Forward pass.  `batch_tile` caps the per-step batch tile: 256 is a
        good default for v5e/v7x; 512 is reasonable on v6e (128 MiB VMEM)."""
        B = inputs.shape[0]
        B8 = _round_up(B, 8)
        # Make sure the (parallel) batch grid has >= 2 steps whenever the
        # padded batch allows it, so v7x's two TensorCores both get work.
        tb_cap = max(8, _round_up((B8 + 1) // 2, 8))
        TB = min(batch_tile, tb_cap)
        Bp = _round_up(B, TB)
        dirs = inputs
        if Bp != B:
            dirs = jnp.pad(dirs, ((0, Bp - B), (0, 0)))

        level_args = []
        for lvl in range(self.num_levels):
            level_args += [self._emb_slabs[lvl], self._s_mats[lvl],
                           self._xcols[lvl]]

        kernel = functools.partial(
            _fused_cubemap_kernel, Ls=tuple(self.Ls), C=self.level_dim,
            interp_id=self.interp_id, out_pad=self.out_pad)

        def build(single_buffer_consts):
            if single_buffer_consts:
                # Grid-invariant blocks: single buffer, no re-DMA per step.
                const_spec = lambda a: pl.BlockSpec(
                    a.shape, lambda i: (0, 0), pipeline_mode=pl.Buffered(1))
            else:
                const_spec = lambda a: pl.BlockSpec(a.shape, lambda i: (0, 0))
            in_specs = [pl.BlockSpec((TB, 3), lambda i: (i, 0))]
            for a in level_args:
                in_specs.append(const_spec(a))
            in_specs.append(const_spec(self.fail_pad))
            return pl.pallas_call(
                kernel,
                out_shape=jax.ShapeDtypeStruct((Bp, self.out_pad), jnp.float32),
                grid=(Bp // TB,),
                in_specs=in_specs,
                out_specs=pl.BlockSpec((TB, self.out_pad), lambda i: (i, 0)),
                scratch_shapes=[pltpu.VMEM((TB, self.out_pad), jnp.float32)],
                compiler_params=pltpu.CompilerParams(
                    dimension_semantics=("parallel",),
                    vmem_limit_bytes=self._vmem_limit_bytes(TB)),
            )

        try:
            out = build(True)(dirs, *level_args, self.fail_pad)
        except Exception:
            # Fallback if this Pallas build rejects pl.Buffered(1) on a
            # pallas_call BlockSpec: default double-buffered constants (the
            # explicit vmem_limit_bytes already covers the extra footprint).
            out = build(False)(dirs, *level_args, self.fail_pad)

        return out[:B, :self.output_dim]

    # ---- pure-JAX reference (same math, XLA gather) for verification ----
    def reference(self, inputs):
        x = inputs[:, 0:1]
        y = inputs[:, 1:2]
        z = inputs[:, 2:3]
        face, u, v, valid = _face_uv(x, y, z)
        facei = face.astype(jnp.int32)
        outs = []
        for p, L in zip(self.params_list, self.Ls):
            C = self.level_dim
            emb_flat = jnp.transpose(p, (0, 2, 3, 1)).reshape(6 * L * L, C)
            base = facei * (L * L)
            if self.interp_id == 0:
                xi = jnp.clip(jnp.floor(u * L), 0, L - 1).astype(jnp.int32)
                yi = jnp.clip(jnp.floor(v * L), 0, L - 1).astype(jnp.int32)
                val = jnp.take(emb_flat, (base + yi * L + xi)[:, 0], axis=0)
            else:
                fx = u * L - 0.5
                fy = v * L - 0.5
                x0f = jnp.floor(fx)
                y0f = jnp.floor(fy)
                wx = fx - x0f
                wy = fy - y0f
                x0 = jnp.clip(x0f, 0, L - 1).astype(jnp.int32)
                x1 = jnp.clip(x0f + 1.0, 0, L - 1).astype(jnp.int32)
                y0 = jnp.clip(y0f, 0, L - 1).astype(jnp.int32)
                y1 = jnp.clip(y0f + 1.0, 0, L - 1).astype(jnp.int32)
                g = lambda idx: jnp.take(emb_flat, idx[:, 0], axis=0)
                val = (g(base + y0 * L + x0) * ((1 - wx) * (1 - wy))
                       + g(base + y0 * L + x1) * (wx * (1 - wy))
                       + g(base + y1 * L + x0) * ((1 - wx) * wy)
                       + g(base + y1 * L + x1) * (wx * wy))
            outs.append(valid * val + (1.0 - valid) * self.fail_value[None, :])
        if self.concat:
            return jnp.concatenate(outs, axis=1)
        return sum(outs)


if __name__ == "__main__":
    key = jax.random.PRNGKey(0)
    k_enc, k_dirs = jax.random.split(key)

    # bf16 MXU operands -> loosened tolerances vs the f32 reference.
    ATOL, RTOL = 3e-6, 2e-2

    # 1) small config (L = 4, 8, 16), bilinear.
    enc = MipCubemapEncoderPallas(k_enc, num_levels=3, level_dim=6,
                                  per_level_scale=2, base_resolution=4,
                                  interpolation="linear", concat=True)
    B = 128
    dirs = jax.random.normal(k_dirs, (B, 3), dtype=jnp.float32)
    out = jax.block_until_ready(enc(dirs))
    assert out.shape == (B, enc.output_dim), out.shape
    ref = jax.block_until_ready(enc.reference(dirs))
    np.testing.assert_allclose(np.asarray(out), np.asarray(ref),
                               atol=ATOL, rtol=RTOL)

    # 2) module-default config (L = 4, 16, 64, 256), bilinear: exercises the
    #    column-chunked big-level path, batch padding and the >=2-step grid.
    enc_d = MipCubemapEncoderPallas(k_enc, num_levels=4, level_dim=6,
                                    per_level_scale=4, base_resolution=4,
                                    interpolation="linear", concat=True)
    dirs_d = jax.random.normal(k_dirs, (200, 3), dtype=jnp.float32)
    out_d = jax.block_until_ready(enc_d(dirs_d))
    assert out_d.shape == (200, enc_d.output_dim), out_d.shape
    ref_d = jax.block_until_ready(enc_d.reference(dirs_d))
    np.testing.assert_allclose(np.asarray(out_d), np.asarray(ref_d),
                               atol=ATOL, rtol=RTOL)

    # 3) nearest-interpolation branch.
    enc_n = MipCubemapEncoderPallas(k_enc, num_levels=2, level_dim=6,
                                    per_level_scale=2, base_resolution=4,
                                    interpolation="nearest", concat=True)
    out_n = jax.block_until_ready(enc_n(dirs))
    ref_n = jax.block_until_ready(enc_n.reference(dirs))
    np.testing.assert_allclose(np.asarray(out_n), np.asarray(ref_n),
                               atol=ATOL, rtol=RTOL)

    print("KERNEL_OK")
</pallas_src>

<mosaic_0001>
module attributes {stable_mosaic.version = 11 : i64} {
  func.func @_fused_cubemap_kernel(%arg0: i32, %arg1: memref<64x3xf32, #tpu.memory_space<vmem>>, %arg2: memref<24x24xbf16, #tpu.memory_space<vmem>>, %arg3: memref<24x128xbf16, #tpu.memory_space<vmem>>, %arg4: memref<1x24xf32, #tpu.memory_space<vmem>>, %arg5: memref<48x48xbf16, #tpu.memory_space<vmem>>, %arg6: memref<48x128xbf16, #tpu.memory_space<vmem>>, %arg7: memref<1x48xf32, #tpu.memory_space<vmem>>, %arg8: memref<96x96xbf16, #tpu.memory_space<vmem>>, %arg9: memref<96x128xbf16, #tpu.memory_space<vmem>>, %arg10: memref<1x96xf32, #tpu.memory_space<vmem>>, %arg11: memref<1x128xf32, #tpu.memory_space<vmem>>, %arg12: memref<64x128xf32, #tpu.memory_space<vmem>>, %arg13: memref<64x128xf32, #tpu.memory_space<vmem>>) attributes {dimension_semantics = [#tpu.dimension_semantics<parallel>], iteration_bounds = array<i64: 2>, scalar_prefetch = 0 : i64, scratch_operands = 1 : i64, tpu.core_type = #tpu.core_type<tc>, window_params = [{transform_indices = @transform_0, window_bounds = array<i64: 64, 3>}, {pipeline_mode = #tpu.pipeline_mode<synchronous>, transform_indices = @transform_1, window_bounds = array<i64: 24, 24>}, {pipeline_mode = #tpu.pipeline_mode<synchronous>, transform_indices = @transform_2, window_bounds = array<i64: 24, 128>}, {pipeline_mode = #tpu.pipeline_mode<synchronous>, transform_indices = @transform_3, window_bounds = array<i64: 1, 24>}, {pipeline_mode = #tpu.pipeline_mode<synchronous>, transform_indices = @transform_4, window_bounds = array<i64: 48, 48>}, {pipeline_mode = #tpu.pipeline_mode<synchronous>, transform_indices = @transform_5, window_bounds = array<i64: 48, 128>}, {pipeline_mode = #tpu.pipeline_mode<synchronous>, transform_indices = @transform_6, window_bounds = array<i64: 1, 48>}, {pipeline_mode = #tpu.pipeline_mode<synchronous>, transform_indices = @transform_7, window_bounds = array<i64: 96, 96>}, {pipeline_mode = #tpu.pipeline_mode<synchronous>, transform_indices = @transform_8, window_bounds = array<i64: 96, 128>}, {pipeline_mode = #tpu.pipeline_mode<synchronous>, transform_indices = @transform_9, window_bounds = array<i64: 1, 96>}, {pipeline_mode = #tpu.pipeline_mode<synchronous>, transform_indices = @transform_10, window_bounds = array<i64: 1, 128>}, {transform_indices = @transform_11, window_bounds = array<i64: 64, 128>}]} {
    %c0 = arith.constant 0 : index
    %c0_0 = arith.constant 0 : index
    %0 = vector.load %arg1[%c0, %c0_0] : memref<64x3xf32, #tpu.memory_space<vmem>>, vector<64x3xf32>
    %1 = vector.extract_strided_slice %0 {offsets = [0, 0], sizes = [64, 1], strides = [1, 1]} : vector<64x3xf32> to vector<64x1xf32>
    %2 = vector.extract_strided_slice %0 {offsets = [0, 1], sizes = [64, 1], strides = [1, 1]} : vector<64x3xf32> to vector<64x1xf32>
    %3 = vector.extract_strided_slice %0 {offsets = [0, 2], sizes = [64, 1], strides = [1, 1]} : vector<64x3xf32> to vector<64x1xf32>
    %4 = math.absf %1 : vector<64x1xf32>
    %5 = math.absf %2 : vector<64x1xf32>
    %6 = math.absf %3 : vector<64x1xf32>
    %7 = arith.maximumf %4, %5 : vector<64x1xf32>
    %8 = arith.maximumf %7, %6 : vector<64x1xf32>
    %cst = arith.constant 0.000000e+00 : f32
    %9 = vector.broadcast %cst : f32 to vector<64x1xf32>
    %10 = arith.cmpf ogt, %8, %9 : vector<64x1xf32>
    %11 = arith.extui %10 : vector<64x1xi1> to vector<64x1xi32>
    %12 = arith.sitofp %11 : vector<64x1xi32> to vector<64x1xf32>
    %cst_1 = arith.constant 0.000000e+00 : f32
    %13 = vector.broadcast %cst_1 : f32 to vector<64x1xf32>
    %14 = arith.cmpf ogt, %8, %13 : vector<64x1xf32>
    %cst_2 = arith.constant 1.000000e+00 : f32
    %15 = vector.broadcast %cst_2 : f32 to vector<64x1xf32>
    %16 = arith.select %14, %8, %15 : vector<64x1xi1>, vector<64x1xf32>
    %17 = arith.cmpf oge, %4, %5 : vector<64x1xf32>
    %18 = arith.cmpf oge, %4, %6 : vector<64x1xf32>
    %19 = arith.andi %17, %18 : vector<64x1xi1>
    %cst_3 = arith.constant dense<true> : vector<64x1xi1>
    %20 = arith.xori %19, %cst_3 : vector<64x1xi1>
    %21 = arith.cmpf oge, %5, %6 : vector<64x1xf32>
    %22 = arith.andi %20, %21 : vector<64x1xi1>
    %cst_4 = arith.constant 0.000000e+00 : f32
    %23 = vector.broadcast %cst_4 : f32 to vector<64x1xf32>
    %24 = arith.cmpf ogt, %1, %23 : vector<64x1xf32>
    %cst_5 = arith.constant 0.000000e+00 : f32
    %cst_6 = arith.constant 1.000000e+00 : f32
    %25 = vector.broadcast %cst_5 : f32 to vector<64x1xf32>
    %26 = vector.broadcast %cst_6 : f32 to vector<64x1xf32>
    %27 = arith.select %24, %25, %26 : vector<64x1xi1>, vector<64x1xf32>
    %cst_7 = arith.constant 0.000000e+00 : f32
    %28 = vector.broadcast %cst_7 : f32 to vector<64x1xf32>
    %29 = arith.cmpf ogt, %2, %28 : vector<64x1xf32>
    %cst_8 = arith.constant 2.000000e+00 : f32
    %cst_9 = arith.constant 3.000000e+00 : f32
    %30 = vector.broadcast %cst_8 : f32 to vector<64x1xf32>
    %31 = vector.broadcast %cst_9 : f32 to vector<64x1xf32>
    %32 = arith.select %29, %30, %31 : vector<64x1xi1>, vector<64x1xf32>
    %cst_10 = arith.constant 0.000000e+00 : f32
    %33 = vector.broadcast %cst_10 : f32 to vector<64x1xf32>
    %34 = arith.cmpf ogt, %3, %33 : vector<64x1xf32>
    %cst_11 = arith.constant 4.000000e+00 : f32
    %cst_12 = arith.constant 5.000000e+00 : f32
    %35 = vector.broadcast %cst_11 : f32 to vector<64x1xf32>
    %36 = vector.broadcast %cst_12 : f32 to vector<64x1xf32>
    %37 = arith.select %34, %35, %36 : vector<64x1xi1>, vector<64x1xf32>
    %38 = arith.select %22, %32, %37 : vector<64x1xi1>, vector<64x1xf32>
    %39 = arith.select %19, %27, %38 : vector<64x1xi1>, vector<64x1xf32>
    %cst_13 = arith.constant 0.000000e+00 : f32
    %40 = vector.broadcast %cst_13 : f32 to vector<64x1xf32>
    %41 = arith.cmpf ogt, %1, %40 : vector<64x1xf32>
    %cst_14 = arith.constant 0.000000e+00 : f32
    %42 = vector.broadcast %cst_14 : f32 to vector<64x1xf32>
    %43 = arith.subf %42, %3 : vector<64x1xf32>
    %44 = arith.select %41, %43, %3 : vector<64x1xi1>, vector<64x1xf32>
    %cst_15 = arith.constant 0.000000e+00 : f32
    %45 = vector.broadcast %cst_15 : f32 to vector<64x1xf32>
    %46 = arith.cmpf ogt, %3, %45 : vector<64x1xf32>
    %cst_16 = arith.constant 0.000000e+00 : f32
    %47 = vector.broadcast %cst_16 : f32 to vector<64x1xf32>
    %48 = arith.subf %47, %1 : vector<64x1xf32>
    %49 = arith.select %46, %1, %48 : vector<64x1xi1>, vector<64x1xf32>
    %50 = arith.select %22, %1, %49 : vector<64x1xi1>, vector<64x1xf32>
    %51 = arith.select %19, %44, %50 : vector<64x1xi1>, vector<64x1xf32>
    %cst_17 = arith.constant 0.000000e+00 : f32
    %52 = vector.broadcast %cst_17 : f32 to vector<64x1xf32>
    %53 = arith.subf %52, %2 : vector<64x1xf32>
    %cst_18 = arith.constant 0.000000e+00 : f32
    %54 = vector.broadcast %cst_18 : f32 to vector<64x1xf32>
    %55 = arith.cmpf ogt, %2, %54 : vector<64x1xf32>
    %cst_19 = arith.constant 0.000000e+00 : f32
    %56 = vector.broadcast %cst_19 : f32 to vector<64x1xf32>
    %57 = arith.subf %56, %3 : vector<64x1xf32>
    %58 = arith.select %55, %3, %57 : vector<64x1xi1>, vector<64x1xf32>
    %cst_20 = arith.constant 0.000000e+00 : f32
    %59 = vector.broadcast %cst_20 : f32 to vector<64x1xf32>
    %60 = arith.subf %59, %2 : vector<64x1xf32>
    %61 = arith.select %22, %58, %60 : vector<64x1xi1>, vector<64x1xf32>
    %62 = arith.select %19, %53, %61 : vector<64x1xi1>, vector<64x1xf32>
    %63 = arith.divf %51, %16 : vector<64x1xf32>
    %cst_21 = arith.constant 1.000000e+00 : f32
    %64 = vector.broadcast %cst_21 : f32 to vector<64x1xf32>
    %65 = arith.addf %63, %64 : vector<64x1xf32>
    %cst_22 = arith.constant 5.000000e-01 : f32
    %66 = vector.broadcast %cst_22 : f32 to vector<64x1xf32>
    %67 = arith.mulf %66, %65 : vector<64x1xf32>
    %68 = arith.divf %62, %16 : vector<64x1xf32>
    %cst_23 = arith.constant 1.000000e+00 : f32
    %69 = vector.broadcast %cst_23 : f32 to vector<64x1xf32>
    %70 = arith.addf %68, %69 : vector<64x1xf32>
    %cst_24 = arith.constant 5.000000e-01 : f32
    %71 = vector.broadcast %cst_24 : f32 to vector<64x1xf32>
    %72 = arith.mulf %71, %70 : vector<64x1xf32>
    %cst_25 = arith.constant 0.000000e+00 : f32
    %73 = vector.broadcast %cst_25 : f32 to vector<64x128xf32>
    %c0_26 = arith.constant 0 : index
    %c0_27 = arith.constant 0 : index
    %74 = vector.load %arg13[%c0_26, %c0_27] : memref<64x128xf32, #tpu.memory_space<vmem>>, vector<64x128xf32>
    tpu.vector_store %arg13[%c0_26, %c0_27], %73 {strides = array<i32>} : memref<64x128xf32, #tpu.memory_space<vmem>>, vector<64x128xf32>,
    %75 = tpu.iota {dimensions = array<i32: 1>} : vector<64x24xi32>
    %cst_28 = arith.constant 4.000000e+00 : f32
    %76 = vector.broadcast %cst_28 : f32 to vector<64x1xf32>
    %77 = arith.mulf %39, %76 : vector<64x1xf32>
    %78 = arith.fptosi %77 : vector<64x1xf32> to vector<64x1xi32>
    %79 = vector.broadcast %78 : vector<64x1xi32> to vector<64x24xi32>
    %80 = arith.subi %75, %79 : vector<64x24xi32>
    %cst_29 = arith.constant 4.000000e+00 : f32
    %81 = vector.broadcast %cst_29 : f32 to vector<64x1xf32>
    %82 = arith.mulf %72, %81 : vector<64x1xf32>
    %cst_30 = arith.constant 5.000000e-01 : f32
    %83 = vector.broadcast %cst_30 : f32 to vector<64x1xf32>
    %84 = arith.subf %82, %83 : vector<64x1xf32>
    %85 = math.floor %84 : vector<64x1xf32>
    %86 = arith.subf %84, %85 : vector<64x1xf32>
    %cst_31 = arith.constant 0.000000e+00 : f32
    %cst_32 = arith.constant 3.000000e+00 : f32
    %87 = vector.broadcast %cst_31 : f32 to vector<64x1xf32>
    %88 = arith.maximumf %87, %85 : vector<64x1xf32>
    %89 = vector.broadcast %cst_32 : f32 to vector<64x1xf32>
    %90 = arith.minimumf %89, %88 : vector<64x1xf32>
    %91 = arith.fptosi %90 : vector<64x1xf32> to vector<64x1xi32>
    %cst_33 = arith.constant 1.000000e+00 : f32
    %92 = vector.broadcast %cst_33 : f32 to vector<64x1xf32>
    %93 = arith.addf %85, %92 : vector<64x1xf32>
    %cst_34 = arith.constant 0.000000e+00 : f32
    %cst_35 = arith.constant 3.000000e+00 : f32
    %94 = vector.broadcast %cst_34 : f32 to vector<64x1xf32>
    %95 = arith.maximumf %94, %93 : vector<64x1xf32>
    %96 = vector.broadcast %cst_35 : f32 to vector<64x1xf32>
    %97 = arith.minimumf %96, %95 : vector<64x1xf32>
    %98 = arith.fptosi %97 : vector<64x1xf32> to vector<64x1xi32>
    %99 = vector.broadcast %91 : vector<64x1xi32> to vector<64x24xi32>
    %100 = arith.cmpi eq, %80, %99 : vector<64x24xi32>
    %101 = arith.extui %100 : vector<64x24xi1> to vector<64x24xi32>
    %102 = arith.sitofp %101 : vector<64x24xi32> to vector<64x24xf32>
    %cst_36 = arith.constant 1.000000e+00 : f32
    %103 = vector.broadcast %cst_36 : f32 to vector<64x1xf32>
    %104 = arith.subf %103, %86 : vector<64x1xf32>
    %105 = vector.broadcast %104 : vector<64x1xf32> to vector<64x24xf32>
    %106 = arith.mulf %102, %105 : vector<64x24xf32>
    %107 = vector.broadcast %98 : vector<64x1xi32> to vector<64x24xi32>
    %108 = arith.cmpi eq, %80, %107 : vector<64x24xi32>
    %109 = arith.extui %108 : vector<64x24xi1> to vector<64x24xi32>
    %110 = arith.sitofp %109 : vector<64x24xi32> to vector<64x24xf32>
    %111 = vector.broadcast %86 : vector<64x1xf32> to vector<64x24xf32>
    %112 = arith.mulf %110, %111 : vector<64x24xf32>
    %113 = arith.addf %106, %112 : vector<64x24xf32>
    %114 = vector.broadcast %12 : vector<64x1xf32> to vector<64x24xf32>
    %115 = arith.mulf %113, %114 : vector<64x24xf32>
    %cst_37 = arith.constant 4.000000e+00 : f32
    %116 = vector.broadcast %cst_37 : f32 to vector<64x1xf32>
    %117 = arith.mulf %67, %116 : vector<64x1xf32>
    %cst_38 = arith.constant 5.000000e-01 : f32
    %118 = vector.broadcast %cst_38 : f32 to vector<64x1xf32>
    %119 = arith.subf %117, %118 : vector<64x1xf32>
    %120 = math.floor %119 : vector<64x1xf32>
    %121 = arith.subf %119, %120 : vector<64x1xf32>
    %cst_39 = arith.constant 0.000000e+00 : f32
    %cst_40 = arith.constant 3.000000e+00 : f32
    %122 = vector.broadcast %cst_39 : f32 to vector<64x1xf32>
    %123 = arith.maximumf %122, %120 : vector<64x1xf32>
    %124 = vector.broadcast %cst_40 : f32 to vector<64x1xf32>
    %125 = arith.minimumf %124, %123 : vector<64x1xf32>
    %cst_41 = arith.constant 1.000000e+00 : f32
    %126 = vector.broadcast %cst_41 : f32 to vector<64x1xf32>
    %127 = arith.addf %120, %126 : vector<64x1xf32>
    %cst_42 = arith.constant 0.000000e+00 : f32
    %cst_43 = arith.constant 3.000000e+00 : f32
    %128 = vector.broadcast %cst_42 : f32 to vector<64x1xf32>
    %129 = arith.maximumf %128, %127 : vector<64x1xf32>
    %130 = vector.broadcast %cst_43 : f32 to vector<64x1xf32>
    %131 = arith.minimumf %130, %129 : vector<64x1xf32>
    %132 = arith.truncf %115 : vector<64x24xf32> to vector<64x24xbf16>
    %c0_44 = arith.constant 0 : index
    %c0_45 = arith.constant 0 : index
    %133 = vector.load %arg13[%c0_44, %c0_45] : memref<64x128xf32, #tpu.memory_space<vmem>>, vector<64x128xf32>
    %c0_46 = arith.constant 0 : index
    %c0_47 = arith.constant 0 : index
    %134 = vector.load %arg4[%c0_46, %c0_47] : memref<1x24xf32, #tpu.memory_space<vmem>>, vector<1x24xf32>
    %c0_48 = arith.constant 0 : index
    %c0_49 = arith.constant 0 : index
    %135 = vector.load %arg2[%c0_48, %c0_49] : memref<24x24xbf16, #tpu.memory_space<vmem>>, vector<24x24xbf16>
    %c0_50 = arith.constant 0 : index
    %c0_51 = arith.constant 0 : index
    %136 = vector.load %arg3[%c0_50, %c0_51] : memref<24x128xbf16, #tpu.memory_space<vmem>>, vector<24x128xbf16>
    %137 = vector.broadcast %134 : vector<1x24xf32> to vector<64x24xf32>
    %138 = vector.broadcast %125 : vector<64x1xf32> to vector<64x24xf32>
    %139 = arith.cmpf oeq, %137, %138 : vector<64x24xf32>
    %140 = arith.extui %139 : vector<64x24xi1> to vector<64x24xi32>
    %141 = arith.sitofp %140 : vector<64x24xi32> to vector<64x24xf32>
    %cst_52 = arith.constant 1.000000e+00 : f32
    %142 = vector.broadcast %cst_52 : f32 to vector<64x1xf32>
    %143 = arith.subf %142, %121 : vector<64x1xf32>
    %144 = vector.broadcast %143 : vector<64x1xf32> to vector<64x24xf32>
    %145 = arith.mulf %141, %144 : vector<64x24xf32>
    %146 = vector.broadcast %134 : vector<1x24xf32> to vector<64x24xf32>
    %147 = vector.broadcast %131 : vector<64x1xf32> to vector<64x24xf32>
    %148 = arith.cmpf oeq, %146, %147 : vector<64x24xf32>
    %149 = arith.extui %148 : vector<64x24xi1> to vector<64x24xi32>
    %150 = arith.sitofp %149 : vector<64x24xi32> to vector<64x24xf32>
    %151 = vector.broadcast %121 : vector<64x1xf32> to vector<64x24xf32>
    %152 = arith.mulf %150, %151 : vector<64x24xf32>
    %153 = arith.addf %145, %152 : vector<64x24xf32>
    %cst_53 = arith.constant dense<0.000000e+00> : vector<64x24xf32>
    %154 = tpu.matmul %132, %135, %cst_53 {dimension_numbers = #tpu.dot_dimension_numbers<[1], [0], [0], [1], [0, 0, 1, 1], [], []>} : vector<64x24xbf16>, vector<24x24xbf16>, vector<64x24xf32> -> vector<64x24xf32>
    %155 = arith.mulf %154, %153 : vector<64x24xf32>
    %156 = arith.truncf %155 : vector<64x24xf32> to vector<64x24xbf16>
    %cst_54 = arith.constant dense<0.000000e+00> : vector<64x128xf32>
    %157 = tpu.matmul %156, %136, %cst_54 {dimension_numbers = #tpu.dot_dimension_numbers<[1], [0], [0], [1], [0, 0, 1, 1], [], []>} : vector<64x24xbf16>, vector<24x128xbf16>, vector<64x128xf32> -> vector<64x128xf32>
    %158 = arith.addf %133, %157 : vector<64x128xf32>
    %c0_55 = arith.constant 0 : index
    %c0_56 = arith.constant 0 : index
    %159 = vector.load %arg13[%c0_55, %c0_56] : memref<64x128xf32, #tpu.memory_space<vmem>>, vector<64x128xf32>
    tpu.vector_store %arg13[%c0_55, %c0_56], %158 {strides = array<i32>} : memref<64x128xf32, #tpu.memory_space<vmem>>, vector<64x128xf32>,
    %160 = tpu.iota {dimensions = array<i32: 1>} : vector<64x48xi32>
    %cst_57 = arith.constant 8.000000e+00 : f32
    %161 = vector.broadcast %cst_57 : f32 to vector<64x1xf32>
    %162 = arith.mulf %39, %161 : vector<64x1xf32>
    %163 = arith.fptosi %162 : vector<64x1xf32> to vector<64x1xi32>
    %164 = vector.broadcast %163 : vector<64x1xi32> to vector<64x48xi32>
    %165 = arith.subi %160, %164 : vector<64x48xi32>
    %cst_58 = arith.constant 8.000000e+00 : f32
    %166 = vector.broadcast %cst_58 : f32 to vector<64x1xf32>
    %167 = arith.mulf %72, %166 : vector<64x1xf32>
    %cst_59 = arith.constant 5.000000e-01 : f32
    %168 = vector.broadcast %cst_59 : f32 to vector<64x1xf32>
    %169 = arith.subf %167, %168 : vector<64x1xf32>
    %170 = math.floor %169 : vector<64x1xf32>
    %171 = arith.subf %169, %170 : vector<64x1xf32>
    %cst_60 = arith.constant 0.000000e+00 : f32
    %cst_61 = arith.constant 7.000000e+00 : f32
    %172 = vector.broadcast %cst_60 : f32 to vector<64x1xf32>
    %173 = arith.maximumf %172, %170 : vector<64x1xf32>
    %174 = vector.broadcast %cst_61 : f32 to vector<64x1xf32>
    %175 = arith.minimumf %174, %173 : vector<64x1xf32>
    %176 = arith.fptosi %175 : vector<64x1xf32> to vector<64x1xi32>
    %cst_62 = arith.constant 1.000000e+00 : f32
    %177 = vector.broadcast %cst_62 : f32 to vector<64x1xf32>
    %178 = arith.addf %170, %177 : vector<64x1xf32>
    %cst_63 = arith.constant 0.000000e+00 : f32
    %cst_64 = arith.constant 7.000000e+00 : f32
    %179 = vector.broadcast %cst_63 : f32 to vector<64x1xf32>
    %180 = arith.maximumf %179, %178 : vector<64x1xf32>
    %181 = vector.broadcast %cst_64 : f32 to vector<64x1xf32>
    %182 = arith.minimumf %181, %180 : vector<64x1xf32>
    %183 = arith.fptosi %182 : vector<64x1xf32> to vector<64x1xi32>
    %184 = vector.broadcast %176 : vector<64x1xi32> to vector<64x48xi32>
    %185 = arith.cmpi eq, %165, %184 : vector<64x48xi32>
    %186 = arith.extui %185 : vector<64x48xi1> to vector<64x48xi32>
    %187 = arith.sitofp %186 : vector<64x48xi32> to vector<64x48xf32>
    %cst_65 = arith.constant 1.000000e+00 : f32
    %188 = vector.broadcast %cst_65 : f32 to vector<64x1xf32>
    %189 = arith.subf %188, %171 : vector<64x1xf32>
    %190 = vector.broadcast %189 : vector<64x1xf32> to vector<64x48xf32>
    %191 = arith.mulf %187, %190 : vector<64x48xf32>
    %192 = vector.broadcast %183 : vector<64x1xi32> to vector<64x48xi32>
    %193 = arith.cmpi eq, %165, %192 : vector<64x48xi32>
    %194 = arith.extui %193 : vector<64x48xi1> to vector<64x48xi32>
    %195 = arith.sitofp %194 : vector<64x48xi32> to vector<64x48xf32>
    %196 = vector.broadcast %171 : vector<64x1xf32> to vector<64x48xf32>
    %197 = arith.mulf %195, %196 : vector<64x48xf32>
    %198 = arith.addf %191, %197 : vector<64x48xf32>
    %199 = vector.broadcast %12 : vector<64x1xf32> to vector<64x48xf32>
    %200 = arith.mulf %198, %199 : vector<64x48xf32>
    %cst_66 = arith.constant 8.000000e+00 : f32
    %201 = vector.broadcast %cst_66 : f32 to vector<64x1xf32>
    %202 = arith.mulf %67, %201 : vector<64x1xf32>
    %cst_67 = arith.constant 5.000000e-01 : f32
    %203 = vector.broadcast %cst_67 : f32 to vector<64x1xf32>
    %204 = arith.subf %202, %203 : vector<64x1xf32>
    %205 = math.floor %204 : vector<64x1xf32>
    %206 = arith.subf %204, %205 : vector<64x1xf32>
    %cst_68 = arith.constant 0.000000e+00 : f32
    %cst_69 = arith.constant 7.000000e+00 : f32
    %207 = vector.broadcast %cst_68 : f32 to vector<64x1xf32>
    %208 = arith.maximumf %207, %205 : vector<64x1xf32>
    %209 = vector.broadcast %cst_69 : f32 to vector<64x1xf32>
    %210 = arith.minimumf %209, %208 : vector<64x1xf32>
    %cst_70 = arith.constant 1.000000e+00 : f32
    %211 = vector.broadcast %cst_70 : f32 to vector<64x1xf32>
    %212 = arith.addf %205, %211 : vector<64x1xf32>
    %cst_71 = arith.constant 0.000000e+00 : f32
    %cst_72 = arith.constant 7.000000e+00 : f32
    %213 = vector.broadcast %cst_71 : f32 to vector<64x1xf32>
    %214 = arith.maximumf %213, %212 : vector<64x1xf32>
    %215 = vector.broadcast %cst_72 : f32 to vector<64x1xf32>
    %216 = arith.minimumf %215, %214 : vector<64x1xf32>
    %217 = arith.truncf %200 : vector<64x48xf32> to vector<64x48xbf16>
    %c0_73 = arith.constant 0 : index
    %c0_74 = arith.constant 0 : index
    %218 = vector.load %arg13[%c0_73, %c0_74] : memref<64x128xf32, #tpu.memory_space<vmem>>, vector<64x128xf32>
    %c0_75 = arith.constant 0 : index
    %c0_76 = arith.constant 0 : index
    %219 = vector.load %arg7[%c0_75, %c0_76] : memref<1x48xf32, #tpu.memory_space<vmem>>, vector<1x48xf32>
    %c0_77 = arith.constant 0 : index
    %c0_78 = arith.constant 0 : index
    %220 = vector.load %arg5[%c0_77, %c0_78] : memref<48x48xbf16, #tpu.memory_space<vmem>>, vector<48x48xbf16>
    %c0_79 = arith.constant 0 : index
    %c0_80 = arith.constant 0 : index
    %221 = vector.load %arg6[%c0_79, %c0_80] : memref<48x128xbf16, #tpu.memory_space<vmem>>, vector<48x128xbf16>
    %222 = vector.broadcast %219 : vector<1x48xf32> to vector<64x48xf32>
    %223 = vector.broadcast %210 : vector<64x1xf32> to vector<64x48xf32>
    %224 = arith.cmpf oeq, %222, %223 : vector<64x48xf32>
    %225 = arith.extui %224 : vector<64x48xi1> to vector<64x48xi32>
    %226 = arith.sitofp %225 : vector<64x48xi32> to vector<64x48xf32>
    %cst_81 = arith.constant 1.000000e+00 : f32
    %227 = vector.broadcast %cst_81 : f32 to vector<64x1xf32>
    %228 = arith.subf %227, %206 : vector<64x1xf32>
    %229 = vector.broadcast %228 : vector<64x1xf32> to vector<64x48xf32>
    %230 = arith.mulf %226, %229 : vector<64x48xf32>
    %231 = vector.broadcast %219 : vector<1x48xf32> to vector<64x48xf32>
    %232 = vector.broadcast %216 : vector<64x1xf32> to vector<64x48xf32>
    %233 = arith.cmpf oeq, %231, %232 : vector<64x48xf32>
    %234 = arith.extui %233 : vector<64x48xi1> to vector<64x48xi32>
    %235 = arith.sitofp %234 : vector<64x48xi32> to vector<64x48xf32>
    %236 = vector.broadcast %206 : vector<64x1xf32> to vector<64x48xf32>
    %237 = arith.mulf %235, %236 : vector<64x48xf32>
    %238 = arith.addf %230, %237 : vector<64x48xf32>
    %cst_82 = arith.constant dense<0.000000e+00> : vector<64x48xf32>
    %239 = tpu.matmul %217, %220, %cst_82 {dimension_numbers = #tpu.dot_dimension_numbers<[1], [0], [0], [1], [0, 0, 1, 1], [], []>} : vector<64x48xbf16>, vector<48x48xbf16>, vector<64x48xf32> -> vector<64x48xf32>
    %240 = arith.mulf %239, %238 : vector<64x48xf32>
    %241 = arith.truncf %240 : vector<64x48xf32> to vector<64x48xbf16>
    %cst_83 = arith.constant dense<0.000000e+00> : vector<64x128xf32>
    %242 = tpu.matmul %241, %221, %cst_83 {dimension_numbers = #tpu.dot_dimension_numbers<[1], [0], [0], [1], [0, 0, 1, 1], [], []>} : vector<64x48xbf16>, vector<48x128xbf16>, vector<64x128xf32> -> vector<64x128xf32>
    %243 = arith.addf %218, %242 : vector<64x128xf32>
    %c0_84 = arith.constant 0 : index
    %c0_85 = arith.constant 0 : index
    %244 = vector.load %arg13[%c0_84, %c0_85] : memref<64x128xf32, #tpu.memory_space<vmem>>, vector<64x128xf32>
    tpu.vector_store %arg13[%c0_84, %c0_85], %243 {strides = array<i32>} : memref<64x128xf32, #tpu.memory_space<vmem>>, vector<64x128xf32>,
    %245 = tpu.iota {dimensions = array<i32: 1>} : vector<64x96xi32>
    %cst_86 = arith.constant 1.600000e+01 : f32
    %246 = vector.broadcast %cst_86 : f32 to vector<64x1xf32>
    %247 = arith.mulf %39, %246 : vector<64x1xf32>
    %248 = arith.fptosi %247 : vector<64x1xf32> to vector<64x1xi32>
    %249 = vector.broadcast %248 : vector<64x1xi32> to vector<64x96xi32>
    %250 = arith.subi %245, %249 : vector<64x96xi32>
    %cst_87 = arith.constant 1.600000e+01 : f32
    %251 = vector.broadcast %cst_87 : f32 to vector<64x1xf32>
    %252 = arith.mulf %72, %251 : vector<64x1xf32>
    %cst_88 = arith.constant 5.000000e-01 : f32
    %253 = vector.broadcast %cst_88 : f32 to vector<64x1xf32>
    %254 = arith.subf %252, %253 : vector<64x1xf32>
    %255 = math.floor %254 : vector<64x1xf32>
    %256 = arith.subf %254, %255 : vector<64x1xf32>
    %cst_89 = arith.constant 0.000000e+00 : f32
    %cst_90 = arith.constant 1.500000e+01 : f32
    %257 = vector.broadcast %cst_89 : f32 to vector<64x1xf32>
    %258 = arith.maximumf %257, %255 : vector<64x1xf32>
    %259 = vector.broadcast %cst_90 : f32 to vector<64x1xf32>
    %260 = arith.minimumf %259, %258 : vector<64x1xf32>
    %261 = arith.fptosi %260 : vector<64x1xf32> to vector<64x1xi32>
    %cst_91 = arith.constant 1.000000e+00 : f32
    %262 = vector.broadcast %cst_91 : f32 to vector<64x1xf32>
    %263 = arith.addf %255, %262 : vector<64x1xf32>
    %cst_92 = arith.constant 0.000000e+00 : f32
    %cst_93 = arith.constant 1.500000e+01 : f32
    %264 = vector.broadcast %cst_92 : f32 to vector<64x1xf32>
    %265 = arith.maximumf %264, %263 : vector<64x1xf32>
    %266 = vector.broadcast %cst_93 : f32 to vector<64x1xf32>
    %267 = arith.minimumf %266, %265 : vector<64x1xf32>
    %268 = arith.fptosi %267 : vector<64x1xf32> to vector<64x1xi32>
    %269 = vector.broadcast %261 : vector<64x1xi32> to vector<64x96xi32>
    %270 = arith.cmpi eq, %250, %269 : vector<64x96xi32>
    %271 = arith.extui %270 : vector<64x96xi1> to vector<64x96xi32>
    %272 = arith.sitofp %271 : vector<64x96xi32> to vector<64x96xf32>
    %cst_94 = arith.constant 1.000000e+00 : f32
    %273 = vector.broadcast %cst_94 : f32 to vector<64x1xf32>
    %274 = arith.subf %273, %256 : vector<64x1xf32>
    %275 = vector.broadcast %274 : vector<64x1xf32> to vector<64x96xf32>
    %276 = arith.mulf %272, %275 : vector<64x96xf32>
    %277 = vector.broadcast %268 : vector<64x1xi32> to vector<64x96xi32>
    %278 = arith.cmpi eq, %250, %277 : vector<64x96xi32>
    %279 = arith.extui %278 : vector<64x96xi1> to vector<64x96xi32>
    %280 = arith.sitofp %279 : vector<64x96xi32> to vector<64x96xf32>
    %281 = vector.broadcast %256 : vector<64x1xf32> to vector<64x96xf32>
    %282 = arith.mulf %280, %281 : vector<64x96xf32>
    %283 = arith.addf %276, %282 : vector<64x96xf32>
    %284 = vector.broadcast %12 : vector<64x1xf32> to vector<64x96xf32>
    %285 = arith.mulf %283, %284 : vector<64x96xf32>
    %cst_95 = arith.constant 1.600000e+01 : f32
    %286 = vector.broadcast %cst_95 : f32 to vector<64x1xf32>
    %287 = arith.mulf %67, %286 : vector<64x1xf32>
    %cst_96 = arith.constant 5.000000e-01 : f32
    %288 = vector.broadcast %cst_96 : f32 to vector<64x1xf32>
    %289 = arith.subf %287, %288 : vector<64x1xf32>
    %290 = math.floor %289 : vector<64x1xf32>
    %291 = arith.subf %289, %290 : vector<64x1xf32>
    %cst_97 = arith.constant 0.000000e+00 : f32
    %cst_98 = arith.constant 1.500000e+01 : f32
    %292 = vector.broadcast %cst_97 : f32 to vector<64x1xf32>
    %293 = arith.maximumf %292, %290 : vector<64x1xf32>
    %294 = vector.broadcast %cst_98 : f32 to vector<64x1xf32>
    %295 = arith.minimumf %294, %293 : vector<64x1xf32>
    %cst_99 = arith.constant 1.000000e+00 : f32
    %296 = vector.broadcast %cst_99 : f32 to vector<64x1xf32>
    %297 = arith.addf %290, %296 : vector<64x1xf32>
    %cst_100 = arith.constant 0.000000e+00 : f32
    %cst_101 = arith.constant 1.500000e+01 : f32
    %298 = vector.broadcast %cst_100 : f32 to vector<64x1xf32>
    %299 = arith.maximumf %298, %297 : vector<64x1xf32>
    %300 = vector.broadcast %cst_101 : f32 to vector<64x1xf32>
    %301 = arith.minimumf %300, %299 : vector<64x1xf32>
    %302 = arith.truncf %285 : vector<64x96xf32> to vector<64x96xbf16>
    %c0_102 = arith.constant 0 : index
    %c0_103 = arith.constant 0 : index
    %303 = vector.load %arg13[%c0_102, %c0_103] : memref<64x128xf32, #tpu.memory_space<vmem>>, vector<64x128xf32>
    %c0_104 = arith.constant 0 : index
    %c0_105 = arith.constant 0 : index
    %304 = vector.load %arg10[%c0_104, %c0_105] : memref<1x96xf32, #tpu.memory_space<vmem>>, vector<1x96xf32>
    %c0_106 = arith.constant 0 : index
    %c0_107 = arith.constant 0 : index
    %305 = vector.load %arg8[%c0_106, %c0_107] : memref<96x96xbf16, #tpu.memory_space<vmem>>, vector<96x96xbf16>
    %c0_108 = arith.constant 0 : index
    %c0_109 = arith.constant 0 : index
    %306 = vector.load %arg9[%c0_108, %c0_109] : memref<96x128xbf16, #tpu.memory_space<vmem>>, vector<96x128xbf16>
    %307 = vector.broadcast %304 : vector<1x96xf32> to vector<64x96xf32>
    %308 = vector.broadcast %295 : vector<64x1xf32> to vector<64x96xf32>
    %309 = arith.cmpf oeq, %307, %308 : vector<64x96xf32>
    %310 = arith.extui %309 : vector<64x96xi1> to vector<64x96xi32>
    %311 = arith.sitofp %310 : vector<64x96xi32> to vector<64x96xf32>
    %cst_110 = arith.constant 1.000000e+00 : f32
    %312 = vector.broadcast %cst_110 : f32 to vector<64x1xf32>
    %313 = arith.subf %312, %291 : vector<64x1xf32>
    %314 = vector.broadcast %313 : vector<64x1xf32> to vector<64x96xf32>
    %315 = arith.mulf %311, %314 : vector<64x96xf32>
    %316 = vector.broadcast %304 : vector<1x96xf32> to vector<64x96xf32>
    %317 = vector.broadcast %301 : vector<64x1xf32> to vector<64x96xf32>
    %318 = arith.cmpf oeq, %316, %317 : vector<64x96xf32>
    %319 = arith.extui %318 : vector<64x96xi1> to vector<64x96xi32>
    %320 = arith.sitofp %319 : vector<64x96xi32> to vector<64x96xf32>
    %321 = vector.broadcast %291 : vector<64x1xf32> to vector<64x96xf32>
    %322 = arith.mulf %320, %321 : vector<64x96xf32>
    %323 = arith.addf %315, %322 : vector<64x96xf32>
    %cst_111 = arith.constant dense<0.000000e+00> : vector<64x96xf32>
    %324 = tpu.matmul %302, %305, %cst_111 {dimension_numbers = #tpu.dot_dimension_numbers<[1], [0], [0], [1], [0, 0, 1, 1], [], []>} : vector<64x96xbf16>, vector<96x96xbf16>, vector<64x96xf32> -> vector<64x96xf32>
    %325 = arith.mulf %324, %323 : vector<64x96xf32>
    %326 = arith.truncf %325 : vector<64x96xf32> to vector<64x96xbf16>
    %cst_112 = arith.constant dense<0.000000e+00> : vector<64x128xf32>
    %327 = tpu.matmul %326, %306, %cst_112 {dimension_numbers = #tpu.dot_dimension_numbers<[1], [0], [0], [1], [0, 0, 1, 1], [], []>} : vector<64x96xbf16>, vector<96x128xbf16>, vector<64x128xf32> -> vector<64x128xf32>
    %328 = arith.addf %303, %327 : vector<64x128xf32>
    %c0_113 = arith.constant 0 : index
    %c0_114 = arith.constant 0 : index
    %329 = vector.load %arg13[%c0_113, %c0_114] : memref<64x128xf32, #tpu.memory_space<vmem>>, vector<64x128xf32>
    tpu.vector_store %arg13[%c0_113, %c0_114], %328 {strides = array<i32>} : memref<64x128xf32, #tpu.memory_space<vmem>>, vector<64x128xf32>,
    %c0_115 = arith.constant 0 : index
    %c0_116 = arith.constant 0 : index
    %330 = vector.load %arg13[%c0_115, %c0_116] : memref<64x128xf32, #tpu.memory_space<vmem>>, vector<64x128xf32>
    %cst_117 = arith.constant 1.000000e+00 : f32
    %331 = vector.broadcast %cst_117 : f32 to vector<64x1xf32>
    %332 = arith.subf %331, %12 : vector<64x1xf32>
    %c0_118 = arith.constant 0 : index
    %c0_119 = arith.constant 0 : index
    %333 = vector.load %arg11[%c0_118, %c0_119] : memref<1x128xf32, #tpu.memory_space<vmem>>, vector<1x128xf32>
    %334 = vector.broadcast %332 : vector<64x1xf32> to vector<64x128xf32>
    %335 = vector.broadcast %333 : vector<1x128xf32> to vector<64x128xf32>
    %336 = arith.mulf %334, %335 : vector<64x128xf32>
    %337 = arith.addf %330, %336 : vector<64x128xf32>
    %c0_120 = arith.constant 0 : index
    %c0_121 = arith.constant 0 : index
    %338 = vector.load %arg12[%c0_120, %c0_121] : memref<64x128xf32, #tpu.memory_space<vmem>>, vector<64x128xf32>
    tpu.vector_store %arg12[%c0_120, %c0_121], %337 {strides = array<i32>} : memref<64x128xf32, #tpu.memory_space<vmem>>, vector<64x128xf32>,
    return
  }
  func.func @transform_0(%arg0: i32) -> (i32, i32) {
    %c0_i32 = arith.constant 0 : i32
    %c0_i32_0 = arith.constant 0 : i32
    return %arg0, %c0_i32 : i32, i32
  }
  func.func @transform_1(%arg0: i32) -> (i32, i32) {
    %c0_i32 = arith.constant 0 : i32
    %c0_i32_0 = arith.constant 0 : i32
    %c0_i32_1 = arith.constant 0 : i32
    return %c0_i32, %c0_i32_0 : i32, i32
  }
  func.func @transform_2(%arg0: i32) -> (i32, i32) {
    %c0_i32 = arith.constant 0 : i32
    %c0_i32_0 = arith.constant 0 : i32
    %c0_i32_1 = arith.constant 0 : i32
    return %c0_i32, %c0_i32_0 : i32, i32
  }
  func.func @transform_3(%arg0: i32) -> (i32, i32) {
    %c0_i32 = arith.constant 0 : i32
    %c0_i32_0 = arith.constant 0 : i32
    %c0_i32_1 = arith.constant 0 : i32
    return %c0_i32, %c0_i32_0 : i32, i32
  }
  func.func @transform_4(%arg0: i32) -> (i32, i32) {
    %c0_i32 = arith.constant 0 : i32
    %c0_i32_0 = arith.constant 0 : i32
    %c0_i32_1 = arith.constant 0 : i32
    return %c0_i32, %c0_i32_0 : i32, i32
  }
  func.func @transform_5(%arg0: i32) -> (i32, i32) {
    %c0_i32 = arith.constant 0 : i32
    %c0_i32_0 = arith.constant 0 : i32
    %c0_i32_1 = arith.constant 0 : i32
    return %c0_i32, %c0_i32_0 : i32, i32
  }
  func.func @transform_6(%arg0: i32) -> (i32, i32) {
    %c0_i32 = arith.constant 0 : i32
    %c0_i32_0 = arith.constant 0 : i32
    %c0_i32_1 = arith.constant 0 : i32
    return %c0_i32, %c0_i32_0 : i32, i32
  }
  func.func @transform_7(%arg0: i32) -> (i32, i32) {
    %c0_i32 = arith.constant 0 : i32
    %c0_i32_0 = arith.constant 0 : i32
    %c0_i32_1 = arith.constant 0 : i32
    return %c0_i32, %c0_i32_0 : i32, i32
  }
  func.func @transform_8(%arg0: i32) -> (i32, i32) {
    %c0_i32 = arith.constant 0 : i32
    %c0_i32_0 = arith.constant 0 : i32
    %c0_i32_1 = arith.constant 0 : i32
    return %c0_i32, %c0_i32_0 : i32, i32
  }
  func.func @transform_9(%arg0: i32) -> (i32, i32) {
    %c0_i32 = arith.constant 0 : i32
    %c0_i32_0 = arith.constant 0 : i32
    %c0_i32_1 = arith.constant 0 : i32
    return %c0_i32, %c0_i32_0 : i32, i32
  }
  func.func @transform_10(%arg0: i32) -> (i32, i32) {
    %c0_i32 = arith.constant 0 : i32
    %c0_i32_0 = arith.constant 0 : i32
    %c0_i32_1 = arith.constant 0 : i32
    return %c0_i32, %c0_i32_0 : i32, i32
  }
  func.func @transform_11(%arg0: i32) -> (i32, i32) {
    %c0_i32 = arith.constant 0 : i32
    %c0_i32_0 = arith.constant 0 : i32
    return %arg0, %c0_i32 : i32, i32
  }
}

module attributes {stable_mosaic.version = 11 : i64} {
  func.func @_fused_cubemap_kernel(%arg0: i32, %arg1: memref<64x3xf32, #tpu.memory_space<vmem>>, %arg2: memref<24x24xbf16, #tpu.memory_space<vmem>>, %arg3: memref<24x128xbf16, #tpu.memory_space<vmem>>, %arg4: memref<1x24xf32, #tpu.memory_space<vmem>>, %arg5: memref<48x48xbf16, #tpu.memory_space<vmem>>, %arg6: memref<48x128xbf16, #tpu.memory_space<vmem>>, %arg7: memref<1x48xf32, #tpu.memory_space<vmem>>, %arg8: memref<96x96xbf16, #tpu.memory_space<vmem>>, %arg9: memref<96x128xbf16, #tpu.memory_space<vmem>>, %arg10: memref<1x96xf32, #tpu.memory_space<vmem>>, %arg11: memref<1x128xf32, #tpu.memory_space<vmem>>, %arg12: memref<64x128xf32, #tpu.memory_space<vmem>>, %arg13: memref<64x128xf32, #tpu.memory_space<vmem>>) attributes {dimension_semantics = [#tpu.dimension_semantics<parallel>], iteration_bounds = array<i64: 2>, scalar_prefetch = 0 : i64, scratch_operands = 1 : i64, tpu.core_type = #tpu.core_type<tc>, window_params = [{transform_indices = @transform_0, window_bounds = array<i64: 64, 3>}, {pipeline_mode = #tpu.pipeline_mode<synchronous>, transform_indices = @transform_1, window_bounds = array<i64: 24, 24>}, {pipeline_mode = #tpu.pipeline_mode<synchronous>, transform_indices = @transform_2, window_bounds = array<i64: 24, 128>}, {pipeline_mode = #tpu.pipeline_mode<synchronous>, transform_indices = @transform_3, window_bounds = array<i64: 1, 24>}, {pipeline_mode = #tpu.pipeline_mode<synchronous>, transform_indices = @transform_4, window_bounds = array<i64: 48, 48>}, {pipeline_mode = #tpu.pipeline_mode<synchronous>, transform_indices = @transform_5, window_bounds = array<i64: 48, 128>}, {pipeline_mode = #tpu.pipeline_mode<synchronous>, transform_indices = @transform_6, window_bounds = array<i64: 1, 48>}, {pipeline_mode = #tpu.pipeline_mode<synchronous>, transform_indices = @transform_7, window_bounds = array<i64: 96, 96>}, {pipeline_mode = #tpu.pipeline_mode<synchronous>, transform_indices = @transform_8, window_bounds = array<i64: 96, 128>}, {pipeline_mode = #tpu.pipeline_mode<synchronous>, transform_indices = @transform_9, window_bounds = array<i64: 1, 96>}, {pipeline_mode = #tpu.pipeline_mode<synchronous>, transform_indices = @transform_10, window_bounds = array<i64: 1, 128>}, {transform_indices = @transform_11, window_bounds = array<i64: 64, 128>}]} {
    %c0 = arith.constant 0 : index
    %c0_0 = arith.constant 0 : index
    %0 = vector.load %arg1[%c0, %c0_0] : memref<64x3xf32, #tpu.memory_space<vmem>>, vector<64x3xf32>
    %1 = vector.extract_strided_slice %0 {offsets = [0, 0], sizes = [64, 1], strides = [1, 1]} : vector<64x3xf32> to vector<64x1xf32>
    %2 = vector.extract_strided_slice %0 {offsets = [0, 1], sizes = [64, 1], strides = [1, 1]} : vector<64x3xf32> to vector<64x1xf32>
    %3 = vector.extract_strided_slice %0 {offsets = [0, 2], sizes = [64, 1], strides = [1, 1]} : vector<64x3xf32> to vector<64x1xf32>
    %4 = math.absf %1 : vector<64x1xf32>
    %5 = math.absf %2 : vector<64x1xf32>
    %6 = math.absf %3 : vector<64x1xf32>
    %7 = arith.maximumf %4, %5 : vector<64x1xf32>
    %8 = arith.maximumf %7, %6 : vector<64x1xf32>
    %cst = arith.constant 0.000000e+00 : f32
    %9 = vector.broadcast %cst : f32 to vector<64x1xf32>
    %10 = arith.cmpf ogt, %8, %9 : vector<64x1xf32>
    %11 = arith.extui %10 : vector<64x1xi1> to vector<64x1xi32>
    %12 = arith.sitofp %11 : vector<64x1xi32> to vector<64x1xf32>
    %cst_1 = arith.constant 0.000000e+00 : f32
    %13 = vector.broadcast %cst_1 : f32 to vector<64x1xf32>
    %14 = arith.cmpf ogt, %8, %13 : vector<64x1xf32>
    %cst_2 = arith.constant 1.000000e+00 : f32
    %15 = vector.broadcast %cst_2 : f32 to vector<64x1xf32>
    %16 = arith.select %14, %8, %15 : vector<64x1xi1>, vector<64x1xf32>
    %17 = arith.cmpf oge, %4, %5 : vector<64x1xf32>
    %18 = arith.cmpf oge, %4, %6 : vector<64x1xf32>
    %19 = arith.andi %17, %18 : vector<64x1xi1>
    %cst_3 = arith.constant dense<true> : vector<64x1xi1>
    %20 = arith.xori %19, %cst_3 : vector<64x1xi1>
    %21 = arith.cmpf oge, %5, %6 : vector<64x1xf32>
    %22 = arith.andi %20, %21 : vector<64x1xi1>
    %cst_4 = arith.constant 0.000000e+00 : f32
    %23 = vector.broadcast %cst_4 : f32 to vector<64x1xf32>
    %24 = arith.cmpf ogt, %1, %23 : vector<64x1xf32>
    %cst_5 = arith.constant 0.000000e+00 : f32
    %cst_6 = arith.constant 1.000000e+00 : f32
    %25 = vector.broadcast %cst_5 : f32 to vector<64x1xf32>
    %26 = vector.broadcast %cst_6 : f32 to vector<64x1xf32>
    %27 = arith.select %24, %25, %26 : vector<64x1xi1>, vector<64x1xf32>
    %cst_7 = arith.constant 0.000000e+00 : f32
    %28 = vector.broadcast %cst_7 : f32 to vector<64x1xf32>
    %29 = arith.cmpf ogt, %2, %28 : vector<64x1xf32>
    %cst_8 = arith.constant 2.000000e+00 : f32
    %cst_9 = arith.constant 3.000000e+00 : f32
    %30 = vector.broadcast %cst_8 : f32 to vector<64x1xf32>
    %31 = vector.broadcast %cst_9 : f32 to vector<64x1xf32>
    %32 = arith.select %29, %30, %31 : vector<64x1xi1>, vector<64x1xf32>
    %cst_10 = arith.constant 0.000000e+00 : f32
    %33 = vector.broadcast %cst_10 : f32 to vector<64x1xf32>
    %34 = arith.cmpf ogt, %3, %33 : vector<64x1xf32>
    %cst_11 = arith.constant 4.000000e+00 : f32
    %cst_12 = arith.constant 5.000000e+00 : f32
    %35 = vector.broadcast %cst_11 : f32 to vector<64x1xf32>
    %36 = vector.broadcast %cst_12 : f32 to vector<64x1xf32>
    %37 = arith.select %34, %35, %36 : vector<64x1xi1>, vector<64x1xf32>
    %38 = arith.select %22, %32, %37 : vector<64x1xi1>, vector<64x1xf32>
    %39 = arith.select %19, %27, %38 : vector<64x1xi1>, vector<64x1xf32>
    %cst_13 = arith.constant 0.000000e+00 : f32
    %40 = vector.broadcast %cst_13 : f32 to vector<64x1xf32>
    %41 = arith.cmpf ogt, %1, %40 : vector<64x1xf32>
    %cst_14 = arith.constant 0.000000e+00 : f32
    %42 = vector.broadcast %cst_14 : f32 to vector<64x1xf32>
    %43 = arith.subf %42, %3 : vector<64x1xf32>
    %44 = arith.select %41, %43, %3 : vector<64x1xi1>, vector<64x1xf32>
    %cst_15 = arith.constant 0.000000e+00 : f32
    %45 = vector.broadcast %cst_15 : f32 to vector<64x1xf32>
    %46 = arith.cmpf ogt, %3, %45 : vector<64x1xf32>
    %cst_16 = arith.constant 0.000000e+00 : f32
    %47 = vector.broadcast %cst_16 : f32 to vector<64x1xf32>
    %48 = arith.subf %47, %1 : vector<64x1xf32>
    %49 = arith.select %46, %1, %48 : vector<64x1xi1>, vector<64x1xf32>
    %50 = arith.select %22, %1, %49 : vector<64x1xi1>, vector<64x1xf32>
    %51 = arith.select %19, %44, %50 : vector<64x1xi1>, vector<64x1xf32>
    %cst_17 = arith.constant 0.000000e+00 : f32
    %52 = vector.broadcast %cst_17 : f32 to vector<64x1xf32>
    %53 = arith.subf %52, %2 : vector<64x1xf32>
    %cst_18 = arith.constant 0.000000e+00 : f32
    %54 = vector.broadcast %cst_18 : f32 to vector<64x1xf32>
    %55 = arith.cmpf ogt, %2, %54 : vector<64x1xf32>
    %cst_19 = arith.constant 0.000000e+00 : f32
    %56 = vector.broadcast %cst_19 : f32 to vector<64x1xf32>
    %57 = arith.subf %56, %3 : vector<64x1xf32>
    %58 = arith.select %55, %3, %57 : vector<64x1xi1>, vector<64x1xf32>
    %cst_20 = arith.constant 0.000000e+00 : f32
    %59 = vector.broadcast %cst_20 : f32 to vector<64x1xf32>
    %60 = arith.subf %59, %2 : vector<64x1xf32>
    %61 = arith.select %22, %58, %60 : vector<64x1xi1>, vector<64x1xf32>
    %62 = arith.select %19, %53, %61 : vector<64x1xi1>, vector<64x1xf32>
    %63 = arith.divf %51, %16 : vector<64x1xf32>
    %cst_21 = arith.constant 1.000000e+00 : f32
    %64 = vector.broadcast %cst_21 : f32 to vector<64x1xf32>
    %65 = arith.addf %63, %64 : vector<64x1xf32>
    %cst_22 = arith.constant 5.000000e-01 : f32
    %66 = vector.broadcast %cst_22 : f32 to vector<64x1xf32>
    %67 = arith.mulf %66, %65 : vector<64x1xf32>
    %68 = arith.divf %62, %16 : vector<64x1xf32>
    %cst_23 = arith.constant 1.000000e+00 : f32
    %69 = vector.broadcast %cst_23 : f32 to vector<64x1xf32>
    %70 = arith.addf %68, %69 : vector<64x1xf32>
    %cst_24 = arith.constant 5.000000e-01 : f32
    %71 = vector.broadcast %cst_24 : f32 to vector<64x1xf32>
    %72 = arith.mulf %71, %70 : vector<64x1xf32>
    %cst_25 = arith.constant 0.000000e+00 : f32
    %73 = vector.broadcast %cst_25 : f32 to vector<64x128xf32>
    %c0_26 = arith.constant 0 : index
    %c0_27 = arith.constant 0 : index
    %74 = vector.load %arg13[%c0_26, %c0_27] : memref<64x128xf32, #tpu.memory_space<vmem>>, vector<64x128xf32>
    tpu.vector_store %arg13[%c0_26, %c0_27], %73 {strides = array<i32>} : memref<64x128xf32, #tpu.memory_space<vmem>>, vector<64x128xf32>,
    %75 = tpu.iota {dimensions = array<i32: 1>} : vector<64x24xi32>
    %cst_28 = arith.constant 4.000000e+00 : f32
    %76 = vector.broadcast %cst_28 : f32 to vector<64x1xf32>
    %77 = arith.mulf %39, %76 : vector<64x1xf32>
    %78 = arith.fptosi %77 : vector<64x1xf32> to vector<64x1xi32>
    %79 = vector.broadcast %78 : vector<64x1xi32> to vector<64x24xi32>
    %80 = arith.subi %75, %79 : vector<64x24xi32>
    %cst_29 = arith.constant 4.000000e+00 : f32
    %81 = vector.broadcast %cst_29 : f32 to vector<64x1xf32>
    %82 = arith.mulf %72, %81 : vector<64x1xf32>
    %cst_30 = arith.constant 5.000000e-01 : f32
    %83 = vector.broadcast %cst_30 : f32 to vector<64x1xf32>
    %84 = arith.subf %82, %83 : vector<64x1xf32>
    %85 = math.floor %84 : vector<64x1xf32>
    %86 = arith.subf %84, %85 : vector<64x1xf32>
    %cst_31 = arith.constant 0.000000e+00 : f32
    %cst_32 = arith.constant 3.000000e+00 : f32
    %87 = vector.broadcast %cst_31 : f32 to vector<64x1xf32>
    %88 = arith.maximumf %87, %85 : vector<64x1xf32>
    %89 = vector.broadcast %cst_32 : f32 to vector<64x1xf32>
    %90 = arith.minimumf %89, %88 : vector<64x1xf32>
    %91 = arith.fptosi %90 : vector<64x1xf32> to vector<64x1xi32>
    %cst_33 = arith.constant 1.000000e+00 : f32
    %92 = vector.broadcast %cst_33 : f32 to vector<64x1xf32>
    %93 = arith.addf %85, %92 : vector<64x1xf32>
    %cst_34 = arith.constant 0.000000e+00 : f32
    %cst_35 = arith.constant 3.000000e+00 : f32
    %94 = vector.broadcast %cst_34 : f32 to vector<64x1xf32>
    %95 = arith.maximumf %94, %93 : vector<64x1xf32>
    %96 = vector.broadcast %cst_35 : f32 to vector<64x1xf32>
    %97 = arith.minimumf %96, %95 : vector<64x1xf32>
    %98 = arith.fptosi %97 : vector<64x1xf32> to vector<64x1xi32>
    %99 = vector.broadcast %91 : vector<64x1xi32> to vector<64x24xi32>
    %100 = arith.cmpi eq, %80, %99 : vector<64x24xi32>
    %101 = arith.extui %100 : vector<64x24xi1> to vector<64x24xi32>
    %102 = arith.sitofp %101 : vector<64x24xi32> to vector<64x24xf32>
    %cst_36 = arith.constant 1.000000e+00 : f32
    %103 = vector.broadcast %cst_36 : f32 to vector<64x1xf32>
    %104 = arith.subf %103, %86 : vector<64x1xf32>
    %105 = vector.broadcast %104 : vector<64x1xf32> to vector<64x24xf32>
    %106 = arith.mulf %102, %105 : vector<64x24xf32>
    %107 = vector.broadcast %98 : vector<64x1xi32> to vector<64x24xi32>
    %108 = arith.cmpi eq, %80, %107 : vector<64x24xi32>
    %109 = arith.extui %108 : vector<64x24xi1> to vector<64x24xi32>
    %110 = arith.sitofp %109 : vector<64x24xi32> to vector<64x24xf32>
    %111 = vector.broadcast %86 : vector<64x1xf32> to vector<64x24xf32>
    %112 = arith.mulf %110, %111 : vector<64x24xf32>
    %113 = arith.addf %106, %112 : vector<64x24xf32>
    %114 = vector.broadcast %12 : vector<64x1xf32> to vector<64x24xf32>
    %115 = arith.mulf %113, %114 : vector<64x24xf32>
    %cst_37 = arith.constant 4.000000e+00 : f32
    %116 = vector.broadcast %cst_37 : f32 to vector<64x1xf32>
    %117 = arith.mulf %67, %116 : vector<64x1xf32>
    %cst_38 = arith.constant 5.000000e-01 : f32
    %118 = vector.broadcast %cst_38 : f32 to vector<64x1xf32>
    %119 = arith.subf %117, %118 : vector<64x1xf32>
    %120 = math.floor %119 : vector<64x1xf32>
    %121 = arith.subf %119, %120 : vector<64x1xf32>
    %cst_39 = arith.constant 0.000000e+00 : f32
    %cst_40 = arith.constant 3.000000e+00 : f32
    %122 = vector.broadcast %cst_39 : f32 to vector<64x1xf32>
    %123 = arith.maximumf %122, %120 : vector<64x1xf32>
    %124 = vector.broadcast %cst_40 : f32 to vector<64x1xf32>
    %125 = arith.minimumf %124, %123 : vector<64x1xf32>
    %cst_41 = arith.constant 1.000000e+00 : f32
    %126 = vector.broadcast %cst_41 : f32 to vector<64x1xf32>
    %127 = arith.addf %120, %126 : vector<64x1xf32>
    %cst_42 = arith.constant 0.000000e+00 : f32
    %cst_43 = arith.constant 3.000000e+00 : f32
    %128 = vector.broadcast %cst_42 : f32 to vector<64x1xf32>
    %129 = arith.maximumf %128, %127 : vector<64x1xf32>
    %130 = vector.broadcast %cst_43 : f32 to vector<64x1xf32>
    %131 = arith.minimumf %130, %129 : vector<64x1xf32>
    %132 = arith.truncf %115 : vector<64x24xf32> to vector<64x24xbf16>
    %c0_44 = arith.constant 0 : index
    %c0_45 = arith.constant 0 : index
    %133 = vector.load %arg13[%c0_44, %c0_45] : memref<64x128xf32, #tpu.memory_space<vmem>>, vector<64x128xf32>
    %c0_46 = arith.constant 0 : index
    %c0_47 = arith.constant 0 : index
    %134 = vector.load %arg4[%c0_46, %c0_47] : memref<1x24xf32, #tpu.memory_space<vmem>>, vector<1x24xf32>
    %c0_48 = arith.constant 0 : index
    %c0_49 = arith.constant 0 : index
    %135 = vector.load %arg2[%c0_48, %c0_49] : memref<24x24xbf16, #tpu.memory_space<vmem>>, vector<24x24xbf16>
    %c0_50 = arith.constant 0 : index
    %c0_51 = arith.constant 0 : index
    %136 = vector.load %arg3[%c0_50, %c0_51] : memref<24x128xbf16, #tpu.memory_space<vmem>>, vector<24x128xbf16>
    %137 = vector.broadcast %134 : vector<1x24xf32> to vector<64x24xf32>
    %138 = vector.broadcast %125 : vector<64x1xf32> to vector<64x24xf32>
    %139 = arith.cmpf oeq, %137, %138 : vector<64x24xf32>
    %140 = arith.extui %139 : vector<64x24xi1> to vector<64x24xi32>
    %141 = arith.sitofp %140 : vector<64x24xi32> to vector<64x24xf32>
    %cst_52 = arith.constant 1.000000e+00 : f32
    %142 = vector.broadcast %cst_52 : f32 to vector<64x1xf32>
    %143 = arith.subf %142, %121 : vector<64x1xf32>
    %144 = vector.broadcast %143 : vector<64x1xf32> to vector<64x24xf32>
    %145 = arith.mulf %141, %144 : vector<64x24xf32>
    %146 = vector.broadcast %134 : vector<1x24xf32> to vector<64x24xf32>
    %147 = vector.broadcast %131 : vector<64x1xf32> to vector<64x24xf32>
    %148 = arith.cmpf oeq, %146, %147 : vector<64x24xf32>
    %149 = arith.extui %148 : vector<64x24xi1> to vector<64x24xi32>
    %150 = arith.sitofp %149 : vector<64x24xi32> to vector<64x24xf32>
    %151 = vector.broadcast %121 : vector<64x1xf32> to vector<64x24xf32>
    %152 = arith.mulf %150, %151 : vector<64x24xf32>
    %153 = arith.addf %145, %152 : vector<64x24xf32>
    %cst_53 = arith.constant dense<0.000000e+00> : vector<64x24xf32>
    %154 = tpu.matmul %132, %135, %cst_53 {dimension_numbers = #tpu.dot_dimension_numbers<[1], [0], [0], [1], [0, 0, 1, 1], [], []>} : vector<64x24xbf16>, vector<24x24xbf16>, vector<64x24xf32> -> vector<64x24xf32>
    %155 = arith.mulf %154, %153 : vector<64x24xf32>
    %156 = arith.truncf %155 : vector<64x24xf32> to vector<64x24xbf16>
    %cst_54 = arith.constant dense<0.000000e+00> : vector<64x128xf32>
    %157 = tpu.matmul %156, %136, %cst_54 {dimension_numbers = #tpu.dot_dimension_numbers<[1], [0], [0], [1], [0, 0, 1, 1], [], []>} : vector<64x24xbf16>, vector<24x128xbf16>, vector<64x128xf32> -> vector<64x128xf32>
    %158 = arith.addf %133, %157 : vector<64x128xf32>
    %c0_55 = arith.constant 0 : index
    %c0_56 = arith.constant 0 : index
    %159 = vector.load %arg13[%c0_55, %c0_56] : memref<64x128xf32, #tpu.memory_space<vmem>>, vector<64x128xf32>
    tpu.vector_store %arg13[%c0_55, %c0_56], %158 {strides = array<i32>} : memref<64x128xf32, #tpu.memory_space<vmem>>, vector<64x128xf32>,
    %160 = tpu.iota {dimensions = array<i32: 1>} : vector<64x48xi32>
    %cst_57 = arith.constant 8.000000e+00 : f32
    %161 = vector.broadcast %cst_57 : f32 to vector<64x1xf32>
    %162 = arith.mulf %39, %161 : vector<64x1xf32>
    %163 = arith.fptosi %162 : vector<64x1xf32> to vector<64x1xi32>
    %164 = vector.broadcast %163 : vector<64x1xi32> to vector<64x48xi32>
    %165 = arith.subi %160, %164 : vector<64x48xi32>
    %cst_58 = arith.constant 8.000000e+00 : f32
    %166 = vector.broadcast %cst_58 : f32 to vector<64x1xf32>
    %167 = arith.mulf %72, %166 : vector<64x1xf32>
    %cst_59 = arith.constant 5.000000e-01 : f32
    %168 = vector.broadcast %cst_59 : f32 to vector<64x1xf32>
    %169 = arith.subf %167, %168 : vector<64x1xf32>
    %170 = math.floor %169 : vector<64x1xf32>
    %171 = arith.subf %169, %170 : vector<64x1xf32>
    %cst_60 = arith.constant 0.000000e+00 : f32
    %cst_61 = arith.constant 7.000000e+00 : f32
    %172 = vector.broadcast %cst_60 : f32 to vector<64x1xf32>
    %173 = arith.maximumf %172, %170 : vector<64x1xf32>
    %174 = vector.broadcast %cst_61 : f32 to vector<64x1xf32>
    %175 = arith.minimumf %174, %173 : vector<64x1xf32>
    %176 = arith.fptosi %175 : vector<64x1xf32> to vector<64x1xi32>
    %cst_62 = arith.constant 1.000000e+00 : f32
    %177 = vector.broadcast %cst_62 : f32 to vector<64x1xf32>
    %178 = arith.addf %170, %177 : vector<64x1xf32>
    %cst_63 = arith.constant 0.000000e+00 : f32
    %cst_64 = arith.constant 7.000000e+00 : f32
    %179 = vector.broadcast %cst_63 : f32 to vector<64x1xf32>
    %180 = arith.maximumf %179, %178 : vector<64x1xf32>
    %181 = vector.broadcast %cst_64 : f32 to vector<64x1xf32>
    %182 = arith.minimumf %181, %180 : vector<64x1xf32>
    %183 = arith.fptosi %182 : vector<64x1xf32> to vector<64x1xi32>
    %184 = vector.broadcast %176 : vector<64x1xi32> to vector<64x48xi32>
    %185 = arith.cmpi eq, %165, %184 : vector<64x48xi32>
    %186 = arith.extui %185 : vector<64x48xi1> to vector<64x48xi32>
    %187 = arith.sitofp %186 : vector<64x48xi32> to vector<64x48xf32>
    %cst_65 = arith.constant 1.000000e+00 : f32
    %188 = vector.broadcast %cst_65 : f32 to vector<64x1xf32>
    %189 = arith.subf %188, %171 : vector<64x1xf32>
    %190 = vector.broadcast %189 : vector<64x1xf32> to vector<64x48xf32>
    %191 = arith.mulf %187, %190 : vector<64x48xf32>
    %192 = vector.broadcast %183 : vector<64x1xi32> to vector<64x48xi32>
    %193 = arith.cmpi eq, %165, %192 : vector<64x48xi32>
    %194 = arith.extui %193 : vector<64x48xi1> to vector<64x48xi32>
    %195 = arith.sitofp %194 : vector<64x48xi32> to vector<64x48xf32>
    %196 = vector.broadcast %171 : vector<64x1xf32> to vector<64x48xf32>
    %197 = arith.mulf %195, %196 : vector<64x48xf32>
    %198 = arith.addf %191, %197 : vector<64x48xf32>
    %199 = vector.broadcast %12 : vector<64x1xf32> to vector<64x48xf32>
    %200 = arith.mulf %198, %199 : vector<64x48xf32>
    %cst_66 = arith.constant 8.000000e+00 : f32
    %201 = vector.broadcast %cst_66 : f32 to vector<64x1xf32>
    %202 = arith.mulf %67, %201 : vector<64x1xf32>
    %cst_67 = arith.constant 5.000000e-01 : f32
    %203 = vector.broadcast %cst_67 : f32 to vector<64x1xf32>
    %204 = arith.subf %202, %203 : vector<64x1xf32>
    %205 = math.floor %204 : vector<64x1xf32>
    %206 = arith.subf %204, %205 : vector<64x1xf32>
    %cst_68 = arith.constant 0.000000e+00 : f32
    %cst_69 = arith.constant 7.000000e+00 : f32
    %207 = vector.broadcast %cst_68 : f32 to vector<64x1xf32>
    %208 = arith.maximumf %207, %205 : vector<64x1xf32>
    %209 = vector.broadcast %cst_69 : f32 to vector<64x1xf32>
    %210 = arith.minimumf %209, %208 : vector<64x1xf32>
    %cst_70 = arith.constant 1.000000e+00 : f32
    %211 = vector.broadcast %cst_70 : f32 to vector<64x1xf32>
    %212 = arith.addf %205, %211 : vector<64x1xf32>
    %cst_71 = arith.constant 0.000000e+00 : f32
    %cst_72 = arith.constant 7.000000e+00 : f32
    %213 = vector.broadcast %cst_71 : f32 to vector<64x1xf32>
    %214 = arith.maximumf %213, %212 : vector<64x1xf32>
    %215 = vector.broadcast %cst_72 : f32 to vector<64x1xf32>
    %216 = arith.minimumf %215, %214 : vector<64x1xf32>
    %217 = arith.truncf %200 : vector<64x48xf32> to vector<64x48xbf16>
    %c0_73 = arith.constant 0 : index
    %c0_74 = arith.constant 0 : index
    %218 = vector.load %arg13[%c0_73, %c0_74] : memref<64x128xf32, #tpu.memory_space<vmem>>, vector<64x128xf32>
    %c0_75 = arith.constant 0 : index
    %c0_76 = arith.constant 0 : index
    %219 = vector.load %arg7[%c0_75, %c0_76] : memref<1x48xf32, #tpu.memory_space<vmem>>, vector<1x48xf32>
    %c0_77 = arith.constant 0 : index
    %c0_78 = arith.constant 0 : index
    %220 = vector.load %arg5[%c0_77, %c0_78] : memref<48x48xbf16, #tpu.memory_space<vmem>>, vector<48x48xbf16>
    %c0_79 = arith.constant 0 : index
    %c0_80 = arith.constant 0 : index
    %221 = vector.load %arg6[%c0_79, %c0_80] : memref<48x128xbf16, #tpu.memory_space<vmem>>, vector<48x128xbf16>
    %222 = vector.broadcast %219 : vector<1x48xf32> to vector<64x48xf32>
    %223 = vector.broadcast %210 : vector<64x1xf32> to vector<64x48xf32>
    %224 = arith.cmpf oeq, %222, %223 : vector<64x48xf32>
    %225 = arith.extui %224 : vector<64x48xi1> to vector<64x48xi32>
    %226 = arith.sitofp %225 : vector<64x48xi32> to vector<64x48xf32>
    %cst_81 = arith.constant 1.000000e+00 : f32
    %227 = vector.broadcast %cst_81 : f32 to vector<64x1xf32>
    %228 = arith.subf %227, %206 : vector<64x1xf32>
    %229 = vector.broadcast %228 : vector<64x1xf32> to vector<64x48xf32>
    %230 = arith.mulf %226, %229 : vector<64x48xf32>
    %231 = vector.broadcast %219 : vector<1x48xf32> to vector<64x48xf32>
    %232 = vector.broadcast %216 : vector<64x1xf32> to vector<64x48xf32>
    %233 = arith.cmpf oeq, %231, %232 : vector<64x48xf32>
    %234 = arith.extui %233 : vector<64x48xi1> to vector<64x48xi32>
    %235 = arith.sitofp %234 : vector<64x48xi32> to vector<64x48xf32>
    %236 = vector.broadcast %206 : vector<64x1xf32> to vector<64x48xf32>
    %237 = arith.mulf %235, %236 : vector<64x48xf32>
    %238 = arith.addf %230, %237 : vector<64x48xf32>
    %cst_82 = arith.constant dense<0.000000e+00> : vector<64x48xf32>
    %239 = tpu.matmul %217, %220, %cst_82 {dimension_numbers = #tpu.dot_dimension_numbers<[1], [0], [0], [1], [0, 0, 1, 1], [], []>} : vector<64x48xbf16>, vector<48x48xbf16>, vector<64x48xf32> -> vector<64x48xf32>
    %240 = arith.mulf %239, %238 : vector<64x48xf32>
    %241 = arith.truncf %240 : vector<64x48xf32> to vector<64x48xbf16>
    %cst_83 = arith.constant dense<0.000000e+00> : vector<64x128xf32>
    %242 = tpu.matmul %241, %221, %cst_83 {dimension_numbers = #tpu.dot_dimension_numbers<[1], [0], [0], [1], [0, 0, 1, 1], [], []>} : vector<64x48xbf16>, vector<48x128xbf16>, vector<64x128xf32> -> vector<64x128xf32>
    %243 = arith.addf %218, %242 : vector<64x128xf32>
    %c0_84 = arith.constant 0 : index
    %c0_85 = arith.constant 0 : index
    %244 = vector.load %arg13[%c0_84, %c0_85] : memref<64x128xf32, #tpu.memory_space<vmem>>, vector<64x128xf32>
    tpu.vector_store %arg13[%c0_84, %c0_85], %243 {strides = array<i32>} : memref<64x128xf32, #tpu.memory_space<vmem>>, vector<64x128xf32>,
    %245 = tpu.iota {dimensions = array<i32: 1>} : vector<64x96xi32>
    %cst_86 = arith.constant 1.600000e+01 : f32
    %246 = vector.broadcast %cst_86 : f32 to vector<64x1xf32>
    %247 = arith.mulf %39, %246 : vector<64x1xf32>
    %248 = arith.fptosi %247 : vector<64x1xf32> to vector<64x1xi32>
    %249 = vector.broadcast %248 : vector<64x1xi32> to vector<64x96xi32>
    %250 = arith.subi %245, %249 : vector<64x96xi32>
    %cst_87 = arith.constant 1.600000e+01 : f32
    %251 = vector.broadcast %cst_87 : f32 to vector<64x1xf32>
    %252 = arith.mulf %72, %251 : vector<64x1xf32>
    %cst_88 = arith.constant 5.000000e-01 : f32
    %253 = vector.broadcast %cst_88 : f32 to vector<64x1xf32>
    %254 = arith.subf %252, %253 : vector<64x1xf32>
    %255 = math.floor %254 : vector<64x1xf32>
    %256 = arith.subf %254, %255 : vector<64x1xf32>
    %cst_89 = arith.constant 0.000000e+00 : f32
    %cst_90 = arith.constant 1.500000e+01 : f32
    %257 = vector.broadcast %cst_89 : f32 to vector<64x1xf32>
    %258 = arith.maximumf %257, %255 : vector<64x1xf32>
    %259 = vector.broadcast %cst_90 : f32 to vector<64x1xf32>
    %260 = arith.minimumf %259, %258 : vector<64x1xf32>
    %261 = arith.fptosi %260 : vector<64x1xf32> to vector<64x1xi32>
    %cst_91 = arith.constant 1.000000e+00 : f32
    %262 = vector.broadcast %cst_91 : f32 to vector<64x1xf32>
    %263 = arith.addf %255, %262 : vector<64x1xf32>
    %cst_92 = arith.constant 0.000000e+00 : f32
    %cst_93 = arith.constant 1.500000e+01 : f32
    %264 = vector.broadcast %cst_92 : f32 to vector<64x1xf32>
    %265 = arith.maximumf %264, %263 : vector<64x1xf32>
    %266 = vector.broadcast %cst_93 : f32 to vector<64x1xf32>
    %267 = arith.minimumf %266, %265 : vector<64x1xf32>
    %268 = arith.fptosi %267 : vector<64x1xf32> to vector<64x1xi32>
    %269 = vector.broadcast %261 : vector<64x1xi32> to vector<64x96xi32>
    %270 = arith.cmpi eq, %250, %269 : vector<64x96xi32>
    %271 = arith.extui %270 : vector<64x96xi1> to vector<64x96xi32>
    %272 = arith.sitofp %271 : vector<64x96xi32> to vector<64x96xf32>
    %cst_94 = arith.constant 1.000000e+00 : f32
    %273 = vector.broadcast %cst_94 : f32 to vector<64x1xf32>
    %274 = arith.subf %273, %256 : vector<64x1xf32>
    %275 = vector.broadcast %274 : vector<64x1xf32> to vector<64x96xf32>
    %276 = arith.mulf %272, %275 : vector<64x96xf32>
    %277 = vector.broadcast %268 : vector<64x1xi32> to vector<64x96xi32>
    %278 = arith.cmpi eq, %250, %277 : vector<64x96xi32>
    %279 = arith.extui %278 : vector<64x96xi1> to vector<64x96xi32>
    %280 = arith.sitofp %279 : vector<64x96xi32> to vector<64x96xf32>
    %281 = vector.broadcast %256 : vector<64x1xf32> to vector<64x96xf32>
    %282 = arith.mulf %280, %281 : vector<64x96xf32>
    %283 = arith.addf %276, %282 : vector<64x96xf32>
    %284 = vector.broadcast %12 : vector<64x1xf32> to vector<64x96xf32>
    %285 = arith.mulf %283, %284 : vector<64x96xf32>
    %cst_95 = arith.constant 1.600000e+01 : f32
    %286 = vector.broadcast %cst_95 : f32 to vector<64x1xf32>
    %287 = arith.mulf %67, %286 : vector<64x1xf32>
    %cst_96 = arith.constant 5.000000e-01 : f32
    %288 = vector.broadcast %cst_96 : f32 to vector<64x1xf32>
    %289 = arith.subf %287, %288 : vector<64x1xf32>
    %290 = math.floor %289 : vector<64x1xf32>
    %291 = arith.subf %289, %290 : vector<64x1xf32>
    %cst_97 = arith.constant 0.000000e+00 : f32
    %cst_98 = arith.constant 1.500000e+01 : f32
    %292 = vector.broadcast %cst_97 : f32 to vector<64x1xf32>
    %293 = arith.maximumf %292, %290 : vector<64x1xf32>
    %294 = vector.broadcast %cst_98 : f32 to vector<64x1xf32>
    %295 = arith.minimumf %294, %293 : vector<64x1xf32>
    %cst_99 = arith.constant 1.000000e+00 : f32
    %296 = vector.broadcast %cst_99 : f32 to vector<64x1xf32>
    %297 = arith.addf %290, %296 : vector<64x1xf32>
    %cst_100 = arith.constant 0.000000e+00 : f32
    %cst_101 = arith.constant 1.500000e+01 : f32
    %298 = vector.broadcast %cst_100 : f32 to vector<64x1xf32>
    %299 = arith.maximumf %298, %297 : vector<64x1xf32>
    %300 = vector.broadcast %cst_101 : f32 to vector<64x1xf32>
    %301 = arith.minimumf %300, %299 : vector<64x1xf32>
    %302 = arith.truncf %285 : vector<64x96xf32> to vector<64x96xbf16>
    %c0_102 = arith.constant 0 : index
    %c0_103 = arith.constant 0 : index
    %303 = vector.load %arg13[%c0_102, %c0_103] : memref<64x128xf32, #tpu.memory_space<vmem>>, vector<64x128xf32>
    %c0_104 = arith.constant 0 : index
    %c0_105 = arith.constant 0 : index
    %304 = vector.load %arg10[%c0_104, %c0_105] : memref<1x96xf32, #tpu.memory_space<vmem>>, vector<1x96xf32>
    %c0_106 = arith.constant 0 : index
    %c0_107 = arith.constant 0 : index
    %305 = vector.load %arg8[%c0_106, %c0_107] : memref<96x96xbf16, #tpu.memory_space<vmem>>, vector<96x96xbf16>
    %c0_108 = arith.constant 0 : index
    %c0_109 = arith.constant 0 : index
    %306 = vector.load %arg9[%c0_108, %c0_109] : memref<96x128xbf16, #tpu.memory_space<vmem>>, vector<96x128xbf16>
    %307 = vector.broadcast %304 : vector<1x96xf32> to vector<64x96xf32>
    %308 = vector.broadcast %295 : vector<64x1xf32> to vector<64x96xf32>
    %309 = arith.cmpf oeq, %307, %308 : vector<64x96xf32>
    %310 = arith.extui %309 : vector<64x96xi1> to vector<64x96xi32>
    %311 = arith.sitofp %310 : vector<64x96xi32> to vector<64x96xf32>
    %cst_110 = arith.constant 1.000000e+00 : f32
    %312 = vector.broadcast %cst_110 : f32 to vector<64x1xf32>
    %313 = arith.subf %312, %291 : vector<64x1xf32>
    %314 = vector.broadcast %313 : vector<64x1xf32> to vector<64x96xf32>
    %315 = arith.mulf %311, %314 : vector<64x96xf32>
    %316 = vector.broadcast %304 : vector<1x96xf32> to vector<64x96xf32>
    %317 = vector.broadcast %301 : vector<64x1xf32> to vector<64x96xf32>
    %318 = arith.cmpf oeq, %316, %317 : vector<64x96xf32>
    %319 = arith.extui %318 : vector<64x96xi1> to vector<64x96xi32>
    %320 = arith.sitofp %319 : vector<64x96xi32> to vector<64x96xf32>
    %321 = vector.broadcast %291 : vector<64x1xf32> to vector<64x96xf32>
    %322 = arith.mulf %320, %321 : vector<64x96xf32>
    %323 = arith.addf %315, %322 : vector<64x96xf32>
    %cst_111 = arith.constant dense<0.000000e+00> : vector<64x96xf32>
    %324 = tpu.matmul %302, %305, %cst_111 {dimension_numbers = #tpu.dot_dimension_numbers<[1], [0], [0], [1], [0, 0, 1, 1], [], []>} : vector<64x96xbf16>, vector<96x96xbf16>, vector<64x96xf32> -> vector<64x96xf32>
    %325 = arith.mulf %324, %323 : vector<64x96xf32>
    %326 = arith.truncf %325 : vector<64x96xf32> to vector<64x96xbf16>
    %cst_112 = arith.constant dense<0.000000e+00> : vector<64x128xf32>
    %327 = tpu.matmul %326, %306, %cst_112 {dimension_numbers = #tpu.dot_dimension_numbers<[1], [0], [0], [1], [0, 0, 1, 1], [], []>} : vector<64x96xbf16>, vector<96x128xbf16>, vector<64x128xf32> -> vector<64x128xf32>
    %328 = arith.addf %303, %327 : vector<64x128xf32>
    %c0_113 = arith.constant 0 : index
    %c0_114 = arith.constant 0 : index
    %329 = vector.load %arg13[%c0_113, %c0_114] : memref<64x128xf32, #tpu.memory_space<vmem>>, vector<64x128xf32>
    tpu.vector_store %arg13[%c0_113, %c0_114], %328 {strides = array<i32>} : memref<64x128xf32, #tpu.memory_space<vmem>>, vector<64x128xf32>,
    %c0_115 = arith.constant 0 : index
    %c0_116 = arith.constant 0 : index
    %330 = vector.load %arg13[%c0_115, %c0_116] : memref<64x128xf32, #tpu.memory_space<vmem>>, vector<64x128xf32>
    %cst_117 = arith.constant 1.000000e+00 : f32
    %331 = vector.broadcast %cst_117 : f32 to vector<64x1xf32>
    %332 = arith.subf %331, %12 : vector<64x1xf32>
    %c0_118 = arith.constant 0 : index
    %c0_119 = arith.constant 0 : index
    %333 = vector.load %arg11[%c0_118, %c0_119] : memref<1x128xf32, #tpu.memory_space<vmem>>, vector<1x128xf32>
    %334 = vector.broadcast %332 : vector<64x1xf32> to vector<64x128xf32>
    %335 = vector.broadcast %333 : vector<1x128xf32> to vector<64x128xf32>
    %336 = arith.mulf %334, %335 : vector<64x128xf32>
    %337 = arith.addf %330, %336 : vector<64x128xf32>
    %c0_120 = arith.constant 0 : index
    %c0_121 = arith.constant 0 : index
    %338 = vector.load %arg12[%c0_120, %c0_121] : memref<64x128xf32, #tpu.memory_space<vmem>>, vector<64x128xf32>
    tpu.vector_store %arg12[%c0_120, %c0_121], %337 {strides = array<i32>} : memref<64x128xf32, #tpu.memory_space<vmem>>, vector<64x128xf32>,
    return
  }
  func.func @transform_0(%arg0: i32) -> (i32, i32) {
    %c0_i32 = arith.constant 0 : i32
    %c0_i32_0 = arith.constant 0 : i32
    return %arg0, %c0_i32 : i32, i32
  }
  func.func @transform_1(%arg0: i32) -> (i32, i32) {
    %c0_i32 = arith.constant 0 : i32
    %c0_i32_0 = arith.constant 0 : i32
    %c0_i32_1 = arith.constant 0 : i32
    return %c0_i32, %c0_i32_0 : i32, i32
  }
  func.func @transform_2(%arg0: i32) -> (i32, i32) {
    %c0_i32 = arith.constant 0 : i32
    %c0_i32_0 = arith.constant 0 : i32
    %c0_i32_1 = arith.constant 0 : i32
    return %c0_i32, %c0_i32_0 : i32, i32
  }
  func.func @transform_3(%arg0: i32) -> (i32, i32) {
    %c0_i32 = arith.constant 0 : i32
    %c0_i32_0 = arith.constant 0 : i32
    %c0_i32_1 = arith.constant 0 : i32
    return %c0_i32, %c0_i32_0 : i32, i32
  }
  func.func @transform_4(%arg0: i32) -> (i32, i32) {
    %c0_i32 = arith.constant 0 : i32
    %c0_i32_0 = arith.constant 0 : i32
    %c0_i32_1 = arith.constant 0 : i32
    return %c0_i32, %c0_i32_0 : i32, i32
  }
  func.func @transform_5(%arg0: i32) -> (i32, i32) {
    %c0_i32 = arith.constant 0 : i32
    %c0_i32_0 = arith.constant 0 : i32
    %c0_i32_1 = arith.constant 0 : i32
    return %c0_i32, %c0_i32_0 : i32, i32
  }
  func.func @transform_6(%arg0: i32) -> (i32, i32) {
    %c0_i32 = arith.constant 0 : i32
    %c0_i32_0 = arith.constant 0 : i32
    %c0_i32_1 = arith.constant 0 : i32
    return %c0_i32, %c0_i32_0 : i32, i32
  }
  func.func @transform_7(%arg0: i32) -> (i32, i32) {
    %c0_i32 = arith.constant 0 : i32
    %c0_i32_0 = arith.constant 0 : i32
    %c0_i32_1 = arith.constant 0 : i32
    return %c0_i32, %c0_i32_0 : i32, i32
  }
  func.func @transform_8(%arg0: i32) -> (i32, i32) {
    %c0_i32 = arith.constant 0 : i32
    %c0_i32_0 = arith.constant 0 : i32
    %c0_i32_1 = arith.constant 0 : i32
    return %c0_i32, %c0_i32_0 : i32, i32
  }
  func.func @transform_9(%arg0: i32) -> (i32, i32) {
    %c0_i32 = arith.constant 0 : i32
    %c0_i32_0 = arith.constant 0 : i32
    %c0_i32_1 = arith.constant 0 : i32
    return %c0_i32, %c0_i32_0 : i32, i32
  }
  func.func @transform_10(%arg0: i32) -> (i32, i32) {
    %c0_i32 = arith.constant 0 : i32
    %c0_i32_0 = arith.constant 0 : i32
    %c0_i32_1 = arith.constant 0 : i32
    return %c0_i32, %c0_i32_0 : i32, i32
  }
  func.func @transform_11(%arg0: i32) -> (i32, i32) {
    %c0_i32 = arith.constant 0 : i32
    %c0_i32_0 = arith.constant 0 : i32
    return %arg0, %c0_i32 : i32, i32
  }
}

</mosaic_0001>

<bundles_post_ra>
// kernel: tpu_custom_call.1
= control target key start
LH: loop header
LB: loop body
LE: loop exit
PB: predicated region body
PF: predicated region fallthrough
CT: control target
= control target key end

     0   :  { %16 = vsyncpa [#allocation4], 0  ;;  %s7664_s0 = inlined_call_operand.vmem [shape: f32[128,3], index: 0, kind: input, shape index: {}]   ;;  %s7665_s1 = inlined_call_operand.vmem [shape: bf16[24,24], index: 1, kind: input, shape index: {}]   ;;  %s7666_s2 = inlined_call_operand.hbm [shape: bf16[24,128], index: 2, kind: input, shape index: {}]   ;;  %s7667_s3 = inlined_call_operand.vmem [shape: f32[1,24], index: 3, kind: input, shape index: {}]   ;;  %s7668_s4 = inlined_call_operand.vmem [shape: bf16[48,48], index: 4, kind: input, shape index: {}]   ;;  %s7669_s5 = inlined_call_operand.hbm [shape: bf16[48,128], index: 5, kind: input, shape index: {}]   ;;  %s7670_s6 = inlined_call_operand.vmem [shape: f32[1,48], index: 6, kind: input, shape index: {}]   ;;  %s7671_s7 = inlined_call_operand.vmem [shape: bf16[96,96], index: 7, kind: input, shape index: {}]   ;;  %s7672_s8 = inlined_call_operand.vmem [shape: bf16[96,128], index: 8, kind: input, shape index: {}]   ;;  %s7673_s9 = inlined_call_operand.vmem [shape: f32[1,96], index: 9, kind: input, shape index: {}]   ;;  %s7674_s10 = inlined_call_operand.vmem [shape: f32[1,128], index: 10, kind: input, shape index: {}]   ;;  %s7675_s11 = inlined_call_operand.hbm [shape: f32[128,128], index: 11, kind: output, shape index: {}]  }
   0x1   :  { %17 = vsyncpa [#allocation7], 0 }
   0x2   :  { %18 = vsyncpa [#allocation5], 0 }
   0x3   :  { %20 = vsyncpa [#allocation5 + $0x1], 0  ;;  %s4913_s17 = smov 0   ;;  %s4915_s18 = smov 0  }
   0x4   :  { %s4917_s19 = smov 0   ;;  %s4919_s20 = smov 0  }
   0x5 LB: > { %7837 = sst [smem:[#allocation12_spill]] %s4832_s19  ;;  %s4934_s21 = sadd.s32 4294967295, %s4836_s20   ;;  %s4836_s20 = sphi %s4919_s20, %s8171_s20   ;;  %s4832_s19 = sphi %s4917_s19, %s8168_s19   ;;  %s4828_s18 = sphi %s4915_s18, %s8170_s18   ;;  %s4824_s17 = sphi %s4913_s17, %s8169_s17  }
   0x6   : > { %s3957_s22 = sadd.s32 4294967294, %s4836_s20   ;;  %s4938_s23 = sadd.s32 1, %s4836_s20  }
   0x7   : > { %s269_s24 = sadd.s32 1, %s4832_s19  ;;  %s266_s25 = ssub.s32 %s4836_s20, %s4938_s23 }
   0x8   : > { %p279_p0 = scmp.ne.s32.totalorder %s4832_s19, %s4828_s18  ;;  %p267_p1 = scmp.eq.s32.totalorder %s266_s25, 0 }
   0x9   : > { %p280_p2 = scmp.eq.s32.totalorder %s4934_s21, 1  ;;  %p285_p3 = scmp.ne.s32.totalorder %s4828_s18, %s4824_s17 }
   0xa   : > { %p286_p4 = scmp.eq.s32.totalorder %s3957_s22, 1  ;;  %p3958_p7 = scmp.ge.s32.totalorder %s4836_s20, 1 }
   0xb   : > { %s4949_s26 = scalar_select %p267_p1, %s4832_s19, %s269_s24  }
   0xc   : > { %p4951_p5 = por %p280_p2, %p279_p0  ;;  %p4955_p6 = por %p286_p4, %p285_p3 }
   0xd   : > { %7838 = sst [smem:[#allocation13_spill]] %s4949_s26  ;;  %p293_p8 = scmp.lt.s32.totalorder %s4836_s20, 3 }
   0xe   : > { %p4563_p9 = scmp.eq.s32.totalorder %s4934_s21, 0  ;;  %s307_s13 = sshll.u32 %s7666_s2, 4  ;;  %s308_s13 = int_to_ptr.hbm [resolvable:$true] %s307_s13 }
   0xf   : > { %p4962_p10 = pnand %p3958_p7, %p293_p8  ;;  %s4838_s14 = smov [#allocation3]  }
  0x10   : > { %s309_s15 = sshll.u32 %s4838_s14, 4  ;;  %s327_s24 = sshll.u32 %s7669_s5, 4  ;;  %s310_s15 = int_to_ptr.vmem [resolvable:$true] %s309_s15  ;;  %s328_s24 = int_to_ptr.hbm [resolvable:$true] %s327_s24 }
  0x11   : > { %p4552_p11 = pneg %p4962_p10  ;;  %s4839_s25 = smov 64  }
  0x12   : > { %s4840_s26 = smov 4   ;;  %s4841_s19 = smov [#allocation6]  }
  0x13   : > { %p4553_p12 = pnand %p4563_p9, %p4552_p11  ;;  %s329_s30 = sshll.u32 %s4841_s19, 4  ;;  %s330_s30 = int_to_ptr.vmem [resolvable:$true] %s329_s30 }
  0x14   : > { %369 = sbr.rel (%p4962_p10) target bundleno = 1470 (0x5be), region = 64 }
  0x15   : > { %4555 = dma.hbm_to_vmem [thread:$0]  (!%p4553_p12), %s308_s13, 192, %s310_s15, [#allocation4], %s4839_s25, %s4839_s25, %s4840_s26  }
  0x16   : > { %4558 = dma.hbm_to_vmem [thread:$0]  (!%p4553_p12), %s328_s24, 384, %s330_s30, [#allocation7], %s4839_s25, %s4839_s25, %s4840_s26  }
  0x19   : > { %4811 = dma.done.wait (%p4563_p9), [#allocation4], 192  }
  0x1a   : > { %4813 = vsyncadd (%p4563_p9), [#allocation4], 4294967104 }
  0x1b   : > { %4815 = dma.done.wait (%p4563_p9), [#allocation7], 384  }
  0x1c   : > { %4817 = vsyncadd (%p4563_p9), [#allocation7], 4294966912  ;;  %s3966_s12 = sshll.u32 %s4934_s21, 3  ;;  %s4842_s14 = smov 127   ;;  %v4844_v16 = vmov 3.0   ;;  %v4845_v23 = vmov 5.0  }
  0x1d   : > { %p416_p13 = scmp.lt.s32.totalorder %s3966_s12, 15  ;;  %s4843_s15 = smov 126   ;;  %v4846_v50 = vmov 0  }
  0x1e   : > { %4656 = vset.pattern.permute.xlu1 %v4846_v50  ;;  %4655 = vset.pattern.permute.xlu0 %v4846_v50  ;;  %s4847_s16 = smov 2  }
  0x1f   : > { %s8173_s12 = smov (!%p416_p13, %s3966_s12), 15  ;;  %4657 = vset.pattern.permute.xlu2 %v4846_v50 }
  0x20   : > { %s3967_s19 = sshll.u32 %s8173_s12, 3  ;;  %s412_s12 = sand.u32 1, %s4828_s18  }
  0x21   : > { %s4990_s13 = scalar_lea.vmem %s7664_s0, %s3967_s19  ;;  %s3965_s29 = sshll.u32 %s412_s12, 6 }
  0x22   : > { %v4993_v0 = vld [vmem:[%s4990_s13 + $0x10] sm:$0xff]  ;;  %v4996_v1 = vld [vmem:[%s4990_s13] sm:$0xff]  ;;  %v5017_v6 = vld [vmem:[%s4990_s13 + $0x18] sm:$0xff] }
  0x23   : > { %v4999_v2 = vld [vmem:[%s4990_s13 + $0x20] sm:$0xff]  ;;  %v5002_v3 = vand.u32 2147483647, %v4993_v0  ;;  %v5005_v4 = vand.u32 2147483647, %v4996_v1  ;;  %7843 = vst [vmem:[#allocation15_spill] sm:$0xff] %v5017_v6 }
  0x24   : > { %v5008_v5 = vand.u32 2147483647, %v4999_v2  ;;  %v5020_v7 = vld [vmem:[%s4990_s13 + $0x8] sm:$0xff]  ;;  %v5026_v9 = vand.u32 2147483647, %v5017_v6  ;;  %v5041_v12 = vld [vmem:[%s4990_s13 + $0x38] sm:$0xff] }
  0x25   : > { %451 = vrot.lane.b32.xlu1 %v5002_v3, %s4842_s14  ;;  %447 = vrot.lane.b32.xlu0 %v5005_v4, %s4842_s14  ;;  %v5023_v8 = vld [vmem:[%s4990_s13 + $0x28] sm:$0xff]  ;;  %v5029_v10 = vand.u32 2147483647, %v5020_v7  ;;  %7845 = vst [vmem:[#allocation17_spill] sm:$0xff] %v5041_v12  ;;  %v5044_v13 = vld [vmem:[%s4990_s13 + $0x30] sm:$0xff]  ;;  %vm7737_vm0 = vcmp.gt.f32.partialorder %v4993_v0, 0.0 }
  0x26   : > { %7842 = vst [vmem:[#allocation14_spill] sm:$0xff] %v5008_v5  ;;  %455 = vrot.lane.b32.xlu2 %v5008_v5, %s4842_s14  ;;  %v5032_v11 = vand.u32 2147483647, %v5023_v8  ;;  %v5047_v14 = vand.u32 2147483647, %v5041_v12  ;;  %vm7739_vm1 = vcmp.gt.f32.partialorder %v5017_v6, 0.0 }
  0x27   : > { %7844 = vst [vmem:[#allocation16_spill] sm:$0xff] %v5023_v8  ;;  %v5050_v15 = vand.u32 2147483647, %v5044_v13  ;;  %vm7734_vm2 = vcmp.gt.f32.partialorder %v4999_v2, 0.0  ;;  %vm7740_vm3 = vcmp.gt.f32.partialorder %v5023_v8, 0.0  ;;  %v633_v17 = vsel %vm7737_vm0, 2.0, %v4844_v16 }
  0x28   : > { %7846 = vst [vmem:[#allocation18_spill] sm:$0xff] %v5044_v13  ;;  %v634_v18 = vsel %vm7739_vm1, 2.0, %v4844_v16  ;;  %v635_v19 = vsel %vm7734_vm2, 2.0, %v4844_v16  ;;  %v636_v20 = vsel %vm7740_vm3, 2.0, %v4844_v16  ;;  %vm7736_vm4 = vcmp.gt.f32.partialorder %v4996_v1, 0.0 }
  0x29   : > { %7847 = vst [vmem:[#allocation19_spill] sm:$0xff] %v5047_v14  ;;  %v4620_v21 = vpack.i.bf16 %v634_v18, %v633_v17  ;;  %v4625_v22 = vpack.i.bf16 %v636_v20, %v635_v19  ;;  %vm7738_vm5 = vcmp.gt.f32.partialorder %v5020_v7, 0.0  ;;  %v639_v24 = vsel %vm7736_vm4, 4.0, %v4845_v23 }
  0x2a   : > { %v640_v25 = vsel %vm7738_vm5, 4.0, %v4845_v23  ;;  %v631_v26 = vsel %vm7736_vm4, 2.0, %v4844_v16  ;;  %v632_v27 = vsel %vm7738_vm5, 2.0, %v4844_v16  ;;  %v641_v28 = vsel %vm7737_vm0, 4.0, %v4845_v23 }
  0x2b   : > { %v642_v29 = vsel %vm7739_vm1, 4.0, %v4845_v23  ;;  %v4635_v30 = vpack.i.bf16 %v640_v25, %v639_v24  ;;  %v4615_v31 = vpack.i.bf16 %v632_v27, %v631_v26  ;;  %vm7735_vm6 = vcmp.gt.f32.partialorder %v5044_v13, 0.0 }
  0x2c   : > { %v4640_v32 = vpack.i.bf16 %v642_v29, %v641_v28  ;;  %vm7733_vm7 = vcmp.gt.f32.partialorder %v5041_v12, 0.0  ;;  %v645_v33 = vsel %vm7735_vm6, 4.0, %v4845_v23  ;;  %v637_v35 = vsel %vm7735_vm6, 2.0, %v4844_v16 }
  0x2d   : > { %453 = vrot.lane.b32.xlu1 %v5026_v9, %s4842_s14  ;;  %449 = vrot.lane.b32.xlu0 %v5029_v10, %s4842_s14  ;;  %v646_v34 = vsel %vm7733_vm7, 4.0, %v4845_v23  ;;  %v638_v36 = vsel %vm7733_vm7, 2.0, %v4844_v16  ;;  %v5114_v39 = vsub.f32 0.0, %v4996_v1  ;;  %v643_v40 = vsel %vm7734_vm2, 4.0, %v4845_v23 }
  0x2e   : > { %457 = vrot.lane.b32.xlu2 %v5032_v11, %s4842_s14  ;;  %v4650_v37 = vpack.i.bf16 %v646_v34, %v645_v33  ;;  %v4630_v38 = vpack.i.bf16 %v638_v36, %v637_v35  ;;  %v644_v41 = vsel %vm7740_vm3, 4.0, %v4845_v23  ;;  %v5125_v42 = vsub.f32 0.0, %v4993_v0 }
  0x2f   : > { %v4645_v43 = vpack.i.bf16 %v644_v41, %v643_v40  ;;  %v5128_v44 = vsub.f32 0.0, %v5017_v6  ;;  %v5136_v45 = vsub.f32 0.0, %v5023_v8  ;;  %v5139_v46 = vsub.f32 0.0, %v5020_v7 }
  0x30   : > { %v5142_v47 = vsub.f32 0.0, %v5044_v13  ;;  %v5151_v48 = vsub.f32 0.0, %v4999_v2  ;;  %v5160_v49 = vsub.f32 0.0, %v5041_v12  ;;  %v7693_v29 = vmov 0.0  }
  0x35   : > { %461 = vrot.lane.b32.xlu1 %v5047_v14, %s4842_s14  ;;  %459 = vrot.lane.b32.xlu0 %v5050_v15, %s4842_s14 }
  0x36   : > { %479 = vrot.lane.b32.xlu2 %v5005_v4, %s4843_s15 }
  0x3d   : > { %483 = vrot.lane.b32.xlu1 %v5002_v3, %s4843_s15  ;;  %481 = vrot.lane.b32.xlu0 %v5029_v10, %s4843_s15 }
  0x3e   : > { %485 = vrot.lane.b32.xlu2 %v5026_v9, %s4843_s15 }
  0x45   : > { %489 = vrot.lane.b32.xlu1 %v5032_v11, %s4843_s15  ;;  %487 = vrot.lane.b32.xlu0 %v5008_v5, %s4843_s15 }
  0x46   : > { %491 = vrot.lane.b32.xlu2 %v5050_v15, %s4843_s15 }
  0x4d   : > { %4621 = vrot.lane.b32.xlu1 %v4620_v21, %s4842_s14  ;;  %493 = vrot.lane.b32.xlu0 %v5047_v14, %s4843_s15 }
  0x4e   : > { %4626 = vrot.lane.b32.xlu2 %v4625_v22, %s4842_s14 }
  0x55   : > { %4636 = vrot.lane.b32.xlu1 %v4635_v30, %s4843_s15  ;;  %4616 = vrot.lane.b32.xlu0 %v4615_v31, %s4842_s14 }
  0x56   : > { %4641 = vrot.lane.b32.xlu2 %v4640_v32, %s4843_s15 }
  0x5d   : > { %4651 = vrot.lane.b32.xlu1 %v4650_v37, %s4843_s15  ;;  %4631 = vrot.lane.b32.xlu0 %v4630_v38, %s4842_s14 }
  0x5e   : > { %743 = vrot.lane.b32.xlu2 %v5114_v39, %s4843_s15 }
  0x65   : > { %747 = vrot.lane.b32.xlu1 %v5125_v42, %s4843_s15  ;;  %4646 = vrot.lane.b32.xlu0 %v4645_v43, %s4843_s15 }
  0x66   : > { %749 = vrot.lane.b32.xlu2 %v5128_v44, %s4843_s15 }
  0x6d   : > { %753 = vrot.lane.b32.xlu1 %v5136_v45, %s4843_s15  ;;  %745 = vrot.lane.b32.xlu0 %v5139_v46, %s4843_s15 }
  0x6e   : > { %755 = vrot.lane.b32.xlu2 %v5142_v47, %s4843_s15 }
  0x75   : > { %775 = vrot.lane.b32.xlu1 %v4996_v1, %s4843_s15  ;;  %751 = vrot.lane.b32.xlu0 %v5151_v48, %s4843_s15 }
  0x76   : > { %777 = vrot.lane.b32.xlu2 %v5020_v7, %s4843_s15 }
  0x7d   : > { %781 = vrot.lane.b32.xlu1 %v5017_v6, %s4843_s15  ;;  %757 = vrot.lane.b32.xlu0 %v5160_v49, %s4843_s15 }
  0x7e   : > { %783 = vrot.lane.b32.xlu2 %v4999_v2, %s4843_s15 }
  0x80   : > { %v5168_v51 = vpop.permute.xlu2 %455 }
  0x81   : > { %7848 = vst [vmem:[#allocation20_spill] sm:$0xff] %v5168_v51  ;;  %vm7677_vm13 = vcmp.ge.f32.partialorder %v5008_v5, %v5168_v51  ;;  %v475_v36 = vmax.f32 %v5008_v5, %v5168_v51 }
  0x82   : > { %v579_v20 = vsel %vm7677_vm13, 1, %v4846_v50 }
  0x85   : > { %787 = vrot.lane.b32.xlu1 %v5044_v13, %s4843_s15  ;;  %779 = vrot.lane.b32.xlu0 %v4993_v0, %s4843_s15 }
  0x86   : > { %789 = vrot.lane.b32.xlu2 %v5041_v12, %s4843_s15 }
  0x88   : > { %v5176_v52 = vpop.permute.xlu2 %457 }
  0x89   : > { %vm7683_vm10 = vcmp.ge.f32.partialorder %v5032_v11, %v5176_v52  ;;  %v476_v37 = vmax.f32 %v5032_v11, %v5176_v52 }
  0x8a   : > { %v580_v61 = vsel %vm7683_vm10, 1, %v4846_v50 }
  0x8d   : > { %785 = vrot.lane.b32.xlu0 %v5023_v8, %s4843_s15 }
  0x90   : > { %v5180_v53 = vpop.permute.xlu2 %479 }
  0x97   : > { %v5182_v54 = vpop.permute.xlu1 %451  ;;  %v5184_v55 = vpop.permute.xlu0 %447 }
  0x98   : > { %vm7678_vm8 = vcmp.ge.f32.partialorder %v5002_v3, %v5182_v54  ;;  %vm543_vm9 = vcmp.ge.f32.partialorder %v5005_v4, %v5184_v55  ;;  %v5198_v58 = vpop.permute.xlu2 %485  ;;  %v471_v21 = vmax.f32 %v5005_v4, %v5184_v55  ;;  %v473_v38 = vmax.f32 %v5002_v3, %v5182_v54 }
  0x99   : > { %v577_v56 = vsel %vm7678_vm8, 1, %v4846_v50  ;;  %v575_v57 = vsel %vm543_vm9, 1, %v4846_v50 }
  0x9a   : > { %587 = vrot.lane.b32.xlu0 %v577_v56, %s4842_s14  ;;  %583 = vrot.lane.b32.xlu1 %v575_v57, %s4842_s14  ;;  %v5251_v24 = vmax.f32 %v471_v21, %v5180_v53 }
  0x9c   : > { %7850 = vst [vmem:[#allocation22_spill] sm:$0xff] %v5251_v24  ;;  %vm7680_vm8 = vcmp.gt.f32.partialorder %v5251_v24, 0.0 }
  0x9d   : > { %v5280_v32 = vsel %vm7680_vm8, 1.0, %v7693_v29 }
  0x9e   : > { %7853 = vst [vmem:[#allocation25_spill] sm:$0xff] %v5280_v32 }
  0x9f   : > { %v5202_v59 = vpop.permute.xlu1 %453  ;;  %v5204_v60 = vpop.permute.xlu0 %449 }
  0xa0   : > { %vm7684_vm11 = vcmp.ge.f32.partialorder %v5026_v9, %v5202_v59  ;;  %vm544_vm12 = vcmp.ge.f32.partialorder %v5029_v10, %v5204_v60  ;;  %v5222_v16 = vpop.permute.xlu2 %491  ;;  %v472_v23 = vmax.f32 %v5029_v10, %v5204_v60  ;;  %v474_v40 = vmax.f32 %v5026_v9, %v5202_v59 }
  0xa1   : > { %v578_v62 = vsel %vm7684_vm11, 1, %v4846_v50  ;;  %v576_v63 = vsel %vm544_vm12, 1, %v4846_v50 }
  0xa2   : > { %593 = vrot.lane.b32.xlu0 %v580_v61, %s4842_s14  ;;  %589 = vrot.lane.b32.xlu1 %v578_v62, %s4842_s14 }
  0xa3   : > { %585 = vrot.lane.b32.xlu2 %v576_v63, %s4842_s14  ;;  %v5320_v63 = vmax.f32 %v474_v40, %v5198_v58 }
  0xa5   : > { %7860 = vst [vmem:[#allocation32_spill] sm:$0xff] %v5320_v63 }
  0xa7   : > { %v5224_v17 = vpop.permute.xlu1 %461  ;;  %v5226_v18 = vpop.permute.xlu0 %459 }
  0xa8   : > { %7849 = vst [vmem:[#allocation21_spill] sm:$0xff] %v5224_v17  ;;  %vm7682_vm14 = vcmp.ge.f32.partialorder %v5050_v15, %v5226_v18  ;;  %v5244_v22 = vpop.permute.xlu2 %4626  ;;  %vm7681_vm15 = vcmp.ge.f32.partialorder %v5047_v14, %v5224_v17  ;;  %v477_v57 = vmax.f32 %v5050_v15, %v5226_v18 }
  0xa9   : > { %v581_v19 = vsel %vm7682_vm14, 1, %v4846_v50  ;;  %v582_v28 = vsel %vm7681_vm15, 1, %v4846_v50  ;;  %vm7732_vm14 = vcmp.gt.f32.partialorder %v5320_v63, 0.0 }
  0xaa   : > { %807 = vrot.lane.b32.xlu0 %v4996_v1, %s4847_s16  ;;  %595 = vrot.lane.b32.xlu1 %v581_v19, %s4842_s14  ;;  %v478_v19 = vmax.f32 %v5047_v14, %v5224_v17 }
  0xab   : > { %591 = vrot.lane.b32.xlu2 %v579_v20, %s4842_s14  ;;  %v5333_v20 = vmax.f32 %v477_v57, %v5222_v16  ;;  %v5366_v57 = vsel %vm7732_vm14, 1.0, %v7693_v29 }
  0xac   : > { %7866 = vst [vmem:[#allocation38_spill] sm:$0xff] %v5366_v57 }
  0xad   : > { %7861 = vst [vmem:[#allocation33_spill] sm:$0xff] %v5333_v20  ;;  %vm7731_vm10 = vcmp.gt.f32.partialorder %v5333_v20, 0.0 }
  0xae   : > { %v5381_v40 = vsel %vm7731_vm10, 1.0, %v7693_v29 }
  0xaf   : > { %v5253_v25 = vpop.permute.xlu1 %483  ;;  %v5255_v26 = vpop.permute.xlu0 %481  ;;  %7868 = vst [vmem:[#allocation40_spill] sm:$0xff] %v5381_v40 }
  0xb0   : > { %v5258_v27 = vmax.f32 %v472_v23, %v5255_v26  ;;  %v5275_v31 = vpop.permute.xlu2 %4641  ;;  %v5315_v61 = vmax.f32 %v473_v38, %v5253_v25 }
  0xb2   : > { %7851 = vst [vmem:[#allocation23_spill] sm:$0xff] %v5258_v27  ;;  %vm7679_vm13 = vcmp.gt.f32.partialorder %v5258_v27, 0.0  ;;  %813 = vrot.lane.b32.xlu0 %v5017_v6, %s4847_s16  ;;  %809 = vrot.lane.b32.xlu1 %v5020_v7, %s4847_s16  ;;  %vm7729_vm15 = vcmp.gt.f32.partialorder %v5315_v61, 0.0 }
  0xb3   : > { %597 = vrot.lane.b32.xlu2 %v582_v28, %s4842_s14  ;;  %v5273_v30 = vsel %vm7679_vm13, 1.0, %v7693_v29  ;;  %7858 = vst [vmem:[#allocation30_spill] sm:$0xff] %v5315_v61 }
  0xb4   : > { %7852 = vst [vmem:[#allocation24_spill] sm:$0xff] %v5273_v30 }
  0xb7   : > { %v5282_v33 = vpop.permute.xlu1 %489  ;;  %v5284_v34 = vpop.permute.xlu0 %487 }
  0xb8   : > { %7854 = vst [vmem:[#allocation26_spill] sm:$0xff] %v5284_v34  ;;  %v5303_v41 = vmax.f32 %v476_v37, %v5282_v33  ;;  %v5306_v43 = vmax.f32 %v475_v36, %v5284_v34  ;;  %v5317_v62 = vpop.permute.xlu2 %743  ;;  %v5355_v37 = vsel %vm7729_vm15, 1.0, %v7693_v29 }
  0xb9   : > { %7859 = vst [vmem:[#allocation31_spill] sm:$0xff] %v5317_v62 }
  0xba   : > { %819 = vrot.lane.b32.xlu0 %v5044_v13, %s4847_s16  ;;  %815 = vrot.lane.b32.xlu1 %v4999_v2, %s4847_s16  ;;  %7855 = vst [vmem:[#allocation27_spill] sm:$0xff] %v5303_v41  ;;  %vm7728_vm13 = vcmp.gt.f32.partialorder %v5303_v41, 0.0  ;;  %vm7730_vm8 = vcmp.gt.f32.partialorder %v5306_v43, 0.0 }
  0xbb   : > { %811 = vrot.lane.b32.xlu2 %v4993_v0, %s4847_s16  ;;  %7856 = vst [vmem:[#allocation28_spill] sm:$0xff] %v5306_v43  ;;  %v5343_v23 = vsel %vm7730_vm8, 1.0, %v7693_v29  ;;  %v5348_v28 = vsel %vm7728_vm13, 1.0, %v7693_v29  ;;  %vm551_vm13 = vcmp.ge.f32.partialorder %v5005_v4, %v5180_v53 }
  0xbc   : > { %7863 = vst [vmem:[#allocation35_spill] sm:$0xff] %v5343_v23  ;;  %vm5543_vm10 = vmand %vm543_vm9, %vm551_vm13  ;;  %vm554_vm9 = vcmp.ge.f32.partialorder %v5026_v9, %v5198_v58 }
  0xbd   : > { %7864 = vst [vmem:[#allocation36_spill] sm:$0xff] %v5348_v28 }
  0xbe   : > { %7865 = vst [vmem:[#allocation37_spill] sm:$0xff] %v5355_v37 }
  0xbf   : > { %v5308_v50 = vpop.permute.xlu1 %4621  ;;  %v5310_v56 = vpop.permute.xlu0 %493 }
  0xc0   : > { %7857 = vst [vmem:[#allocation29_spill] sm:$0xff] %v5310_v56  ;;  %v5337_v21 = vmax.f32 %v478_v19, %v5310_v56  ;;  %v5376_v35 = vpop.permute.xlu2 %749 }
  0xc1   : > { %7867 = vst [vmem:[#allocation39_spill] sm:$0xff] %v5376_v35 }
  0xc2   : > { %833 = vrot.lane.b32.xlu0 %v5139_v46, %s4847_s16  ;;  %821 = vrot.lane.b32.xlu1 %v5041_v12, %s4847_s16  ;;  %7862 = vst [vmem:[#allocation34_spill] sm:$0xff] %v5337_v21  ;;  %vm7727_vm11 = vcmp.gt.f32.partialorder %v5337_v21, 0.0 }
  0xc3   : > { %817 = vrot.lane.b32.xlu2 %v5023_v8, %s4847_s16  ;;  %v5386_v23 = vsel %vm7727_vm11, 1.0, %v7693_v29  ;;  %vm552_vm11 = vcmp.ge.f32.partialorder %v5029_v10, %v5255_v26 }
  0xc4   : > { %7869 = vst [vmem:[#allocation41_spill] sm:$0xff] %v5386_v23  ;;  %vm5535_vm15 = vmand %vm544_vm12, %vm552_vm11  ;;  %vm7741_vm11 = vmmov 1  }
  0xc5   : > { %vm568_vm12 = vmxor %vm5535_vm15, %vm7741_vm11 }
  0xc6   : > { %vm567_vm13 = vmxor %vm5543_vm10, %vm7741_vm11 }
  0xc7   : > { %v5350_v36 = vpop.permute.xlu0 %4616  ;;  %v5359_v38 = vpop.permute.xlu1 %4636 }
  0xc8   : > { %v5400_v37 = vpop.permute.xlu2 %755  ;;  %v4639_v53 = vunpack.i.h.bf16 %v5359_v38  ;;  %v4619_v55 = vunpack.i.h.bf16 %v5350_v36  ;;  %v4618_v58 = vunpack.i.l.bf16 %v5350_v36  ;;  %v7902_v36 = vmov 0 }
  0xc9   : > { %7870 = vst [vmem:[#allocation42_spill] sm:$0xff] %v5400_v37 }
  0xca   : > { %839 = vrot.lane.b32.xlu0 %v5151_v48, %s4847_s16  ;;  %835 = vrot.lane.b32.xlu1 %v5125_v42, %s4847_s16 }
  0xcb   : > { %831 = vrot.lane.b32.xlu2 %v5114_v39, %s4847_s16 }
  0xcf   : > { %v5390_v32 = vpop.permute.xlu0 %4631  ;;  %v5392_v19 = vpop.permute.xlu1 %4651 }
  0xd0   : > { %v5410_v23 = vpop.permute.xlu2 %777 }
  0xd1   : > { %7873 = vst [vmem:[#allocation45_spill] sm:$0xff] %v5410_v23 }
  0xd2   : > { %845 = vrot.lane.b32.xlu0 %v5160_v49, %s4847_s16  ;;  %841 = vrot.lane.b32.xlu1 %v5136_v45, %s4847_s16 }
  0xd3   : > { %837 = vrot.lane.b32.xlu2 %v5128_v44, %s4847_s16 }
  0xd7   : > { %v5402_v29 = vpop.permute.xlu0 %4646  ;;  %v5406_v28 = vpop.permute.xlu1 %747 }
  0xd8   : > { %7871 = vst [vmem:[#allocation43_spill] sm:$0xff] %v5406_v28  ;;  %v5416_v35 = vpop.permute.xlu2 %783 }
  0xd9   : > { %7876 = vst [vmem:[#allocation48_spill] sm:$0xff] %v5416_v35 }
  0xdb   : > { %843 = vrot.lane.b32.xlu2 %v5142_v47, %s4847_s16 }
  0xdf   : > { %v5408_v40 = vpop.permute.xlu0 %745  ;;  %v5412_v57 = vpop.permute.xlu1 %753 }
  0xe0   : > { %7872 = vst [vmem:[#allocation44_spill] sm:$0xff] %v5408_v40  ;;  %v5422_v21 = vpop.permute.xlu2 %789 }
  0xe1   : > { %7874 = vst [vmem:[#allocation46_spill] sm:$0xff] %v5412_v57 }
  0xe2   : > { %7879 = vst [vmem:[#allocation51_spill] sm:$0xff] %v5422_v21 }
  0xe7   : > { %v5414_v30 = vpop.permute.xlu0 %751  ;;  %v5418_v62 = vpop.permute.xlu1 %775 }
  0xe8   : > { %7875 = vst [vmem:[#allocation47_spill] sm:$0xff] %v5414_v30 }
  0xe9   : > { %7877 = vst [vmem:[#allocation49_spill] sm:$0xff] %v5418_v62 }
  0xef   : > { %v5420_v37 = vpop.permute.xlu0 %757  ;;  %v5424_v41 = vpop.permute.xlu1 %781 }
  0xf0   : > { %7878 = vst [vmem:[#allocation50_spill] sm:$0xff] %v5420_v37 }
  0xf1   : > { %7880 = vst [vmem:[#allocation52_spill] sm:$0xff] %v5424_v41 }
  0xf7   : > { %v5426_v61 = vpop.permute.xlu0 %779  ;;  %v5430_v40 = vpop.permute.xlu1 %787 }
  0xf8   : > { %7881 = vst [vmem:[#allocation53_spill] sm:$0xff] %v5426_v61 }
  0xf9   : > { %7882 = vst [vmem:[#allocation54_spill] sm:$0xff] %v5430_v40 }
  0xfd   : > { %v5428_v28 = vpop.permute.xlu2 %585 }
  0xfe   : > { %vm600_vm8 = vcmp.ne.s32.totalorder %v5428_v28, 0  ;;  %v4638_v28 = vunpack.i.l.bf16 %v5359_v38 }
  0xff   : > { %v5432_v23 = vpop.permute.xlu0 %785 }
 0x100   : > { %7883 = vst [vmem:[#allocation55_spill] sm:$0xff] %v5432_v23 }
 0x105   : > { %v5434_v57 = vpop.permute.xlu2 %591 }
 0x106   : > { %7884 = vst [vmem:[#allocation56_spill] sm:$0xff] %v5434_v57 }
 0x10c   : > { %v5436_v30 = vpop.permute.xlu1 %583  ;;  %v5438_v35 = vpop.permute.xlu0 %587 }
 0x10d   : > { %v5440_v62 = vpop.permute.xlu2 %597  ;;  %vm599_vm14 = vcmp.ne.s32.totalorder %v5436_v30, 0 }
 0x10e   : > { %7885 = vst [vmem:[#allocation57_spill] sm:$0xff] %v5440_v62 }
 0x114   : > { %v5442_v37 = vpop.permute.xlu1 %589  ;;  %v5444_v21 = vpop.permute.xlu0 %593 }
 0x115   : > { %v812_v41 = vpop.permute.xlu2 %811 }
 0x11c   : > { %v5446_v61 = vpop.permute.xlu1 %595  ;;  %v808_v43 = vpop.permute.xlu0 %807 }
 0x11d   : > { %v818_v20 = vpop.permute.xlu2 %817 }
 0x124   : > { %v810_v40 = vpop.permute.xlu1 %809  ;;  %v814_v27 = vpop.permute.xlu0 %813 }
 0x125   : > { %v832_v23 = vpop.permute.xlu2 %831 }
 0x126   : > { %v855_v63 = vsel %vm7736_vm4, %v808_v43, %v832_v23 }
 0x127   : > { %871 = vrot.lane.b32.xlu1 %v855_v63, %s4843_s15 }
 0x12c   : > { %v816_v24 = vpop.permute.xlu1 %815  ;;  %v820_v17 = vpop.permute.xlu0 %819 }
 0x12d   : > { %v838_v62 = vpop.permute.xlu2 %837 }
 0x12e   : > { %v858_v14 = vsel %vm7739_vm1, %v814_v27, %v838_v62 }
 0x12f   : > { %877 = vrot.lane.b32.xlu1 %v858_v14, %s4843_s15 }
 0x134   : > { %v822_v56 = vpop.permute.xlu1 %821  ;;  %v834_v57 = vpop.permute.xlu0 %833 }
 0x135   : > { %v844_v51 = vpop.permute.xlu2 %843  ;;  %v856_v5 = vsel %vm7738_vm5, %v810_v40, %v834_v57 }
 0x136   : > { %v861_v34 = vsel %vm7735_vm6, %v820_v17, %v844_v51  ;;  %873 = vrot.lane.b32.xlu2 %v856_v5, %s4843_s15 }
 0x137   : > { %883 = vrot.lane.b32.xlu1 %v861_v34, %s4843_s15 }
 0x13c   : > { %v836_v43 = vpop.permute.xlu1 %835  ;;  %v840_v63 = vpop.permute.xlu0 %839 }
 0x13d   : > { %v857_v27 = vsel %vm7737_vm0, %v812_v41, %v836_v43  ;;  %v859_v14 = vsel %vm7734_vm2, %v816_v24, %v840_v63  ;;  %vm556_vm2 = vcmp.ge.f32.partialorder %v5032_v11, %v5282_v33  ;;  %v4850_v43 = vmov 1.0  }
 0x13e   : > { %875 = vrot.lane.b32.xlu0 %v857_v27, %s4843_s15  ;;  %879 = vrot.lane.b32.xlu2 %v859_v14, %s4843_s15  ;;  %v624_v63 = vsel %vm7738_vm5, 0.0, %v4850_v43  ;;  %v7899_v33 = vmov 0  ;;  %v623_v38 = vsel %vm7736_vm4, 0.0, %v4850_v43 }
 0x13f   : > { %913 = vrot.lane.b32.xlu1 %v5020_v7, %s4842_s14 }
 0x144   : > { %v842_v51 = vpop.permute.xlu1 %841  ;;  %v846_v17 = vpop.permute.xlu0 %845 }
 0x145   : > { %v860_v5 = vsel %vm7740_vm3, %v818_v20, %v842_v51  ;;  %v862_v34 = vsel %vm7733_vm7, %v822_v56, %v846_v17  ;;  %vm5557_vm7 = vmand %vm568_vm12, %vm600_vm8  ;;  %vm7898_vm12 = vcmp.ge.f32.partialorder %v5026_v9, %v5202_v59 }
 0x146   : > { %881 = vrot.lane.b32.xlu0 %v860_v5, %s4843_s15  ;;  %885 = vrot.lane.b32.xlu2 %v862_v34, %s4843_s15  ;;  %vm5572_vm8 = vmand %vm567_vm13, %vm599_vm14  ;;  %v712_v27 = vsel %vm5557_vm7, %v4619_v55, %v4639_v53  ;;  %vm7901_vm14 = vcmp.ge.f32.partialorder %v5032_v11, %v5176_v52  ;;  %v4624_v5 = vunpack.i.h.bf16 %v5308_v50  ;;  %v4644_v34 = vunpack.i.h.bf16 %v5275_v31 }
 0x147   : > { %919 = vrot.lane.b32.xlu1 %v4999_v2, %s4842_s14  ;;  %vm5586_vm6 = vmand %vm7898_vm12, %vm554_vm9  ;;  %v711_v14 = vsel %vm5572_vm8, %v4618_v58, %v4638_v28  ;;  %v5604_v9 = vsel %vm5535_vm15, %v624_v63, %v712_v27  ;;  %vm602_vm9 = vcmp.ne.s32.totalorder %v5442_v37, 0  ;;  %vm604_vm12 = vcmp.ne.s32.totalorder %v5444_v21, 0 }
 0x148   : > { %v7900_v33 = vsel %vm5586_vm6, 4294967295, %v7899_v33  ;;  %vm5593_vm13 = vmand %vm7901_vm14, %vm556_vm2  ;;  %7904 = vst [vmem:[#allocation62_spill] sm:$0xff] %v5604_v9  ;;  %v5622_v37 = vsel %vm5543_vm10, %v623_v38, %v711_v14  ;;  %v1186_v17 = vmul.f32 4.0, %v5604_v9  ;;  %v7906_v21 = vmov 0 }
 0x149   : > { %v7903_v36 = vsel %vm5593_vm13, 4294967295, %v7902_v36  ;;  %vm570_vm2 = vmxor %vm5586_vm6, %vm7741_vm11  ;;  %7905 = vst [vmem:[#allocation63_spill] sm:$0xff] %v5622_v37  ;;  %v1185_v53 = vmul.f32 4.0, %v5622_v37  ;;  %v7911_v58 = vmov 0  ;;  %v628_v63 = vsel %vm7740_vm3, 0.0, %v4850_v43 }
 0x14a   : > { %vm572_vm14 = vmxor %vm5593_vm13, %vm7741_vm11 }
 0x14b   : > { %vm5637_vm5 = vmand %vm572_vm14, %vm604_vm12  ;;  %vm4259_vm12 = vcmp.lt.s32.totalorder %v1186_v17, 0  ;;  %vm605_vm14 = vcmp.ne.s32.totalorder %v5446_v61, 0 }
 0x14e   : > { %911 = vrot.lane.b32.xlu0 %v4996_v1, %s4842_s14  ;;  %915 = vrot.lane.b32.xlu2 %v4993_v0, %s4842_s14 }
 0x14f   : > { %925 = vrot.lane.b32.xlu1 %v5041_v12, %s4842_s14 }
 0x156   : > { %917 = vrot.lane.b32.xlu0 %v5017_v6, %s4842_s14  ;;  %921 = vrot.lane.b32.xlu2 %v5023_v8, %s4842_s14 }
 0x157   : > { %939 = vrot.lane.b32.xlu1 %v5125_v42, %s4842_s14 }
 0x15e   : > { %923 = vrot.lane.b32.xlu0 %v5044_v13, %s4842_s14  ;;  %935 = vrot.lane.b32.xlu2 %v5114_v39, %s4842_s14 }
 0x15f   : > { %945 = vrot.lane.b32.xlu1 %v5136_v45, %s4842_s14 }
 0x166   : > { %937 = vrot.lane.b32.xlu0 %v5139_v46, %s4842_s14  ;;  %941 = vrot.lane.b32.xlu2 %v5128_v44, %s4842_s14 }
 0x16e   : > { %943 = vrot.lane.b32.xlu0 %v5151_v48, %s4842_s14  ;;  %947 = vrot.lane.b32.xlu2 %v5142_v47, %s4842_s14 }
 0x176   : > { %949 = vrot.lane.b32.xlu0 %v5160_v49, %s4842_s14 }
 0x190   : > { %v5504_v42 = vpop.permute.xlu2 %873 }
 0x198   : > { %v5506_v39 = vpop.permute.xlu2 %879 }
 0x199   : > { %v5508_v45 = vpop.permute.xlu1 %871 }
 0x1a0   : > { %v5510_v24 = vpop.permute.xlu2 %885 }
 0x1a1   : > { %7886 = vst [vmem:[#allocation58_spill] sm:$0xff] %v5510_v24  ;;  %v5512_v46 = vpop.permute.xlu1 %877 }
 0x1a2   : > { %7887 = vst [vmem:[#allocation59_spill] sm:$0xff] %v5512_v46 }
 0x1a8   : > { %v916_v44 = vpop.permute.xlu2 %915 }
 0x1a9   : > { %v5514_v41 = vpop.permute.xlu1 %883 }
 0x1aa   : > { %7888 = vst [vmem:[#allocation60_spill] sm:$0xff] %v5514_v41 }
 0x1b0   : > { %v5516_v48 = vpop.permute.xlu0 %875  ;;  %v5518_v56 = vpop.permute.xlu2 %921 }
 0x1b1   : > { %v5520_v47 = vpop.permute.xlu1 %913 }
 0x1b8   : > { %v5522_v49 = vpop.permute.xlu0 %881  ;;  %v5526_v20 = vpop.permute.xlu2 %935 }
 0x1b9   : > { %7889 = vst [vmem:[#allocation61_spill] sm:$0xff] %v5522_v49  ;;  %v5524_v62 = vpop.permute.xlu1 %919 }
 0x1c0   : > { %v912_v40 = vpop.permute.xlu0 %911  ;;  %v5568_v60 = vpop.permute.xlu2 %941 }
 0x1c1   : > { %v5547_v26 = vpop.permute.xlu1 %925  ;;  %v959_v10 = vsel %vm7736_vm4, %v912_v40, %v5526_v20  ;;  %vm5629_vm4 = vmand %vm570_vm2, %vm602_vm9  ;;  %v4629_v40 = vunpack.i.h.bf16 %v5244_v22  ;;  %vm7910_vm9 = vcmp.ge.f32.partialorder %v5050_v15, %v5226_v18  ;;  %v4260_v18 = vceil.f32 %v1186_v17 }
 0x1c2   : > { %975 = vrot.lane.b32.xlu1 %v959_v10, %s4842_s14  ;;  %v7907_v21 = vsel %vm5629_vm4, 4294967295, %v7906_v21  ;;  %v4649_v10 = vunpack.i.h.bf16 %v5402_v29  ;;  %v714_v28 = vsel %vm5629_vm4, %v4624_v5, %v4644_v34  ;;  %v4255_v5 = vceil.f32 %v1185_v53 }
 0x1c3   : > { %v4256_v34 = vfloor.f32 %v1185_v53 }
 0x1c4   : > { %v716_v27 = vsel %vm5637_vm5, %v4629_v40, %v4649_v10  ;;  %v4653_v10 = vunpack.i.l.bf16 %v5392_v19 }
 0x1c5   : > { %v5680_v40 = vsel %vm5593_vm13, %v628_v63, %v716_v27  ;;  %vm601_vm13 = vcmp.ne.s32.totalorder %v5438_v35, 0  ;;  %v7930_v35 = vld [vmem:[#allocation20_spill] sm:$0xff] }
 0x1c6   : > { %7915 = vst [vmem:[#allocation65_spill] sm:$0xff] %v5680_v40  ;;  %v1190_v27 = vmul.f32 4.0, %v5680_v40 }
 0x1c8   : > { %v918_v51 = vpop.permute.xlu0 %917  ;;  %v5644_v55 = vpop.permute.xlu2 %947 }
 0x1c9   : > { %v5607_v59 = vpop.permute.xlu1 %939  ;;  %v962_v11 = vsel %vm7739_vm1, %v918_v51, %v5568_v60  ;;  %v4261_v51 = vfloor.f32 %v1186_v17 }
 0x1ca   : > { %v961_v52 = vsel %vm7737_vm0, %v916_v44, %v5607_v59  ;;  %981 = vrot.lane.b32.xlu1 %v962_v11, %s4842_s14  ;;  %vm557_vm0 = vcmp.ge.f32.partialorder %v5050_v15, %v5222_v16  ;;  %v7908_v44 = vmov 0  ;;  %v626_v16 = vsel %vm7739_vm1, 0.0, %v4850_v43 }
 0x1cb   : > { %979 = vrot.lane.b32.xlu0 %v961_v52, %s4842_s14  ;;  %v7909_v44 = vsel %vm5637_vm5, 4294967295, %v7908_v44  ;;  %vm5654_vm2 = vmand %vm7910_vm9, %vm557_vm0  ;;  %vm7913_vm1 = vcmp.gt.f32.partialorder %v5044_v13, 0.0  ;;  %v5671_v11 = vsel %vm5586_vm6, %v626_v16, %v714_v28  ;;  %vm553_vm9 = vcmp.ge.f32.partialorder %v5002_v3, %v5253_v25 }
 0x1cc   : > { %v7912_v58 = vsel %vm5654_vm2, 4294967295, %v7911_v58  ;;  %7914 = vst [vmem:[#allocation64_spill] sm:$0xff] %v5671_v11  ;;  %vm573_vm0 = vmxor %vm5654_vm2, %vm7741_vm11  ;;  %v4633_v16 = vunpack.i.l.bf16 %v5390_v32  ;;  %v1188_v28 = vmul.f32 4.0, %v5671_v11  ;;  %v4262_v63 = vsel %vm4259_vm12, %v4260_v18, %v4261_v51 }
 0x1cd   : > { %vm7918_vm11 = vcmp.gt.f32.partialorder %v5044_v13, 0.0  ;;  %vm7922_vm12 = vcmp.gt.f32.partialorder %v5020_v7, 0.0 }
 0x1ce   : > { %v629_v25 = vsel %vm7918_vm11, 0.0, %v4850_v43  ;;  %vm4269_vm11 = vcmp.lt.s32.totalorder %v1188_v28, 0 }
 0x1d0   : > { %v924_v38 = vpop.permute.xlu0 %923 }
 0x1d1   : > { %v5664_v14 = vpop.permute.xlu1 %945  ;;  %v965_v15 = vsel %vm7913_vm1, %v924_v38, %v5644_v55  ;;  %vm4254_vm1 = vcmp.lt.s32.totalorder %v1185_v53, 0  ;;  %v7920_v38 = vmov 0 }
 0x1d2   : > { %v964_v52 = vsel %vm7740_vm3, %v5518_v56, %v5664_v14  ;;  %987 = vrot.lane.b32.xlu1 %v965_v15, %s4842_s14  ;;  %vm5690_vm3 = vmand %vm573_vm0, %vm605_vm14  ;;  %v7916_v56 = vmov 0  ;;  %v4257_v53 = vsel %vm4254_vm1, %v4255_v5, %v4256_v34  ;;  %vm7919_vm14 = vcmp.ge.f32.partialorder %v5002_v3, %v5182_v54 }
 0x1d3   : > { %985 = vrot.lane.b32.xlu0 %v964_v52, %s4842_s14  ;;  %v7917_v56 = vsel %vm5690_vm3, 4294967295, %v7916_v56  ;;  %v717_v61 = vsel %vm5690_vm3, %v4633_v16, %v4653_v10  ;;  %vm5707_vm0 = vmand %vm7919_vm14, %vm553_vm9  ;;  %v4263_v15 = vcvt.f32.s32 %v4262_v63  ;;  %v4258_v51 = vcvt.f32.s32 %v4257_v53  ;;  %v7927_v16 = vld [vmem:[#allocation26_spill] sm:$0xff] }
 0x1d4   : > { %v7921_v38 = vsel %vm5707_vm0, 4294967295, %v7920_v38  ;;  %v4270_v52 = vceil.f32 %v1188_v28  ;;  %v4271_v5 = vfloor.f32 %v1188_v28  ;;  %v5720_v3 = vsel %vm5654_vm2, %v629_v25, %v717_v61  ;;  %v7928_v63 = vld [vmem:[#allocation14_spill] sm:$0xff] }
 0x1d5   : > { %7923 = vst [vmem:[#allocation66_spill] sm:$0xff] %v5720_v3  ;;  %v4280_v54 = vceil.f32 %v1190_v27  ;;  %v4281_v34 = vfloor.f32 %v1190_v27  ;;  %vm7924_vm1 = vmmov 1   ;;  %vm4279_vm14 = vcmp.lt.s32.totalorder %v1190_v27, 0 }
 0x1d6   : > { %vm569_vm9 = vmxor %vm5707_vm0, %vm7924_vm1  ;;  %v7925_v10 = vmov 0  ;;  %vm555_vm5 = vcmp.ge.f32.partialorder %v7928_v63, %v7927_v16  ;;  %v4623_v28 = vunpack.i.l.bf16 %v5308_v50  ;;  %v1191_v53 = vmul.f32 4.0, %v5720_v3 }
 0x1d7   : > { %v4272_v25 = vsel %vm4269_vm11, %v4270_v52, %v4271_v5  ;;  %v4282_v61 = vsel %vm4279_vm14, %v4280_v54, %v4281_v34  ;;  %vm7929_vm2 = vcmp.gt.f32.partialorder %v4993_v0, 0.0  ;;  %vm7935_vm11 = vcmp.gt.f32.partialorder %v4999_v2, 0.0 }
 0x1d8   : > { %v5712_v17 = vpop.permute.xlu0 %937  ;;  %v625_v27 = vsel %vm7929_vm2, 0.0, %v4850_v43  ;;  %v4283_v5 = vcvt.f32.s32 %v4282_v61  ;;  %v4285_v54 = vceil.f32 %v1191_v53  ;;  %v4286_v34 = vfloor.f32 %v1191_v53 }
 0x1d9   : > { %v960_v18 = vsel %vm7922_vm12, %v5520_v47, %v5712_v17  ;;  %v4643_v47 = vunpack.i.l.bf16 %v5275_v31  ;;  %vm5729_vm12 = vmand %vm569_vm9, %vm601_vm13  ;;  %vm7931_vm13 = vcmp.ge.f32.partialorder %v7928_v63, %v7930_v35  ;;  %v4628_v16 = vunpack.i.l.bf16 %v5244_v22  ;;  %v7939_v63 = vld [vmem:[#allocation29_spill] sm:$0xff] }
 0x1da   : > { %977 = vrot.lane.b32.xlu2 %v960_v18, %s4842_s14  ;;  %1205 = vperm.xlu1 %4656, %v4263_v15   ;;  %v7926_v10 = vsel %vm5729_vm12, 4294967295, %v7925_v10  ;;  %vm5745_vm9 = vmand %vm7931_vm13, %vm555_vm5  ;;  %v7934_v18 = vld [vmem:[#allocation56_spill] sm:$0xff]  ;;  %vm4284_vm5 = vcmp.lt.s32.totalorder %v1191_v53, 0  ;;  %v627_v53 = vsel %vm7935_vm11, 0.0, %v4850_v43  ;;  %v7941_v22 = vld [vmem:[#allocation21_spill] sm:$0xff]  ;;  %v7943_v35 = vmov 0 }
 0x1db   : > { %1202 = vperm.xlu0 %4655, %v4258_v51   ;;  %v713_v31 = vsel %vm5729_vm12, %v4623_v28, %v4643_v47  ;;  %vm603_vm3 = vcmp.ne.s32.totalorder %v7934_v18, 0  ;;  %v4273_v51 = vcvt.f32.s32 %v4272_v25  ;;  %vm571_vm2 = vmxor %vm5745_vm9, %vm7924_vm1  ;;  %v7940_v28 = vld [vmem:[#allocation19_spill] sm:$0xff]  ;;  %v4648_v25 = vunpack.i.l.bf16 %v5402_v29 }
 0x1dc   : > { %v5758_v47 = vsel %vm5707_vm0, %v625_v27, %v713_v31  ;;  %vm5765_vm14 = vmand %vm571_vm2, %vm603_vm3  ;;  %vm558_vm13 = vcmp.ge.f32.partialorder %v7940_v28, %v7939_v63  ;;  %v4287_v27 = vsel %vm4284_vm5, %v4285_v54, %v4286_v34  ;;  %vm7942_vm3 = vcmp.ge.f32.partialorder %v7940_v28, %v7941_v22 }
 0x1dd   : > { %7936 = vst [vmem:[#allocation26_spill] sm:$0xff] %v5758_v47  ;;  %v1187_v61 = vmul.f32 4.0, %v5758_v47  ;;  %v715_v31 = vsel %vm5765_vm14, %v4628_v16, %v4648_v25  ;;  %vm5781_vm2 = vmand %vm7942_vm3, %vm558_vm13  ;;  %v4288_v29 = vcvt.f32.s32 %v4287_v27  ;;  %vm7946_vm5 = vcmp.gt.f32.partialorder %v5041_v12, 0.0  ;;  %v7965_v47 = vld [vmem:[#allocation34_spill] sm:$0xff] }
 0x1de   : > { %v7944_v35 = vsel %vm5781_vm2, 4294967295, %v7943_v35  ;;  %v5794_v34 = vsel %vm5745_vm9, %v627_v53, %v715_v31  ;;  %v7948_v16 = vmov 0  ;;  %v4634_v63 = vunpack.i.h.bf16 %v5390_v32 }
 0x1df   : > { %v4266_v54 = vfloor.f32 %v1187_v61  ;;  %7947 = vst [vmem:[#allocation14_spill] sm:$0xff] %v5794_v34  ;;  %vm4264_vm13 = vcmp.lt.s32.totalorder %v1187_v61, 0  ;;  %v1189_v28 = vmul.f32 4.0, %v5794_v34  ;;  %v630_v27 = vsel %vm7946_vm5, 0.0, %v4850_v43  ;;  %v7963_v34 = vld [vmem:[#allocation27_spill] sm:$0xff] }
 0x1e0   : > { %v5750_v50 = vpop.permute.xlu0 %943 }
 0x1e1   : > { %v963_v52 = vsel %vm7935_vm11, %v5524_v62, %v5750_v50  ;;  %vm574_vm11 = vmxor %vm5781_vm2, %vm7924_vm1  ;;  %v4275_v31 = vceil.f32 %v1189_v28  ;;  %v4276_v22 = vfloor.f32 %v1189_v28 }
 0x1e2   : > { %983 = vrot.lane.b32.xlu2 %v963_v52, %s4842_s14  ;;  %1211 = vperm.xlu1 %4656, %v4273_v51   ;;  %v7945_v51 = vld [vmem:[#allocation57_spill] sm:$0xff] }
 0x1e3   : > { %1217 = vperm.xlu0 %4655, %v4283_v5   ;;  %vm606_vm0 = vcmp.ne.s32.totalorder %v7945_v51, 0  ;;  %v4265_v5 = vceil.f32 %v1187_v61 }
 0x1e4   : > { %vm5800_vm3 = vmand %vm574_vm11, %vm606_vm0  ;;  %vm4274_vm0 = vcmp.lt.s32.totalorder %v1189_v28, 0 }
 0x1e5   : > { %v7949_v16 = vsel %vm5800_vm3, 4294967295, %v7948_v16  ;;  %v4267_v25 = vsel %vm4264_vm13, %v4265_v5, %v4266_v54 }
 0x1e6   : > { %v4268_v53 = vcvt.f32.s32 %v4267_v25  ;;  %v7953_v25 = vld [vmem:[#allocation32_spill] sm:$0xff] }
 0x1e7   : > { %vm7954_vm11 = vcmp.gt.f32.partialorder %v7953_v25, 0.0 }
 0x1e8   : > { %v5785_v18 = vpop.permute.xlu0 %949  ;;  %v538_v28 = vsel %vm7954_vm11, %v7953_v25, 1.0  ;;  %vm7964_vm11 = vcmp.gt.f32.partialorder %v7963_v34, 0.0 }
 0x1e9   : > { %v966_v52 = vsel %vm7946_vm5, %v5547_v26, %v5785_v18  ;;  %v4654_v26 = vunpack.i.h.bf16 %v5392_v19  ;;  %v4277_v19 = vsel %vm4274_vm0, %v4275_v31, %v4276_v22 }
 0x1ea   : > { %989 = vrot.lane.b32.xlu2 %v966_v52, %s4842_s14  ;;  %1220 = vperm.xlu1 %4656, %v4288_v29   ;;  %v4278_v51 = vcvt.f32.s32 %v4277_v19  ;;  %v7957_v19 = vld [vmem:[#allocation33_spill] sm:$0xff]  ;;  %s4249_s14 = sshll.u32 %s4934_s21, 6  ;;  %s3858_s21 = scalar_lea.sflag [#allocation5], %s412_s12 }
 0x1eb   : > { %v718_v61 = vsel %vm5800_vm3, %v4634_v63, %v4654_v26  ;;  %v7951_v26 = vld [vmem:[#allocation22_spill] sm:$0xff]  ;;  %vm7958_vm0 = vcmp.gt.f32.partialorder %v7957_v19, 0.0  ;;  %s3869_s22 = scalar_lea.hbm %s7675_s11, %s4249_s14  ;;  %s4786_s14 = scalar_lea.hbm %s7675_s11, 128 }
 0x1ec   : > { %v5814_v29 = vsel %vm5781_vm2, %v630_v27, %v718_v61  ;;  %vm7952_vm13 = vcmp.gt.f32.partialorder %v7951_v26, 0.0  ;;  %v7955_v27 = vld [vmem:[#allocation23_spill] sm:$0xff]  ;;  %vm1065_vm2 = vweird.f32 %v538_v28  ;;  %s3872_s25 = sshll.u32 %s3869_s22, 4  ;;  %s3873_s25 = int_to_ptr.hbm [resolvable:$true] %s3872_s25 }
 0x1ed   : > { %7950 = vst [vmem:[#allocation20_spill] sm:$0xff] %v5814_v29  ;;  %v1192_v32 = vmul.f32 4.0, %v5814_v29  ;;  %v535_v63 = vsel %vm7952_vm13, %v7951_v26, 1.0  ;;  %vm7956_vm5 = vcmp.gt.f32.partialorder %v7955_v27, 0.0  ;;  %v7961_v26 = vld [vmem:[#allocation30_spill] sm:$0xff]  ;;  %s4780_s30 = sshra.s32 %s3873_s25, 4  ;;  %s4781_s30 = int_to_ptr.hbm [resolvable:$true] %s4780_s30 }
 0x1ee   : > { %4682 = vrcp.f32 %v535_v63  ;;  %v5826_v61 = vsel %vm7956_vm5, %v7955_v27, 1.0  ;;  %vm7962_vm13 = vcmp.gt.f32.partialorder %v7961_v26, 0.0  ;;  %s4782_s19 = scalar_lea.hbm %s4781_s30, 64  ;;  %p4787_p3 = scmp.lt.s32.totalorder %s4781_s30, %s7675_s11 }
 0x1ef   : > { %v4290_v52 = vceil.f32 %v1192_v32  ;;  %v4291_v5 = vfloor.f32 %v1192_v32  ;;  %vm4289_vm1 = vcmp.lt.s32.totalorder %v1192_v32, 0  ;;  %4684 = vrcp.f32 %v538_v28  ;;  %p4783_p0 = scmp.ne.s32.totalorder %s4781_s30, %s4782_s19  ;;  %p4788_p4 = scmp.lt.s32.totalorder %s4786_s14, %s4782_s19 }
 0x1f0   : > { %4686 = vrcp.f32 %v5826_v61  ;;  %v5848_v25 = vsel %vm7962_vm13, %v7961_v26, 1.0  ;;  %v5862_v26 = vsel %vm7964_vm11, %v7963_v34, 1.0  ;;  %v1026_v34 = vand.u32 2147483648, %v535_v63 }
 0x1f1   : > { %v4292_v43 = vsel %vm4289_vm1, %v4290_v52, %v4291_v5  ;;  %v7959_v5 = vld [vmem:[#allocation28_spill] sm:$0xff]  ;;  %v1041_v24 = vand.u32 2147483648, %v5826_v61  ;;  %v1054_v46 = vand.u32 2147483647, %v5848_v25  ;;  %p4784_p1 = pnand %p4783_p0, %p4951_p5  ;;  %p4789_p7 = por %p4788_p4, %p4787_p3 }
 0x1f2   : > { %1208 = vperm.xlu2 %4657, %v4268_v53   ;;  %v4293_v54 = vcvt.f32.s32 %v4292_v43  ;;  %vm7960_vm1 = vcmp.gt.f32.partialorder %v7959_v5, 0.0  ;;  %v1027_v6 = vor.u32 1.1754944e-38, %v1026_v34 }
 0x1f3   : > { %v5842_v43 = vsel %vm7960_vm1, %v7959_v5, 1.0  ;;  %v1024_v5 = vand.u32 2147483647, %v535_v63  ;;  %vm1020_vm1 = vweird.f32 %v535_v63  ;;  %p4785_p2 = pneg %p4784_p1 }
 0x1f4   : > { %v4683_v53 = vpop.eup %4682 }
 0x1f5   : > { %v5829_v31 = vpop.eup %4684  ;;  %v1016_v22 = vmul.f32 %v4683_v53, %v535_v63  ;;  %vm1021_vm5 = vweird.f32 %v4683_v53  ;;  %vm5874_vm13 = vcmp.eq.f32.partialorder %v1024_v5, 8.507059e+37  ;;  %v1071_v63 = vand.u32 2147483648, %v538_v28  ;;  %p4790_p8 = pnand %p4789_p7, %p4785_p2 }
 0x1f6   : > { %v5831_v32 = vpop.eup %4686  ;;  %v1061_v52 = vmul.f32 %v5829_v31, %v538_v28  ;;  %vm5881_vm11 = vmor %vm1020_vm1, %vm1021_vm5 }
 0x1f7   : > { %v1031_v27 = vmul.f32 %v5831_v32, %v5826_v61  ;;  %vm1036_vm5 = vweird.f32 %v5831_v32 }
 0x1f9   : > { %v1032_v29 = vsub.f32 1.0, %v1031_v27 }
 0x1fa   : > { %1214 = vperm.xlu2 %4657, %v4278_v51   ;;  %v5836_v51 = vsel %vm7958_vm0, %v7957_v19, 1.0  ;;  %v1062_v19 = vsub.f32 1.0, %v1061_v52  ;;  %vm7966_vm0 = vcmp.gt.f32.partialorder %v7965_v47, 0.0 }
 0x1fb   : > { %4688 = vrcp.f32 %v5836_v51  ;;  %v1033_v52 = vmul.f32 %v5831_v32, %v1032_v29  ;;  %v1116_v12 = vand.u32 2147483648, %v5836_v51  ;;  %v1114_v34 = vand.u32 2147483647, %v5836_v51 }
 0x1fc   : > { %4690 = vrcp.f32 %v5842_v43 }
 0x1fd   : > { %4692 = vrcp.f32 %v5848_v25  ;;  %v1034_v8 = vadd.f32 %v5831_v32, %v1033_v52 }
 0x1fe   : > { %4694 = vrcp.f32 %v5862_v26 }
 0x201   : > { %v5854_v11 = vpop.eup %4688 }
 0x202   : > { %1223 = vperm.xlu2 %4657, %v4293_v54   ;;  %v1017_v54 = vsub.f32 1.0, %v1016_v22  ;;  %v1063_v22 = vmul.f32 %v5829_v31, %v1062_v19  ;;  %v5857_v40 = vpop.eup %4690  ;;  %v1106_v19 = vmul.f32 %v5854_v11, %v5836_v51 }
 0x203   : > { %v5870_v27 = vpop.eup %4692  ;;  %v1076_v29 = vmul.f32 %v5857_v40, %v5842_v43 }
 0x204   : > { %v1018_v3 = vmul.f32 %v4683_v53, %v1017_v54  ;;  %v5868_v54 = vsel %vm7966_vm0, %v7965_v47, 1.0  ;;  %v1064_v13 = vadd.f32 %v5829_v31, %v1063_v22  ;;  %vm1066_vm0 = vweird.f32 %v5829_v31 }
 0x205   : > { %4696 = vrcp.f32 %v5868_v54  ;;  %v1046_v41 = vmul.f32 %v5870_v27, %v5848_v25  ;;  %v1107_v49 = vsub.f32 1.0, %v1106_v19  ;;  %v1039_v22 = vand.u32 2147483647, %v5826_v61  ;;  %vm5897_vm1 = vmor %vm1065_vm2, %vm1066_vm0 }
 0x206   : > { %v1019_v37 = vadd.f32 %v4683_v53, %v1018_v3  ;;  %v1069_v3 = vand.u32 2147483647, %v538_v28  ;;  %v1068_v28 = vsel %vm5897_vm1, %v5829_v31, %v1064_v13  ;;  %v1072_v19 = vor.u32 1.1754944e-38, %v1071_v63 }
 0x207   : > { %vm1110_vm2 = vweird.f32 %v5836_v51  ;;  %vm1111_vm0 = vweird.f32 %v5854_v11  ;;  %v5921_v31 = vor.u32 1.1754944e-38, %v1116_v12  ;;  %vm1051_vm1 = vweird.f32 %v5870_v27 }
 0x208   : > { %v1023_v5 = vsel %vm5881_vm11, %v4683_v53, %v1019_v37  ;;  %v1077_v37 = vsub.f32 1.0, %v1076_v29  ;;  %vm1035_vm11 = vweird.f32 %v5826_v61  ;;  %vm1070_vm3 = vcmp.eq.f32.partialorder %v1069_v3, 8.507059e+37  ;;  %v5915_v29 = vpop.eup %4694 }
 0x209   : > { %vm5905_vm12 = vmor %vm1035_vm11, %vm1036_vm5  ;;  %v5911_v52 = vsel %vm5874_vm13, %v1027_v6, %v1023_v5  ;;  %v1047_v61 = vsub.f32 1.0, %v1046_v41  ;;  %vm1040_vm13 = vcmp.eq.f32.partialorder %v1039_v22, 8.507059e+37  ;;  %v1042_v6 = vor.u32 1.1754944e-38, %v1041_v24 }
 0x20a   : > { %7975 = vst [vmem:[#allocation56_spill] sm:$0xff] %v5911_v52  ;;  %v1038_v13 = vsel %vm5905_vm12, %v5831_v32, %v1034_v8  ;;  %v5925_v9 = vsel %vm1070_vm3, %v1072_v19, %v1068_v28  ;;  %v1108_v5 = vmul.f32 %v5854_v11, %v1107_v49  ;;  %v1078_v41 = vmul.f32 %v5857_v40, %v1077_v37  ;;  %vm5966_vm11 = vmor %vm1110_vm2, %vm1111_vm0 }
 0x20b   : > { %v5923_v3 = vpop.eup %4696  ;;  %v1091_v24 = vmul.f32 %v5915_v29, %v5862_v26  ;;  %v5938_v32 = vsel %vm1040_vm13, %v1042_v6, %v1038_v13  ;;  %v1048_v37 = vmul.f32 %v5870_v27, %v1047_v61  ;;  %v1084_v13 = vand.u32 2147483647, %v5842_v43 }
 0x20c   : > { %v1121_v28 = vmul.f32 %v5923_v3, %v5868_v54  ;;  %v1086_v6 = vand.u32 2147483648, %v5842_v43  ;;  %vm1081_vm12 = vweird.f32 %v5857_v40  ;;  %vm1080_vm3 = vweird.f32 %v5842_v43 }
 0x20d   : > { %vm5975_vm13 = vmor %vm1080_vm3, %vm1081_vm12  ;;  %vm5979_vm5 = vcmp.eq.f32.partialorder %v1084_v13, 8.507059e+37  ;;  %vm5987_vm2 = vcmp.eq.f32.partialorder %v1054_v46, 8.507059e+37  ;;  %vm5994_vm0 = vcmp.eq.f32.partialorder %v1114_v34, 8.507059e+37  ;;  %vm7988_vm12 = vweird.f32 %v5848_v25 }
 0x20e   : > { %v1087_v13 = vor.u32 1.1754944e-38, %v1086_v6  ;;  %vm6005_vm3 = vmor %vm7988_vm12, %vm1051_vm1  ;;  %vm1096_vm1 = vweird.f32 %v5915_v29  ;;  %vm1125_vm12 = vweird.f32 %v5868_v54 }
 0x234   : > { %v976_v63 = vpop.permute.xlu1 %975  ;;  %v978_v47 = vpop.permute.xlu2 %977 }
 0x235   : > { %v999_v8 = vsel %vm5572_vm8, %v976_v63, %v5526_v20  ;;  %v1000_v12 = vsel %vm5557_vm7, %v978_v47, %v5712_v17  ;;  %v5954_v63 = vadd.f32 %v5854_v11, %v1108_v5 }
 0x236   : > { %v1007_v49 = vsel %vm5543_vm10, %v5526_v20, %v999_v8  ;;  %v1008_v22 = vsel %vm5535_vm15, %v5712_v17, %v1000_v12  ;;  %v1056_v20 = vand.u32 2147483648, %v5848_v25  ;;  %v1079_v17 = vadd.f32 %v5857_v40, %v1078_v41 }
 0x237   : > { %v1151_v53 = vmul.f32 %v5911_v52, %v1007_v49  ;;  %v1152_v19 = vmul.f32 %v5938_v32, %v1008_v22  ;;  %v1092_v8 = vsub.f32 1.0, %v1091_v24  ;;  %v1122_v12 = vsub.f32 1.0, %v1121_v28 }
 0x238   : > { %v1049_v41 = vadd.f32 %v5870_v27, %v1048_v37  ;;  %v1113_v51 = vsel %vm5966_vm11, %v5854_v11, %v5954_v63  ;;  %v1057_v37 = vor.u32 1.1754944e-38, %v1056_v20  ;;  %vm7991_vm11 = vnez %v7926_v10  ;;  %v8022_v10 = vld [vmem:[#allocation56_spill] sm:$0xff] }
 0x239   : > { %v1159_v61 = vadd.f32 1.0, %v1151_v53  ;;  %v1160_v47 = vadd.f32 1.0, %v1152_v19  ;;  %v1093_v63 = vmul.f32 %v5915_v29, %v1092_v8  ;;  %v1101_v8 = vand.u32 2147483648, %v5862_v26 }
 0x23a   : > { %v1053_v25 = vsel %vm6005_vm3, %v5870_v27, %v1049_v41  ;;  %v1131_v28 = vand.u32 2147483648, %v5868_v54 }
 0x23b   : > { %v5971_v49 = vmul.f32 0.5, %v1159_v61  ;;  %v5973_v24 = vmul.f32 0.5, %v1160_v47  ;;  %v1083_v61 = vsel %vm5975_vm13, %v5857_v40, %v1079_v17  ;;  %v1099_v40 = vand.u32 2147483647, %v5862_v26 }
 0x23c   : > { %v982_v53 = vpop.permute.xlu1 %981  ;;  %v984_v19 = vpop.permute.xlu2 %983  ;;  %v1123_v17 = vmul.f32 %v5923_v3, %v1122_v12  ;;  %v6025_v43 = vsel %vm5979_vm5, %v1087_v13, %v1083_v61  ;;  %vm7992_vm5 = vnez %v7921_v38  ;;  %vm7996_vm13 = vnez %v7917_v56  ;;  %v8027_v38 = vld [vmem:[#allocation52_spill] sm:$0xff] }
 0x23d   : > { %7978 = vst [vmem:[#allocation29_spill] sm:$0xff] %v5971_v49  ;;  %v1233_v52 = vmul.f32 4.0, %v5971_v49  ;;  %v1234_v11 = vmul.f32 4.0, %v5973_v24  ;;  %v980_v46 = vpop.permute.xlu0 %979  ;;  %v1002_v34 = vsel %vm5629_vm4, %v982_v53, %v5568_v60  ;;  %v1003_v6 = vsel %vm5765_vm14, %v984_v19, %v5750_v50 }
 0x23e   : > { %7979 = vst [vmem:[#allocation19_spill] sm:$0xff] %v5973_v24  ;;  %v1010_v53 = vsel %vm5586_vm6, %v5568_v60, %v1002_v34  ;;  %v1011_v12 = vsel %vm5745_vm9, %v5750_v50, %v1003_v6  ;;  %v1001_v41 = vsel %vm7991_vm11, %v980_v46, %v5607_v59  ;;  %v1094_v60 = vadd.f32 %v5915_v29, %v1093_v63 }
 0x23f   : > { %v6021_v5 = vadd.f32 -0.5, %v1234_v11  ;;  %v6027_v24 = vadd.f32 -0.5, %v1233_v52  ;;  %v1155_v27 = vmul.f32 %v6025_v43, %v1011_v12  ;;  %v6045_v52 = vsel %vm5987_vm2, %v1057_v37, %v1053_v25 }
 0x240   : > { %v1154_v19 = vmul.f32 %v5925_v9, %v1010_v53  ;;  %v1009_v50 = vsel %vm7992_vm5, %v5607_v59, %v1001_v41  ;;  %v1124_v61 = vadd.f32 %v5923_v3, %v1123_v17  ;;  %vm1095_vm2 = vweird.f32 %v5862_v26 }
 0x241   : > { %v6041_v22 = vfloor.f32 %v6021_v5  ;;  %v1163_v13 = vadd.f32 1.0, %v1155_v27  ;;  %v1153_v11 = vmul.f32 %v6045_v52, %v1009_v50  ;;  %v6059_v46 = vfloor.f32 %v6027_v24  ;;  %vm6063_vm3 = vmor %vm1095_vm2, %vm1096_vm1 }
 0x242   : > { %vm7997_vm6 = vweird.f32 %v5923_v3  ;;  %v1129_v53 = vand.u32 2147483647, %v5868_v54  ;;  %v6083_v12 = vsel %vm5994_vm0, %v5921_v31, %v1113_v51  ;;  %v1162_v27 = vadd.f32 1.0, %v1154_v19 }
 0x243   : > { %v6067_v63 = vmul.f32 0.5, %v1163_v13  ;;  %v1161_v20 = vadd.f32 1.0, %v1153_v11  ;;  %v1266_v26 = vmax.f32 %v6041_v22, 0.0  ;;  %vm6075_vm4 = vmor %vm1125_vm12, %vm7997_vm6  ;;  %8000 = vst [vmem:[#allocation57_spill] sm:$0xff] %v6083_v12  ;;  %vm8001_vm1 = vnez %v7912_v58 }
 0x244   : > { %v988_v37 = vpop.permute.xlu1 %987  ;;  %v990_v6 = vpop.permute.xlu2 %989  ;;  %v1128_v50 = vsel %vm6075_vm4, %v5923_v3, %v1124_v61  ;;  %v1098_v13 = vsel %vm6063_vm3, %v5915_v29, %v1094_v60  ;;  %vm1100_vm6 = vcmp.eq.f32.partialorder %v1099_v40, 8.507059e+37  ;;  %v1102_v54 = vor.u32 1.1754944e-38, %v1101_v8 }
 0x245   : > { %7995 = vst [vmem:[#allocation21_spill] sm:$0xff] %v6067_v63  ;;  %v1005_v34 = vsel %vm7996_vm13, %v988_v37, %v5644_v55  ;;  %v986_v17 = vpop.permute.xlu0 %985  ;;  %v6094_v11 = vmul.f32 0.5, %v1161_v20  ;;  %vm8003_vm0 = vnez %v7949_v16  ;;  %vm8004_vm12 = vnez %v7909_v44  ;;  %v8040_v16 = vld [vmem:[#allocation46_spill] sm:$0xff] }
 0x246   : > { %v1013_v41 = vsel %vm8001_vm1, %v5644_v55, %v1005_v34  ;;  %v1006_v51 = vsel %vm8003_vm0, %v990_v6, %v5785_v18  ;;  %v1004_v55 = vsel %vm8004_vm12, %v986_v17, %v5664_v14  ;;  %v1132_v47 = vor.u32 1.1754944e-38, %v1131_v28 }
 0x247   : > { %8002 = vst [vmem:[#allocation22_spill] sm:$0xff] %v6094_v11  ;;  %v1157_v31 = vmul.f32 %v6083_v12, %v1013_v41  ;;  %v1237_v3 = vmul.f32 4.0, %v6067_v63  ;;  %v1274_v19 = vmin.f32 %v1266_v26, 3.0  ;;  %v1265_v29 = vmax.f32 %v6059_v46, 0.0 }
 0x248   : > { %vm1130_vm4 = vcmp.eq.f32.partialorder %v1129_v53, 8.507059e+37  ;;  %v6105_v40 = vsel %vm1100_vm6, %v1102_v54, %v1098_v13  ;;  %v6107_v8 = vmul.f32 0.5, %v1162_v27  ;;  %v1235_v60 = vmul.f32 4.0, %v6094_v11 }
 0x249   : > { %v6110_v61 = vsel %vm1130_vm4, %v1132_v47, %v1128_v50  ;;  %v1165_v37 = vadd.f32 1.0, %v1157_v31  ;;  %vm8006_vm2 = vnez %v7944_v35  ;;  %vm8007_vm3 = vnez %v7903_v36 }
 0x24a   : > { %8005 = vst [vmem:[#allocation32_spill] sm:$0xff] %v6107_v8  ;;  %v1014_v59 = vsel %vm8006_vm2, %v5785_v18, %v1006_v51  ;;  %v1012_v28 = vsel %vm8007_vm3, %v5664_v14, %v1004_v55  ;;  %v3978_v20 = vadd.f32 -0.5, %v1235_v60  ;;  %v6120_v17 = vadd.f32 -0.5, %v1237_v3 }
 0x24b   : > { %v1158_v34 = vmul.f32 %v6110_v61, %v1014_v59  ;;  %v1156_v6 = vmul.f32 %v6105_v40, %v1012_v28  ;;  %v6122_v26 = vmul.f32 0.5, %v1165_v37  ;;  %v4297_v25 = vcvt.f32.s32 %v1274_v19 }
 0x24c   : > { %v1273_v53 = vmin.f32 %v1265_v29, 3.0  ;;  %v1236_v27 = vmul.f32 4.0, %v6107_v8  ;;  %v1251_v31 = vfloor.f32 %v3978_v20  ;;  %v6131_v51 = vfloor.f32 %v6120_v17 }
 0x24d   : > { %v1166_v41 = vadd.f32 1.0, %v1158_v34  ;;  %v1164_v50 = vadd.f32 1.0, %v1156_v6  ;;  %1325 = vperm.xlu1 %4656, %v4297_v25   ;;  %v1239_v13 = vmul.f32 4.0, %v6122_v26  ;;  %v1289_v49 = vadd.f32 1.0, %v6059_v46 }
 0x24e   : > { %v4295_v18 = vcvt.f32.s32 %v1273_v53  ;;  %v3979_v55 = vadd.f32 -0.5, %v1236_v27  ;;  %v1267_v19 = vmax.f32 %v1251_v31, 0.0  ;;  %v1269_v29 = vmax.f32 %v6131_v51, 0.0 }
 0x24f   : > { %v6126_v14 = vmul.f32 0.5, %v1166_v41  ;;  %v6128_v54 = vmul.f32 0.5, %v1164_v50  ;;  %v3982_v60 = vadd.f32 -0.5, %v1239_v13 }
 0x250   : > { %1322 = vperm.xlu0 %4655, %v4295_v18   ;;  %v1275_v28 = vmin.f32 %v1267_v19, 3.0  ;;  %v1277_v34 = vmin.f32 %v1269_v29, 3.0  ;;  %v1252_v6 = vfloor.f32 %v3979_v55 }
 0x251   : > { %8008 = vst [vmem:[#allocation23_spill] sm:$0xff] %v6128_v54  ;;  %v1240_v47 = vmul.f32 4.0, %v6126_v14  ;;  %v1238_v3 = vmul.f32 4.0, %v6128_v54  ;;  %v1255_v18 = vfloor.f32 %v3982_v60 }
 0x252   : > { %v4299_v25 = vcvt.f32.s32 %v1275_v28  ;;  %v4303_v53 = vcvt.f32.s32 %v1277_v34  ;;  %v1268_v50 = vmax.f32 %v1252_v6, 0.0 }
 0x253   : > { %v6136_v37 = vadd.f32 -0.5, %v1240_v47  ;;  %v3981_v59 = vadd.f32 -0.5, %v1238_v3  ;;  %v1271_v3 = vmax.f32 %v1255_v18, 0.0 }
 0x254   : > { %1328 = vperm.xlu2 %4657, %v4299_v25   ;;  %v1276_v47 = vmin.f32 %v1268_v50, 3.0  ;;  %v6147_v25 = vsub.f32 %v6027_v24, %v6059_v46 }
 0x255   : > { %v6138_v41 = vfloor.f32 %v3981_v59  ;;  %v6141_v27 = vfloor.f32 %v6136_v37  ;;  %1334 = vperm.xlu1 %4656, %v4303_v53   ;;  %v1279_v11 = vmin.f32 %v1271_v3, 3.0  ;;  %v6149_v53 = vsub.f32 %v3978_v20, %v1251_v31 }
 0x256   : > { %v4301_v63 = vcvt.f32.s32 %v1276_v47  ;;  %v1292_v47 = vadd.f32 1.0, %v1252_v6 }
 0x257   : > { %v1270_v54 = vmax.f32 %v6138_v41, 0.0  ;;  %v1272_v13 = vmax.f32 %v6141_v27, 0.0  ;;  %v4307_v8 = vcvt.f32.s32 %v1279_v11  ;;  %v1371_v50 = vsub.f32 1.0, %v6149_v53 }
 0x258   : > { %1331 = vperm.xlu0 %4655, %v4301_v63   ;;  %v6156_v63 = vsub.f32 %v6021_v5, %v6041_v22  ;;  %v6158_v11 = vsub.f32 %v3979_v55, %v1252_v6  ;;  %v6161_v24 = vsub.f32 %v3981_v59, %v6138_v41  ;;  %v1300_v59 = vmax.f32 %v1292_v47, 0.0 }
 0x259   : > { %v1278_v19 = vmin.f32 %v1270_v54, 3.0  ;;  %v1280_v29 = vmin.f32 %v1272_v13, 3.0  ;;  %v1369_v54 = vsub.f32 1.0, %v6147_v25  ;;  %v1297_v13 = vmax.f32 %v1289_v49, 0.0 }
 0x25a   : > { %v1370_v20 = vsub.f32 1.0, %v6156_v63  ;;  %v1372_v3 = vsub.f32 1.0, %v6158_v11  ;;  %v1374_v5 = vsub.f32 1.0, %v6161_v24  ;;  %v6169_v49 = vsub.f32 %v6120_v17, %v6131_v51 }
 0x25b   : > { %v4305_v28 = vcvt.f32.s32 %v1278_v19  ;;  %v4309_v34 = vcvt.f32.s32 %v1280_v29  ;;  %v1305_v46 = vmin.f32 %v1297_v13, 3.0  ;;  %v1295_v6 = vadd.f32 1.0, %v1255_v18 }
 0x25c   : > { %v6178_v47 = vsub.f32 %v6136_v37, %v6141_v27 }
 0x25d   : > { %1337 = vperm.xlu2 %4657, %v4305_v28   ;;  %1343 = vperm.xlu1 %4656, %v4309_v34   ;;  %v4311_v55 = vceil.f32 %v1305_v46  ;;  %v4312_v19 = vfloor.f32 %v1305_v46  ;;  %vm4310_vm6 = vcmp.lt.s32.totalorder %v1305_v46, 0  ;;  %v1291_v28 = vadd.f32 1.0, %v1251_v31 }
 0x25e   : > { %v6171_v34 = vsub.f32 %v3982_v60, %v1255_v18  ;;  %v1303_v60 = vmax.f32 %v1295_v6, 0.0 }
 0x25f   : > { %v1299_v17 = vmax.f32 %v1291_v28, 0.0 }
 0x260   : > { %1340 = vperm.xlu0 %4655, %v4307_v8   ;;  %v1290_v8 = vadd.f32 1.0, %v6041_v22  ;;  %8009 = vst [vmem:[#allocation33_spill] sm:$0xff] %v6171_v34  ;;  %v1293_v22 = vadd.f32 1.0, %v6131_v51  ;;  %v1375_v12 = vsub.f32 1.0, %v6171_v34  ;;  %v1311_v37 = vmin.f32 %v1303_v60, 3.0 }
 0x262   : > { %v1298_v29 = vmax.f32 %v1290_v8, 0.0  ;;  %v1301_v31 = vmax.f32 %v1293_v22, 0.0  ;;  %v1296_v22 = vadd.f32 1.0, %v6141_v27  ;;  %v4342_v34 = vfloor.f32 %v1311_v37 }
 0x264   : > { %v1306_v13 = vmin.f32 %v1298_v29, 3.0  ;;  %v1309_v29 = vmin.f32 %v1301_v31, 3.0 }
 0x265   : > { %1379 = vperm.xlu2 %4657, %v1369_v54   ;;  %1389 = vperm.xlu1 %4656, %v1371_v50   ;;  %v1373_v54 = vsub.f32 1.0, %v6169_v49  ;;  %v4313_v50 = vsel %vm4310_vm6, %v4311_v55, %v4312_v19  ;;  %v1294_v55 = vadd.f32 1.0, %v6138_v41  ;;  %v1376_v19 = vsub.f32 1.0, %v6178_v47 }
 0x266   : > { %v4314_v8 = vcvt.f32.s32 %v4313_v50  ;;  %v4316_v46 = vceil.f32 %v1306_v13  ;;  %vm4315_vm4 = vcmp.lt.s32.totalorder %v1306_v13, 0  ;;  %v1304_v41 = vmax.f32 %v1296_v22, 0.0 }
 0x267   : > { %v1302_v50 = vmax.f32 %v1294_v55, 0.0 }
 0x268   : > { %1384 = vperm.xlu0 %4655, %v1370_v20   ;;  %v1308_v20 = vmin.f32 %v1300_v59, 3.0 }
 0x269   : > { %v1310_v60 = vmin.f32 %v1302_v50, 3.0  ;;  %v8011_v50 = vld [vmem:[#allocation44_spill] sm:$0xff] }
 0x26a   : > { %v4326_v51 = vceil.f32 %v1308_v20  ;;  %v4327_v18 = vfloor.f32 %v1308_v20  ;;  %vm4325_vm6 = vcmp.lt.s32.totalorder %v1308_v20, 0  ;;  %v4332_v20 = vfloor.f32 %v1309_v29 }
 0x26b   : > { %vm4335_vm13 = vcmp.lt.s32.totalorder %v1310_v60, 0 }
 0x26c   : > { %v4328_v28 = vsel %vm4325_vm6, %v4326_v51, %v4327_v18  ;;  %vm4340_vm6 = vcmp.lt.s32.totalorder %v1311_v37, 0  ;;  %v1312_v51 = vmin.f32 %v1304_v41, 3.0  ;;  %v4336_v18 = vceil.f32 %v1310_v60  ;;  %v8013_v41 = vld [vmem:[#allocation49_spill] sm:$0xff] }
 0x26d   : > { %1394 = vperm.xlu2 %4657, %v1372_v3   ;;  %1404 = vperm.xlu1 %4656, %v1374_v5   ;;  %v4317_v3 = vfloor.f32 %v1306_v13  ;;  %v1307_v5 = vmin.f32 %v1299_v17, 3.0  ;;  %v4331_v13 = vceil.f32 %v1309_v29  ;;  %v4341_v17 = vceil.f32 %v1311_v37 }
 0x26f   : > { %v4318_v59 = vsel %vm4315_vm4, %v4316_v46, %v4317_v3  ;;  %v4321_v6 = vceil.f32 %v1307_v5  ;;  %vm4320_vm1 = vcmp.lt.s32.totalorder %v1307_v5, 0  ;;  %vm4330_vm4 = vcmp.lt.s32.totalorder %v1309_v29, 0  ;;  %v4698_v29 = vld [vmem:[%s4990_s13 + $0x8] sm:$0xff] }
 0x270   : > { %1399 = vperm.xlu0 %4655, %v1373_v54   ;;  %v4322_v54 = vfloor.f32 %v1307_v5  ;;  %v4333_v27 = vsel %vm4330_vm4, %v4331_v13, %v4332_v20  ;;  %v4343_v3 = vsel %vm4340_vm6, %v4341_v17, %v4342_v34  ;;  %v4337_v5 = vfloor.f32 %v1310_v60  ;;  %v4699_v20 = vld [vmem:[%s4990_s13] sm:$0xff] }
 0x271   : > { %v4334_v55 = vcvt.f32.s32 %v4333_v27  ;;  %v896_v34 = vsel %vm5557_vm7, %v4698_v29, %v5504_v42  ;;  %vm8012_vm4 = vcmp.gt.f32.partialorder %v5020_v7, 0.0  ;;  %v895_v42 = vsel %vm5572_vm8, %v4699_v20, %v5508_v45  ;;  %v8014_v7 = vld [vmem:[#allocation31_spill] sm:$0xff]  ;;  %v4700_v60 = vld [vmem:[%s4990_s13 + $0x20] sm:$0xff] }
 0x272   : > { %v4323_v31 = vsel %vm4320_vm1, %v4321_v6, %v4322_v54  ;;  %v4338_v22 = vsel %vm4335_vm13, %v4336_v18, %v4337_v5  ;;  %vm4345_vm1 = vcmp.lt.s32.totalorder %v1312_v51, 0  ;;  %v8010_v54 = vld [vmem:[#allocation45_spill] sm:$0xff]  ;;  %v2940_v17 = vmul.f32 16.0, %v6122_v26  ;;  %v8017_v27 = vld [vmem:[#allocation47_spill] sm:$0xff]  ;;  %v6224_v18 = vpop.permute.xlu2 %1208 }
 0x273   : > { %v4324_v46 = vcvt.f32.s32 %v4323_v31  ;;  %v4339_v37 = vcvt.f32.s32 %v4338_v22  ;;  %vm8015_vm7 = vcmp.gt.f32.partialorder %v4996_v1, 0.0  ;;  %v8016_v1 = vld [vmem:[#allocation48_spill] sm:$0xff]  ;;  %vm8025_vm8 = vnez %v7907_v21  ;;  %v8028_v29 = vld [vmem:[#allocation39_spill] sm:$0xff] }
 0x274   : > { %v799_v31 = vsel %vm8015_vm7, %v8014_v7, %v8013_v41  ;;  %v4126_v62 = vadd.f32 -0.5, %v2940_v17  ;;  %v8041_v17 = vld [vmem:[#allocation16_spill] sm:$0xff]  ;;  %vm8046_vm13 = vnez %v7917_v56 }
 0x275   : > { %1409 = vperm.xlu2 %4657, %v1375_v12   ;;  %1426 = vperm.xlu1 %4656, %v4314_v8   ;;  %v4319_v12 = vcvt.f32.s32 %v4318_v59  ;;  %v4329_v8 = vcvt.f32.s32 %v4328_v28  ;;  %v4346_v59 = vceil.f32 %v1312_v51  ;;  %v4347_v28 = vfloor.f32 %v1312_v51  ;;  %v8020_v51 = vld [vmem:[#allocation43_spill] sm:$0xff] }
 0x276   : > { %v903_v23 = vsel %vm5543_vm10, %v799_v31, %v895_v42  ;;  %vm8018_vm10 = vcmp.gt.f32.partialorder %v4999_v2, 0.0  ;;  %v6241_v22 = vfloor.f32 %v4126_v62  ;;  %v8039_v42 = vld [vmem:[#allocation55_spill] sm:$0xff] }
 0x277   : > { %v4348_v6 = vsel %vm4345_vm1, %v4346_v59, %v4347_v28  ;;  %v803_v57 = vsel %vm8018_vm10, %v8017_v27, %v8016_v1 }
 0x278   : > { %1414 = vperm.xlu0 %4655, %v1376_v19   ;;  %v4344_v19 = vcvt.f32.s32 %v4343_v3  ;;  %v4349_v13 = vcvt.f32.s32 %v4348_v6  ;;  %v8019_v3 = vld [vmem:[#allocation53_spill] sm:$0xff]  ;;  %8026 = vst [vmem:[#allocation30_spill] sm:$0xff] %v6241_v22  ;;  %v6270_v31 = vsub.f32 %v4126_v62, %v6241_v22 }
 0x279   : > { %v4703_v6 = vld [vmem:[%s4990_s13 + $0x38] sm:$0xff] }
 0x27a   : > { %8043 = vst [vmem:[#allocation34_spill] sm:$0xff] %v6270_v31  ;;  %v8077_v22 = vld [vmem:[#allocation65_spill] sm:$0xff] }
 0x27d   : > { %1429 = vperm.xlu2 %4657, %v4319_v12   ;;  %1435 = vperm.xlu1 %4656, %v4329_v8   ;;  %v800_v12 = vsel %vm8012_vm4, %v8011_v50, %v8010_v54  ;;  %v8032_v54 = vld [vmem:[#allocation58_spill] sm:$0xff] }
 0x27e   : > { %v904_v8 = vsel %vm5535_vm15, %v800_v12, %v896_v34  ;;  %vm8021_vm15 = vcmp.gt.f32.partialorder %v4993_v0, 0.0  ;;  %v4702_v0 = vld [vmem:[%s4990_s13 + $0x18] sm:$0xff]  ;;  %v8029_v34 = vld [vmem:[#allocation15_spill] sm:$0xff]  ;;  %v902_v21 = vsel %vm8003_vm0, %v4703_v6, %v8032_v54 }
 0x27f   : > { %v1044_v4 = vmul.f32 %v5938_v32, %v904_v8  ;;  %v899_v32 = vsel %vm5765_vm14, %v4700_v60, %v5506_v39  ;;  %v801_v39 = vsel %vm8021_vm15, %v8020_v51, %v8019_v3  ;;  %vm8031_vm14 = vnez %v7900_v33  ;;  %v4704_v50 = vld [vmem:[%s4990_s13 + $0x28] sm:$0xff] }
 0x280   : > { %1432 = vperm.xlu0 %4655, %v4324_v46   ;;  %v2941_v46 = vmul.f32 16.0, %v6126_v14  ;;  %v907_v5 = vsel %vm5745_vm9, %v803_v57, %v899_v32  ;;  %vm8030_vm9 = vcmp.gt.f32.partialorder %v8029_v34, 0.0  ;;  %v8034_v12 = vld [vmem:[#allocation51_spill] sm:$0xff]  ;;  %v8035_v8 = vld [vmem:[#allocation50_spill] sm:$0xff] }
 0x281   : > { %v1136_v30 = vadd.f32 1.0, %v1044_v4  ;;  %v1089_v28 = vmul.f32 %v6025_v43, %v907_v5  ;;  %v8033_v43 = vld [vmem:[#allocation61_spill] sm:$0xff]  ;;  %v8050_v57 = vld [vmem:[#allocation54_spill] sm:$0xff]  ;;  %v8062_v34 = vld [vmem:[#allocation35_spill] sm:$0xff] }
 0x282   : > { %v4127_v59 = vadd.f32 -0.5, %v2941_v46  ;;  %v8052_v3 = vld [vmem:[#allocation18_spill] sm:$0xff] }
 0x283   : > { %v6233_v2 = vmul.f32 0.5, %v1136_v30  ;;  %v1139_v7 = vadd.f32 1.0, %v1089_v28  ;;  %v8045_v30 = vld [vmem:[#allocation60_spill] sm:$0xff]  ;;  %vm8053_vm0 = vcmp.gt.f32.partialorder %v8052_v3, 0.0 }
 0x284   : > { %v6263_v33 = vfloor.f32 %v4127_v59 }
 0x285   : > { %1438 = vperm.xlu2 %4657, %v4334_v55   ;;  %1444 = vperm.xlu1 %4656, %v4344_v19   ;;  %8023 = vst [vmem:[#allocation28_spill] sm:$0xff] %v6233_v2  ;;  %v8024_v55 = vld [vmem:[#allocation59_spill] sm:$0xff]  ;;  %v1578_v20 = vmul.f32 4.0, %v6233_v2  ;;  %v6292_v35 = vmul.f32 0.5, %v1139_v7 }
 0x286   : > { %v898_v19 = vsel %vm8025_vm8, %v4702_v0, %v8024_v55  ;;  %8038 = vst [vmem:[#allocation27_spill] sm:$0xff] %v6263_v33 }
 0x287   : > { %v6287_v1 = vadd.f32 -0.5, %v1578_v20  ;;  %8048 = vst [vmem:[#allocation49_spill] sm:$0xff] %v6292_v35 }
 0x288   : > { %1441 = vperm.xlu0 %4655, %v4339_v37  }
 0x28d   : > { %1447 = vperm.xlu2 %4657, %v4349_v13   ;;  %1480 = vperm.xlu1 %4656, %v6156_v63   ;;  %v4701_v63 = vld [vmem:[%s4990_s13 + $0x10] sm:$0xff]  ;;  %v8036_v13 = vld [vmem:[#allocation17_spill] sm:$0xff] }
 0x28e   : > { %v897_v45 = vsel %vm7991_vm11, %v4701_v63, %v5516_v48  ;;  %v1029_v48 = vmul.f32 %v8022_v10, %v903_v23  ;;  %vm8037_vm11 = vcmp.gt.f32.partialorder %v8036_v13, 0.0  ;;  %v6279_v63 = vpop.permute.xlu2 %1214  ;;  %v6305_v10 = vpop.permute.xlu1 %1205  ;;  %v8067_v13 = vld [vmem:[#allocation37_spill] sm:$0xff] }
 0x28f   : > { %v806_v4 = vsel %vm8037_vm11, %v8035_v8, %v8034_v12  ;;  %v8066_v8 = vld [vmem:[#allocation38_spill] sm:$0xff] }
 0x290   : > { %1475 = vperm.xlu0 %4655, %v6147_v25   ;;  %v905_v25 = vsel %vm7992_vm5, %v801_v39, %v897_v45  ;;  %vm8042_vm5 = vcmp.gt.f32.partialorder %v8041_v17, 0.0  ;;  %v910_v32 = vsel %vm8006_vm2, %v806_v4, %v902_v21  ;;  %v4705_v45 = vld [vmem:[%s4990_s13 + $0x30] sm:$0xff]  ;;  %v8068_v4 = vpack.i.bf16 %v8066_v8, %v8067_v13  ;;  %v8076_v13 = vld [vmem:[#allocation14_spill] sm:$0xff]  ;;  %s7612_s13 = scalar_lea.vmem [#allocation8], %s3965_s29 }
 0x291   : > { %v1059_v15 = vmul.f32 %v6045_v52, %v905_v25  ;;  %v900_v52 = vsel %vm8004_vm12, %v4704_v50, %v8033_v43  ;;  %v804_v41 = vsel %vm8042_vm5, %v8040_v16, %v8039_v42  ;;  %v901_v46 = vsel %vm8046_vm13, %v4705_v45, %v8045_v30  ;;  %v8071_v45 = vld [vmem:[#allocation40_spill] sm:$0xff]  ;;  %s3870_s24 = sshll.u32 %s7612_s13, 4  ;;  %s3871_s24 = int_to_ptr.vmem [resolvable:$true] %s3870_s24 }
 0x292   : > { %v1134_v36 = vmul.f32 %v6110_v61, %v910_v32  ;;  %vm8054_vm12 = vnez %v7912_v58  ;;  %v6309_v61 = vfloor.f32 %v6287_v1  ;;  %v8058_v58 = vld [vmem:[#allocation24_spill] sm:$0xff]  ;;  %vm1933_vm2 = vcmask 1043456  }
 0x293   : > { %v1137_v44 = vadd.f32 1.0, %v1059_v15  ;;  %v8059_v15 = vld [vmem:[#allocation25_spill] sm:$0xff]  ;;  %vm1920_vm13 = vcmask 195584  }
 0x294   : > { %v1142_v5 = vadd.f32 1.0, %v1134_v36 }
 0x295   : > { %1485 = vperm.xlu2 %4657, %v6149_v53   ;;  %1495 = vperm.xlu1 %4656, %v6169_v49   ;;  %v802_v53 = vsel %vm8030_vm9, %v8028_v29, %v8027_v38  ;;  %v1135_v49 = vadd.f32 1.0, %v1029_v48  ;;  %v6295_v27 = vmul.f32 0.5, %v1137_v44  ;;  %v8055_v48 = vld [vmem:[#allocation33_spill] sm:$0xff]  ;;  %v8060_v38 = vpack.i.bf16 %v8058_v58, %v8059_v15  ;;  %v8061_v29 = vld [vmem:[#allocation36_spill] sm:$0xff] }
 0x296   : > { %v906_v37 = vsel %vm8031_vm14, %v802_v53, %v898_v19  ;;  %v8057_v19 = vld [vmem:[#allocation57_spill] sm:$0xff]  ;;  %v8063_v53 = vpack.i.bf16 %v8061_v29, %v8062_v34  ;;  %v6327_v54 = vpop.permute.xlu2 %1223  ;;  %v6339_v17 = vpop.permute.xlu1 %1211 }
 0x297   : > { %v6272_v23 = vmul.f32 0.5, %v1135_v49  ;;  %v1074_v60 = vmul.f32 %v5925_v9, %v906_v37  ;;  %v6290_v9 = vsub.f32 %v4127_v59, %v6263_v33  ;;  %8049 = vst [vmem:[#allocation31_spill] sm:$0xff] %v6295_v27  ;;  %v1579_v25 = vmul.f32 4.0, %v6295_v27 }
 0x298   : > { %1490 = vperm.xlu0 %4655, %v6158_v11   ;;  %v908_v11 = vsel %vm8007_vm3, %v804_v41, %v900_v52  ;;  %v1610_v49 = vmax.f32 %v6309_v61, 0.0  ;;  %v6323_v37 = vmul.f32 0.5, %v1142_v5 }
 0x299   : > { %8044 = vst [vmem:[#allocation45_spill] sm:$0xff] %v6272_v23  ;;  %v1577_v56 = vmul.f32 4.0, %v6272_v23  ;;  %v1138_v39 = vadd.f32 1.0, %v1074_v60  ;;  %v4002_v21 = vadd.f32 -0.5, %v1579_v25 }
 0x29a   : > { %8047 = vst [vmem:[#allocation44_spill] sm:$0xff] %v6290_v9  ;;  %v1618_v20 = vmin.f32 %v1610_v49, 3.0  ;;  %v1584_v42 = vmul.f32 4.0, %v6323_v37  ;;  %v6476_v9 = vmul.f32 8.0, %v8076_v13 }
 0x29b   : > { %v6313_v55 = vmul.f32 0.5, %v1138_v39  ;;  %v4000_v28 = vadd.f32 -0.5, %v1577_v56  ;;  %8064 = vst [vmem:[#allocation47_spill] sm:$0xff] %v6323_v37  ;;  %v6341_v41 = vfloor.f32 %v4002_v21 }
 0x29c   : > { %vm4370_vm10 = vcmp.lt.s32.totalorder %v6476_v9, 0 }
 0x29d   : > { %1500 = vperm.xlu2 %4657, %v6161_v24   ;;  %1510 = vperm.xlu1 %4656, %v6178_v47   ;;  %v1104_v24 = vmul.f32 %v6105_v40, %v908_v11  ;;  %v8051_v47 = vld [vmem:[#allocation42_spill] sm:$0xff]  ;;  %v1581_v40 = vmul.f32 4.0, %v6292_v35  ;;  %8056 = vst [vmem:[#allocation48_spill] sm:$0xff] %v6313_v55  ;;  %v1580_v43 = vmul.f32 4.0, %v6313_v55  ;;  %v6332_v12 = vfloor.f32 %v4000_v28  ;;  %v8070_v11 = vld [vmem:[#allocation41_spill] sm:$0xff] }
 0x29e   : > { %v805_v51 = vsel %vm8053_vm0, %v8051_v47, %v8050_v57  ;;  %v8072_v30 = vpack.i.bf16 %v8070_v11, %v8071_v45  ;;  %v1626_v11 = vadd.f32 1.0, %v6309_v61 }
 0x29f   : > { %v909_v62 = vsel %vm8054_vm12, %v805_v51, %v901_v46  ;;  %v1140_v0 = vadd.f32 1.0, %v1104_v24  ;;  %v6329_v50 = vadd.f32 -0.5, %v1581_v40  ;;  %v1609_v60 = vmax.f32 %v6332_v12, 0.0  ;;  %v6359_v51 = vpop.permute.xlu0 %1202 }
 0x2a0   : > { %1505 = vperm.xlu0 %4655, %v8055_v48   ;;  %v1119_v59 = vmul.f32 %v8057_v19, %v909_v62  ;;  %v4003_v32 = vadd.f32 -0.5, %v1580_v43  ;;  %v6352_v46 = vadd.f32 -0.5, %v1584_v42  ;;  %v1611_v24 = vmax.f32 %v6341_v41, 0.0  ;;  %v6366_v19 = vpop.permute.xlu1 %1220 }
 0x2a1   : > { %v6325_v6 = vmul.f32 0.5, %v1140_v0  ;;  %v6344_v7 = vfloor.f32 %v6329_v50  ;;  %v1617_v56 = vmin.f32 %v1609_v60, 3.0 }
 0x2a2   : > { %v1141_v52 = vadd.f32 1.0, %v1119_v59  ;;  %v1596_v39 = vfloor.f32 %v4003_v32  ;;  %v1619_v62 = vmin.f32 %v1611_v24, 3.0  ;;  %v6364_v5 = vfloor.f32 %v6352_v46 }
 0x2a3   : > { %8065 = vst [vmem:[#allocation53_spill] sm:$0xff] %v6325_v6  ;;  %v1582_v16 = vmul.f32 4.0, %v6325_v6  ;;  %v1613_v57 = vmax.f32 %v6344_v7, 0.0  ;;  %v6382_v24 = vsub.f32 %v4002_v21, %v6341_v41  ;;  %v1629_v8 = vadd.f32 1.0, %v6344_v7 }
 0x2a4   : > { %v6346_v44 = vmul.f32 0.5, %v1141_v52  ;;  %v1612_v25 = vmax.f32 %v1596_v39, 0.0  ;;  %v6396_v21 = vsub.f32 %v4003_v32, %v1596_v39  ;;  %v1628_v45 = vadd.f32 1.0, %v1596_v39 }
 0x2a5   : > { %4659 = vperm.xlu2 %4657, %v8060_v38   ;;  %4669 = vperm.xlu1 %4656, %v8063_v53   ;;  %v4005_v47 = vadd.f32 -0.5, %v1582_v16  ;;  %v1621_v48 = vmin.f32 %v1613_v57, 3.0  ;;  %v1616_v53 = vmax.f32 %v6364_v5, 0.0  ;;  %v4371_v6 = vceil.f32 %v6476_v9 }
 0x2a6   : > { %8069 = vst [vmem:[#allocation43_spill] sm:$0xff] %v6346_v44  ;;  %v1583_v3 = vmul.f32 4.0, %v6346_v44  ;;  %v1620_v49 = vmin.f32 %v1612_v25, 3.0 }
 0x2a7   : > { %v6361_v40 = vfloor.f32 %v4005_v47  ;;  %v6372_v52 = vpop.permute.xlu0 %1217 }
 0x2a8   : > { %4664 = vperm.xlu0 %4655, %v8068_v4   ;;  %v4006_v0 = vadd.f32 -0.5, %v1583_v3 }
 0x2a9   : > { %v1614_v38 = vmax.f32 %v6361_v40, 0.0 }
 0x2aa   : > { %v1599_v43 = vfloor.f32 %v4006_v0 }
 0x2ab   : > { %v1622_v4 = vmin.f32 %v1614_v38, 3.0  ;;  %v6399_v38 = vsub.f32 %v4005_v47, %v6361_v40 }
 0x2ac   : > { %v1615_v42 = vmax.f32 %v1599_v43, 0.0  ;;  %v1631_v29 = vadd.f32 1.0, %v1599_v43 }
 0x2ad   : > { %4674 = vperm.xlu2 %4657, %v8072_v30   ;;  %1678 = vperm.xlu1 %4656, %v1618_v20   ;;  %v1624_v20 = vmin.f32 %v1616_v53, 3.0  ;;  %v6379_v30 = vsub.f32 %v4000_v28, %v6332_v12 }
 0x2ae   : > { %v6354_v36 = vpop.permute.xlu2 %1328  ;;  %v1623_v57 = vmin.f32 %v1615_v42, 3.0  ;;  %v6409_v42 = vsub.f32 %v6329_v50, %v6344_v7  ;;  %v1632_v7 = vadd.f32 1.0, %v6364_v5 }
 0x2b0   : > { %1673 = vperm.xlu0 %4655, %v1617_v56   ;;  %v1735_v56 = vsub.f32 1.0, %v6379_v30 }
 0x2b5   : > { %1683 = vperm.xlu2 %4657, %v1619_v62   ;;  %1693 = vperm.xlu1 %4656, %v1621_v48   ;;  %v1737_v62 = vsub.f32 1.0, %v6382_v24  ;;  %v6390_v48 = vsub.f32 %v6287_v1, %v6309_v61  ;;  %v1625_v1 = vadd.f32 1.0, %v6332_v12 }
 0x2b7   : > { %v6368_v59 = vpop.permute.xlu2 %1337  ;;  %v1736_v53 = vsub.f32 1.0, %v6390_v48 }
 0x2b8   : > { %1688 = vperm.xlu0 %4655, %v1620_v49   ;;  %v1738_v49 = vsub.f32 1.0, %v6396_v21 }
 0x2bd   : > { %1698 = vperm.xlu2 %4657, %v1622_v4   ;;  %1708 = vperm.xlu1 %4656, %v1624_v20   ;;  %v1740_v4 = vsub.f32 1.0, %v6399_v38 }
 0x2bf   : > { %v6374_v16 = vpop.permute.xlu1 %1325  ;;  %v6376_v60 = vpop.permute.xlu2 %1379 }
 0x2c0   : > { %1703 = vperm.xlu0 %4655, %v1623_v57   ;;  %v6415_v57 = vsub.f32 %v4006_v0, %v1599_v43 }
 0x2c2   : > { %v6384_v3 = vpop.permute.xlu0 %1322  ;;  %v1741_v12 = vsub.f32 1.0, %v6415_v57 }
 0x2c5   : > { %1745 = vperm.xlu2 %4657, %v1735_v56   ;;  %1755 = vperm.xlu1 %4656, %v1737_v62   ;;  %v1633_v56 = vmax.f32 %v1625_v1, 0.0  ;;  %v1739_v62 = vsub.f32 1.0, %v6409_v42  ;;  %v1634_v1 = vmax.f32 %v1626_v11, 0.0  ;;  %v1637_v11 = vmax.f32 %v1629_v8, 0.0 }
 0x2c7   : > { %v6392_v25 = vpop.permute.xlu2 %1394  ;;  %v6394_v28 = vpop.permute.xlu1 %1334  ;;  %v1642_v61 = vmin.f32 %v1634_v1, 3.0 }
 0x2c8   : > { %1750 = vperm.xlu0 %4655, %v1736_v53   ;;  %v1641_v53 = vmin.f32 %v1633_v56, 3.0  ;;  %v1627_v56 = vadd.f32 1.0, %v6341_v41  ;;  %v1630_v41 = vadd.f32 1.0, %v6361_v40 }
 0x2ca   : > { %v6405_v20 = vpop.permute.xlu0 %1331 }
 0x2cd   : > { %1760 = vperm.xlu2 %4657, %v1738_v49   ;;  %1770 = vperm.xlu1 %4656, %v1740_v4   ;;  %v6424_v49 = vsub.f32 %v6352_v46, %v6364_v5 }
 0x2cf   : > { %v6411_v32 = vpop.permute.xlu2 %1409  ;;  %v6413_v47 = vpop.permute.xlu1 %1343  ;;  %v1742_v34 = vsub.f32 1.0, %v6424_v49 }
 0x2d0   : > { %1765 = vperm.xlu0 %4655, %v1739_v62   ;;  %v1636_v62 = vmax.f32 %v1628_v45, 0.0  ;;  %v1639_v45 = vmax.f32 %v1631_v29, 0.0  ;;  %v1664_v29 = vld [vmem:[%s7665_s1 + $0x8] sm:$0xf] }
 0x2d2   : > { %v6420_v50 = vpop.permute.xlu0 %1340  ;;  %v1644_v39 = vmin.f32 %v1636_v62, 3.0  ;;  %v1647_v1 = vmin.f32 %v1639_v45, 3.0  ;;  %v1638_v62 = vmax.f32 %v1630_v41, 0.0 }
 0x2d4   : > { %v1646_v8 = vmin.f32 %v1638_v62, 3.0 }
 0x2d5   : > { %1775 = vperm.xlu2 %4657, %v1741_v12   ;;  %1793 = vperm.xlu1 %4656, %v1641_v53   ;;  %v1635_v12 = vmax.f32 %v1627_v56, 0.0 }
 0x2d7   : > { %v6426_v0 = vpop.permute.xlu2 %1429  ;;  %v6428_v4 = vpop.permute.xlu1 %1389  ;;  %v1643_v15 = vmin.f32 %v1635_v12, 3.0 }
 0x2d8   : > { %1780 = vperm.xlu0 %4655, %v1742_v34   ;;  %v1645_v34 = vmin.f32 %v1637_v11, 3.0 }
 0x2da   : > { %v6433_v46 = vpop.permute.xlu0 %1384 }
 0x2dd   : > { %1798 = vperm.xlu2 %4657, %v1642_v61   ;;  %1808 = vperm.xlu1 %4656, %v1644_v39   ;;  %v1640_v39 = vmax.f32 %v1632_v7, 0.0  ;;  %v8073_v7 = vld [vmem:[#allocation62_spill] sm:$0xff] }
 0x2de   : > { %v2048_v62 = vmul.f32 8.0, %v8073_v7 }
 0x2df   : > { %v6435_v53 = vpop.permute.xlu2 %1438  ;;  %v6437_v58 = vpop.permute.xlu1 %1404  ;;  %v1648_v40 = vmin.f32 %v1640_v39, 3.0  ;;  %v8074_v39 = vld [vmem:[#allocation26_spill] sm:$0xff] }
 0x2e0   : > { %1803 = vperm.xlu0 %4655, %v1643_v15   ;;  %v1916_v15 = vunpack.c.l.b16 %v1664_v29  ;;  %vm4355_vm3 = vcmp.lt.s32.totalorder %v2048_v62, 0 }
 0x2e2   : > { %v6441_v43 = vpop.permute.xlu0 %1399  ;;  %v1918_v12 = vpack.c.b16 %v1916_v15, %v1916_v15  ;;  %v8075_v15 = vld [vmem:[#allocation63_spill] sm:$0xff] }
 0x2e4   : > { %v1935_v11 = vsel %vm1933_vm2, %v1918_v12, 0 }
 0x2e5   : > { %1813 = vperm.xlu2 %4657, %v1645_v34   ;;  %1823 = vperm.xlu1 %4656, %v1647_v1   ;;  %v4229_v34 = vld [vmem:[%s7665_s1] sm:$0xff]  ;;  %v1183_v1 = vlaneseq }
 0x2e6   : > { %1943 = vmatpush.bf16.msra.mxu0 %v1935_v11  ;;  %4250 = vmatpush.bf16.msra.mxu2 %v1935_v11 }
 0x2e7   : > { %v6443_v56 = vpop.permute.xlu2 %1447  ;;  %v6445_v61 = vpop.permute.xlu1 %1426  ;;  %v6468_v29 = vand.u32 127, %v1183_v1 }
 0x2e8   : > { %1818 = vperm.xlu0 %4655, %v1646_v8   ;;  %v2049_v8 = vmul.f32 8.0, %v8074_v39  ;;  %v8078_v39 = vld [vmem:[#allocation64_spill] sm:$0xff] }
 0x2e9   : > { %v6483_v7 = vmul.f32 8.0, %v8078_v39 }
 0x2ea   : > { %v6450_v5 = vpop.permute.xlu0 %1414  ;;  %1944 = vmatpush.bf16.msra.mxu0 %v4229_v34  ;;  %4251 = vmatpush.bf16.msra.mxu2 %v4229_v34  ;;  %v4357_v34 = vfloor.f32 %v2048_v62  ;;  %v4361_v31 = vceil.f32 %v2049_v8  ;;  %v4362_v33 = vfloor.f32 %v2049_v8  ;;  %vm4360_vm6 = vcmp.lt.s32.totalorder %v2049_v8, 0 }
 0x2eb   : > { %vm4365_vm14 = vcmp.lt.s32.totalorder %v6483_v7, 0 }
 0x2ed   : > { %1828 = vperm.xlu2 %4657, %v1648_v40   ;;  %1862 = vperm.xlu1 %4656, %v6390_v48   ;;  %v2047_v40 = vmul.f32 8.0, %v8075_v15 }
 0x2ef   : > { %v6454_v45 = vpop.permute.xlu2 %1485  ;;  %v6456_v41 = vpop.permute.xlu1 %1435  ;;  %v4351_v1 = vceil.f32 %v2047_v40  ;;  %v4352_v15 = vfloor.f32 %v2047_v40  ;;  %vm4350_vm4 = vcmp.lt.s32.totalorder %v2047_v40, 0 }
 0x2f0   : > { %1857 = vperm.xlu0 %4655, %v6379_v30   ;;  %v4356_v30 = vceil.f32 %v2048_v62  ;;  %v8079_v62 = vld [vmem:[#allocation29_spill] sm:$0xff] }
 0x2f2   : > { %v6463_v48 = vpop.permute.xlu0 %1432  ;;  %v6488_v44 = vsel %vm4355_vm3, %v4356_v30, %v4357_v34  ;;  %v4372_v30 = vfloor.f32 %v6476_v9  ;;  %v2102_v9 = vmul.f32 8.0, %v6126_v14 }
 0x2f5   : > { %1867 = vperm.xlu2 %4657, %v6382_v24   ;;  %1877 = vperm.xlu1 %4656, %v6409_v42   ;;  %v2052_v24 = vmul.f32 8.0, %v8077_v22  ;;  %v1226_v42 = vsub.s32 %v6468_v29, %v6305_v10  ;;  %v2095_v22 = vmul.f32 8.0, %v8079_v62  ;;  %v1225_v10 = vsub.s32 %v6468_v29, %v6359_v51 }
 0x2f6   : > { %v8080_v62 = vmov 0.0  }
 0x2f7   : > { %v6471_v12 = vpop.permute.xlu2 %1500  ;;  %v6473_v11 = vpop.permute.xlu1 %1444  ;;  %vm1450_vm1 = vcmp.eq.s32.totalorder %v1226_v42, %v6426_v0  ;;  %vm1346_vm7 = vcmp.eq.s32.totalorder %v1226_v42, %v6374_v16  ;;  %v4376_v8 = vceil.f32 %v2052_v24  ;;  %v4377_v39 = vfloor.f32 %v2052_v24  ;;  %v8082_v0 = vld [vmem:[#allocation66_spill] sm:$0xff]  ;;  %v8083_v16 = vld [vmem:[#allocation32_spill] sm:$0xff] }
 0x2f8   : > { %1872 = vperm.xlu0 %4655, %v6396_v21   ;;  %v4363_v21 = vsel %vm4360_vm6, %v4361_v31, %v4362_v33  ;;  %vm1345_vm15 = vcmp.eq.s32.totalorder %v1225_v10, %v6384_v3  ;;  %v3993_v51 = vsel %vm1450_vm1, 1.0, %v8080_v62  ;;  %vm4375_vm8 = vcmp.lt.s32.totalorder %v2052_v24, 0  ;;  %v8081_v33 = vld [vmem:[#allocation20_spill] sm:$0xff] }
 0x2f9   : > { %v2054_v31 = vmul.f32 8.0, %v8081_v33  ;;  %v4364_v27 = vcvt.f32.s32 %v4363_v21  ;;  %v6508_v35 = vadd.f32 -0.5, %v2095_v22  ;;  %vm1449_vm9 = vcmp.eq.s32.totalorder %v1225_v10, %v6445_v61 }
 0x2fa   : > { %v6486_v13 = vpop.permute.xlu0 %1441  ;;  %v2053_v40 = vmul.f32 8.0, %v8082_v0  ;;  %v2098_v42 = vmul.f32 8.0, %v8083_v16  ;;  %v4366_v22 = vceil.f32 %v6483_v7  ;;  %v4367_v21 = vfloor.f32 %v6483_v7  ;;  %v8088_v7 = vld [vmem:[#allocation21_spill] sm:$0xff] }
 0x2fb   : > { %v3992_v61 = vsel %vm1449_vm9, 1.0, %v8080_v62  ;;  %v4387_v33 = vfloor.f32 %v2054_v31  ;;  %vm4385_vm5 = vcmp.lt.s32.totalorder %v2054_v31, 0 }
 0x2fc   : > { %vm4380_vm11 = vcmp.lt.s32.totalorder %v2053_v40, 0 }
 0x2fd   : > { %1882 = vperm.xlu2 %4657, %v6399_v38   ;;  %1892 = vperm.xlu1 %4656, %v6424_v49   ;;  %v4353_v38 = vsel %vm4350_vm4, %v4351_v1, %v4352_v15  ;;  %v3985_v49 = vsel %vm1346_vm7, 1.0, %v8080_v62  ;;  %v3984_v15 = vsel %vm1345_vm15, 1.0, %v8080_v62  ;;  %v4378_v1 = vsel %vm4375_vm8, %v4376_v8, %v4377_v39 }
 0x2fe   : > { %v1418_v3 = vmul.f32 %v3985_v49, %v6433_v46  ;;  %v4354_v24 = vcvt.f32.s32 %v4353_v38  ;;  %v8084_v46 = vld [vmem:[#allocation19_spill] sm:$0xff]  ;;  %v4386_v49 = vceil.f32 %v2054_v31  ;;  %v1417_v0 = vmul.f32 %v3984_v15, %v6376_v60 }
 0x2ff   : > { %v4660_v34 = vpop.permute.xlu2 %4659  ;;  %v1481_v37 = vpop.permute.xlu1 %1480  ;;  %v4381_v39 = vceil.f32 %v2053_v40  ;;  %v4382_v8 = vfloor.f32 %v2053_v40  ;;  %v6527_v38 = vadd.f32 -0.5, %v2098_v42 }
 0x300   : > { %v1514_v55 = vmul.f32 %v3993_v51, %v1481_v37  ;;  %1887 = vperm.xlu0 %4655, %v6415_v57   ;;  %v2096_v51 = vmul.f32 8.0, %v8084_v46  ;;  %v6522_v23 = vunpack.i.h.bf16 %v4660_v34 }
 0x302   : > { %v1522_v37 = vadd.f32 %v1514_v55, %v1418_v3  ;;  %v1476_v10 = vpop.permute.xlu0 %1475  ;;  %8085 = vst [vmem:[#allocation56_spill] sm:$0xff] %v6522_v23  ;;  %v6525_v55 = vfloor.f32 %v6508_v35  ;;  %v6529_v3 = vunpack.i.l.bf16 %v4660_v34  ;;  %v6539_v31 = vadd.f32 -0.5, %v2096_v51 }
 0x303   : > { %v1513_v57 = vmul.f32 %v3992_v61, %v1476_v10  ;;  %v4368_v61 = vsel %vm4365_vm14, %v4366_v22, %v4367_v21  ;;  %v4373_v10 = vsel %vm4370_vm10, %v4371_v6, %v4372_v30  ;;  %v6551_v30 = vfloor.f32 %v6527_v38 }
 0x304   : > { %8086 = vst [vmem:[#allocation59_spill] sm:$0xff] %v6529_v3  ;;  %v1570_v46 = vmul.f32 %v6522_v23, %v1522_v37  ;;  %v2127_v42 = vmax.f32 %v6525_v55, 0.0  ;;  %v6543_v37 = vsel %vm4385_vm5, %v4386_v49, %v4387_v33  ;;  %v2101_v23 = vmul.f32 8.0, %v6122_v26 }
 0x305   : > { %2070 = vperm.xlu1 %4656, %v4364_v27   ;;  %2064 = vperm.xlu2 %4657, %v4354_v24   ;;  %v1521_v16 = vadd.f32 %v1513_v57, %v1417_v0  ;;  %v4359_v27 = vcvt.f32.s32 %v6488_v44  ;;  %v4379_v24 = vcvt.f32.s32 %v4378_v1  ;;  %v8087_v0 = vld [vmem:[#allocation22_spill] sm:$0xff]  ;;  %v4383_v44 = vsel %vm4380_vm11, %v4381_v39, %v4382_v8 }
 0x306   : > { %v2097_v57 = vmul.f32 8.0, %v8087_v0  ;;  %v2099_v1 = vmul.f32 8.0, %v8088_v7  ;;  %v1230_v33 = vsub.s32 %v6468_v29, %v6372_v52  ;;  %v4369_v26 = vcvt.f32.s32 %v4368_v61 }
 0x307   : > { %v6532_v60 = vpop.permute.xlu2 %4674  ;;  %v1496_v15 = vpop.permute.xlu1 %1495  ;;  %v1569_v34 = vmul.f32 %v6529_v3, %v1521_v16  ;;  %v8089_v16 = vld [vmem:[#allocation23_spill] sm:$0xff]  ;;  %v4374_v51 = vcvt.f32.s32 %v4373_v10  ;;  %v2135_v40 = vmin.f32 %v2127_v42, 7.0  ;;  %v4384_v49 = vcvt.f32.s32 %v4383_v44 }
 0x308   : > { %2067 = vperm.xlu0 %4655, %v4359_v27   ;;  %v2100_v22 = vmul.f32 8.0, %v8089_v16  ;;  %v4389_v14 = vcvt.f32.s32 %v6543_v37  ;;  %v6563_v39 = vadd.f32 -0.5, %v2097_v57  ;;  %v6565_v8 = vadd.f32 -0.5, %v2101_v23 }
 0x309   : > { %v1649_v6 = vpack.c.bf16 %v1570_v46, %v1569_v34  ;;  %v6561_v46 = vfloor.f32 %v6539_v31  ;;  %v1229_v52 = vsub.s32 %v6468_v29, %v6279_v63  ;;  %vm1454_vm0 = vcmp.eq.s32.totalorder %v1230_v33, %v6486_v13 }
 0x30a   : > { %v6556_v21 = vpop.permute.xlu0 %1490  ;;  %v6570_v27 = vadd.f32 -0.5, %v2099_v1  ;;  %v1227_v61 = vsub.s32 %v6468_v29, %v6224_v18  ;;  %v2130_v23 = vmax.f32 %v6551_v30, 0.0  ;;  %v6581_v42 = vadd.f32 -0.5, %v2100_v22 }
 0x30b   : > { %4028 = vmatmul.msk.bf16.vlgmr.msra.gmra.mxu0 %vm1920_vm13, %v1649_v6  ;;  %v1228_v63 = vsub.s32 %v6468_v29, %v6339_v17  ;;  %v6587_v13 = vsub.s32 %v6468_v29, %v6327_v54  ;;  %vm1453_vm12 = vcmp.eq.s32.totalorder %v1229_v52, %v6435_v53  ;;  %v6592_v18 = vsub.s32 %v6468_v29, %v6366_v19 }
 0x30c   : > { %v3997_v37 = vsel %vm1454_vm0, 1.0, %v8080_v62  ;;  %v4391_v57 = vcvt.f32.s32 %v2135_v40  ;;  %v2128_v44 = vmax.f32 %v6561_v46, 0.0  ;;  %vm1350_vm3 = vcmp.eq.s32.totalorder %v1230_v33, %v6368_v59 }
 0x30d   : > { %2079 = vperm.xlu1 %4656, %v4379_v24   ;;  %2073 = vperm.xlu2 %4657, %v4369_v26   ;;  %v6572_v24 = vadd.f32 -0.5, %v2102_v9  ;;  %vm1349_vm6 = vcmp.eq.s32.totalorder %v1229_v52, %v6394_v28  ;;  %v6599_v17 = vfloor.f32 %v6563_v39  ;;  %v6602_v54 = vfloor.f32 %v6565_v8 }
 0x30e   : > { %vm1451_vm1 = vcmp.eq.s32.totalorder %v1227_v61, %v6463_v48  ;;  %v3996_v19 = vsel %vm1453_vm12, 1.0, %v8080_v62  ;;  %v2138_v53 = vmin.f32 %v2130_v23, 7.0  ;;  %v6607_v1 = vfloor.f32 %v6570_v27 }
 0x30f   : > { %v6576_v10 = vpop.permute.xlu2 %1683  ;;  %v6578_v34 = vpop.permute.xlu1 %1510  ;;  %vm1348_vm4 = vcmp.eq.s32.totalorder %v1228_v63, %v6405_v20  ;;  %vm1452_vm7 = vcmp.eq.s32.totalorder %v1228_v63, %v6456_v41  ;;  %v1518_v59 = vmul.f32 %v3997_v37, %v6471_v12  ;;  %v1517_v28 = vmul.f32 %v3996_v19, %v1496_v15 }
 0x310   : > { %2076 = vperm.xlu0 %4655, %v4374_v51   ;;  %v3989_v6 = vsel %vm1350_vm3, 1.0, %v8080_v62  ;;  %v3988_v22 = vsel %vm1349_vm6, 1.0, %v8080_v62  ;;  %v2136_v33 = vmin.f32 %v2128_v44, 7.0  ;;  %v6615_v26 = vfloor.f32 %v6581_v42 }
 0x311   : > { %v1422_v51 = vmul.f32 %v3989_v6, %v6437_v58  ;;  %v1421_v40 = vmul.f32 %v3988_v22, %v6441_v43  ;;  %v3994_v52 = vsel %vm1451_vm1, 1.0, %v8080_v62  ;;  %v2129_v12 = vmax.f32 %v6599_v17, 0.0 }
 0x312   : > { %v1506_v9 = vpop.permute.xlu0 %1505  ;;  %vm1347_vm10 = vcmp.eq.s32.totalorder %v1227_v61, %v6354_v36  ;;  %v3987_v15 = vsel %vm1348_vm4, 1.0, %v8080_v62  ;;  %v3995_v23 = vsel %vm1452_vm7, 1.0, %v8080_v62  ;;  %v2133_v37 = vmax.f32 %v6602_v54, 0.0 }
 0x313   : > { %v1526_v48 = vadd.f32 %v1518_v59, %v1422_v51  ;;  %v1515_v36 = vmul.f32 %v3994_v52, %v6454_v45  ;;  %v1516_v20 = vmul.f32 %v3995_v23, %v6556_v21  ;;  %v4397_v61 = vcvt.f32.s32 %v2138_v53 }
 0x314   : > { %v2131_v19 = vmax.f32 %v6607_v1, 0.0  ;;  %v3986_v41 = vsel %vm1347_vm10, 1.0, %v8080_v62  ;;  %v2132_v59 = vmax.f32 %v6615_v26, 0.0  ;;  %vm1351_vm15 = vcmp.eq.s32.totalorder %v6592_v18, %v6420_v50 }
 0x315   : > { %2184 = vperm.xlu1 %4656, %v4391_v57   ;;  %2082 = vperm.xlu2 %4657, %v4384_v49   ;;  %v1525_v57 = vadd.f32 %v1517_v28, %v1421_v40  ;;  %v1420_v28 = vmul.f32 %v3987_v15, %v6392_v25  ;;  %v1419_v45 = vmul.f32 %v3986_v41, %v6428_v4  ;;  %v4393_v21 = vcvt.f32.s32 %v2136_v33 }
 0x316   : > { %vm1456_vm8 = vcmp.eq.s32.totalorder %v6587_v13, %v6443_v56  ;;  %vm1455_vm9 = vcmp.eq.s32.totalorder %v6592_v18, %v6473_v11  ;;  %v2137_v53 = vmin.f32 %v2129_v12, 7.0  ;;  %vm1352_vm14 = vcmp.eq.s32.totalorder %v6587_v13, %v6413_v47 }
 0x317   : > { %v6630_v58 = vpop.permute.xlu2 %1698  ;;  %v4670_v43 = vpop.permute.xlu1 %4669  ;;  %v1523_v51 = vadd.f32 %v1515_v36, %v1419_v45  ;;  %v1524_v40 = vadd.f32 %v1516_v20, %v1420_v28  ;;  %v3990_v50 = vsel %vm1351_vm15, 1.0, %v8080_v62  ;;  %v2141_v4 = vmin.f32 %v2133_v37, 7.0 }
 0x318   : > { %v6633_v49 = vunpack.i.h.bf16 %v4670_v43  ;;  %v6635_v44 = vunpack.i.l.bf16 %v4670_v43  ;;  %2085 = vperm.xlu0 %4655, %v4389_v14   ;;  %v6661_v33 = vfloor.f32 %v6572_v24  ;;  %v3999_v12 = vsel %vm1456_vm8, 1.0, %v8080_v62 }
 0x319   : > { %v3998_v15 = vsel %vm1455_vm9, 1.0, %v8080_v62  ;;  %v4395_v20 = vcvt.f32.s32 %v2137_v53  ;;  %v3991_v56 = vsel %vm1352_vm14, 1.0, %v8080_v62  ;;  %v1423_v18 = vmul.f32 %v3990_v50, %v6411_v32 }
 0x31a   : > { %8090 = vst [vmem:[#allocation52_spill] sm:$0xff] %v6633_v49  ;;  %v1573_v63 = vmul.f32 %v6635_v44, %v1525_v57  ;;  %v1574_v6 = vmul.f32 %v6633_v49, %v1526_v48  ;;  %v4665_v14 = vpop.permute.xlu0 %4664  ;;  %v1520_v57 = vmul.f32 %v3999_v12, %v6578_v34  ;;  %v1519_v36 = vmul.f32 %v3998_v15, %v1506_v9 }
 0x31b   : > { %8091 = vst [vmem:[#allocation39_spill] sm:$0xff] %v6635_v44  ;;  %v6652_v52 = vunpack.i.h.bf16 %v4665_v14  ;;  %v6654_v25 = vunpack.i.l.bf16 %v4665_v14  ;;  %v1424_v41 = vmul.f32 %v3991_v56, %v6450_v5  ;;  %v2134_v45 = vmax.f32 %v6661_v33, 0.0 }
 0x31c   : > { %v1651_v22 = vpack.c.bf16 %v1574_v6, %v1573_v63  ;;  %v4403_v63 = vcvt.f32.s32 %v2141_v4  ;;  %v2140_v6 = vmin.f32 %v2132_v59, 7.0  ;;  %v1527_v34 = vadd.f32 %v1519_v36, %v1423_v18 }
 0x31d   : > { %8092 = vst [vmem:[#allocation15_spill] sm:$0xff] %v6652_v52  ;;  %2193 = vperm.xlu1 %4656, %v4397_v61   ;;  %2187 = vperm.xlu2 %4657, %v4393_v21   ;;  %v1571_v23 = vmul.f32 %v6654_v25, %v1523_v51  ;;  %v1572_v43 = vmul.f32 %v6652_v52, %v1524_v40  ;;  %v2139_v61 = vmin.f32 %v2131_v19, 7.0  ;;  %v6689_v47 = vunpack.i.h.bf16 %v6532_v60 }
 0x31e   : > { %8093 = vst [vmem:[#allocation58_spill] sm:$0xff] %v6654_v25  ;;  %4030 = vmatmul.msk.bf16.vlgmr.msra.gmra.mxu2 %vm1920_vm13, %v1651_v22  ;;  %v1528_v28 = vadd.f32 %v1520_v57, %v1424_v41  ;;  %v6692_v32 = vunpack.i.l.bf16 %v6532_v60  ;;  %v6700_v59 = vsub.f32 %v6539_v31, %v6561_v46  ;;  %v4401_v53 = vcvt.f32.s32 %v2140_v6 }
 0x31f   : > { %v6673_v48 = vpop.permute.xlu2 %1745  ;;  %v6675_v37 = vpop.permute.xlu1 %1678  ;;  %v1650_v11 = vpack.c.bf16 %v1572_v43, %v1571_v23  ;;  %v4399_v19 = vcvt.f32.s32 %v2139_v61  ;;  %8094 = vst [vmem:[#allocation61_spill] sm:$0xff] %v6689_v47  ;;  %v2142_v22 = vmin.f32 %v2134_v45, 7.0  ;;  %v6709_v50 = vsub.f32 %v6508_v35, %v6525_v55 }
 0x320   : > { %2190 = vperm.xlu0 %4655, %v4395_v20   ;;  %8095 = vst [vmem:[#allocation51_spill] sm:$0xff] %v6692_v32  ;;  %v1576_v21 = vmul.f32 %v6689_v47, %v1528_v28  ;;  %v1575_v14 = vmul.f32 %v6692_v32, %v1527_v34  ;;  %v2232_v51 = vsub.f32 1.0, %v6700_v59  ;;  %v6718_v15 = vsub.f32 %v6570_v27, %v6607_v1 }
 0x321   : > { %4029 = vmatmul.msk.bf16.gmra.mxu0 %vm1920_vm13, %v1650_v11  ;;  %v4405_v40 = vcvt.f32.s32 %v2142_v22  ;;  %v2231_v23 = vsub.f32 1.0, %v6709_v50  ;;  %v6723_v43 = vsub.f32 %v6563_v39, %v6599_v17  ;;  %v2153_v35 = vadd.f32 1.0, %v6599_v17 }
 0x322   : > { %v6685_v9 = vpop.permute.xlu0 %1673  ;;  %v1652_v4 = vpack.c.bf16 %v1576_v21, %v1575_v14  ;;  %v2151_v57 = vadd.f32 1.0, %v6525_v55  ;;  %v2235_v36 = vsub.f32 1.0, %v6718_v15  ;;  %v6733_v27 = vsub.f32 %v6527_v38, %v6551_v30 }
 0x323   : > { %v2233_v61 = vsub.f32 1.0, %v6723_v43  ;;  %v2161_v56 = vmax.f32 %v2153_v35, 0.0  ;;  %v2152_v11 = vadd.f32 1.0, %v6561_v46  ;;  %v6742_v18 = vsub.f32 %v6572_v24, %v6661_v33 }
 0x324   : > { %v2159_v39 = vmax.f32 %v2151_v57, 0.0  ;;  %v6746_v41 = vsub.f32 %v6581_v42, %v6615_v26  ;;  %v2234_v38 = vsub.f32 1.0, %v6733_v27  ;;  %v2156_v46 = vadd.f32 1.0, %v6615_v26 }
 0x325   : > { %2202 = vperm.xlu1 %4656, %v4403_v63   ;;  %2196 = vperm.xlu2 %4657, %v4399_v19   ;;  %v2169_v63 = vmin.f32 %v2161_v56, 7.0  ;;  %v2160_v6 = vmax.f32 %v2152_v11, 0.0  ;;  %v2154_v34 = vadd.f32 1.0, %v6551_v30  ;;  %v2238_v19 = vsub.f32 1.0, %v6742_v18 }
 0x326   : > { %v2167_v28 = vmin.f32 %v2159_v39, 7.0  ;;  %v2236_v45 = vsub.f32 1.0, %v6746_v41  ;;  %v6755_v24 = vsub.f32 %v6565_v8, %v6602_v54  ;;  %v2155_v42 = vadd.f32 1.0, %v6607_v1 }
 0x327   : > { %v6694_v5 = vpop.permute.xlu2 %1760  ;;  %v6696_v13 = vpop.permute.xlu1 %1693  ;;  %v4417_v14 = vceil.f32 %v2169_v63  ;;  %v2168_v22 = vmin.f32 %v2160_v6, 7.0  ;;  %v2164_v26 = vmax.f32 %v2156_v46, 0.0  ;;  %vm4416_vm11 = vcmp.lt.s32.totalorder %v2169_v63, 0 }
 0x328   : > { %2199 = vperm.xlu0 %4655, %v4401_v53   ;;  %v4418_v53 = vfloor.f32 %v2169_v63  ;;  %v4407_v30 = vceil.f32 %v2167_v28  ;;  %vm4406_vm5 = vcmp.lt.s32.totalorder %v2167_v28, 0  ;;  %v2163_v8 = vmax.f32 %v2155_v42, 0.0 }
 0x329   : > { %v2237_v1 = vsub.f32 1.0, %v6755_v24  ;;  %v2172_v57 = vmin.f32 %v2164_v26, 7.0  ;;  %v4412_v56 = vceil.f32 %v2168_v22  ;;  %v4413_v11 = vfloor.f32 %v2168_v22 }
 0x32a   : > { %v6705_v60 = vpop.permute.xlu0 %1688  ;;  %v4419_v35 = vsel %vm4416_vm11, %v4417_v14, %v4418_v53  ;;  %vm4411_vm0 = vcmp.lt.s32.totalorder %v2168_v22, 0  ;;  %v2171_v63 = vmin.f32 %v2163_v8, 7.0  ;;  %v2158_v6 = vadd.f32 1.0, %v6661_v33 }
 0x32b   : > { %v4414_v42 = vsel %vm4411_vm0, %v4412_v56, %v4413_v11  ;;  %vm4431_vm12 = vcmp.lt.s32.totalorder %v2172_v57, 0 }
 0x32c   : > { %v4415_v26 = vcvt.f32.s32 %v4414_v42  ;;  %v4427_v33 = vceil.f32 %v2171_v63  ;;  %vm4426_vm6 = vcmp.lt.s32.totalorder %v2171_v63, 0 }
 0x32d   : > { %2246 = vperm.xlu1 %4656, %v2232_v51   ;;  %2205 = vperm.xlu2 %4657, %v4405_v40   ;;  %v4408_v51 = vfloor.f32 %v2167_v28  ;;  %v2162_v40 = vmax.f32 %v2154_v34, 0.0  ;;  %v4432_v34 = vceil.f32 %v2172_v57 }
 0x32e   : > { %4031 = vmatmul.msk.bf16.gmra.mxu2 %vm1920_vm13, %v1652_v4 }
 0x32f   : > { %v6712_v31 = vpop.permute.xlu2 %1775  ;;  %v6714_v12 = vpop.permute.xlu1 %1708  ;;  %v2170_v39 = vmin.f32 %v2162_v40, 7.0  ;;  %v4428_v40 = vfloor.f32 %v2171_v63 }
 0x330   : > { %8096 = vst [vmem:[#allocation50_spill] sm:$0xff] %v6712_v31  ;;  %2241 = vperm.xlu0 %4655, %v2231_v23  }
 0x331   : > { %v4423_v14 = vfloor.f32 %v2170_v39  ;;  %vm4421_vm3 = vcmp.lt.s32.totalorder %v2170_v39, 0 }
 0x332   : > { %v6728_v20 = vpop.permute.xlu0 %1703 }
 0x335   : > { %2261 = vperm.xlu1 %4656, %v2235_v36   ;;  %2251 = vperm.xlu2 %4657, %v2233_v61   ;;  %v2157_v36 = vadd.f32 1.0, %v6602_v54  ;;  %v4409_v61 = vsel %vm4406_vm5, %v4407_v30, %v4408_v51  ;;  %v4422_v54 = vceil.f32 %v2170_v39 }
 0x336   : > { %v4410_v28 = vcvt.f32.s32 %v4409_v61  ;;  %v4429_v61 = vsel %vm4426_vm6, %v4427_v33, %v4428_v40  ;;  %v2400_v33 = vmul.f32 8.0, %v6233_v2 }
 0x337   : > { %v6736_v17 = vpop.permute.xlu2 %1798  ;;  %v6738_v55 = vpop.permute.xlu1 %1755  ;;  %v4424_v51 = vsel %vm4421_vm3, %v4422_v54, %v4423_v14 }
 0x338   : > { %2256 = vperm.xlu0 %4655, %v2234_v38   ;;  %v4420_v38 = vcvt.f32.s32 %v4419_v35  ;;  %v6791_v40 = vadd.f32 -0.5, %v2400_v33  ;;  %v8104_v33 = vld [vmem:[#allocation47_spill] sm:$0xff] }
 0x33a   : > { %v6758_v21 = vpop.permute.xlu0 %1750 }
 0x33d   : > { %2276 = vperm.xlu1 %4656, %v2238_v19   ;;  %2266 = vperm.xlu2 %4657, %v2236_v45   ;;  %v4433_v19 = vfloor.f32 %v2172_v57  ;;  %v2165_v45 = vmax.f32 %v2157_v36, 0.0  ;;  %v4425_v57 = vcvt.f32.s32 %v4424_v51 }
 0x33f   : > { %v6760_v4 = vpop.permute.xlu2 %1813  ;;  %v6762_v23 = vpop.permute.xlu1 %1770  ;;  %v4434_v30 = vsel %vm4431_vm12, %v4432_v34, %v4433_v19  ;;  %v2173_v8 = vmin.f32 %v2165_v45, 7.0  ;;  %v4430_v34 = vcvt.f32.s32 %v4429_v61  ;;  %v8100_v61 = vld [vmem:[#allocation49_spill] sm:$0xff] }
 0x340   : > { %2271 = vperm.xlu0 %4655, %v2237_v1   ;;  %v2166_v1 = vmax.f32 %v2158_v6, 0.0  ;;  %v4435_v35 = vcvt.f32.s32 %v4434_v30 }
 0x341   : > { %v4437_v56 = vceil.f32 %v2173_v8  ;;  %v4438_v11 = vfloor.f32 %v2173_v8  ;;  %vm4436_vm1 = vcmp.lt.s32.totalorder %v2173_v8, 0  ;;  %v8098_v8 = vld [vmem:[#allocation45_spill] sm:$0xff] }
 0x342   : > { %v6767_v46 = vpop.permute.xlu0 %1765  ;;  %v2174_v39 = vmin.f32 %v2166_v1, 7.0 }
 0x343   : > { %v4439_v19 = vsel %vm4436_vm1, %v4437_v56, %v4438_v11  ;;  %v2403_v56 = vmul.f32 8.0, %v8100_v61  ;;  %v6803_v11 = vfloor.f32 %v6791_v40 }
 0x344   : > { %v4442_v6 = vceil.f32 %v2174_v39  ;;  %v4443_v45 = vfloor.f32 %v2174_v39  ;;  %vm4441_vm4 = vcmp.lt.s32.totalorder %v2174_v39, 0  ;;  %v4440_v42 = vcvt.f32.s32 %v4439_v19 }
 0x345   : > { %2294 = vperm.xlu1 %4656, %v4420_v38   ;;  %2288 = vperm.xlu2 %4657, %v4410_v28  }
 0x346   : > { %v4444_v54 = vsel %vm4441_vm4, %v4442_v6, %v4443_v45  ;;  %v8102_v45 = vld [vmem:[#allocation48_spill] sm:$0xff] }
 0x347   : > { %v6769_v53 = vpop.permute.xlu2 %1828  ;;  %v6771_v22 = vpop.permute.xlu1 %1793  ;;  %v4445_v30 = vcvt.f32.s32 %v4444_v54 }
 0x348   : > { %2291 = vperm.xlu0 %4655, %v4415_v26  }
 0x34a   : > { %v6773_v36 = vpop.permute.xlu0 %1780 }
 0x34b   : > { %8097 = vst [vmem:[#allocation17_spill] sm:$0xff] %v6773_v36 }
 0x34d   : > { %2303 = vperm.xlu1 %4656, %v4435_v35   ;;  %2297 = vperm.xlu2 %4657, %v4425_v57  }
 0x34f   : > { %v6775_v38 = vpop.permute.xlu2 %1867  ;;  %v6777_v28 = vpop.permute.xlu1 %1808 }
 0x350   : > { %2300 = vperm.xlu0 %4655, %v4430_v34   ;;  %v6810_v34 = vadd.f32 -0.5, %v2403_v56 }
 0x352   : > { %v6779_v63 = vpop.permute.xlu0 %1803  ;;  %v6825_v56 = vfloor.f32 %v6810_v34 }
 0x355   : > { %2337 = vperm.xlu1 %4656, %v6709_v50   ;;  %2306 = vperm.xlu2 %4657, %v4440_v42   ;;  %v2399_v50 = vmul.f32 8.0, %v8098_v8  ;;  %v2402_v42 = vmul.f32 8.0, %v8102_v45 }
 0x357   : > { %v6782_v14 = vpop.permute.xlu2 %1882  ;;  %v6784_v26 = vpop.permute.xlu1 %1823  ;;  %v6799_v57 = vadd.f32 -0.5, %v2399_v50  ;;  %v6827_v61 = vadd.f32 -0.5, %v2402_v42  ;;  %v2435_v42 = vmax.f32 %v6825_v56, 0.0 }
 0x358   : > { %2309 = vperm.xlu0 %4655, %v4445_v30  }
 0x359   : > { %v6816_v6 = vfloor.f32 %v6799_v57 }
 0x35a   : > { %v6787_v51 = vpop.permute.xlu0 %1818 }
 0x35d   : > { %2352 = vperm.xlu1 %4656, %v6733_v27   ;;  %2342 = vperm.xlu2 %4657, %v6700_v59   ;;  %v8101_v27 = vld [vmem:[#allocation31_spill] sm:$0xff] }
 0x35e   : > { %v2401_v39 = vmul.f32 8.0, %v8101_v27  ;;  %v8105_v27 = vld [vmem:[#allocation53_spill] sm:$0xff] }
 0x35f   : > { %v6794_v1 = vpop.permute.xlu1 %1862  ;;  %v6796_v35 = vpop.permute.xlu2 %2064  ;;  %v2404_v8 = vmul.f32 8.0, %v8105_v27 }
 0x360   : > { %8099 = vst [vmem:[#allocation55_spill] sm:$0xff] %v6796_v35  ;;  %2347 = vperm.xlu0 %4655, %v6723_v43   ;;  %v2432_v43 = vmax.f32 %v6803_v11, 0.0  ;;  %v4066_v54 = vadd.f32 -0.5, %v2401_v39  ;;  %v1667_v39 = vld [vmem:[#allocation3 + $0x8] sm:$0xf] }
 0x361   : > { %v4069_v49 = vadd.f32 -0.5, %v2404_v8 }
 0x362   : > { %v6806_v59 = vpop.permute.xlu0 %1857  ;;  %v2440_v50 = vmin.f32 %v2432_v43, 7.0  ;;  %v6832_v45 = vfloor.f32 %v4066_v54  ;;  %v8106_v43 = vld [vmem:[#allocation43_spill] sm:$0xff] }
 0x363   : > { %v2405_v47 = vmul.f32 8.0, %v8106_v43  ;;  %v6856_v7 = vfloor.f32 %v4069_v49 }
 0x364   : > { %v2433_v25 = vmax.f32 %v6832_v45, 0.0 }
 0x365   : > { %2367 = vperm.xlu1 %4656, %v6755_v24   ;;  %2357 = vperm.xlu2 %4657, %v6718_v15   ;;  %v2406_v24 = vmul.f32 8.0, %v8104_v33  ;;  %v2431_v15 = vmax.f32 %v6816_v6, 0.0 }
 0x366   : > { %v2441_v43 = vmin.f32 %v2433_v25, 7.0 }
 0x367   : > { %v6812_v19 = vpop.permute.xlu1 %1877  ;;  %v6819_v30 = vpop.permute.xlu2 %2073  ;;  %v6835_v33 = vadd.f32 -0.5, %v2406_v24  ;;  %v2439_v32 = vmin.f32 %v2431_v15, 7.0  ;;  %v2443_v24 = vmin.f32 %v2435_v42, 7.0  ;;  %v6851_v15 = vadd.f32 -0.5, %v2405_v47 }
 0x368   : > { %8103 = vst [vmem:[#allocation46_spill] sm:$0xff] %v6819_v30  ;;  %2362 = vperm.xlu0 %4655, %v6746_v41   ;;  %v1983_v41 = vunpack.c.l.b16 %v1667_v39  ;;  %v2436_v47 = vmax.f32 %v6856_v7, 0.0 }
 0x369   : > { %v6849_v39 = vfloor.f32 %v6835_v33  ;;  %v6865_v25 = vfloor.f32 %v6851_v15 }
 0x36a   : > { %v6830_v2 = vpop.permute.xlu0 %1872  ;;  %v1985_v52 = vpack.c.b16 %v1983_v41, %v1983_v41  ;;  %v4230_v41 = vld [vmem:[#allocation3] sm:$0xff] }
 0x36d   : > { %2506 = vperm.xlu1 %4656, %v2440_v50   ;;  %2372 = vperm.xlu2 %4657, %v6742_v18   ;;  %v6845_v50 = vfloor.f32 %v6827_v61  ;;  %v2000_v18 = vsel %vm1933_vm2, %v1985_v52, 0  ;;  %v2438_v52 = vmax.f32 %v6849_v39, 0.0 }
 0x36e   : > { %2008 = vmatpush.bf16.msra.mxu1 %v2000_v18  ;;  %4252 = vmatpush.bf16.msra.mxu3 %v2000_v18 }
 0x36f   : > { %v6838_v44 = vpop.permute.xlu1 %1892  ;;  %v6841_v27 = vpop.permute.xlu2 %2082  ;;  %v2434_v16 = vmax.f32 %v6845_v50, 0.0  ;;  %v2446_v3 = vmin.f32 %v2438_v52, 7.0 }
 0x370   : > { %2501 = vperm.xlu0 %4655, %v2439_v32  }
 0x371   : > { %v2442_v42 = vmin.f32 %v2434_v16, 7.0  ;;  %v6873_v16 = vsub.f32 %v4066_v54, %v6832_v45  ;;  %v6892_v54 = vld [vmem:[%s7667_s3] ss:$0 sm:$0xff] }
 0x372   : > { %v6853_v8 = vpop.permute.xlu0 %1887  ;;  %2009 = vmatpush.bf16.msra.mxu1 %v4230_v41  ;;  %4253 = vmatpush.bf16.msra.mxu3 %v4230_v41  ;;  %vm1711_vm2 = vcmp.eq.f32.partialorder %v6892_v54, %v6685_v9  ;;  %vm1832_vm7 = vcmp.eq.f32.partialorder %v6892_v54, %v6736_v17  ;;  %vm1831_vm10 = vcmp.eq.f32.partialorder %v6892_v54, %v6771_v22 }
 0x373   : > { %8110 = vst [vmem:[#allocation42_spill] sm:$0xff] %v6873_v16  ;;  %v2565_v52 = vsub.f32 1.0, %v6873_v16  ;;  %vm1712_vm15 = vcmp.eq.f32.partialorder %v6892_v54, %v6675_v37  ;;  %v4008_v9 = vsel %vm1711_vm2, 1.0, %v8080_v62  ;;  %v4017_v17 = vsel %vm1832_vm7, 1.0, %v8080_v62 }
 0x374   : > { %v1896_v35 = vmul.f32 %v4017_v17, %v6794_v1  ;;  %v6939_v1 = vsub.f32 %v6851_v15, %v6865_v25  ;;  %v6949_v15 = vsub.f32 %v6835_v33, %v6849_v39  ;;  %vm1833_vm14 = vcmp.eq.f32.partialorder %v6892_v54, %v6779_v63 }
 0x375   : > { %2521 = vperm.xlu1 %4656, %v2443_v24   ;;  %2511 = vperm.xlu2 %4657, %v2441_v43   ;;  %v2444_v24 = vmin.f32 %v2436_v47, 7.0  ;;  %v2437_v43 = vmax.f32 %v6865_v25, 0.0  ;;  %v6887_v47 = vsub.f32 %v6791_v40, %v6803_v11  ;;  %v6904_v40 = vsub.f32 %v6827_v61, %v6845_v50 }
 0x376   : > { %v6917_v61 = vsub.f32 %v6810_v34, %v6825_v56  ;;  %v2569_v17 = vsub.f32 1.0, %v6939_v1  ;;  %vm1836_vm5 = vcmp.eq.f32.partialorder %v6892_v54, %v6787_v51  ;;  %vm1714_vm0 = vcmp.eq.f32.partialorder %v6892_v54, %v6705_v60 }
 0x377   : > { %v6858_v32 = vpop.permute.xlu1 %2070  ;;  %v6861_v18 = vpop.permute.xlu2 %2187  ;;  %v2445_v41 = vmin.f32 %v2437_v43, 7.0  ;;  %v2564_v43 = vsub.f32 1.0, %v6887_v47  ;;  %8113 = vst [vmem:[#allocation57_spill] sm:$0xff] %v6904_v40  ;;  %vm1834_vm12 = vcmp.eq.f32.partialorder %v6892_v54, %v6777_v28  ;;  %vm1835_vm3 = vcmp.eq.f32.partialorder %v6892_v54, %v6760_v4 }
 0x378   : > { %8107 = vst [vmem:[#allocation16_spill] sm:$0xff] %v6858_v32  ;;  %2516 = vperm.xlu0 %4655, %v2442_v42   ;;  %vm1713_vm6 = vcmp.eq.f32.partialorder %v6892_v54, %v6576_v10  ;;  %vm1716_vm1 = vcmp.eq.f32.partialorder %v6892_v54, %v6630_v58  ;;  %vm1715_vm4 = vcmp.eq.f32.partialorder %v6892_v54, %v6696_v13  ;;  %v4019_v10 = vsel %vm1834_vm12, 1.0, %v8080_v62 }
 0x379   : > { %8108 = vst [vmem:[#allocation60_spill] sm:$0xff] %v6861_v18  ;;  %v6879_v18 = vsub.f32 %v6799_v57, %v6816_v6  ;;  %v4012_v4 = vsel %vm1715_vm4, 1.0, %v8080_v62  ;;  %vm1717_vm7 = vcmp.eq.f32.partialorder %v6892_v54, %v6728_v20 }
 0x37a   : > { %v6867_v0 = vpop.permute.xlu0 %2067  ;;  %v4014_v20 = vsel %vm1717_vm7, 1.0, %v8080_v62 }
 0x37b   : > { %8109 = vst [vmem:[#allocation54_spill] sm:$0xff] %v6867_v0 }
 0x37d   : > { %2536 = vperm.xlu1 %4656, %v2446_v3   ;;  %2526 = vperm.xlu2 %4657, %v2444_v24   ;;  %v2563_v3 = vsub.f32 1.0, %v6879_v18  ;;  %v6897_v24 = vsub.f32 %v4069_v49, %v6856_v7 }
 0x37f   : > { %v6870_v32 = vpop.permute.xlu1 %2079  ;;  %v6875_v30 = vpop.permute.xlu2 %2196  ;;  %8112 = vst [vmem:[#allocation33_spill] sm:$0xff] %v6897_v24 }
 0x380   : > { %2531 = vperm.xlu0 %4655, %v2445_v41  }
 0x382   : > { %v6882_v42 = vpop.permute.xlu0 %2076 }
 0x385   : > { %2583 = vperm.xlu1 %4656, %v2565_v52   ;;  %2573 = vperm.xlu2 %4657, %v2563_v3   ;;  %v2568_v52 = vsub.f32 1.0, %v6897_v24  ;;  %v2447_v3 = vadd.f32 1.0, %v6816_v6  ;;  %v4009_v24 = vsel %vm1712_vm15, 1.0, %v8080_v62  ;;  %v1783_v6 = vmul.f32 %v4008_v9, %v6673_v48 }
 0x386   : > { %v1784_v0 = vmul.f32 %v4009_v24, %v6758_v21  ;;  %vm1837_vm15 = vcmp.eq.f32.partialorder %v6892_v54, %v6784_v26 }
 0x387   : > { %v6894_v57 = vpop.permute.xlu1 %2184  ;;  %v6900_v41 = vpop.permute.xlu2 %2205  ;;  %v2455_v36 = vmax.f32 %v2447_v3, 0.0  ;;  %v2450_v3 = vadd.f32 1.0, %v6845_v50  ;;  %v4022_v26 = vsel %vm1837_vm15, 1.0, %v8080_v62 }
 0x388   : > { %8111 = vst [vmem:[#allocation18_spill] sm:$0xff] %v6894_v57  ;;  %2578 = vperm.xlu0 %4655, %v2564_v43   ;;  %v1946_v49 = vpop.f32.mrf.mxu0  ;;  %v4016_v57 = vsel %vm1831_vm10, 1.0, %v8080_v62  ;;  %v2566_v43 = vsub.f32 1.0, %v6904_v40  ;;  %v2567_v40 = vsub.f32 1.0, %v6917_v61  ;;  %vm1838_vm10 = vcmp.eq.f32.partialorder %v6892_v54, %v6769_v53 }
 0x389   : > { %v1895_v37 = vmul.f32 %v4016_v57, %v6806_v59  ;;  %v1904_v57 = vadd.f32 %v1896_v35, %v1784_v0  ;;  %v2463_v24 = vmin.f32 %v2455_v36, 7.0  ;;  %v2448_v0 = vadd.f32 1.0, %v6803_v11 }
 0x38a   : > { %v2086_v22 = vpop.permute.xlu0 %2085  ;;  %v2458_v50 = vmax.f32 %v2450_v3, 0.0  ;;  %v2449_v11 = vadd.f32 1.0, %v6832_v45  ;;  %v4023_v53 = vsel %vm1838_vm10, 1.0, %v8080_v62 }
 0x38b   : > { %v6928_v34 = vsub.s32 %v6468_v29, %v2086_v22  ;;  %v1903_v59 = vadd.f32 %v1895_v37, %v1783_v6  ;;  %v2456_v22 = vmax.f32 %v2448_v0, 0.0  ;;  %v6967_v37 = vsub.s32 %v6468_v29, %v6870_v32 }
 0x38c   : > { %v2466_v6 = vmin.f32 %v2458_v50, 7.0  ;;  %v2454_v32 = vadd.f32 1.0, %v6849_v39  ;;  %v6990_v39 = vsub.s32 %v6468_v29, %v6882_v42  ;;  %v4011_v42 = vsel %vm1714_vm0, 1.0, %v8080_v62 }
 0x38d   : > { %2598 = vperm.xlu1 %4656, %v2568_v52   ;;  %2588 = vperm.xlu2 %4657, %v2566_v43   ;;  %vm2214_vm8 = vcmp.eq.s32.totalorder %v6928_v34, %v6900_v41  ;;  %v1966_v48 = vmul.f32 %v1946_v49, %v1903_v59  ;;  %v2570_v49 = vsub.f32 1.0, %v6949_v15  ;;  %v2453_v43 = vadd.f32 1.0, %v6865_v25  ;;  %v4231_v41 = vld [vmem:[%s7668_s4] sm:$0xff] }
 0x38e   : > { %vm2211_vm2 = vcmp.eq.s32.totalorder %v6990_v39, %v6875_v30 }
 0x38f   : > { %v6932_v16 = vpop.permute.xlu1 %2193  ;;  %v6935_v31 = vpop.permute.xlu2 %2251  ;;  %v2461_v45 = vmax.f32 %v2453_v43, 0.0  ;;  %v4010_v43 = vsel %vm1713_vm6, 1.0, %v8080_v62 }
 0x390   : > { %2593 = vperm.xlu0 %4655, %v2567_v40   ;;  %v1948_v52 = vpop.f32.mrf.mxu0  ;;  %v6954_v40 = vsub.s32 %v6468_v29, %v6841_v27  ;;  %v2451_v27 = vadd.f32 1.0, %v6825_v56  ;;  %v1785_v28 = vmul.f32 %v4010_v43, %v6738_v55  ;;  %v4052_v55 = vsel %vm2211_vm2, 1.0, %v8080_v62 }
 0x391   : > { %v1967_v21 = vmul.f32 %v1948_v52, %v1904_v57  ;;  %v2464_v57 = vmin.f32 %v2456_v22, 7.0  ;;  %v2457_v52 = vmax.f32 %v2449_v11, 0.0  ;;  %v2469_v50 = vmin.f32 %v2461_v45, 7.0 }
 0x392   : > { %v6944_v9 = vpop.permute.xlu0 %2190  ;;  %v1898_v22 = vmul.f32 %v4019_v10, %v6830_v2  ;;  %v4013_v2 = vsel %vm1716_vm1, 1.0, %v8080_v62 }
 0x393   : > { %v1974_v35 = vpack.c.bf16 %v1967_v21, %v1966_v48  ;;  %v2459_v48 = vmax.f32 %v2451_v27, 0.0  ;;  %v2452_v21 = vadd.f32 1.0, %v6856_v7  ;;  %v4021_v7 = vsel %vm1836_vm5, 1.0, %v8080_v62 }
 0x394   : > { %v1900_v60 = vmul.f32 %v4021_v7, %v6782_v14  ;;  %v1788_v14 = vmul.f32 %v4013_v2, %v6762_v23  ;;  %v8116_v2 = vld [vmem:[#allocation42_spill] sm:$0xff] }
 0x395   : > { %2621 = vperm.xlu1 %4656, %v2463_v24   ;;  %2603 = vperm.xlu2 %4657, %v2569_v17   ;;  %v4018_v24 = vsel %vm1833_vm14, 1.0, %v8080_v62  ;;  %v2465_v17 = vmin.f32 %v2457_v52, 7.0  ;;  %v2460_v11 = vmax.f32 %v2452_v21, 0.0 }
 0x396   : > { %4036 = vmatmul.msk.bf16.vlgmr.msra.gmra.mxu1 %vm1920_vm13, %v1974_v35  ;;  %v1897_v51 = vmul.f32 %v4018_v24, %v6775_v38  ;;  %v1786_v38 = vmul.f32 %v4011_v42, %v6694_v5  ;;  %v1908_v13 = vadd.f32 %v1900_v60, %v1788_v14  ;;  %v8114_v60 = vld [vmem:[#allocation50_spill] sm:$0xff] }
 0x397   : > { %v6957_v36 = vpop.permute.xlu1 %2202  ;;  %v2267_v33 = vpop.permute.xlu2 %2266  ;;  %v2468_v45 = vmin.f32 %v2460_v11, 7.0  ;;  %v1901_v11 = vmul.f32 %v4022_v26, %v6853_v8 }
 0x398   : > { %vm2213_vm9 = vcmp.eq.s32.totalorder %v6954_v40, %v6957_v36  ;;  %2608 = vperm.xlu0 %4655, %v2570_v49   ;;  %v2467_v49 = vmin.f32 %v2459_v48, 7.0  ;;  %v1905_v30 = vadd.f32 %v1897_v51, %v1785_v28  ;;  %v1906_v5 = vadd.f32 %v1898_v22, %v1786_v38  ;;  %v8115_v38 = vld [vmem:[#allocation17_spill] sm:$0xff]  ;;  %v8119_v36 = vld [vmem:[#allocation63_spill] sm:$0xff] }
 0x399   : > { %v1902_v22 = vmul.f32 %v4023_v53, %v6838_v44  ;;  %v8117_v44 = vld [vmem:[#allocation62_spill] sm:$0xff] }
 0x39a   : > { %v2200_v59 = vpop.permute.xlu0 %2199  ;;  %v2887_v8 = vmul.f32 16.0, %v8117_v44 }
 0x39b   : > { %vm2212_vm11 = vcmp.eq.s32.totalorder %v6967_v37, %v2200_v59 }
 0x39c   : > { %v4053_v56 = vsel %vm2212_vm11, 1.0, %v8080_v62  ;;  %vm4451_vm11 = vcmp.lt.s32.totalorder %v2887_v8, 0 }
 0x39d   : > { %2636 = vperm.xlu1 %4656, %v2466_v6   ;;  %2626 = vperm.xlu2 %4657, %v2464_v57   ;;  %v6980_v63 = vmul.f32 %v4053_v56, %v2267_v33  ;;  %v4020_v33 = vsel %vm1835_vm3, 1.0, %v8080_v62  ;;  %v2462_v57 = vmax.f32 %v2454_v32, 0.0 }
 0x39e   : > { %v1951_v3 = vpop.f32.mrf.mxu0  ;;  %v1899_v27 = vmul.f32 %v4020_v33, %v6812_v19  ;;  %v1787_v19 = vmul.f32 %v4012_v4, %v6767_v46  ;;  %v4233_v46 = vld [vmem:[%s7668_s4 + $0x10] sm:$0xff]  ;;  %v4232_v33 = vld [vmem:[%s7668_s4 + $0x8] sm:$0xff] }
 0x39f   : > { %v6982_v25 = vpop.permute.xlu1 %2246  ;;  %v6992_v0 = vpop.permute.xlu2 %2288  ;;  %v1968_v21 = vmul.f32 %v1951_v3, %v1905_v30  ;;  %2775 = vmatpush.bf16.msrb.mxu2 %v4233_v46  ;;  %v2470_v42 = vmin.f32 %v2462_v57, 7.0  ;;  %v8118_v4 = vld [vmem:[#allocation26_spill] sm:$0xff]  ;;  %v2886_v30 = vmul.f32 16.0, %v8119_v36 }
 0x3a0   : > { %2631 = vperm.xlu0 %4655, %v2465_v17   ;;  %v1907_v52 = vadd.f32 %v1899_v27, %v1787_v19  ;;  %v1789_v27 = vmul.f32 %v4014_v20, %v8114_v60  ;;  %v2888_v14 = vmul.f32 16.0, %v8118_v4  ;;  %v8124_v20 = vld [vmem:[#allocation64_spill] sm:$0xff] }
 0x3a1   : > { %v1956_v35 = vpop.f32.mrf.mxu2  ;;  %v2889_v53 = vmul.f32 16.0, %v8124_v20  ;;  %vm4446_vm14 = vcmp.lt.s32.totalorder %v2886_v30, 0 }
 0x3a2   : > { %v7021_v6 = vpop.permute.xlu0 %2241  ;;  %v1970_v17 = vmul.f32 %v1956_v35, %v1907_v52  ;;  %v4055_v35 = vsel %vm2214_vm8, 1.0, %v8080_v62  ;;  %vm1718_vm8 = vcmp.eq.f32.partialorder %v6892_v54, %v6714_v12  ;;  %v4054_v12 = vsel %vm2213_vm9, 1.0, %v8080_v62 }
 0x3a3   : > { %2776 = vmatpush.bf16.msrb.mxu2 %v4232_v33  ;;  %v4015_v54 = vsel %vm1718_vm8, 1.0, %v8080_v62  ;;  %v4458_v46 = vfloor.f32 %v2888_v14  ;;  %v4448_v33 = vfloor.f32 %v2886_v30  ;;  %vm4456_vm9 = vcmp.lt.s32.totalorder %v2888_v14, 0 }
 0x3a4   : > { %v1790_v28 = vmul.f32 %v4015_v54, %v8115_v38  ;;  %v4463_v4 = vfloor.f32 %v2889_v53  ;;  %vm4461_vm3 = vcmp.lt.s32.totalorder %v2889_v53, 0  ;;  %vm2757_vm8 = vcmask 392192  }
 0x3a5   : > { %2651 = vperm.xlu1 %4656, %v2469_v50   ;;  %2641 = vperm.xlu2 %4657, %v2467_v49  }
 0x3a6   : > { %v1953_v58 = vpop.f32.mrf.mxu0 }
 0x3a7   : > { %v2262_v59 = vpop.permute.xlu1 %2261  ;;  %v7040_v56 = vpop.permute.xlu2 %2297  ;;  %v1969_v24 = vmul.f32 %v1953_v58, %v1906_v5  ;;  %2777 = vmatpush.bf16.msrb.mxu2 %v4231_v41  ;;  %v1909_v5 = vadd.f32 %v1901_v11, %v1789_v27  ;;  %v8121_v58 = vld [vmem:[#allocation65_spill] sm:$0xff] }
 0x3a8   : > { %v7038_v48 = vmul.f32 %v4052_v55, %v2262_v59  ;;  %2646 = vperm.xlu0 %4655, %v2468_v45   ;;  %v1910_v55 = vadd.f32 %v1902_v22, %v1790_v28  ;;  %v2891_v45 = vmul.f32 16.0, %v8121_v58  ;;  %v8126_v41 = vld [vmem:[#allocation33_spill] sm:$0xff] }
 0x3a9   : > { %v1958_v23 = vpop.f32.mrf.mxu2  ;;  %v1975_v50 = vpack.c.bf16 %v1969_v24, %v1968_v21  ;;  %v8122_v21 = vld [vmem:[#allocation57_spill] sm:$0xff] }
 0x3aa   : > { %v1971_v7 = vmul.f32 %v1958_v23, %v1908_v13  ;;  %v7045_v32 = vpop.permute.xlu0 %2256  ;;  %v4457_v23 = vceil.f32 %v2888_v14  ;;  %v8127_v22 = vld [vmem:[#allocation29_spill] sm:$0xff]  ;;  %v4472_v28 = vceil.f32 %v2891_v45  ;;  %v4473_v44 = vfloor.f32 %v2891_v45  ;;  %v8128_v14 = vld [vmem:[#allocation55_spill] sm:$0xff] }
 0x3ab   : > { %4037 = vmatmul.msk.bf16.gmra.mxu1 %vm1920_vm13, %v1975_v50  ;;  %v8123_v50 = vld [vmem:[#allocation54_spill] sm:$0xff]  ;;  %v2934_v11 = vmul.f32 16.0, %v8127_v22  ;;  %v2087_v36 = vsub.s32 %v6468_v29, %v8128_v14  ;;  %vm4471_vm12 = vcmp.lt.s32.totalorder %v2891_v45, 0  ;;  %v8136_v14 = vld [vmem:[#allocation56_spill] sm:$0xff] }
 0x3ac   : > { %v1976_v49 = vpack.c.bf16 %v1971_v7, %v1970_v17  ;;  %v4452_v17 = vceil.f32 %v2887_v8  ;;  %v4453_v7 = vfloor.f32 %v2887_v8  ;;  %v4462_v8 = vceil.f32 %v2889_v53 }
 0x3ad   : > { %2690 = vperm.xlu1 %4656, %v6887_v47   ;;  %2656 = vperm.xlu2 %4657, %v2470_v42   ;;  %vm2311_vm1 = vcmp.eq.s32.totalorder %v2087_v36, %v6992_v0 }
 0x3ae   : > { %4038 = vmatmul.msk.bf16.vlgmr.msra.gmra.mxu3 %vm1920_vm13, %v1976_v49  ;;  %v2088_v49 = vsub.s32 %v6468_v29, %v8123_v50  ;;  %v4454_v38 = vsel %vm4451_vm11, %v4452_v17, %v4453_v7  ;;  %v4464_v45 = vsel %vm4461_vm3, %v4462_v8, %v4463_v4  ;;  %v8132_v7 = vld [vmem:[#allocation32_spill] sm:$0xff]  ;;  %v8135_v8 = vld [vmem:[#allocation22_spill] sm:$0xff] }
 0x3af   : > { %v2277_v3 = vpop.permute.xlu1 %2276  ;;  %v7062_v47 = vpop.permute.xlu2 %2306  ;;  %v4455_v58 = vcvt.f32.s32 %v4454_v38  ;;  %v2937_v50 = vmul.f32 16.0, %v8132_v7  ;;  %v2936_v4 = vmul.f32 16.0, %v8135_v8 }
 0x3b0   : > { %v7060_v10 = vmul.f32 %v4055_v35, %v2277_v3  ;;  %2685 = vperm.xlu0 %4655, %v6879_v18   ;;  %v4447_v35 = vceil.f32 %v2886_v30  ;;  %v8129_v30 = vld [vmem:[#allocation60_spill] sm:$0xff] }
 0x3b1   : > { %v1961_v51 = vpop.f32.mrf.mxu2 }
 0x3b2   : > { %v2272_v18 = vpop.permute.xlu0 %2271  ;;  %v1972_v13 = vmul.f32 %v1961_v51, %v1909_v5  ;;  %v8125_v51 = vld [vmem:[#allocation66_spill] sm:$0xff]  ;;  %v4449_v27 = vsel %vm4446_vm14, %v4447_v35, %v4448_v33  ;;  %v8130_v5 = vld [vmem:[#allocation20_spill] sm:$0xff] }
 0x3b3   : > { %v7083_v43 = vmul.f32 %v4054_v12, %v2272_v18  ;;  %v7102_v26 = vmul.f32 16.0, %v8125_v51 }
 0x3b5   : > { %2705 = vperm.xlu1 %4656, %v6917_v61   ;;  %2695 = vperm.xlu2 %4657, %v8116_v2   ;;  %v8120_v61 = vld [vmem:[#allocation14_spill] sm:$0xff]  ;;  %vm4476_vm4 = vcmp.lt.s32.totalorder %v7102_v26, 0 }
 0x3b6   : > { %v2890_v52 = vmul.f32 16.0, %v8120_v61 }
 0x3b7   : > { %v7091_v19 = vpop.permute.xlu1 %2294  ;;  %v2343_v59 = vpop.permute.xlu2 %2342 }
 0x3b8   : > { %2700 = vperm.xlu0 %4655, %v8122_v21   ;;  %vm4466_vm0 = vcmp.lt.s32.totalorder %v2890_v52, 0  ;;  %v4467_v18 = vceil.f32 %v2890_v52  ;;  %v4468_v54 = vfloor.f32 %v2890_v52  ;;  %v4056_v52 = vsel %vm2311_vm1, 1.0, %v8080_v62 }
 0x3b9   : > { %v1963_v57 = vpop.f32.mrf.mxu2 }
 0x3ba   : > { %v1973_v24 = vmul.f32 %v1963_v57, %v1910_v55  ;;  %v2292_v42 = vpop.permute.xlu0 %2291  ;;  %v7117_v55 = vmul.f32 16.0, %v8130_v5  ;;  %v7119_v57 = vadd.f32 -0.5, %v2934_v11  ;;  %v4469_v17 = vsel %vm4466_vm0, %v4467_v18, %v4468_v54 }
 0x3bb   : > { %vm2312_vm5 = vcmp.eq.s32.totalorder %v2088_v49, %v2292_v42  ;;  %v4477_v42 = vceil.f32 %v7102_v26  ;;  %v4465_v18 = vcvt.f32.s32 %v4464_v45  ;;  %v4470_v54 = vcvt.f32.s32 %v4469_v17 }
 0x3bc   : > { %v1977_v3 = vpack.c.bf16 %v1973_v24, %v1972_v13  ;;  %v4057_v2 = vsel %vm2312_vm5, 1.0, %v8080_v62  ;;  %v8131_v13 = vld [vmem:[#allocation18_spill] sm:$0xff]  ;;  %v7139_v53 = vfloor.f32 %v7119_v57  ;;  %vm4481_vm2 = vcmp.lt.s32.totalorder %v7117_v55, 0 }
 0x3bd   : > { %2720 = vperm.xlu1 %4656, %v6949_v15   ;;  %2710 = vperm.xlu2 %4657, %v8126_v41   ;;  %v4459_v15 = vsel %vm4456_vm9, %v4457_v23, %v4458_v46  ;;  %vm2207_vm6 = vcmp.eq.s32.totalorder %v2087_v36, %v8131_v13  ;;  %v2376_v21 = vmul.f32 %v4057_v2, %v2343_v59  ;;  %v4450_v23 = vcvt.f32.s32 %v4449_v27  ;;  %v8133_v59 = vld [vmem:[#allocation19_spill] sm:$0xff]  ;;  %v8134_v27 = vld [vmem:[#allocation46_spill] sm:$0xff] }
 0x3be   : > { %4039 = vmatmul.msk.bf16.gmra.mxu3 %vm1920_vm13, %v1977_v3  ;;  %vm2208_vm13 = vcmp.eq.s32.totalorder %v2088_v49, %v8129_v30  ;;  %v4460_v61 = vcvt.f32.s32 %v4459_v15  ;;  %v4478_v3 = vfloor.f32 %v7102_v26  ;;  %v2935_v35 = vmul.f32 16.0, %v8133_v59  ;;  %v8137_v30 = vld [vmem:[#allocation59_spill] sm:$0xff] }
 0x3bf   : > { %v7107_v12 = vpop.permute.xlu1 %2303  ;;  %v7109_v60 = vpop.permute.xlu2 %2357  ;;  %v4049_v46 = vsel %vm2208_vm13, 1.0, %v8080_v62  ;;  %v4048_v33 = vsel %vm2207_vm6, 1.0, %v8080_v62  ;;  %v7144_v15 = vadd.f32 -0.5, %v2937_v50  ;;  %v2090_v0 = vsub.s32 %v6468_v29, %v8134_v27 }
 0x3c0   : > { %2715 = vperm.xlu0 %4655, %v6939_v1   ;;  %v4474_v1 = vsel %vm4471_vm12, %v4472_v28, %v4473_v44  ;;  %v2280_v49 = vmul.f32 %v4049_v46, %v6982_v25  ;;  %v2279_v25 = vmul.f32 %v4048_v33, %v7021_v6  ;;  %v4482_v28 = vceil.f32 %v7117_v55 }
 0x3c1   : > { %v4475_v11 = vcvt.f32.s32 %v4474_v1  ;;  %v7149_v6 = vadd.f32 -0.5, %v2935_v35  ;;  %v2966_v2 = vmax.f32 %v7139_v53, 0.0  ;;  %v4479_v44 = vsel %vm4476_vm4, %v4477_v42, %v4478_v3 }
 0x3c2   : > { %v7123_v24 = vpop.permute.xlu0 %2300  ;;  %v2384_v51 = vadd.f32 %v2376_v21, %v2280_v49  ;;  %v4483_v26 = vfloor.f32 %v7117_v55  ;;  %vm2314_vm7 = vcmp.eq.s32.totalorder %v2090_v0, %v7040_v56  ;;  %vm2210_vm10 = vcmp.eq.s32.totalorder %v2090_v0, %v6932_v16  ;;  %v8139_v21 = vld [vmem:[#allocation21_spill] sm:$0xff] }
 0x3c3   : > { %v7164_v45 = vfloor.f32 %v7144_v15  ;;  %v4059_v16 = vsel %vm2314_vm7, 1.0, %v8080_v62  ;;  %v7170_v50 = vadd.f32 -0.5, %v2936_v4  ;;  %v4051_v49 = vsel %vm2210_vm10, 1.0, %v8080_v62 }
 0x3c4   : > { %v2392_v36 = vmul.f32 %v8136_v14, %v2384_v51  ;;  %v7177_v59 = vfloor.f32 %v7149_v6  ;;  %v2282_v35 = vmul.f32 %v4051_v49, %v7045_v32  ;;  %v4484_v33 = vsel %vm4481_vm2, %v4482_v28, %v4483_v26 }
 0x3c5   : > { %2909 = vperm.xlu1 %4656, %v4460_v61   ;;  %2903 = vperm.xlu2 %4657, %v4450_v23   ;;  %v2938_v23 = vmul.f32 16.0, %v8139_v21  ;;  %vm2315_vm11 = vcmp.eq.s32.totalorder %v6990_v39, %v7123_v24  ;;  %vm2317_vm5 = vcmp.eq.s32.totalorder %v6954_v40, %v7062_v47  ;;  %v4485_v24 = vcvt.f32.s32 %v4484_v33  ;;  %v8141_v40 = vld [vmem:[#allocation15_spill] sm:$0xff] }
 0x3c6   : > { %v4060_v39 = vsel %vm2315_vm11, 1.0, %v8080_v62  ;;  %v4062_v28 = vsel %vm2317_vm5, 1.0, %v8080_v62  ;;  %vm2316_vm0 = vcmp.eq.s32.totalorder %v6967_v37, %v7107_v12 }
 0x3c7   : > { %v2338_v20 = vpop.permute.xlu1 %2337  ;;  %v2373_v22 = vpop.permute.xlu2 %2372 }
 0x3c8   : > { %v2375_v41 = vmul.f32 %v4056_v52, %v2338_v20  ;;  %2906 = vperm.xlu0 %4655, %v4455_v58   ;;  %v8138_v58 = vld [vmem:[#allocation16_spill] sm:$0xff]  ;;  %v7186_v20 = vadd.f32 -0.5, %v2938_v23  ;;  %v8140_v52 = vld [vmem:[#allocation23_spill] sm:$0xff]  ;;  %v8143_v23 = vld [vmem:[#allocation30_spill] sm:$0xff] }
 0x3c9   : > { %v2089_v13 = vsub.s32 %v6468_v29, %v8138_v58 }
 0x3ca   : > { %v2383_v38 = vadd.f32 %v2375_v41, %v2279_v25  ;;  %v2310_v61 = vpop.permute.xlu0 %2309  ;;  %v2939_v25 = vmul.f32 16.0, %v8140_v52  ;;  %v4480_v41 = vcvt.f32.s32 %v4479_v44  ;;  %v7205_v27 = vfloor.f32 %v7186_v20 }
 0x3cb   : > { %vm2318_vm15 = vcmp.eq.s32.totalorder %v6928_v34, %v2310_v61  ;;  %vm2209_vm9 = vcmp.eq.s32.totalorder %v2089_v13, %v6944_v9  ;;  %v2974_v34 = vmin.f32 %v2966_v2, 15.0  ;;  %vm2313_vm14 = vcmp.eq.s32.totalorder %v2089_v13, %v7091_v19 }
 0x3cc   : > { %v2391_v5 = vmul.f32 %v8137_v30, %v2383_v38  ;;  %v4063_v1 = vsel %vm2318_vm15, 1.0, %v8080_v62  ;;  %v4050_v51 = vsel %vm2209_vm9, 1.0, %v8080_v62  ;;  %v4058_v55 = vsel %vm2313_vm14, 1.0, %v8080_v62 }
 0x3cd   : > { %2918 = vperm.xlu1 %4656, %v4475_v11   ;;  %2912 = vperm.xlu2 %4657, %v4465_v18   ;;  %v2382_v17 = vmul.f32 %v4063_v1, %v2373_v22  ;;  %v4487_v19 = vcvt.f32.s32 %v2974_v34  ;;  %v2967_v11 = vmax.f32 %v7177_v59, 0.0  ;;  %v7200_v9 = vfloor.f32 %v7170_v50 }
 0x3ce   : > { %v2471_v46 = vpack.c.bf16 %v2392_v36, %v2391_v5  ;;  %v2281_v18 = vmul.f32 %v4050_v51, %v6935_v31  ;;  %v7209_v44 = vadd.f32 -0.5, %v2939_v25  ;;  %v2379_v36 = vmul.f32 %v4060_v39, %v7109_v60  ;;  %v8142_v5 = vld [vmem:[#allocation58_spill] sm:$0xff]  ;;  %v8144_v51 = vld [vmem:[#allocation52_spill] sm:$0xff] }
 0x3cf   : > { %v2353_v7 = vpop.permute.xlu1 %2352  ;;  %v7173_v3 = vpop.permute.xlu2 %2511  ;;  %v7182_v56 = vadd.f32 %v2382_v17, %v7060_v10  ;;  %v2969_v10 = vmax.f32 %v7164_v45, 0.0  ;;  %v2975_v8 = vmin.f32 %v2967_v11, 15.0  ;;  %v2968_v4 = vmax.f32 %v7200_v9, 0.0 }
 0x3d0   : > { %v2378_v42 = vmul.f32 %v4059_v16, %v2353_v7  ;;  %4100 = vmatmul.msk.bf16.vlgmr.msrb.gmra.mxu2 %vm2757_vm8, %v2471_v46  ;;  %2915 = vperm.xlu0 %4655, %v4470_v54   ;;  %v2972_v46 = vmax.f32 %v8143_v23, 0.0  ;;  %v2970_v1 = vmax.f32 %v7205_v27, 0.0  ;;  %v4061_v17 = vsel %vm2316_vm0, 1.0, %v8080_v62 }
 0x3d1   : > { %v2977_v2 = vmin.f32 %v2969_v10, 15.0  ;;  %v4489_v16 = vcvt.f32.s32 %v2975_v8  ;;  %v2976_v34 = vmin.f32 %v2968_v4, 15.0  ;;  %v7223_v37 = vfloor.f32 %v7209_v44  ;;  %v8146_v10 = vld [vmem:[#allocation51_spill] sm:$0xff] }
 0x3d2   : > { %v2386_v32 = vadd.f32 %v2378_v42, %v2282_v35  ;;  %v2348_v22 = vpop.permute.xlu0 %2347  ;;  %v2387_v12 = vadd.f32 %v2379_v36, %v7038_v48  ;;  %v2980_v42 = vmin.f32 %v2972_v46, 15.0  ;;  %v2978_v52 = vmin.f32 %v2970_v1, 15.0 }
 0x3d3   : > { %v2377_v54 = vmul.f32 %v4058_v55, %v2348_v22  ;;  %v4493_v13 = vcvt.f32.s32 %v2977_v2  ;;  %v4491_v35 = vcvt.f32.s32 %v2976_v34  ;;  %v2971_v25 = vmax.f32 %v7223_v37, 0.0 }
 0x3d4   : > { %v2394_v47 = vmul.f32 %v8141_v40, %v2386_v32  ;;  %v8145_v32 = vld [vmem:[#allocation39_spill] sm:$0xff]  ;;  %v2990_v48 = vadd.f32 1.0, %v7139_v53  ;;  %v4499_v22 = vcvt.f32.s32 %v2980_v42  ;;  %v7256_v36 = vsub.f32 %v7149_v6, %v7177_v59 }
 0x3d5   : > { %3023 = vperm.xlu1 %4656, %v4487_v19   ;;  %2921 = vperm.xlu2 %4657, %v4480_v41   ;;  %v2385_v0 = vadd.f32 %v2377_v54, %v2281_v18  ;;  %v2395_v19 = vmul.f32 %v8145_v32, %v2387_v12  ;;  %v4495_v54 = vcvt.f32.s32 %v2978_v52  ;;  %v2979_v39 = vmin.f32 %v2971_v25, 15.0 }
 0x3d6   : > { %v2958_v34 = vsub.f32 %v7119_v57, %v7139_v53 }
 0x3d7   : > { %v2368_v38 = vpop.permute.xlu1 %2367  ;;  %v7211_v31 = vpop.permute.xlu2 %2526  ;;  %v2393_v61 = vmul.f32 %v8142_v5, %v2385_v0  ;;  %v2998_v0 = vmax.f32 %v2990_v48, 0.0 }
 0x3d8   : > { %v2381_v26 = vmul.f32 %v4062_v28, %v2368_v38  ;;  %2924 = vperm.xlu0 %4655, %v4485_v24   ;;  %v8147_v24 = vld [vmem:[#allocation27_spill] sm:$0xff]  ;;  %v2991_v38 = vadd.f32 1.0, %v7177_v59  ;;  %v8148_v28 = vld [vmem:[#allocation61_spill] sm:$0xff]  ;;  %v2992_v59 = vadd.f32 1.0, %v7200_v9  ;;  %v3070_v52 = vsub.f32 1.0, %v2958_v34 }
 0x3d9   : > { %v2472_v21 = vpack.c.bf16 %v2394_v47, %v2393_v61  ;;  %v2973_v47 = vmax.f32 %v8147_v24, 0.0  ;;  %v7247_v2 = vmul.f32 %v8148_v28, %v7182_v56  ;;  %v2993_v56 = vadd.f32 1.0, %v7164_v45 }
 0x3da   : > { %v2389_v58 = vadd.f32 %v2381_v26, %v7083_v43  ;;  %v2363_v7 = vpop.permute.xlu0 %2362  ;;  %v3006_v46 = vmin.f32 %v2998_v0, 15.0  ;;  %v2999_v1 = vmax.f32 %v2991_v38, 0.0  ;;  %v3000_v48 = vmax.f32 %v2992_v59, 0.0 }
 0x3db   : > { %v2380_v60 = vmul.f32 %v4061_v17, %v2363_v7  ;;  %v3071_v17 = vsub.f32 1.0, %v7256_v36  ;;  %v3001_v6 = vmax.f32 %v2993_v56, 0.0 }
 0x3dc   : > { %v7240_v55 = vmul.f32 %v8146_v10, %v2389_v58  ;;  %v4497_v58 = vcvt.f32.s32 %v2979_v39  ;;  %v4503_v12 = vceil.f32 %v3006_v46  ;;  %vm4502_vm3 = vcmp.lt.s32.totalorder %v3006_v46, 0 }
 0x3dd   : > { %3032 = vperm.xlu1 %4656, %v4493_v13   ;;  %3026 = vperm.xlu2 %4657, %v4489_v16   ;;  %v2388_v43 = vadd.f32 %v2380_v60, %v6980_v63  ;;  %v7237_v63 = vld [vmem:[%s7670_s6] ss:$0 sm:$0xff]  ;;  %v4504_v60 = vfloor.f32 %v3006_v46  ;;  %v3009_v57 = vmin.f32 %v3001_v6, 15.0  ;;  %v2995_v46 = vadd.f32 1.0, %v7223_v37 }
 0x3de   : > { %v2474_v61 = vpack.c.bf16 %v7247_v2, %v7240_v55  ;;  %vm2541_vm1 = vcmp.eq.f32.partialorder %v7237_v63, %v7173_v3  ;;  %vm2544_vm15 = vcmp.eq.f32.partialorder %v7237_v63, %v7211_v31  ;;  %v2960_v31 = vsub.f32 %v7170_v50, %v7200_v9 }
 0x3df   : > { %v7227_v49 = vpop.permute.xlu1 %2506  ;;  %v2574_v33 = vpop.permute.xlu2 %2573  ;;  %v2396_v41 = vmul.f32 %v8144_v51, %v2388_v43  ;;  %v3007_v43 = vmin.f32 %v2999_v1, 15.0  ;;  %v4505_v53 = vsel %vm4502_vm3, %v4503_v12, %v4504_v60  ;;  %v4519_v39 = vfloor.f32 %v3009_v57 }
 0x3e0   : > { %4101 = vmatmul.msk.bf16.gmra.mxu2 %vm2757_vm8, %v2472_v21  ;;  %3029 = vperm.xlu0 %4655, %v4491_v35   ;;  %v2981_v21 = vmin.f32 %v2973_v47, 15.0  ;;  %vm4517_vm2 = vcmp.lt.s32.totalorder %v3009_v57, 0  ;;  %vm2540_vm7 = vcmp.eq.f32.partialorder %v7237_v63, %v7227_v49  ;;  %v3003_v6 = vmax.f32 %v2995_v46, 0.0 }
 0x3e1   : > { %v2473_v11 = vpack.c.bf16 %v2396_v41, %v2395_v19  ;;  %v4508_v41 = vceil.f32 %v3007_v43  ;;  %v4509_v19 = vfloor.f32 %v3007_v43  ;;  %vm4507_vm6 = vcmp.lt.s32.totalorder %v3007_v43, 0 }
 0x3e2   : > { %v2502_v18 = vpop.permute.xlu0 %2501  ;;  %v4501_v16 = vcvt.f32.s32 %v2981_v21  ;;  %v2994_v60 = vadd.f32 1.0, %v7205_v27  ;;  %v4077_v43 = vsel %vm2544_vm15, 1.0, %v8080_v62  ;;  %v2962_v46 = vsub.f32 %v7186_v20, %v7205_v27 }
 0x3e3   : > { %vm2539_vm13 = vcmp.eq.f32.partialorder %v7237_v63, %v2502_v18  ;;  %v4506_v18 = vcvt.f32.s32 %v4505_v53  ;;  %v4510_v47 = vsel %vm4507_vm6, %v4508_v41, %v4509_v19  ;;  %v2961_v53 = vsub.f32 %v7144_v15, %v7164_v45 }
 0x3e4   : > { %v4072_v26 = vsel %vm2539_vm13, 1.0, %v8080_v62  ;;  %v2997_v15 = vadd.f32 1.0, %v8147_v24 }
 0x3e5   : > { %3041 = vperm.xlu1 %4656, %v4499_v22   ;;  %3035 = vperm.xlu2 %4657, %v4495_v54   ;;  %v7250_v8 = vmul.f32 %v4072_v26, %v2574_v33  ;;  %v4518_v54 = vceil.f32 %v3009_v57  ;;  %v3011_v57 = vmin.f32 %v3003_v6, 15.0 }
 0x3e7   : > { %v7252_v4 = vpop.permute.xlu1 %2521  ;;  %v2589_v13 = vpop.permute.xlu2 %2588  ;;  %v4520_v56 = vsel %vm4517_vm2, %v4518_v54, %v4519_v39  ;;  %v4529_v55 = vfloor.f32 %v3011_v57  ;;  %vm4527_vm14 = vcmp.lt.s32.totalorder %v3011_v57, 0 }
 0x3e8   : > { %3038 = vperm.xlu0 %4655, %v4497_v58   ;;  %v4074_v58 = vsel %vm2541_vm1, 1.0, %v8080_v62  ;;  %vm2543_vm9 = vcmp.eq.f32.partialorder %v7237_v63, %v7252_v4  ;;  %v3073_v4 = vsub.f32 1.0, %v2961_v53 }
 0x3e9   : > { %v4076_v41 = vsel %vm2543_vm9, 1.0, %v8080_v62 }
 0x3ea   : > { %v2517_v7 = vpop.permute.xlu0 %2516 }
 0x3eb   : > { %vm2542_vm12 = vcmp.eq.f32.partialorder %v7237_v63, %v2517_v7  ;;  %v4521_v7 = vcvt.f32.s32 %v4520_v56 }
 0x3ec   : > { %v4075_v42 = vsel %vm2542_vm12, 1.0, %v8080_v62 }
 0x3ed   : > { %3085 = vperm.xlu1 %4656, %v3071_v17   ;;  %3044 = vperm.xlu2 %4657, %v4501_v16   ;;  %v7267_v35 = vmul.f32 %v4075_v42, %v2589_v13  ;;  %v4511_v13 = vcvt.f32.s32 %v4510_v47  ;;  %v4073_v16 = vsel %vm2540_vm7, 1.0, %v8080_v62 }
 0x3ef   : > { %v7269_v33 = vpop.permute.xlu1 %2536  ;;  %v2604_v25 = vpop.permute.xlu2 %2603 }
 0x3f0   : > { %4102 = vmatmul.msk.bf16.gmra.mxu2 %vm2757_vm8, %v2473_v11  ;;  %3080 = vperm.xlu0 %4655, %v3070_v52   ;;  %v3008_v11 = vmin.f32 %v3000_v48, 15.0  ;;  %v3072_v48 = vsub.f32 1.0, %v2960_v31  ;;  %vm2546_vm11 = vcmp.eq.f32.partialorder %v7237_v63, %v7269_v33 }
 0x3f1   : > { %v4079_v47 = vsel %vm2546_vm11, 1.0, %v8080_v62 }
 0x3f2   : > { %v2532_v22 = vpop.permute.xlu0 %2531  ;;  %v4513_v1 = vceil.f32 %v3008_v11  ;;  %v4514_v17 = vfloor.f32 %v3008_v11  ;;  %vm4512_vm10 = vcmp.lt.s32.totalorder %v3008_v11, 0 }
 0x3f3   : > { %vm2545_vm4 = vcmp.eq.f32.partialorder %v7237_v63, %v2532_v22  ;;  %v4528_v22 = vceil.f32 %v3011_v57 }
 0x3f4   : > { %v4078_v0 = vsel %vm2545_vm4, 1.0, %v8080_v62  ;;  %v4515_v12 = vsel %vm4512_vm10, %v4513_v1, %v4514_v17 }
 0x3f5   : > { %3176 = vperm.xlu1 %4656, %v2958_v34   ;;  %3127 = vperm.xlu2 %4657, %v4506_v18   ;;  %v7276_v38 = vmul.f32 %v4078_v0, %v2604_v25  ;;  %v4516_v42 = vcvt.f32.s32 %v4515_v12  ;;  %v4530_v18 = vsel %vm4527_vm14, %v4528_v22, %v4529_v55  ;;  %v3005_v0 = vmax.f32 %v2997_v15, 0.0 }
 0x3f6   : > { %v4531_v39 = vcvt.f32.s32 %v4530_v18 }
 0x3f7   : > { %v2584_v26 = vpop.permute.xlu1 %2583  ;;  %v7281_v21 = vpop.permute.xlu2 %2626  ;;  %v3013_v1 = vmin.f32 %v3005_v0, 15.0 }
 0x3f8   : > { %v7279_v3 = vmul.f32 %v4074_v58, %v2584_v26  ;;  %3130 = vperm.xlu0 %4655, %v4511_v13   ;;  %v2996_v13 = vadd.f32 1.0, %v8143_v23  ;;  %vm2660_vm7 = vcmp.eq.f32.partialorder %v7237_v63, %v7281_v21 }
 0x3f9   : > { %v4538_v6 = vceil.f32 %v3013_v1  ;;  %v4539_v12 = vfloor.f32 %v3013_v1  ;;  %vm4537_vm13 = vcmp.lt.s32.totalorder %v3013_v1, 0 }
 0x3fa   : > { %v2579_v34 = vpop.permute.xlu0 %2578  ;;  %v3004_v17 = vmax.f32 %v2996_v13, 0.0 }
 0x3fb   : > { %v7289_v59 = vmul.f32 %v4073_v16, %v2579_v34  ;;  %v3074_v16 = vsub.f32 1.0, %v2962_v46  ;;  %v2963_v34 = vsub.f32 %v7209_v44, %v7223_v37  ;;  %v8149_v44 = vld [vmem:[#allocation28_spill] sm:$0xff] }
 0x3fc   : > { %v3012_v23 = vmin.f32 %v3004_v17, 15.0  ;;  %v3239_v37 = vmul.f32 16.0, %v8149_v44 }
 0x3fd   : > { %3136 = vperm.xlu1 %4656, %v4521_v7   ;;  %3181 = vperm.xlu2 %4657, %v7256_v36   ;;  %v3002_v36 = vmax.f32 %v2994_v60, 0.0  ;;  %v3075_v27 = vsub.f32 1.0, %v2963_v34 }
 0x3fe   : > { %v4534_v57 = vfloor.f32 %v3012_v23  ;;  %vm4532_vm12 = vcmp.lt.s32.totalorder %v3012_v23, 0 }
 0x3ff   : > { %v2599_v49 = vpop.permute.xlu1 %2598  ;;  %v7296_v25 = vpop.permute.xlu2 %2641  ;;  %v3010_v50 = vmin.f32 %v3002_v36, 15.0 }
 0x400   : > { %v7294_v52 = vmul.f32 %v4077_v43, %v2599_v49  ;;  %4103 = vmatmul.msk.bf16.gmra.mxu2 %vm2757_vm8, %v2474_v61  ;;  %3133 = vperm.xlu0 %4655, %v4516_v42   ;;  %v4540_v42 = vsel %vm4537_vm13, %v4538_v6, %v4539_v12  ;;  %vm2663_vm6 = vcmp.eq.f32.partialorder %v7237_v63, %v7296_v25  ;;  %v8153_v6 = vld [vmem:[#allocation31_spill] sm:$0xff] }
 0x401   : > { %v4523_v45 = vceil.f32 %v3010_v50  ;;  %v4524_v54 = vfloor.f32 %v3010_v50  ;;  %vm4522_vm5 = vcmp.lt.s32.totalorder %v3010_v50, 0  ;;  %v4541_v36 = vcvt.f32.s32 %v4540_v42  ;;  %v8150_v50 = vld [vmem:[#allocation45_spill] sm:$0xff] }
 0x402   : > { %v2594_v19 = vpop.permute.xlu0 %2593  ;;  %v3240_v12 = vmul.f32 16.0, %v8153_v6  ;;  %v4235_v6 = vld [vmem:[#allocation6 + $0x8] sm:$0xff] }
 0x403   : > { %v7309_v2 = vmul.f32 %v4076_v41, %v2594_v19  ;;  %v4525_v58 = vsel %vm4522_vm5, %v4523_v45, %v4524_v54  ;;  %vm3626_vm5 = vcmask 785408  }
 0x404   : > { %v4526_v56 = vcvt.f32.s32 %v4525_v58  ;;  %v4084_v58 = vsel %vm2663_vm6, 1.0, %v8080_v62 }
 0x405   : > { %3186 = vperm.xlu1 %4656, %v2960_v31   ;;  %3090 = vperm.xlu2 %4657, %v3072_v48   ;;  %v4533_v31 = vceil.f32 %v3012_v23  ;;  %v7335_v48 = vadd.f32 -0.5, %v3239_v37  ;;  %v7370_v37 = vadd.f32 -0.5, %v3240_v12 }
 0x407   : > { %v7311_v9 = vpop.permute.xlu1 %2621  ;;  %v7313_v61 = vpop.permute.xlu2 %2656  ;;  %v4535_v41 = vsel %vm4532_vm12, %v4533_v31, %v4534_v57  ;;  %v3255_v45 = vfloor.f32 %v7335_v48 }
 0x408   : > { %3095 = vperm.xlu0 %4655, %v3073_v4   ;;  %v3238_v4 = vmul.f32 16.0, %v8150_v50  ;;  %v4536_v18 = vcvt.f32.s32 %v4535_v41  ;;  %vm2666_vm1 = vcmp.eq.f32.partialorder %v7237_v63, %v7313_v61  ;;  %vm2659_vm4 = vcmp.eq.f32.partialorder %v7237_v63, %v7311_v9 }
 0x409   : > { %v3271_v13 = vmax.f32 %v3255_v45, 0.0  ;;  %v4080_v42 = vsel %vm2659_vm4, 1.0, %v8080_v62 }
 0x40a   : > { %v2609_v11 = vpop.permute.xlu0 %2608  ;;  %v4144_v54 = vadd.f32 -0.5, %v3238_v4 }
 0x40b   : > { %v7319_v26 = vmul.f32 %v4079_v47, %v2609_v11  ;;  %v8151_v47 = vld [vmem:[#allocation34_spill] sm:$0xff] }
 0x40c   : > { %v3076_v11 = vsub.f32 1.0, %v8151_v47  ;;  %v3254_v17 = vfloor.f32 %v4144_v54 }
 0x40d   : > { %3142 = vperm.xlu1 %4656, %v4531_v39   ;;  %3191 = vperm.xlu2 %4657, %v2961_v53  }
 0x40f   : > { %v7322_v24 = vpop.permute.xlu1 %2636  ;;  %v2696_v33 = vpop.permute.xlu2 %2695 }
 0x410   : > { %3139 = vperm.xlu0 %4655, %v4526_v56   ;;  %v8152_v56 = vld [vmem:[#allocation44_spill] sm:$0xff]  ;;  %vm2662_vm10 = vcmp.eq.f32.partialorder %v7237_v63, %v7322_v24 }
 0x412   : > { %v2632_v7 = vpop.permute.xlu0 %2631 }
 0x413   : > { %vm2661_vm0 = vcmp.eq.f32.partialorder %v7237_v63, %v2632_v7  ;;  %v3279_v7 = vmin.f32 %v3271_v13, 15.0 }
 0x414   : > { %v4082_v60 = vsel %vm2661_vm0, 1.0, %v8080_v62 }
 0x415   : > { %3196 = vperm.xlu1 %4656, %v2962_v46   ;;  %3100 = vperm.xlu2 %4657, %v3074_v16   ;;  %v7330_v49 = vmul.f32 %v4082_v60, %v2696_v33  ;;  %v3077_v33 = vsub.f32 1.0, %v8152_v56  ;;  %v3270_v16 = vmax.f32 %v3254_v17, 0.0  ;;  %v4087_v60 = vsel %vm2666_vm1, 1.0, %v8080_v62 }
 0x417   : > { %v2652_v20 = vpop.permute.xlu1 %2651  ;;  %v2711_v43 = vpop.permute.xlu2 %2710  ;;  %v3278_v61 = vmin.f32 %v3270_v16, 15.0 }
 0x418   : > { %3105 = vperm.xlu0 %4655, %v3075_v27   ;;  %v3262_v27 = vsub.f32 %v4144_v54, %v3254_v17  ;;  %vm2665_vm2 = vcmp.eq.f32.partialorder %v7237_v63, %v2652_v20  ;;  %v4242_v20 = vld [vmem:[%s7671_s7 + $0x28] sm:$0xff]  ;;  %v4236_v54 = vld [vmem:[#allocation6 + $0x10] sm:$0xff] }
 0x419   : > { %3641 = vmatpush.bf16.msrb.mxu0 %v4242_v20  ;;  %2846 = vmatpush.bf16.msrb.mxu3 %v4236_v54 }
 0x41a   : > { %v2647_v53 = vpop.permute.xlu0 %2646 }
 0x41b   : > { %vm2664_vm3 = vcmp.eq.f32.partialorder %v7237_v63, %v2647_v53  ;;  %v4086_v53 = vsel %vm2665_vm2, 1.0, %v8080_v62 }
 0x41c   : > { %v4085_v19 = vsel %vm2664_vm3, 1.0, %v8080_v62 }
 0x41d   : > { %3148 = vperm.xlu1 %4656, %v4541_v36   ;;  %3201 = vperm.xlu2 %4657, %v2963_v34   ;;  %v7337_v22 = vmul.f32 %v4085_v19, %v2711_v43  ;;  %v3286_v34 = vadd.f32 1.0, %v3254_v17  ;;  %v3287_v43 = vadd.f32 1.0, %v3255_v45  ;;  %v3414_v36 = vsub.f32 1.0, %v3262_v27 }
 0x41e   : > { %2847 = vmatpush.bf16.msrb.mxu3 %v4235_v6 }
 0x41f   : > { %v7339_v55 = vpop.permute.xlu1 %2690  ;;  %v7342_v15 = vpop.permute.xlu2 %2903  ;;  %v3294_v44 = vmax.f32 %v3286_v34, 0.0  ;;  %v3295_v50 = vmax.f32 %v3287_v43, 0.0  ;;  %v4241_v34 = vld [vmem:[%s7671_s7 + $0x20] sm:$0xff] }
 0x420   : > { %3145 = vperm.xlu0 %4655, %v4536_v18   ;;  %3642 = vmatpush.bf16.msrb.mxu0 %v4241_v34 }
 0x421   : > { %v3302_v19 = vmin.f32 %v3294_v44, 15.0 }
 0x422   : > { %v2686_v39 = vpop.permute.xlu0 %2685 }
 0x423   : > { %v2723_v9 = vmul.f32 %v4080_v42, %v2686_v39 }
 0x425   : > { %3206 = vperm.xlu1 %4656, %v8151_v47   ;;  %3110 = vperm.xlu2 %4657, %v3076_v11   ;;  %v7381_v18 = vadd.f32 %v2723_v9, %v7250_v8  ;;  %v3256_v47 = vfloor.f32 %v7370_v37  ;;  %v8154_v11 = vld [vmem:[#allocation48_spill] sm:$0xff] }
 0x426   : > { %v3241_v21 = vmul.f32 16.0, %v8154_v11 }
 0x427   : > { %v2706_v0 = vpop.permute.xlu1 %2705  ;;  %v7353_v1 = vpop.permute.xlu2 %2912  ;;  %v3272_v43 = vmax.f32 %v3256_v47, 0.0 }
 0x428   : > { %v7351_v46 = vmul.f32 %v4084_v58, %v2706_v0  ;;  %3115 = vperm.xlu0 %4655, %v3077_v33   ;;  %v4081_v0 = vsel %vm2660_vm7, 1.0, %v8080_v62  ;;  %v3303_v58 = vmin.f32 %v3295_v50, 15.0  ;;  %v3288_v33 = vadd.f32 1.0, %v3256_v47  ;;  %v8156_v50 = vld [vmem:[#allocation53_spill] sm:$0xff] }
 0x429   : > { %v2724_v8 = vmul.f32 %v4081_v0, %v7339_v55  ;;  %v4147_v17 = vadd.f32 -0.5, %v3241_v21  ;;  %v3243_v20 = vmul.f32 16.0, %v8156_v50 }
 0x42a   : > { %v7357_v25 = vpop.permute.xlu0 %2700 }
 0x42b   : > { %v7398_v12 = vadd.f32 %v2724_v8, %v7289_v59  ;;  %v3257_v42 = vfloor.f32 %v4147_v17 }
 0x42d   : > { %3357 = vperm.xlu1 %4656, %v3279_v7   ;;  %3211 = vperm.xlu2 %4657, %v8152_v56   ;;  %v3263_v56 = vsub.f32 %v7335_v48, %v3255_v45  ;;  %v7402_v48 = vadd.f32 %v7330_v49, %v7279_v3  ;;  %v3296_v45 = vmax.f32 %v3288_v33, 0.0  ;;  %v3280_v49 = vmin.f32 %v3272_v43, 15.0 }
 0x42e   : > { %v3265_v11 = vsub.f32 %v4147_v17, %v3257_v42  ;;  %v4083_v17 = vsel %vm2662_vm10, 1.0, %v8080_v62 }
 0x42f   : > { %v2721_v23 = vpop.permute.xlu1 %2720  ;;  %v7367_v57 = vpop.permute.xlu2 %2921  ;;  %v3415_v16 = vsub.f32 1.0, %v3263_v56  ;;  %v3304_v9 = vmin.f32 %v3296_v45, 15.0  ;;  %v2726_v34 = vmul.f32 %v4083_v17, %v7357_v25  ;;  %v7443_v25 = vadd.f32 %v7351_v46, %v7309_v2 }
 0x430   : > { %v7365_v31 = vmul.f32 %v4087_v60, %v2721_v23  ;;  %3352 = vperm.xlu0 %4655, %v3278_v61   ;;  %v4234_v23 = vld [vmem:[#allocation6] sm:$0xff]  ;;  %v4240_v60 = vld [vmem:[%s7671_s7 + $0x18] sm:$0xff] }
 0x431   : > { %v8155_v61 = vld [vmem:[#allocation49_spill] sm:$0xff]  ;;  %2848 = vmatpush.bf16.msrb.mxu3 %v4234_v23  ;;  %3643 = vmatpush.bf16.msrb.mxu0 %v4240_v60 }
 0x432   : > { %v2716_v41 = vpop.permute.xlu0 %2715  ;;  %v3242_v44 = vmul.f32 16.0, %v8155_v61  ;;  %v4237_v61 = vld [vmem:[%s7671_s7] sm:$0xff] }
 0x433   : > { %v7375_v4 = vmul.f32 %v4086_v53, %v2716_v41  ;;  %v3289_v53 = vadd.f32 1.0, %v3257_v42  ;;  %v4239_v41 = vld [vmem:[%s7671_s7 + $0x10] sm:$0xff] }
 0x435   : > { %3424 = vperm.xlu1 %4656, %v3414_v36   ;;  %3472 = vperm.xlu2 %4657, %v3302_v19   ;;  %v3273_v36 = vmax.f32 %v3257_v42, 0.0  ;;  %v4148_v19 = vadd.f32 -0.5, %v3242_v44  ;;  %v3297_v0 = vmax.f32 %v3289_v53, 0.0  ;;  %v4238_v42 = vld [vmem:[%s7671_s7 + $0x8] sm:$0xff] }
 0x436   : > { %3644 = vmatpush.bf16.msrb.mxu0 %v4239_v41 }
 0x437   : > { %v7383_v39 = vpop.permute.xlu1 %2909  ;;  %v7388_v13 = vpop.permute.xlu2 %3026  ;;  %v3281_v21 = vmin.f32 %v3273_v36, 15.0  ;;  %v3258_v8 = vfloor.f32 %v4148_v19 }
 0x438   : > { %3477 = vperm.xlu0 %4655, %v3303_v58   ;;  %v4149_v58 = vadd.f32 -0.5, %v3243_v20 }
 0x439   : > { %v3274_v45 = vmax.f32 %v3258_v8, 0.0  ;;  %v3290_v53 = vadd.f32 1.0, %v3258_v8 }
 0x43a   : > { %v7392_v7 = vpop.permute.xlu0 %2906  ;;  %v3259_v23 = vfloor.f32 %v4149_v58  ;;  %3645 = vmatpush.bf16.msrb.mxu0 %v4238_v42  ;;  %v2926_v42 = vsub.s32 %v6468_v29, %v7342_v15 }
 0x43b   : > { %v3282_v60 = vmin.f32 %v3274_v45, 15.0  ;;  %v3298_v20 = vmax.f32 %v3290_v53, 0.0 }
 0x43c   : > { %v3291_v43 = vadd.f32 1.0, %v3259_v23  ;;  %v3275_v36 = vmax.f32 %v3259_v23, 0.0 }
 0x43d   : > { %3541 = vperm.xlu1 %4656, %v3263_v56   ;;  %3429 = vperm.xlu2 %4657, %v3415_v16   ;;  %v3417_v56 = vsub.f32 1.0, %v3265_v11  ;;  %v3264_v16 = vsub.f32 %v7370_v37, %v3256_v47  ;;  %v2734_v37 = vadd.f32 %v2726_v34, %v7267_v35  ;;  %v8157_v35 = vld [vmem:[#allocation47_spill] sm:$0xff] }
 0x43e   : > { %3646 = vmatpush.bf16.msrb.mxu0 %v4237_v61  ;;  %v3245_v41 = vmul.f32 16.0, %v8157_v35  ;;  %v3283_v46 = vmin.f32 %v3275_v36, 15.0  ;;  %v8158_v34 = vld [vmem:[#allocation43_spill] sm:$0xff]  ;;  %v2927_v61 = vsub.s32 %v6468_v29, %v7392_v7 }
 0x43f   : > { %v7404_v55 = vpop.permute.xlu1 %2918  ;;  %v7409_v59 = vpop.permute.xlu2 %3035  ;;  %v3416_v63 = vsub.f32 1.0, %v3264_v16  ;;  %v3244_v45 = vmul.f32 16.0, %v8158_v34 }
 0x440   : > { %3536 = vperm.xlu0 %4655, %v3262_v27   ;;  %v7419_v27 = vadd.f32 %v7337_v22, %v7294_v52  ;;  %v3305_v22 = vmin.f32 %v3297_v0, 15.0  ;;  %v7463_v17 = vadd.f32 -0.5, %v3245_v41  ;;  %vm3047_vm14 = vcmp.eq.s32.totalorder %v2927_v61, %v7388_v13 }
 0x442   : > { %v7412_v3 = vpop.permute.xlu0 %2915 }
 0x445   : > { %3482 = vperm.xlu1 %4656, %v3304_v9   ;;  %3362 = vperm.xlu2 %4657, %v3280_v49   ;;  %v3299_v49 = vmax.f32 %v3291_v43, 0.0  ;;  %v3267_v43 = vsub.f32 %v4149_v58, %v3259_v23 }
 0x447   : > { %v7422_v54 = vpop.permute.xlu1 %3023  ;;  %v7426_v33 = vpop.permute.xlu2 %3044  ;;  %v3307_v2 = vmin.f32 %v3299_v49, 15.0  ;;  %v3419_v36 = vsub.f32 1.0, %v3267_v43 }
 0x448   : > { %3367 = vperm.xlu0 %4655, %v3281_v21   ;;  %vm3046_vm9 = vcmp.eq.s32.totalorder %v2926_v42, %v7422_v54  ;;  %v4129_v54 = vsel %vm3047_vm14, 1.0, %v8080_v62 }
 0x449   : > { %v4128_v7 = vsel %vm3046_vm9, 1.0, %v8080_v62 }
 0x44a   : > { %v7428_v52 = vpop.permute.xlu0 %2924 }
 0x44d   : > { %3439 = vperm.xlu1 %4656, %v3417_v56   ;;  %3487 = vperm.xlu2 %4657, %v3305_v22   ;;  %v7457_v22 = vadd.f32 %v7375_v4, %v7276_v38  ;;  %v4150_v38 = vadd.f32 -0.5, %v3244_v45 }
 0x44f   : > { %v7433_v6 = vpop.permute.xlu1 %3032  ;;  %v3128_v44 = vpop.permute.xlu2 %3127 }
 0x450   : > { %3434 = vperm.xlu0 %4655, %v3416_v63   ;;  %vm3150_vm15 = vcmp.eq.s32.totalorder %v2926_v42, %v3128_v44 }
 0x451   : > { %v4136_v58 = vsel %vm3150_vm15, 1.0, %v8080_v62 }
 0x452   : > { %v7439_v47 = vpop.permute.xlu0 %3029 }
 0x453   : > { %v2779_v24 = vpop.f32.mrf.mxu2 }
 0x454   : > { %v2799_v21 = vmul.f32 %v2779_v24, %v7381_v18  ;;  %v3306_v24 = vmin.f32 %v3298_v20, 15.0 }
 0x455   : > { %3372 = vperm.xlu1 %4656, %v3282_v60   ;;  %3546 = vperm.xlu2 %4657, %v3264_v16   ;;  %v7461_v16 = vadd.f32 %v7365_v31, %v7319_v26  ;;  %v7468_v60 = vfloor.f32 %v7463_v17 }
 0x457   : > { %v7448_v9 = vpop.permute.xlu1 %3041  ;;  %v3182_v63 = vpop.permute.xlu2 %3181 }
 0x458   : > { %3551 = vperm.xlu0 %4655, %v3265_v11  }
 0x45a   : > { %v7452_v0 = vpop.permute.xlu0 %3038 }
 0x45b   : > { %v2781_v50 = vpop.f32.mrf.mxu2 }
 0x45c   : > { %v2800_v56 = vmul.f32 %v2781_v50, %v7398_v12  ;;  %v3266_v12 = vsub.f32 %v4148_v19, %v3258_v8  ;;  %v3277_v19 = vmax.f32 %v7468_v60, 0.0  ;;  %v3260_v8 = vfloor.f32 %v4150_v38 }
 0x45d   : > { %3497 = vperm.xlu1 %4656, %v3307_v2   ;;  %3377 = vperm.xlu2 %4657, %v3283_v46  }
 0x45e   : > { %v2807_v11 = vpack.c.bf16 %v2800_v56, %v2799_v21  ;;  %v3418_v31 = vsub.f32 1.0, %v3266_v12  ;;  %v3285_v35 = vmin.f32 %v3277_v19, 15.0  ;;  %v3276_v41 = vmax.f32 %v3260_v8, 0.0 }
 0x45f   : > { %v3086_v18 = vpop.permute.xlu1 %3085  ;;  %v3091_v53 = vpop.permute.xlu2 %3090  ;;  %v3292_v46 = vadd.f32 1.0, %v3260_v8  ;;  %v2929_v19 = vsub.s32 %v6468_v29, %v7353_v1 }
 0x460   : > { %4116 = vmatmul.msk.bf16.vlgmr.msrb.gmra.mxu3 %vm2757_vm8, %v2807_v11  ;;  %3492 = vperm.xlu0 %4655, %v3306_v24   ;;  %v3119_v13 = vmul.f32 %v4129_v54, %v3086_v18  ;;  %v3268_v24 = vsub.f32 %v4150_v38, %v3260_v8 }
 0x461   : > { %vm3049_vm3 = vcmp.eq.s32.totalorder %v2929_v19, %v7433_v6 }
 0x462   : > { %v3081_v26 = vpop.permute.xlu0 %3080  ;;  %v3420_v42 = vsub.f32 1.0, %v3268_v24 }
 0x463   : > { %v2784_v4 = vpop.f32.mrf.mxu2  ;;  %v3118_v20 = vmul.f32 %v4128_v7, %v3081_v26  ;;  %v2928_v26 = vsub.s32 %v6468_v29, %v7383_v39 }
 0x464   : > { %v2801_v44 = vmul.f32 %v2784_v4, %v7402_v48  ;;  %v3300_v48 = vmax.f32 %v3292_v46, 0.0 }
 0x465   : > { %3556 = vperm.xlu1 %4656, %v3266_v12   ;;  %3444 = vperm.xlu2 %4657, %v3418_v31   ;;  %v3284_v12 = vmin.f32 %v3276_v41, 15.0  ;;  %vm3048_vm13 = vcmp.eq.s32.totalorder %v2928_v26, %v7439_v47  ;;  %v4131_v41 = vsel %vm3049_vm3, 1.0, %v8080_v62 }
 0x466   : > { %v3308_v38 = vmin.f32 %v3300_v48, 15.0  ;;  %v4130_v1 = vsel %vm3048_vm13, 1.0, %v8080_v62 }
 0x467   : > { %v3177_v49 = vpop.permute.xlu1 %3176 }
 0x468   : > { %3449 = vperm.xlu0 %4655, %v3419_v36   ;;  %v3214_v15 = vmul.f32 %v4136_v58, %v3177_v49  ;;  %v3269_v36 = vsub.f32 %v7463_v17, %v7468_v60 }
 0x46a   : > { %v3131_v50 = vpop.permute.xlu0 %3130  ;;  %v3222_v11 = vadd.f32 %v3214_v15, %v3118_v20 }
 0x46b   : > { %v2786_v23 = vpop.f32.mrf.mxu2  ;;  %vm3151_vm11 = vcmp.eq.s32.totalorder %v2927_v61, %v3131_v50  ;;  %v3421_v50 = vsub.f32 1.0, %v3269_v36 }
 0x46c   : > { %v2802_v2 = vmul.f32 %v2786_v23, %v2734_v37  ;;  %v4137_v21 = vsel %vm3151_vm11, 1.0, %v8080_v62  ;;  %v3293_v37 = vadd.f32 1.0, %v7468_v60  ;;  %v3230_v31 = vmul.f32 %v8137_v30, %v3222_v11  ;;  %v8160_v11 = vld [vmem:[#allocation25_spill] sm:$0xff] }
 0x46d   : > { %3387 = vperm.xlu1 %4656, %v3285_v35   ;;  %3561 = vperm.xlu2 %4657, %v3267_v43   ;;  %v3215_v34 = vmul.f32 %v4137_v21, %v3182_v63  ;;  %v3192_v63 = vpop.permute.xlu2 %3191  ;;  %v3120_v23 = vmul.f32 %v4130_v1, %v3091_v53  ;;  %v8164_v1 = vld [vmem:[#allocation35_spill] sm:$0xff] }
 0x46e   : > { %v2808_v56 = vpack.c.bf16 %v2802_v2, %v2801_v44  ;;  %v3301_v49 = vmax.f32 %v3293_v37, 0.0 }
 0x46f   : > { %v3137_v45 = vpop.permute.xlu1 %3136  ;;  %v3223_v4 = vadd.f32 %v3215_v34, %v3119_v13  ;;  %v3781_v34 = vsub.f32 1.0, %v8160_v11  ;;  %v4247_v11 = vld [vmem:[%s7672_s8 + $0x20] sm:$0xff] }
 0x470   : > { %4117 = vmatmul.msk.bf16.gmra.mxu3 %vm2757_vm8, %v2808_v56  ;;  %3382 = vperm.xlu0 %4655, %v3284_v12   ;;  %vm3153_vm12 = vcmp.eq.s32.totalorder %v2929_v19, %v3137_v45  ;;  %v3309_v30 = vmin.f32 %v3301_v49, 15.0  ;;  %v2931_v12 = vsub.s32 %v6468_v29, %v7404_v55 }
 0x471   : > { %v3231_v43 = vmul.f32 %v8136_v14, %v3223_v4  ;;  %v4139_v15 = vsel %vm3153_vm12, 1.0, %v8080_v62 }
 0x472   : > { %v3134_v61 = vpop.permute.xlu0 %3133  ;;  %v3217_v2 = vmul.f32 %v4139_v15, %v3192_v63  ;;  %vm3051_vm2 = vcmp.eq.s32.totalorder %v2931_v12, %v7452_v0  ;;  %v8163_v63 = vld [vmem:[#allocation38_spill] sm:$0xff]  ;;  %v3785_v15 = vsub.f32 1.0, %v8164_v1 }
 0x473   : > { %v2789_v18 = vpop.f32.mrf.mxu2  ;;  %vm3152_vm0 = vcmp.eq.s32.totalorder %v2928_v26, %v3134_v61  ;;  %v3310_v8 = vpack.c.bf16 %v3231_v43, %v3230_v31  ;;  %v8162_v31 = vld [vmem:[#allocation36_spill] sm:$0xff]  ;;  %v3784_v61 = vsub.f32 1.0, %v8163_v63  ;;  %v4133_v49 = vsel %vm3051_vm2, 1.0, %v8080_v62 }
 0x474   : > { %v4138_v39 = vsel %vm3152_vm0, 1.0, %v8080_v62  ;;  %v2803_v35 = vmul.f32 %v2789_v18, %v7443_v25  ;;  %v2930_v25 = vsub.s32 %v6468_v29, %v7412_v3  ;;  %v8161_v3 = vld [vmem:[#allocation24_spill] sm:$0xff]  ;;  %v3786_v43 = vsub.f32 1.0, %v8162_v31 }
 0x475   : > { %3454 = vperm.xlu1 %4656, %v3420_v42   ;;  %3502 = vperm.xlu2 %4657, %v3308_v38   ;;  %v3101_v6 = vpop.permute.xlu2 %3100 }
 0x476   : > { %4192 = vmatmul.msk.bf16.vlgmr.msrb.gmra.mxu0 %vm3626_vm5, %v3310_v8  ;;  %vm3050_vm6 = vcmp.eq.s32.totalorder %v2930_v25, %v7409_v59 }
 0x477   : > { %v3187_v14 = vpop.permute.xlu1 %3186  ;;  %v4132_v37 = vsel %vm3050_vm6, 1.0, %v8080_v62 }
 0x478   : > { %v3216_v58 = vmul.f32 %v4138_v39, %v3187_v14  ;;  %3507 = vperm.xlu0 %4655, %v3309_v30   ;;  %v3122_v55 = vmul.f32 %v4132_v37, %v3101_v6 }
 0x47a   : > { %v3096_v7 = vpop.permute.xlu0 %3095  ;;  %v3224_v17 = vadd.f32 %v3216_v58, %v3120_v23 }
 0x47b   : > { %v2791_v47 = vpop.f32.mrf.mxu2  ;;  %v3121_v60 = vmul.f32 %v4131_v41, %v3096_v7 }
 0x47c   : > { %v2804_v44 = vmul.f32 %v2791_v47, %v7419_v27  ;;  %v3232_v53 = vmul.f32 %v8142_v5, %v3224_v17  ;;  %v8159_v27 = vld [vmem:[#allocation37_spill] sm:$0xff] }
 0x47d   : > { %3571 = vperm.xlu1 %4656, %v3269_v36   ;;  %3459 = vperm.xlu2 %4657, %v3421_v50   ;;  %v3225_v20 = vadd.f32 %v3217_v2, %v3121_v60  ;;  %v3783_v56 = vsub.f32 1.0, %v8159_v27  ;;  %v3202_v4 = vpop.permute.xlu2 %3201  ;;  %v8166_v50 = vld [vmem:[#allocation41_spill] sm:$0xff] }
 0x47e   : > { %v2809_v46 = vpack.c.bf16 %v2804_v44, %v2803_v35  ;;  %v8165_v35 = vld [vmem:[#allocation40_spill] sm:$0xff]  ;;  %v3788_v2 = vsub.f32 1.0, %v8166_v50 }
 0x47f   : > { %v3143_v54 = vpop.permute.xlu1 %3142  ;;  %v3233_v21 = vmul.f32 %v8141_v40, %v3225_v20  ;;  %v3787_v41 = vsub.f32 1.0, %v8165_v35 }
 0x480   : > { %4118 = vmatmul.msk.bf16.gmra.mxu3 %vm2757_vm8, %v2809_v46  ;;  %3566 = vperm.xlu0 %4655, %v3268_v24   ;;  %vm3155_vm4 = vcmp.eq.s32.totalorder %v2931_v12, %v3143_v54  ;;  %v3782_v24 = vsub.f32 1.0, %v8161_v3  ;;  %v4243_v3 = vld [vmem:[%s7672_s8] sm:$0xff] }
 0x481   : > { %v3311_v48 = vpack.c.bf16 %v3233_v21, %v3232_v53  ;;  %v4141_v59 = vsel %vm3155_vm4, 1.0, %v8080_v62 }
 0x482   : > { %v3140_v45 = vpop.permute.xlu0 %3139  ;;  %v3219_v14 = vmul.f32 %v4141_v59, %v3202_v4 }
 0x483   : > { %v2794_v13 = vpop.f32.mrf.mxu2  ;;  %vm3154_vm1 = vcmp.eq.s32.totalorder %v2930_v25, %v3140_v45  ;;  %v4245_v45 = vld [vmem:[%s7672_s8 + $0x10] sm:$0xff] }
 0x484   : > { %v4140_v5 = vsel %vm3154_vm1, 1.0, %v8080_v62  ;;  %v2805_v38 = vmul.f32 %v2794_v13, %v7457_v22 }
 0x485   : > { %3802 = vperm.xlu1 %4656, %v3783_v56   ;;  %3792 = vperm.xlu2 %4657, %v3781_v34   ;;  %v3111_v23 = vpop.permute.xlu2 %3110 }
 0x486   : > { %4193 = vmatmul.msk.bf16.gmra.mxu0 %vm3626_vm5, %v3311_v48 }
 0x487   : > { %v3197_v40 = vpop.permute.xlu1 %3196 }
 0x488   : > { %v3218_v26 = vmul.f32 %v4140_v5, %v3197_v40  ;;  %3797 = vperm.xlu0 %4655, %v3782_v24   ;;  %v4244_v5 = vld [vmem:[%s7672_s8 + $0x8] sm:$0xff] }
 0x48a   : > { %v3226_v18 = vadd.f32 %v3218_v26, %v3122_v55  ;;  %v3106_v19 = vpop.permute.xlu0 %3105 }
 0x48b   : > { %v2796_v42 = vpop.f32.mrf.mxu2  ;;  %v3123_v30 = vmul.f32 %v4133_v49, %v3106_v19 }
 0x48c   : > { %v2806_v8 = vmul.f32 %v2796_v42, %v7461_v16  ;;  %v3234_v39 = vmul.f32 %v8145_v32, %v3226_v18  ;;  %v2932_v16 = vsub.s32 %v6468_v29, %v7367_v57  ;;  %v2933_v32 = vsub.s32 %v6468_v29, %v7428_v52 }
 0x48d   : > { %3817 = vperm.xlu1 %4656, %v3786_v43   ;;  %3807 = vperm.xlu2 %4657, %v3784_v61   ;;  %v3227_v36 = vadd.f32 %v3219_v14, %v3123_v30  ;;  %v7563_v43 = vld [vmem:[%s7673_s9] ss:$0 sm:$0xff] }
 0x48e   : > { %v2810_v0 = vpack.c.bf16 %v2806_v8, %v2805_v38  ;;  %vm3052_vm7 = vcmp.eq.s32.totalorder %v2932_v16, %v7448_v9  ;;  %v3212_v9 = vpop.permute.xlu2 %3211 }
 0x48f   : > { %v3149_v58 = vpop.permute.xlu1 %3148  ;;  %v3235_v22 = vmul.f32 %v8144_v51, %v3227_v36  ;;  %v4134_v57 = vsel %vm3052_vm7, 1.0, %v8080_v62 }
 0x490   : > { %4119 = vmatmul.msk.bf16.gmra.mxu3 %vm2757_vm8, %v2810_v0  ;;  %3812 = vperm.xlu0 %4655, %v3785_v15   ;;  %vm3157_vm15 = vcmp.eq.s32.totalorder %v2933_v32, %v3149_v58  ;;  %v3124_v60 = vmul.f32 %v4134_v57, %v3111_v23  ;;  %vm3053_vm8 = vcmp.eq.s32.totalorder %v2933_v32, %v7426_v33  ;;  %v4248_v33 = vld [vmem:[%s7672_s8 + $0x28] sm:$0xff] }
 0x491   : > { %v3312_v47 = vpack.c.bf16 %v3235_v22, %v3234_v39  ;;  %v4143_v29 = vsel %vm3157_vm15, 1.0, %v8080_v62  ;;  %v4135_v6 = vsel %vm3053_vm8, 1.0, %v8080_v62  ;;  %3730 = vmatpush.bf16.msrb.mxu1 %v4248_v33 }
 0x492   : > { %v3146_v7 = vpop.permute.xlu0 %3145  ;;  %v3221_v20 = vmul.f32 %v4143_v29, %v3212_v9 }
 0x493   : > { %vm3156_vm10 = vcmp.eq.s32.totalorder %v2932_v16, %v3146_v7 }
 0x494   : > { %v4142_v44 = vsel %vm3156_vm10, 1.0, %v8080_v62 }
 0x495   : > { %3822 = vperm.xlu2 %4657, %v3787_v41   ;;  %3731 = vmatpush.bf16.msrb.mxu1 %v4247_v11 }
 0x496   : > { %4194 = vmatmul.msk.bf16.gmra.mxu0 %vm3626_vm5, %v3312_v47  ;;  %v3473_v12 = vpop.permute.xlu2 %3472 }
 0x497   : > { %v3207_v51 = vpop.permute.xlu1 %3206  ;;  %vm3510_vm9 = vcmp.eq.f32.partialorder %v7563_v43, %v3473_v12 }
 0x498   : > { %v3220_v17 = vmul.f32 %v4142_v44, %v3207_v51  ;;  %3827 = vperm.xlu0 %4655, %v3788_v2   ;;  %v4160_v19 = vsel %vm3510_vm9, 1.0, %v8080_v62 }
 0x49a   : > { %v3228_v52 = vadd.f32 %v3220_v17, %v3124_v60  ;;  %v3116_v46 = vpop.permute.xlu0 %3115 }
 0x49b   : > { %v3125_v54 = vmul.f32 %v4135_v6, %v3116_v46 }
 0x49c   : > { %v3236_v25 = vmul.f32 %v8146_v10, %v3228_v52  ;;  %v4246_v10 = vld [vmem:[%s7672_s8 + $0x18] sm:$0xff] }
 0x49d   : > { %v3229_v53 = vadd.f32 %v3221_v20, %v3125_v54  ;;  %3732 = vmatpush.bf16.msrb.mxu1 %v4246_v10 }
 0x49e   : > { %v3430_v24 = vpop.permute.xlu2 %3429 }
 0x49f   : > { %v3237_v21 = vmul.f32 %v8148_v28, %v3229_v53  ;;  %v3358_v56 = vpop.permute.xlu1 %3357 }
 0x4a0   : > { %vm3391_vm14 = vcmp.eq.f32.partialorder %v7563_v43, %v3358_v56 }
 0x4a1   : > { %v3313_v27 = vpack.c.bf16 %v3237_v21, %v3236_v25  ;;  %3733 = vmatpush.bf16.msrb.mxu1 %v4245_v45  ;;  %v4153_v61 = vsel %vm3391_vm14, 1.0, %v8080_v62 }
 0x4a2   : > { %v3353_v13 = vpop.permute.xlu0 %3352  ;;  %v3463_v0 = vmul.f32 %v4153_v61, %v3430_v24 }
 0x4a3   : > { %vm3390_vm0 = vcmp.eq.f32.partialorder %v7563_v43, %v3353_v13 }
 0x4a4   : > { %v4152_v30 = vsel %vm3390_vm0, 1.0, %v8080_v62 }
 0x4a5   : > { %3734 = vmatpush.bf16.msrb.mxu1 %v4244_v5 }
 0x4a6   : > { %4195 = vmatmul.msk.bf16.gmra.mxu0 %vm3626_vm5, %v3313_v27  ;;  %v3363_v26 = vpop.permute.xlu2 %3362 }
 0x4a7   : > { %v3425_v28 = vpop.permute.xlu1 %3424  ;;  %vm3392_vm13 = vcmp.eq.f32.partialorder %v7563_v43, %v3363_v26 }
 0x4a8   : > { %v3462_v39 = vmul.f32 %v4152_v30, %v3425_v28  ;;  %v4154_v51 = vsel %vm3392_vm13, 1.0, %v8080_v62 }
 0x4a9   : > { %3735 = vmatpush.bf16.msrb.mxu1 %v4243_v3 }
 0x4aa   : > { %v3478_v34 = vpop.permute.xlu0 %3477 }
 0x4ab   : > { %vm3511_vm11 = vcmp.eq.f32.partialorder %v7563_v43, %v3478_v34 }
 0x4ac   : > { %v4161_v38 = vsel %vm3511_vm11, 1.0, %v8080_v62 }
 0x4ae   : > { %v3488_v31 = vpop.permute.xlu2 %3487 }
 0x4af   : > { %v3542_v48 = vpop.permute.xlu1 %3541  ;;  %vm3513_vm12 = vcmp.eq.f32.partialorder %v7563_v43, %v3488_v31 }
 0x4b0   : > { %v3575_v8 = vmul.f32 %v4161_v38, %v3542_v48  ;;  %v4163_v44 = vsel %vm3513_vm12, 1.0, %v8080_v62 }
 0x4b2   : > { %v3537_v40 = vpop.permute.xlu0 %3536  ;;  %v3583_v1 = vadd.f32 %v3575_v8, %v3463_v0 }
 0x4b3   : > { %v3574_v14 = vmul.f32 %v4160_v19, %v3537_v40 }
 0x4b5   : > { %v3582_v58 = vadd.f32 %v3574_v14, %v3462_v39 }
 0x4b6   : > { %v3547_v49 = vpop.permute.xlu2 %3546 }
 0x4b7   : > { %v3483_v37 = vpop.permute.xlu1 %3482 }
 0x4b8   : > { %vm3512_vm3 = vcmp.eq.f32.partialorder %v7563_v43, %v3483_v37 }
 0x4b9   : > { %v4162_v32 = vsel %vm3512_vm3, 1.0, %v8080_v62 }
 0x4ba   : > { %v3368_v4 = vpop.permute.xlu0 %3367  ;;  %v3576_v60 = vmul.f32 %v4162_v32, %v3547_v49 }
 0x4bb   : > { %vm3393_vm6 = vcmp.eq.f32.partialorder %v7563_v43, %v3368_v4 }
 0x4bc   : > { %v4155_v17 = vsel %vm3393_vm6, 1.0, %v8080_v62 }
 0x4be   : > { %v3378_v35 = vpop.permute.xlu2 %3377 }
 0x4bf   : > { %v3440_v55 = vpop.permute.xlu1 %3439  ;;  %vm3395_vm1 = vcmp.eq.f32.partialorder %v7563_v43, %v3378_v35 }
 0x4c0   : > { %v3465_v29 = vmul.f32 %v4155_v17, %v3440_v55  ;;  %v4157_v10 = vsel %vm3395_vm1, 1.0, %v8080_v62 }
 0x4c2   : > { %v3435_v59 = vpop.permute.xlu0 %3434 }
 0x4c3   : > { %v3464_v2 = vmul.f32 %v4154_v51, %v3435_v59  ;;  %v7607_v51 = vld [vmem:[%s7674_s10] ss:$0 sm:$0xff] }
 0x4c5   : > { %v3584_v9 = vadd.f32 %v3576_v60, %v3464_v2 }
 0x4c6   : > { %v3445_v52 = vpop.permute.xlu2 %3444 }
 0x4c7   : > { %v3373_v18 = vpop.permute.xlu1 %3372 }
 0x4c8   : > { %vm3394_vm4 = vcmp.eq.f32.partialorder %v7563_v43, %v3373_v18 }
 0x4c9   : > { %v4156_v56 = vsel %vm3394_vm4, 1.0, %v8080_v62 }
 0x4ca   : > { %v3552_v42 = vpop.permute.xlu0 %3551  ;;  %v3466_v45 = vmul.f32 %v4156_v56, %v3445_v52 }
 0x4cb   : > { %v3577_v57 = vmul.f32 %v4163_v44, %v3552_v42 }
 0x4cd   : > { %v3585_v6 = vadd.f32 %v3577_v57, %v3465_v29 }
 0x4ce   : > { %v3562_v27 = vpop.permute.xlu2 %3561 }
 0x4cf   : > { %v3498_v36 = vpop.permute.xlu1 %3497 }
 0x4d0   : > { %vm3515_vm2 = vcmp.eq.f32.partialorder %v7563_v43, %v3498_v36 }
 0x4d1   : > { %v4165_v13 = vsel %vm3515_vm2, 1.0, %v8080_v62 }
 0x4d2   : > { %v3493_v15 = vpop.permute.xlu0 %3492  ;;  %v3579_v12 = vmul.f32 %v4165_v13, %v3562_v27 }
 0x4d3   : > { %vm3514_vm7 = vcmp.eq.f32.partialorder %v7563_v43, %v3493_v15  ;;  %v2021_v15 = vpop.f32.mrf.mxu3 }
 0x4d4   : > { %v4164_v11 = vsel %vm3514_vm7, 1.0, %v8080_v62 }
 0x4d6   : > { %v3503_v26 = vpop.permute.xlu2 %3502 }
 0x4d7   : > { %v3557_v7 = vpop.permute.xlu1 %3556  ;;  %vm3516_vm10 = vcmp.eq.f32.partialorder %v7563_v43, %v3503_v26 }
 0x4d8   : > { %v3578_v28 = vmul.f32 %v4164_v11, %v3557_v7  ;;  %v4166_v61 = vsel %vm3516_vm10, 1.0, %v8080_v62 }
 0x4da   : > { %v3450_v50 = vpop.permute.xlu0 %3449  ;;  %v3586_v5 = vadd.f32 %v3578_v28, %v3466_v45 }
 0x4db   : > { %v3467_v34 = vmul.f32 %v4157_v10, %v3450_v50 }
 0x4dd   : > { %v3587_v3 = vadd.f32 %v3579_v12, %v3467_v34 }
 0x4de   : > { %v3460_v19 = vpop.permute.xlu2 %3459 }
 0x4df   : > { %v3388_v25 = vpop.permute.xlu1 %3387 }
 0x4e0   : > { %vm3397_vm15 = vcmp.eq.f32.partialorder %v7563_v43, %v3388_v25 }
 0x4e1   : > { %v4159_v42 = vsel %vm3397_vm15, 1.0, %v8080_v62 }
 0x4e2   : > { %v3383_v21 = vpop.permute.xlu0 %3382  ;;  %v3469_v14 = vmul.f32 %v4159_v42, %v3460_v19 }
 0x4e3   : > { %vm3396_vm9 = vcmp.eq.f32.partialorder %v7563_v43, %v3383_v21 }
 0x4e4   : > { %v4158_v8 = vsel %vm3396_vm9, 1.0, %v8080_v62 }
 0x4e6   : > { %v3793_v44 = vpop.permute.xlu2 %3792 }
 0x4e7   : > { %v3455_v48 = vpop.permute.xlu1 %3454  ;;  %v3833_v57 = vmul.f32 %v7607_v51, %v3793_v44 }
 0x4e8   : > { %v3468_v30 = vmul.f32 %v4158_v8, %v3455_v48 }
 0x4ea   : > { %v3508_v40 = vpop.permute.xlu0 %3507 }
 0x4eb   : > { %vm3517_vm8 = vcmp.eq.f32.partialorder %v7563_v43, %v3508_v40 }
 0x4ee   : > { %v3808_v11 = vpop.permute.xlu2 %3807 }
 0x4ef   : > { %v3572_v59 = vpop.permute.xlu1 %3571  ;;  %v3836_v45 = vmul.f32 %v7607_v51, %v3808_v11 }
 0x4f2   : > { %v3567_v31 = vpop.permute.xlu0 %3566 }
 0x4f3   : > { %v3648_v63 = vpop.f32.mrf.mxu0  ;;  %v3580_v49 = vmul.f32 %v4166_v61, %v3567_v31 }
 0x4f4   : > { %v3668_v23 = vmul.f32 %v3648_v63, %v3582_v58  ;;  %v4167_v63 = vsel %vm3517_vm8, 1.0, %v8080_v62 }
 0x4f5   : > { %v3581_v38 = vmul.f32 %v4167_v63, %v3572_v59  ;;  %v3588_v0 = vadd.f32 %v3580_v49, %v3468_v30 }
 0x4f7   : > { %v3589_v39 = vadd.f32 %v3581_v38, %v3469_v14  ;;  %v3823_v38 = vpop.permute.xlu2 %3822 }
 0x4f8   : > { %v3839_v8 = vmul.f32 %v7607_v51, %v3823_v38 }
 0x4fa   : > { %v3798_v52 = vpop.permute.xlu0 %3797 }
 0x4fb   : > { %v3650_v22 = vpop.f32.mrf.mxu0 }
 0x4fc   : > { %v3669_v16 = vmul.f32 %v3650_v22, %v3583_v1  ;;  %v2023_v22 = vpop.f32.mrf.mxu3 }
 0x4fe   : > { %v3676_v47 = vpack.c.bf16 %v3669_v16, %v3668_v23  ;;  %v2011_v23 = vpop.f32.mrf.mxu1 }
 0x500   : > { %4220 = vmatmul.msk.bf16.vlgmr.msrb.gmra.mxu1 %vm3626_vm5, %v3676_v47 }
 0x502   : > { %v3813_v40 = vpop.permute.xlu0 %3812 }
 0x503   : > { %v3653_v41 = vpop.f32.mrf.mxu0 }
 0x504   : > { %v3670_v20 = vmul.f32 %v3653_v41, %v3584_v9  ;;  %v2026_v16 = vpop.f32.mrf.mxu3 }
 0x506   : > { %v2013_v47 = vpop.f32.mrf.mxu1 }
 0x50b   : > { %v3655_v46 = vpop.f32.mrf.mxu0 }
 0x50c   : > { %v3671_v54 = vmul.f32 %v3655_v46, %v3585_v6  ;;  %v7601_v35 = vpop.f32.mrf.mxu3  ;;  %v3834_v46 = vmul.f32 %v7607_v51, %v3798_v52 }
 0x50e   : > { %v3677_v53 = vpack.c.bf16 %v3671_v54, %v3670_v20  ;;  %v2016_v62 = vpop.f32.mrf.mxu1 }
 0x510   : > { %4221 = vmatmul.msk.bf16.gmra.mxu1 %vm3626_vm5, %v3677_v53  ;;  %v3803_v53 = vpop.permute.xlu1 %3802 }
 0x513   : > { %v3658_v33 = vpop.f32.mrf.mxu0 }
 0x514   : > { %v3672_v37 = vmul.f32 %v3658_v33, %v3586_v5  ;;  %v2850_v41 = vpop.f32.mrf.mxu3  ;;  %v3835_v33 = vmul.f32 %v7607_v51, %v3803_v53 }
 0x515   : > { %v2870_v50 = vadd.f32 %v2850_v41, %v2011_v23 }
 0x516   : > { %v2018_v7 = vpop.f32.mrf.mxu1 }
 0x51b   : > { %v3660_v24 = vpop.f32.mrf.mxu0 }
 0x51c   : > { %v3673_v4 = vmul.f32 %v3660_v24, %v3587_v3  ;;  %v2852_v32 = vpop.f32.mrf.mxu3 }
 0x51d   : > { %v2871_v9 = vadd.f32 %v2852_v32, %v2013_v47 }
 0x51e   : > { %v3678_v55 = vpack.c.bf16 %v3673_v4, %v3672_v37  ;;  %v3837_v37 = vmul.f32 %v7607_v51, %v3813_v40 }
 0x520   : > { %4222 = vmatmul.msk.bf16.gmra.mxu1 %vm3626_vm5, %v3678_v55  ;;  %v3818_v55 = vpop.permute.xlu1 %3817 }
 0x523   : > { %v3663_v18 = vpop.f32.mrf.mxu0 }
 0x524   : > { %v3674_v58 = vmul.f32 %v3663_v18, %v3588_v0  ;;  %v2855_v60 = vpop.f32.mrf.mxu3  ;;  %v3838_v18 = vmul.f32 %v7607_v51, %v3818_v55 }
 0x525   : > { %v2872_v21 = vadd.f32 %v2855_v60, %v2016_v62 }
 0x52b   : > { %v3665_v36 = vpop.f32.mrf.mxu0 }
 0x52c   : > { %v3675_v1 = vmul.f32 %v3665_v36, %v3589_v39  ;;  %v2857_v25 = vpop.f32.mrf.mxu3  ;;  %v3828_v39 = vpop.permute.xlu0 %3827 }
 0x52d   : > { %v2873_v28 = vadd.f32 %v2857_v25, %v2018_v7 }
 0x52e   : > { %v3679_v43 = vpack.c.bf16 %v3675_v1, %v3674_v58  ;;  %v3840_v1 = vmul.f32 %v7607_v51, %v3828_v39 }
 0x530   : > { %4223 = vmatmul.msk.bf16.gmra.mxu1 %vm3626_vm5, %v3679_v43 }
 0x534   : > { %v2860_v10 = vpop.f32.mrf.mxu3 }
 0x535   : > { %v2874_v5 = vadd.f32 %v2860_v10, %v2021_v15 }
 0x53c   : > { %v2862_v3 = vpop.f32.mrf.mxu3 }
 0x53d   : > { %v2875_v59 = vadd.f32 %v2862_v3, %v2023_v22 }
 0x544   : > { %v2865_v63 = vpop.f32.mrf.mxu3 }
 0x545   : > { %v2876_v49 = vadd.f32 %v2865_v63, %v2026_v16 }
 0x54c   : > { %v2867_v0 = vpop.f32.mrf.mxu3 }
 0x54d   : > { %v2877_v36 = vadd.f32 %v2867_v0, %v7601_v35 }
 0x57d   : > { %v3737_v2 = vpop.f32.mrf.mxu1 }
 0x57e   : > { %v3757_v17 = vadd.f32 %v3737_v2, %v2870_v50 }
 0x580   : > { %v3841_v29 = vadd.f32 %v3833_v57, %v3757_v17 }
 0x582   : > { %3849 = vst [vmem:[%s7612_s13] sm:$0xff] %v3841_v29 }
 0x585   : > { %v3739_v6 = vpop.f32.mrf.mxu1 }
 0x586   : > { %v3758_v20 = vadd.f32 %v3739_v6, %v2871_v9 }
 0x588   : > { %v3842_v54 = vadd.f32 %v3834_v46, %v3758_v20 }
 0x58a   : > { %3850 = vst [vmem:[%s7612_s13 + $0x8] sm:$0xff] %v3842_v54 }
 0x58d   : > { %v3742_v27 = vpop.f32.mrf.mxu1 }
 0x58e   : > { %v3759_v56 = vadd.f32 %v3742_v27, %v2872_v21 }
 0x590   : > { %v3843_v13 = vadd.f32 %v3835_v33, %v3759_v56 }
 0x592   : > { %3851 = vst [vmem:[%s7612_s13 + $0x10] sm:$0xff] %v3843_v13 }
 0x595   : > { %v3744_v34 = vpop.f32.mrf.mxu1 }
 0x596   : > { %v3760_v12 = vadd.f32 %v3744_v34, %v2873_v28 }
 0x598   : > { %v3844_v48 = vadd.f32 %v3836_v45, %v3760_v12 }
 0x59a   : > { %3852 = vst [vmem:[%s7612_s13 + $0x18] sm:$0xff] %v3844_v48 }
 0x59d   : > { %v3747_v24 = vpop.f32.mrf.mxu1 }
 0x59e   : > { %v3761_v4 = vadd.f32 %v3747_v24, %v2874_v5 }
 0x5a0   : > { %v3845_v26 = vadd.f32 %v3837_v37, %v3761_v4 }
 0x5a2   : > { %3853 = vst [vmem:[%s7612_s13 + $0x20] sm:$0xff] %v3845_v26 }
 0x5a5   : > { %v3749_v31 = vpop.f32.mrf.mxu1 }
 0x5a6   : > { %v3762_v42 = vadd.f32 %v3749_v31, %v2875_v59 }
 0x5a8   : > { %v3846_v61 = vadd.f32 %v3838_v18, %v3762_v42 }
 0x5aa   : > { %3854 = vst [vmem:[%s7612_s13 + $0x28] sm:$0xff] %v3846_v61 }
 0x5ad   : > { %v3752_v19 = vpop.f32.mrf.mxu1 }
 0x5ae   : > { %v3763_v14 = vadd.f32 %v3752_v19, %v2876_v49 }
 0x5b0   : > { %v3847_v30 = vadd.f32 %v3839_v8, %v3763_v14 }
 0x5b2   : > { %3855 = vst [vmem:[%s7612_s13 + $0x30] sm:$0xff] %v3847_v30 }
 0x5b5   : > { %v3754_v58 = vpop.f32.mrf.mxu1 }
 0x5b6   : > { %v3764_v43 = vadd.f32 %v3754_v58, %v2877_v36 }
 0x5b8   : > { %v3848_v15 = vadd.f32 %v3840_v1, %v3764_v43 }
 0x5ba   : > { %3856 = vst [vmem:[%s7612_s13 + $0x38] sm:$0xff] %v3848_v15 }
 0x5bb   : > { %4793 = shalt.err (!%p4790_p8)
}
 0x5bc   : > { %s4851_s12 = smov 128   ;;  %s4852_s13 = smov 8  }
 0x5bd   : > { %4550 = dma.vmem_to_hbm [thread:$0]  (%p4951_p5), %s3871_s24, 1024, %s3873_s25, %s3858_s21, %s4851_s12, %s4851_s12, %s4852_s13  }
 0x5be PF: > { %p4567_p9 = scmp.ge.s32.totalorder %s4836_s20, 2  ;;  %s3887_s22 = sand.u32 1, %s4824_s17  }
 0x5bf   : > { %s3888_s26 = scalar_lea.sflag [#allocation5], %s3887_s22 }
 0x5c0   : > { %p4560_p10 = pnand %p4567_p9, %p4955_p6 }
 0x5c2   : > { %p4561_p11 = pneg %p4560_p10 }
 0x5c4   : > { %4819 = dma.done.wait (%p4561_p11), %s3888_s26, 1024  }
 0x5c5   : > { %4821 = vsyncadd (%p4561_p11), %s3888_s26, 4294966272  ;;  %s8167_s30 = sld [smem:[#allocation12_spill]]  ;;  %p23_p12 = scmp.ge.s32.totalorder %s4938_s23, 4  }
 0x5c6   : > { %s8168_s19 = sld [smem:[#allocation13_spill]]  ;;  %s8169_s17 = smov %s4828_s18 }
 0x5c7   : > { %s8171_s20 = smov %s4938_s23  ;;  %25 = sbr.rel (!%p23_p12) target bundleno = 5 (0x5), region = 108 }
 0x5cb   : > { %s8170_s18 = smov %s8167_s30 }
 0x5cc   :  { %3894 = vsyncpa [#allocation4], 1 }
 0x5cd   :  { %3896 = vsyncpa [#allocation4 + $0x1], 1 }
 0x5ce   :  { %3897 = vsyncpa [#allocation7], 1 }
 0x5cf   :  { %3898 = vsyncpa [#allocation5], 1 }
 0x5d0   :  { %3900 = vsyncpa [#allocation5 + $0x1], 1 }

// kernel: tpu_custom_call.1
= control target key start
LH: loop header
LB: loop body
LE: loop exit
PB: predicated region body
PF: predicated region fallthrough
CT: control target
= control target key end

     0   :  { %16 = vsyncpa [#allocation4], 0  ;;  %s7664_s0 = inlined_call_operand.vmem [shape: f32[128,3], index: 0, kind: input, shape index: {}]   ;;  %s7665_s1 = inlined_call_operand.vmem [shape: bf16[24,24], index: 1, kind: input, shape index: {}]   ;;  %s7666_s2 = inlined_call_operand.hbm [shape: bf16[24,128], index: 2, kind: input, shape index: {}]   ;;  %s7667_s3 = inlined_call_operand.vmem [shape: f32[1,24], index: 3, kind: input, shape index: {}]   ;;  %s7668_s4 = inlined_call_operand.vmem [shape: bf16[48,48], index: 4, kind: input, shape index: {}]   ;;  %s7669_s5 = inlined_call_operand.hbm [shape: bf16[48,128], index: 5, kind: input, shape index: {}]   ;;  %s7670_s6 = inlined_call_operand.vmem [shape: f32[1,48], index: 6, kind: input, shape index: {}]   ;;  %s7671_s7 = inlined_call_operand.vmem [shape: bf16[96,96], index: 7, kind: input, shape index: {}]   ;;  %s7672_s8 = inlined_call_operand.vmem [shape: bf16[96,128], index: 8, kind: input, shape index: {}]   ;;  %s7673_s9 = inlined_call_operand.vmem [shape: f32[1,96], index: 9, kind: input, shape index: {}]   ;;  %s7674_s10 = inlined_call_operand.vmem [shape: f32[1,128], index: 10, kind: input, shape index: {}]   ;;  %s7675_s11 = inlined_call_operand.hbm [shape: f32[128,128], index: 11, kind: output, shape index: {}]  }
   0x1   :  { %17 = vsyncpa [#allocation7], 0 }
   0x2   :  { %18 = vsyncpa [#allocation5], 0 }
   0x3   :  { %20 = vsyncpa [#allocation5 + $0x1], 0  ;;  %s4913_s17 = smov 0   ;;  %s4915_s18 = smov 0  }
   0x4   :  { %s4917_s19 = smov 0   ;;  %s4919_s20 = smov 0  }
   0x5 LB: > { %7837 = sst [smem:[#allocation12_spill]] %s4832_s19  ;;  %s4934_s21 = sadd.s32 4294967295, %s4836_s20   ;;  %s4836_s20 = sphi %s4919_s20, %s8171_s20   ;;  %s4832_s19 = sphi %s4917_s19, %s8168_s19   ;;  %s4828_s18 = sphi %s4915_s18, %s8170_s18   ;;  %s4824_s17 = sphi %s4913_s17, %s8169_s17  }
   0x6   : > { %s3957_s22 = sadd.s32 4294967294, %s4836_s20   ;;  %s4938_s23 = sadd.s32 1, %s4836_s20  }
   0x7   : > { %s269_s24 = sadd.s32 1, %s4832_s19  ;;  %s266_s25 = ssub.s32 %s4836_s20, %s4938_s23 }
   0x8   : > { %p279_p0 = scmp.ne.s32.totalorder %s4832_s19, %s4828_s18  ;;  %p267_p1 = scmp.eq.s32.totalorder %s266_s25, 0 }
   0x9   : > { %p280_p2 = scmp.eq.s32.totalorder %s4934_s21, 1  ;;  %p285_p3 = scmp.ne.s32.totalorder %s4828_s18, %s4824_s17 }
   0xa   : > { %p286_p4 = scmp.eq.s32.totalorder %s3957_s22, 1  ;;  %p3958_p7 = scmp.ge.s32.totalorder %s4836_s20, 1 }
   0xb   : > { %s4949_s26 = scalar_select %p267_p1, %s4832_s19, %s269_s24  }
   0xc   : > { %p4951_p5 = por %p280_p2, %p279_p0  ;;  %p4955_p6 = por %p286_p4, %p285_p3 }
   0xd   : > { %7838 = sst [smem:[#allocation13_spill]] %s4949_s26  ;;  %p293_p8 = scmp.lt.s32.totalorder %s4836_s20, 3 }
   0xe   : > { %p4563_p9 = scmp.eq.s32.totalorder %s4934_s21, 0  ;;  %s307_s13 = sshll.u32 %s7666_s2, 4  ;;  %s308_s13 = int_to_ptr.hbm [resolvable:$true] %s307_s13 }
   0xf   : > { %p4962_p10 = pnand %p3958_p7, %p293_p8  ;;  %s4838_s14 = smov [#allocation3]  }
  0x10   : > { %s309_s15 = sshll.u32 %s4838_s14, 4  ;;  %s327_s24 = sshll.u32 %s7669_s5, 4  ;;  %s310_s15 = int_to_ptr.vmem [resolvable:$true] %s309_s15  ;;  %s328_s24 = int_to_ptr.hbm [resolvable:$true] %s327_s24 }
  0x11   : > { %p4552_p11 = pneg %p4962_p10  ;;  %s4839_s25 = smov 64  }
  0x12   : > { %s4840_s26 = smov 4   ;;  %s4841_s19 = smov [#allocation6]  }
  0x13   : > { %p4553_p12 = pnand %p4563_p9, %p4552_p11  ;;  %s329_s30 = sshll.u32 %s4841_s19, 4  ;;  %s330_s30 = int_to_ptr.vmem [resolvable:$true] %s329_s30 }
  0x14   : > { %369 = sbr.rel (%p4962_p10) target bundleno = 1470 (0x5be), region = 64 }
  0x15   : > { %4555 = dma.hbm_to_vmem [thread:$0]  (!%p4553_p12), %s308_s13, 192, %s310_s15, [#allocation4], %s4839_s25, %s4839_s25, %s4840_s26  }
  0x16   : > { %4558 = dma.hbm_to_vmem [thread:$0]  (!%p4553_p12), %s328_s24, 384, %s330_s30, [#allocation7], %s4839_s25, %s4839_s25, %s4840_s26  }
  0x19   : > { %4811 = dma.done.wait (%p4563_p9), [#allocation4], 192  }
  0x1a   : > { %4813 = vsyncadd (%p4563_p9), [#allocation4], 4294967104 }
  0x1b   : > { %4815 = dma.done.wait (%p4563_p9), [#allocation7], 384  }
  0x1c   : > { %4817 = vsyncadd (%p4563_p9), [#allocation7], 4294966912  ;;  %s3966_s12 = sshll.u32 %s4934_s21, 3  ;;  %s4842_s14 = smov 127   ;;  %v4844_v16 = vmov 3.0   ;;  %v4845_v23 = vmov 5.0  }
  0x1d   : > { %p416_p13 = scmp.lt.s32.totalorder %s3966_s12, 15  ;;  %s4843_s15 = smov 126   ;;  %v4846_v50 = vmov 0  }
  0x1e   : > { %4656 = vset.pattern.permute.xlu1 %v4846_v50  ;;  %4655 = vset.pattern.permute.xlu0 %v4846_v50  ;;  %s4847_s16 = smov 2  }
  0x1f   : > { %s8173_s12 = smov (!%p416_p13, %s3966_s12), 15  ;;  %4657 = vset.pattern.permute.xlu2 %v4846_v50 }
  0x20   : > { %s3967_s19 = sshll.u32 %s8173_s12, 3  ;;  %s412_s12 = sand.u32 1, %s4828_s18  }
  0x21   : > { %s4990_s13 = scalar_lea.vmem %s7664_s0, %s3967_s19  ;;  %s3965_s29 = sshll.u32 %s412_s12, 6 }
  0x22   : > { %v4993_v0 = vld [vmem:[%s4990_s13 + $0x10] sm:$0xff]  ;;  %v4996_v1 = vld [vmem:[%s4990_s13] sm:$0xff]  ;;  %v5017_v6 = vld [vmem:[%s4990_s13 + $0x18] sm:$0xff] }
  0x23   : > { %v4999_v2 = vld [vmem:[%s4990_s13 + $0x20] sm:$0xff]  ;;  %v5002_v3 = vand.u32 2147483647, %v4993_v0  ;;  %v5005_v4 = vand.u32 2147483647, %v4996_v1  ;;  %7843 = vst [vmem:[#allocation15_spill] sm:$0xff] %v5017_v6 }
  0x24   : > { %v5008_v5 = vand.u32 2147483647, %v4999_v2  ;;  %v5020_v7 = vld [vmem:[%s4990_s13 + $0x8] sm:$0xff]  ;;  %v5026_v9 = vand.u32 2147483647, %v5017_v6  ;;  %v5041_v12 = vld [vmem:[%s4990_s13 + $0x38] sm:$0xff] }
  0x25   : > { %451 = vrot.lane.b32.xlu1 %v5002_v3, %s4842_s14  ;;  %447 = vrot.lane.b32.xlu0 %v5005_v4, %s4842_s14  ;;  %v5023_v8 = vld [vmem:[%s4990_s13 + $0x28] sm:$0xff]  ;;  %v5029_v10 = vand.u32 2147483647, %v5020_v7  ;;  %7845 = vst [vmem:[#allocation17_spill] sm:$0xff] %v5041_v12  ;;  %v5044_v13 = vld [vmem:[%s4990_s13 + $0x30] sm:$0xff]  ;;  %vm7737_vm0 = vcmp.gt.f32.partialorder %v4993_v0, 0.0 }
  0x26   : > { %7842 = vst [vmem:[#allocation14_spill] sm:$0xff] %v5008_v5  ;;  %455 = vrot.lane.b32.xlu2 %v5008_v5, %s4842_s14  ;;  %v5032_v11 = vand.u32 2147483647, %v5023_v8  ;;  %v5047_v14 = vand.u32 2147483647, %v5041_v12  ;;  %vm7739_vm1 = vcmp.gt.f32.partialorder %v5017_v6, 0.0 }
  0x27   : > { %7844 = vst [vmem:[#allocation16_spill] sm:$0xff] %v5023_v8  ;;  %v5050_v15 = vand.u32 2147483647, %v5044_v13  ;;  %vm7734_vm2 = vcmp.gt.f32.partialorder %v4999_v2, 0.0  ;;  %vm7740_vm3 = vcmp.gt.f32.partialorder %v5023_v8, 0.0  ;;  %v633_v17 = vsel %vm7737_vm0, 2.0, %v4844_v16 }
  0x28   : > { %7846 = vst [vmem:[#allocation18_spill] sm:$0xff] %v5044_v13  ;;  %v634_v18 = vsel %vm7739_vm1, 2.0, %v4844_v16  ;;  %v635_v19 = vsel %vm7734_vm2, 2.0, %v4844_v16  ;;  %v636_v20 = vsel %vm7740_vm3, 2.0, %v4844_v16  ;;  %vm7736_vm4 = vcmp.gt.f32.partialorder %v4996_v1, 0.0 }
  0x29   : > { %7847 = vst [vmem:[#allocation19_spill] sm:$0xff] %v5047_v14  ;;  %v4620_v21 = vpack.i.bf16 %v634_v18, %v633_v17  ;;  %v4625_v22 = vpack.i.bf16 %v636_v20, %v635_v19  ;;  %vm7738_vm5 = vcmp.gt.f32.partialorder %v5020_v7, 0.0  ;;  %v639_v24 = vsel %vm7736_vm4, 4.0, %v4845_v23 }
  0x2a   : > { %v640_v25 = vsel %vm7738_vm5, 4.0, %v4845_v23  ;;  %v631_v26 = vsel %vm7736_vm4, 2.0, %v4844_v16  ;;  %v632_v27 = vsel %vm7738_vm5, 2.0, %v4844_v16  ;;  %v641_v28 = vsel %vm7737_vm0, 4.0, %v4845_v23 }
  0x2b   : > { %v642_v29 = vsel %vm7739_vm1, 4.0, %v4845_v23  ;;  %v4635_v30 = vpack.i.bf16 %v640_v25, %v639_v24  ;;  %v4615_v31 = vpack.i.bf16 %v632_v27, %v631_v26  ;;  %vm7735_vm6 = vcmp.gt.f32.partialorder %v5044_v13, 0.0 }
  0x2c   : > { %v4640_v32 = vpack.i.bf16 %v642_v29, %v641_v28  ;;  %vm7733_vm7 = vcmp.gt.f32.partialorder %v5041_v12, 0.0  ;;  %v645_v33 = vsel %vm7735_vm6, 4.0, %v4845_v23  ;;  %v637_v35 = vsel %vm7735_vm6, 2.0, %v4844_v16 }
  0x2d   : > { %453 = vrot.lane.b32.xlu1 %v5026_v9, %s4842_s14  ;;  %449 = vrot.lane.b32.xlu0 %v5029_v10, %s4842_s14  ;;  %v646_v34 = vsel %vm7733_vm7, 4.0, %v4845_v23  ;;  %v638_v36 = vsel %vm7733_vm7, 2.0, %v4844_v16  ;;  %v5114_v39 = vsub.f32 0.0, %v4996_v1  ;;  %v643_v40 = vsel %vm7734_vm2, 4.0, %v4845_v23 }
  0x2e   : > { %457 = vrot.lane.b32.xlu2 %v5032_v11, %s4842_s14  ;;  %v4650_v37 = vpack.i.bf16 %v646_v34, %v645_v33  ;;  %v4630_v38 = vpack.i.bf16 %v638_v36, %v637_v35  ;;  %v644_v41 = vsel %vm7740_vm3, 4.0, %v4845_v23  ;;  %v5125_v42 = vsub.f32 0.0, %v4993_v0 }
  0x2f   : > { %v4645_v43 = vpack.i.bf16 %v644_v41, %v643_v40  ;;  %v5128_v44 = vsub.f32 0.0, %v5017_v6  ;;  %v5136_v45 = vsub.f32 0.0, %v5023_v8  ;;  %v5139_v46 = vsub.f32 0.0, %v5020_v7 }
  0x30   : > { %v5142_v47 = vsub.f32 0.0, %v5044_v13  ;;  %v5151_v48 = vsub.f32 0.0, %v4999_v2  ;;  %v5160_v49 = vsub.f32 0.0, %v5041_v12  ;;  %v7693_v29 = vmov 0.0  }
  0x35   : > { %461 = vrot.lane.b32.xlu1 %v5047_v14, %s4842_s14  ;;  %459 = vrot.lane.b32.xlu0 %v5050_v15, %s4842_s14 }
  0x36   : > { %479 = vrot.lane.b32.xlu2 %v5005_v4, %s4843_s15 }
  0x3d   : > { %483 = vrot.lane.b32.xlu1 %v5002_v3, %s4843_s15  ;;  %481 = vrot.lane.b32.xlu0 %v5029_v10, %s4843_s15 }
  0x3e   : > { %485 = vrot.lane.b32.xlu2 %v5026_v9, %s4843_s15 }
  0x45   : > { %489 = vrot.lane.b32.xlu1 %v5032_v11, %s4843_s15  ;;  %487 = vrot.lane.b32.xlu0 %v5008_v5, %s4843_s15 }
  0x46   : > { %491 = vrot.lane.b32.xlu2 %v5050_v15, %s4843_s15 }
  0x4d   : > { %4621 = vrot.lane.b32.xlu1 %v4620_v21, %s4842_s14  ;;  %493 = vrot.lane.b32.xlu0 %v5047_v14, %s4843_s15 }
  0x4e   : > { %4626 = vrot.lane.b32.xlu2 %v4625_v22, %s4842_s14 }
  0x55   : > { %4636 = vrot.lane.b32.xlu1 %v4635_v30, %s4843_s15  ;;  %4616 = vrot.lane.b32.xlu0 %v4615_v31, %s4842_s14 }
  0x56   : > { %4641 = vrot.lane.b32.xlu2 %v4640_v32, %s4843_s15 }
  0x5d   : > { %4651 = vrot.lane.b32.xlu1 %v4650_v37, %s4843_s15  ;;  %4631 = vrot.lane.b32.xlu0 %v4630_v38, %s4842_s14 }
  0x5e   : > { %743 = vrot.lane.b32.xlu2 %v5114_v39, %s4843_s15 }
  0x65   : > { %747 = vrot.lane.b32.xlu1 %v5125_v42, %s4843_s15  ;;  %4646 = vrot.lane.b32.xlu0 %v4645_v43, %s4843_s15 }
  0x66   : > { %749 = vrot.lane.b32.xlu2 %v5128_v44, %s4843_s15 }
  0x6d   : > { %753 = vrot.lane.b32.xlu1 %v5136_v45, %s4843_s15  ;;  %745 = vrot.lane.b32.xlu0 %v5139_v46, %s4843_s15 }
  0x6e   : > { %755 = vrot.lane.b32.xlu2 %v5142_v47, %s4843_s15 }
  0x75   : > { %775 = vrot.lane.b32.xlu1 %v4996_v1, %s4843_s15  ;;  %751 = vrot.lane.b32.xlu0 %v5151_v48, %s4843_s15 }
  0x76   : > { %777 = vrot.lane.b32.xlu2 %v5020_v7, %s4843_s15 }
  0x7d   : > { %781 = vrot.lane.b32.xlu1 %v5017_v6, %s4843_s15  ;;  %757 = vrot.lane.b32.xlu0 %v5160_v49, %s4843_s15 }
  0x7e   : > { %783 = vrot.lane.b32.xlu2 %v4999_v2, %s4843_s15 }
  0x80   : > { %v5168_v51 = vpop.permute.xlu2 %455 }
  0x81   : > { %7848 = vst [vmem:[#allocation20_spill] sm:$0xff] %v5168_v51  ;;  %vm7677_vm13 = vcmp.ge.f32.partialorder %v5008_v5, %v5168_v51  ;;  %v475_v36 = vmax.f32 %v5008_v5, %v5168_v51 }
  0x82   : > { %v579_v20 = vsel %vm7677_vm13, 1, %v4846_v50 }
  0x85   : > { %787 = vrot.lane.b32.xlu1 %v5044_v13, %s4843_s15  ;;  %779 = vrot.lane.b32.xlu0 %v4993_v0, %s4843_s15 }
  0x86   : > { %789 = vrot.lane.b32.xlu2 %v5041_v12, %s4843_s15 }
  0x88   : > { %v5176_v52 = vpop.permute.xlu2 %457 }
  0x89   : > { %vm7683_vm10 = vcmp.ge.f32.partialorder %v5032_v11, %v5176_v52  ;;  %v476_v37 = vmax.f32 %v5032_v11, %v5176_v52 }
  0x8a   : > { %v580_v61 = vsel %vm7683_vm10, 1, %v4846_v50 }
  0x8d   : > { %785 = vrot.lane.b32.xlu0 %v5023_v8, %s4843_s15 }
  0x90   : > { %v5180_v53 = vpop.permute.xlu2 %479 }
  0x97   : > { %v5182_v54 = vpop.permute.xlu1 %451  ;;  %v5184_v55 = vpop.permute.xlu0 %447 }
  0x98   : > { %vm7678_vm8 = vcmp.ge.f32.partialorder %v5002_v3, %v5182_v54  ;;  %vm543_vm9 = vcmp.ge.f32.partialorder %v5005_v4, %v5184_v55  ;;  %v5198_v58 = vpop.permute.xlu2 %485  ;;  %v471_v21 = vmax.f32 %v5005_v4, %v5184_v55  ;;  %v473_v38 = vmax.f32 %v5002_v3, %v5182_v54 }
  0x99   : > { %v577_v56 = vsel %vm7678_vm8, 1, %v4846_v50  ;;  %v575_v57 = vsel %vm543_vm9, 1, %v4846_v50 }
  0x9a   : > { %587 = vrot.lane.b32.xlu0 %v577_v56, %s4842_s14  ;;  %583 = vrot.lane.b32.xlu1 %v575_v57, %s4842_s14  ;;  %v5251_v24 = vmax.f32 %v471_v21, %v5180_v53 }
  0x9c   : > { %7850 = vst [vmem:[#allocation22_spill] sm:$0xff] %v5251_v24  ;;  %vm7680_vm8 = vcmp.gt.f32.partialorder %v5251_v24, 0.0 }
  0x9d   : > { %v5280_v32 = vsel %vm7680_vm8, 1.0, %v7693_v29 }
  0x9e   : > { %7853 = vst [vmem:[#allocation25_spill] sm:$0xff] %v5280_v32 }
  0x9f   : > { %v5202_v59 = vpop.permute.xlu1 %453  ;;  %v5204_v60 = vpop.permute.xlu0 %449 }
  0xa0   : > { %vm7684_vm11 = vcmp.ge.f32.partialorder %v5026_v9, %v5202_v59  ;;  %vm544_vm12 = vcmp.ge.f32.partialorder %v5029_v10, %v5204_v60  ;;  %v5222_v16 = vpop.permute.xlu2 %491  ;;  %v472_v23 = vmax.f32 %v5029_v10, %v5204_v60  ;;  %v474_v40 = vmax.f32 %v5026_v9, %v5202_v59 }
  0xa1   : > { %v578_v62 = vsel %vm7684_vm11, 1, %v4846_v50  ;;  %v576_v63 = vsel %vm544_vm12, 1, %v4846_v50 }
  0xa2   : > { %593 = vrot.lane.b32.xlu0 %v580_v61, %s4842_s14  ;;  %589 = vrot.lane.b32.xlu1 %v578_v62, %s4842_s14 }
  0xa3   : > { %585 = vrot.lane.b32.xlu2 %v576_v63, %s4842_s14  ;;  %v5320_v63 = vmax.f32 %v474_v40, %v5198_v58 }
  0xa5   : > { %7860 = vst [vmem:[#allocation32_spill] sm:$0xff] %v5320_v63 }
  0xa7   : > { %v5224_v17 = vpop.permute.xlu1 %461  ;;  %v5226_v18 = vpop.permute.xlu0 %459 }
  0xa8   : > { %7849 = vst [vmem:[#allocation21_spill] sm:$0xff] %v5224_v17  ;;  %vm7682_vm14 = vcmp.ge.f32.partialorder %v5050_v15, %v5226_v18  ;;  %v5244_v22 = vpop.permute.xlu2 %4626  ;;  %vm7681_vm15 = vcmp.ge.f32.partialorder %v5047_v14, %v5224_v17  ;;  %v477_v57 = vmax.f32 %v5050_v15, %v5226_v18 }
  0xa9   : > { %v581_v19 = vsel %vm7682_vm14, 1, %v4846_v50  ;;  %v582_v28 = vsel %vm7681_vm15, 1, %v4846_v50  ;;  %vm7732_vm14 = vcmp.gt.f32.partialorder %v5320_v63, 0.0 }
  0xaa   : > { %807 = vrot.lane.b32.xlu0 %v4996_v1, %s4847_s16  ;;  %595 = vrot.lane.b32.xlu1 %v581_v19, %s4842_s14  ;;  %v478_v19 = vmax.f32 %v5047_v14, %v5224_v17 }
  0xab   : > { %591 = vrot.lane.b32.xlu2 %v579_v20, %s4842_s14  ;;  %v5333_v20 = vmax.f32 %v477_v57, %v5222_v16  ;;  %v5366_v57 = vsel %vm7732_vm14, 1.0, %v7693_v29 }
  0xac   : > { %7866 = vst [vmem:[#allocation38_spill] sm:$0xff] %v5366_v57 }
  0xad   : > { %7861 = vst [vmem:[#allocation33_spill] sm:$0xff] %v5333_v20  ;;  %vm7731_vm10 = vcmp.gt.f32.partialorder %v5333_v20, 0.0 }
  0xae   : > { %v5381_v40 = vsel %vm7731_vm10, 1.0, %v7693_v29 }
  0xaf   : > { %v5253_v25 = vpop.permute.xlu1 %483  ;;  %v5255_v26 = vpop.permute.xlu0 %481  ;;  %7868 = vst [vmem:[#allocation40_spill] sm:$0xff] %v5381_v40 }
  0xb0   : > { %v5258_v27 = vmax.f32 %v472_v23, %v5255_v26  ;;  %v5275_v31 = vpop.permute.xlu2 %4641  ;;  %v5315_v61 = vmax.f32 %v473_v38, %v5253_v25 }
  0xb2   : > { %7851 = vst [vmem:[#allocation23_spill] sm:$0xff] %v5258_v27  ;;  %vm7679_vm13 = vcmp.gt.f32.partialorder %v5258_v27, 0.0  ;;  %813 = vrot.lane.b32.xlu0 %v5017_v6, %s4847_s16  ;;  %809 = vrot.lane.b32.xlu1 %v5020_v7, %s4847_s16  ;;  %vm7729_vm15 = vcmp.gt.f32.partialorder %v5315_v61, 0.0 }
  0xb3   : > { %597 = vrot.lane.b32.xlu2 %v582_v28, %s4842_s14  ;;  %v5273_v30 = vsel %vm7679_vm13, 1.0, %v7693_v29  ;;  %7858 = vst [vmem:[#allocation30_spill] sm:$0xff] %v5315_v61 }
  0xb4   : > { %7852 = vst [vmem:[#allocation24_spill] sm:$0xff] %v5273_v30 }
  0xb7   : > { %v5282_v33 = vpop.permute.xlu1 %489  ;;  %v5284_v34 = vpop.permute.xlu0 %487 }
  0xb8   : > { %7854 = vst [vmem:[#allocation26_spill] sm:$0xff] %v5284_v34  ;;  %v5303_v41 = vmax.f32 %v476_v37, %v5282_v33  ;;  %v5306_v43 = vmax.f32 %v475_v36, %v5284_v34  ;;  %v5317_v62 = vpop.permute.xlu2 %743  ;;  %v5355_v37 = vsel %vm7729_vm15, 1.0, %v7693_v29 }
  0xb9   : > { %7859 = vst [vmem:[#allocation31_spill] sm:$0xff] %v5317_v62 }
  0xba   : > { %819 = vrot.lane.b32.xlu0 %v5044_v13, %s4847_s16  ;;  %815 = vrot.lane.b32.xlu1 %v4999_v2, %s4847_s16  ;;  %7855 = vst [vmem:[#allocation27_spill] sm:$0xff] %v5303_v41  ;;  %vm7728_vm13 = vcmp.gt.f32.partialorder %v5303_v41, 0.0  ;;  %vm7730_vm8 = vcmp.gt.f32.partialorder %v5306_v43, 0.0 }
  0xbb   : > { %811 = vrot.lane.b32.xlu2 %v4993_v0, %s4847_s16  ;;  %7856 = vst [vmem:[#allocation28_spill] sm:$0xff] %v5306_v43  ;;  %v5343_v23 = vsel %vm7730_vm8, 1.0, %v7693_v29  ;;  %v5348_v28 = vsel %vm7728_vm13, 1.0, %v7693_v29  ;;  %vm551_vm13 = vcmp.ge.f32.partialorder %v5005_v4, %v5180_v53 }
  0xbc   : > { %7863 = vst [vmem:[#allocation35_spill] sm:$0xff] %v5343_v23  ;;  %vm5543_vm10 = vmand %vm543_vm9, %vm551_vm13  ;;  %vm554_vm9 = vcmp.ge.f32.partialorder %v5026_v9, %v5198_v58 }
  0xbd   : > { %7864 = vst [vmem:[#allocation36_spill] sm:$0xff] %v5348_v28 }
  0xbe   : > { %7865 = vst [vmem:[#allocation37_spill] sm:$0xff] %v5355_v37 }
  0xbf   : > { %v5308_v50 = vpop.permute.xlu1 %4621  ;;  %v5310_v56 = vpop.permute.xlu0 %493 }
  0xc0   : > { %7857 = vst [vmem:[#allocation29_spill] sm:$0xff] %v5310_v56  ;;  %v5337_v21 = vmax.f32 %v478_v19, %v5310_v56  ;;  %v5376_v35 = vpop.permute.xlu2 %749 }
  0xc1   : > { %7867 = vst [vmem:[#allocation39_spill] sm:$0xff] %v5376_v35 }
  0xc2   : > { %833 = vrot.lane.b32.xlu0 %v5139_v46, %s4847_s16  ;;  %821 = vrot.lane.b32.xlu1 %v5041_v12, %s4847_s16  ;;  %7862 = vst [vmem:[#allocation34_spill] sm:$0xff] %v5337_v21  ;;  %vm7727_vm11 = vcmp.gt.f32.partialorder %v5337_v21, 0.0 }
  0xc3   : > { %817 = vrot.lane.b32.xlu2 %v5023_v8, %s4847_s16  ;;  %v5386_v23 = vsel %vm7727_vm11, 1.0, %v7693_v29  ;;  %vm552_vm11 = vcmp.ge.f32.partialorder %v5029_v10, %v5255_v26 }
  0xc4   : > { %7869 = vst [vmem:[#allocation41_spill] sm:$0xff] %v5386_v23  ;;  %vm5535_vm15 = vmand %vm544_vm12, %vm552_vm11  ;;  %vm7741_vm11 = vmmov 1  }
  0xc5   : > { %vm568_vm12 = vmxor %vm5535_vm15, %vm7741_vm11 }
  0xc6   : > { %vm567_vm13 = vmxor %vm5543_vm10, %vm7741_vm11 }
  0xc7   : > { %v5350_v36 = vpop.permute.xlu0 %4616  ;;  %v5359_v38 = vpop.permute.xlu1 %4636 }
  0xc8   : > { %v5400_v37 = vpop.permute.xlu2 %755  ;;  %v4639_v53 = vunpack.i.h.bf16 %v5359_v38  ;;  %v4619_v55 = vunpack.i.h.bf16 %v5350_v36  ;;  %v4618_v58 = vunpack.i.l.bf16 %v5350_v36  ;;  %v7902_v36 = vmov 0 }
  0xc9   : > { %7870 = vst [vmem:[#allocation42_spill] sm:$0xff] %v5400_v37 }
  0xca   : > { %839 = vrot.lane.b32.xlu0 %v5151_v48, %s4847_s16  ;;  %835 = vrot.lane.b32.xlu1 %v5125_v42, %s4847_s16 }
  0xcb   : > { %831 = vrot.lane.b32.xlu2 %v5114_v39, %s4847_s16 }
  0xcf   : > { %v5390_v32 = vpop.permute.xlu0 %4631  ;;  %v5392_v19 = vpop.permute.xlu1 %4651 }
  0xd0   : > { %v5410_v23 = vpop.permute.xlu2 %777 }
  0xd1   : > { %7873 = vst [vmem:[#allocation45_spill] sm:$0xff] %v5410_v23 }
  0xd2   : > { %845 = vrot.lane.b32.xlu0 %v5160_v49, %s4847_s16  ;;  %841 = vrot.lane.b32.xlu1 %v5136_v45, %s4847_s16 }
  0xd3   : > { %837 = vrot.lane.b32.xlu2 %v5128_v44, %s4847_s16 }
  0xd7   : > { %v5402_v29 = vpop.permute.xlu0 %4646  ;;  %v5406_v28 = vpop.permute.xlu1 %747 }
  0xd8   : > { %7871 = vst [vmem:[#allocation43_spill] sm:$0xff] %v5406_v28  ;;  %v5416_v35 = vpop.permute.xlu2 %783 }
  0xd9   : > { %7876 = vst [vmem:[#allocation48_spill] sm:$0xff] %v5416_v35 }
  0xdb   : > { %843 = vrot.lane.b32.xlu2 %v5142_v47, %s4847_s16 }
  0xdf   : > { %v5408_v40 = vpop.permute.xlu0 %745  ;;  %v5412_v57 = vpop.permute.xlu1 %753 }
  0xe0   : > { %7872 = vst [vmem:[#allocation44_spill] sm:$0xff] %v5408_v40  ;;  %v5422_v21 = vpop.permute.xlu2 %789 }
  0xe1   : > { %7874 = vst [vmem:[#allocation46_spill] sm:$0xff] %v5412_v57 }
  0xe2   : > { %7879 = vst [vmem:[#allocation51_spill] sm:$0xff] %v5422_v21 }
  0xe7   : > { %v5414_v30 = vpop.permute.xlu0 %751  ;;  %v5418_v62 = vpop.permute.xlu1 %775 }
  0xe8   : > { %7875 = vst [vmem:[#allocation47_spill] sm:$0xff] %v5414_v30 }
  0xe9   : > { %7877 = vst [vmem:[#allocation49_spill] sm:$0xff] %v5418_v62 }
  0xef   : > { %v5420_v37 = vpop.permute.xlu0 %757  ;;  %v5424_v41 = vpop.permute.xlu1 %781 }
  0xf0   : > { %7878 = vst [vmem:[#allocation50_spill] sm:$0xff] %v5420_v37 }
  0xf1   : > { %7880 = vst [vmem:[#allocation52_spill] sm:$0xff] %v5424_v41 }
  0xf7   : > { %v5426_v61 = vpop.permute.xlu0 %779  ;;  %v5430_v40 = vpop.permute.xlu1 %787 }
  0xf8   : > { %7881 = vst [vmem:[#allocation53_spill] sm:$0xff] %v5426_v61 }
  0xf9   : > { %7882 = vst [vmem:[#allocation54_spill] sm:$0xff] %v5430_v40 }
  0xfd   : > { %v5428_v28 = vpop.permute.xlu2 %585 }
  0xfe   : > { %vm600_vm8 = vcmp.ne.s32.totalorder %v5428_v28, 0  ;;  %v4638_v28 = vunpack.i.l.bf16 %v5359_v38 }
  0xff   : > { %v5432_v23 = vpop.permute.xlu0 %785 }
 0x100   : > { %7883 = vst [vmem:[#allocation55_spill] sm:$0xff] %v5432_v23 }
 0x105   : > { %v5434_v57 = vpop.permute.xlu2 %591 }
 0x106   : > { %7884 = vst [vmem:[#allocation56_spill] sm:$0xff] %v5434_v57 }
 0x10c   : > { %v5436_v30 = vpop.permute.xlu1 %583  ;;  %v5438_v35 = vpop.permute.xlu0 %587 }
 0x10d   : > { %v5440_v62 = vpop.permute.xlu2 %597  ;;  %vm599_vm14 = vcmp.ne.s32.totalorder %v5436_v30, 0 }
 0x10e   : > { %7885 = vst [vmem:[#allocation57_spill] sm:$0xff] %v5440_v62 }
 0x114   : > { %v5442_v37 = vpop.permute.xlu1 %589  ;;  %v5444_v21 = vpop.permute.xlu0 %593 }
 0x115   : > { %v812_v41 = vpop.permute.xlu2 %811 }
 0x11c   : > { %v5446_v61 = vpop.permute.xlu1 %595  ;;  %v808_v43 = vpop.permute.xlu0 %807 }
 0x11d   : > { %v818_v20 = vpop.permute.xlu2 %817 }
 0x124   : > { %v810_v40 = vpop.permute.xlu1 %809  ;;  %v814_v27 = vpop.permute.xlu0 %813 }
 0x125   : > { %v832_v23 = vpop.permute.xlu2 %831 }
 0x126   : > { %v855_v63 = vsel %vm7736_vm4, %v808_v43, %v832_v23 }
 0x127   : > { %871 = vrot.lane.b32.xlu1 %v855_v63, %s4843_s15 }
 0x12c   : > { %v816_v24 = vpop.permute.xlu1 %815  ;;  %v820_v17 = vpop.permute.xlu0 %819 }
 0x12d   : > { %v838_v62 = vpop.permute.xlu2 %837 }
 0x12e   : > { %v858_v14 = vsel %vm7739_vm1, %v814_v27, %v838_v62 }
 0x12f   : > { %877 = vrot.lane.b32.xlu1 %v858_v14, %s4843_s15 }
 0x134   : > { %v822_v56 = vpop.permute.xlu1 %821  ;;  %v834_v57 = vpop.permute.xlu0 %833 }
 0x135   : > { %v844_v51 = vpop.permute.xlu2 %843  ;;  %v856_v5 = vsel %vm7738_vm5, %v810_v40, %v834_v57 }
 0x136   : > { %v861_v34 = vsel %vm7735_vm6, %v820_v17, %v844_v51  ;;  %873 = vrot.lane.b32.xlu2 %v856_v5, %s4843_s15 }
 0x137   : > { %883 = vrot.lane.b32.xlu1 %v861_v34, %s4843_s15 }
 0x13c   : > { %v836_v43 = vpop.permute.xlu1 %835  ;;  %v840_v63 = vpop.permute.xlu0 %839 }
 0x13d   : > { %v857_v27 = vsel %vm7737_vm0, %v812_v41, %v836_v43  ;;  %v859_v14 = vsel %vm7734_vm2, %v816_v24, %v840_v63  ;;  %vm556_vm2 = vcmp.ge.f32.partialorder %v5032_v11, %v5282_v33  ;;  %v4850_v43 = vmov 1.0  }
 0x13e   : > { %875 = vrot.lane.b32.xlu0 %v857_v27, %s4843_s15  ;;  %879 = vrot.lane.b32.xlu2 %v859_v14, %s4843_s15  ;;  %v624_v63 = vsel %vm7738_vm5, 0.0, %v4850_v43  ;;  %v7899_v33 = vmov 0  ;;  %v623_v38 = vsel %vm7736_vm4, 0.0, %v4850_v43 }
 0x13f   : > { %913 = vrot.lane.b32.xlu1 %v5020_v7, %s4842_s14 }
 0x144   : > { %v842_v51 = vpop.permute.xlu1 %841  ;;  %v846_v17 = vpop.permute.xlu0 %845 }
 0x145   : > { %v860_v5 = vsel %vm7740_vm3, %v818_v20, %v842_v51  ;;  %v862_v34 = vsel %vm7733_vm7, %v822_v56, %v846_v17  ;;  %vm5557_vm7 = vmand %vm568_vm12, %vm600_vm8  ;;  %vm7898_vm12 = vcmp.ge.f32.partialorder %v5026_v9, %v5202_v59 }
 0x146   : > { %881 = vrot.lane.b32.xlu0 %v860_v5, %s4843_s15  ;;  %885 = vrot.lane.b32.xlu2 %v862_v34, %s4843_s15  ;;  %vm5572_vm8 = vmand %vm567_vm13, %vm599_vm14  ;;  %v712_v27 = vsel %vm5557_vm7, %v4619_v55, %v4639_v53  ;;  %vm7901_vm14 = vcmp.ge.f32.partialorder %v5032_v11, %v5176_v52  ;;  %v4624_v5 = vunpack.i.h.bf16 %v5308_v50  ;;  %v4644_v34 = vunpack.i.h.bf16 %v5275_v31 }
 0x147   : > { %919 = vrot.lane.b32.xlu1 %v4999_v2, %s4842_s14  ;;  %vm5586_vm6 = vmand %vm7898_vm12, %vm554_vm9  ;;  %v711_v14 = vsel %vm5572_vm8, %v4618_v58, %v4638_v28  ;;  %v5604_v9 = vsel %vm5535_vm15, %v624_v63, %v712_v27  ;;  %vm602_vm9 = vcmp.ne.s32.totalorder %v5442_v37, 0  ;;  %vm604_vm12 = vcmp.ne.s32.totalorder %v5444_v21, 0 }
 0x148   : > { %v7900_v33 = vsel %vm5586_vm6, 4294967295, %v7899_v33  ;;  %vm5593_vm13 = vmand %vm7901_vm14, %vm556_vm2  ;;  %7904 = vst [vmem:[#allocation62_spill] sm:$0xff] %v5604_v9  ;;  %v5622_v37 = vsel %vm5543_vm10, %v623_v38, %v711_v14  ;;  %v1186_v17 = vmul.f32 4.0, %v5604_v9  ;;  %v7906_v21 = vmov 0 }
 0x149   : > { %v7903_v36 = vsel %vm5593_vm13, 4294967295, %v7902_v36  ;;  %vm570_vm2 = vmxor %vm5586_vm6, %vm7741_vm11  ;;  %7905 = vst [vmem:[#allocation63_spill] sm:$0xff] %v5622_v37  ;;  %v1185_v53 = vmul.f32 4.0, %v5622_v37  ;;  %v7911_v58 = vmov 0  ;;  %v628_v63 = vsel %vm7740_vm3, 0.0, %v4850_v43 }
 0x14a   : > { %vm572_vm14 = vmxor %vm5593_vm13, %vm7741_vm11 }
 0x14b   : > { %vm5637_vm5 = vmand %vm572_vm14, %vm604_vm12  ;;  %vm4259_vm12 = vcmp.lt.s32.totalorder %v1186_v17, 0  ;;  %vm605_vm14 = vcmp.ne.s32.totalorder %v5446_v61, 0 }
 0x14e   : > { %911 = vrot.lane.b32.xlu0 %v4996_v1, %s4842_s14  ;;  %915 = vrot.lane.b32.xlu2 %v4993_v0, %s4842_s14 }
 0x14f   : > { %925 = vrot.lane.b32.xlu1 %v5041_v12, %s4842_s14 }
 0x156   : > { %917 = vrot.lane.b32.xlu0 %v5017_v6, %s4842_s14  ;;  %921 = vrot.lane.b32.xlu2 %v5023_v8, %s4842_s14 }
 0x157   : > { %939 = vrot.lane.b32.xlu1 %v5125_v42, %s4842_s14 }
 0x15e   : > { %923 = vrot.lane.b32.xlu0 %v5044_v13, %s4842_s14  ;;  %935 = vrot.lane.b32.xlu2 %v5114_v39, %s4842_s14 }
 0x15f   : > { %945 = vrot.lane.b32.xlu1 %v5136_v45, %s4842_s14 }
 0x166   : > { %937 = vrot.lane.b32.xlu0 %v5139_v46, %s4842_s14  ;;  %941 = vrot.lane.b32.xlu2 %v5128_v44, %s4842_s14 }
 0x16e   : > { %943 = vrot.lane.b32.xlu0 %v5151_v48, %s4842_s14  ;;  %947 = vrot.lane.b32.xlu2 %v5142_v47, %s4842_s14 }
 0x176   : > { %949 = vrot.lane.b32.xlu0 %v5160_v49, %s4842_s14 }
 0x190   : > { %v5504_v42 = vpop.permute.xlu2 %873 }
 0x198   : > { %v5506_v39 = vpop.permute.xlu2 %879 }
 0x199   : > { %v5508_v45 = vpop.permute.xlu1 %871 }
 0x1a0   : > { %v5510_v24 = vpop.permute.xlu2 %885 }
 0x1a1   : > { %7886 = vst [vmem:[#allocation58_spill] sm:$0xff] %v5510_v24  ;;  %v5512_v46 = vpop.permute.xlu1 %877 }
 0x1a2   : > { %7887 = vst [vmem:[#allocation59_spill] sm:$0xff] %v5512_v46 }
 0x1a8   : > { %v916_v44 = vpop.permute.xlu2 %915 }
 0x1a9   : > { %v5514_v41 = vpop.permute.xlu1 %883 }
 0x1aa   : > { %7888 = vst [vmem:[#allocation60_spill] sm:$0xff] %v5514_v41 }
 0x1b0   : > { %v5516_v48 = vpop.permute.xlu0 %875  ;;  %v5518_v56 = vpop.permute.xlu2 %921 }
 0x1b1   : > { %v5520_v47 = vpop.permute.xlu1 %913 }
 0x1b8   : > { %v5522_v49 = vpop.permute.xlu0 %881  ;;  %v5526_v20 = vpop.permute.xlu2 %935 }
 0x1b9   : > { %7889 = vst [vmem:[#allocation61_spill] sm:$0xff] %v5522_v49  ;;  %v5524_v62 = vpop.permute.xlu1 %919 }
 0x1c0   : > { %v912_v40 = vpop.permute.xlu0 %911  ;;  %v5568_v60 = vpop.permute.xlu2 %941 }
 0x1c1   : > { %v5547_v26 = vpop.permute.xlu1 %925  ;;  %v959_v10 = vsel %vm7736_vm4, %v912_v40, %v5526_v20  ;;  %vm5629_vm4 = vmand %vm570_vm2, %vm602_vm9  ;;  %v4629_v40 = vunpack.i.h.bf16 %v5244_v22  ;;  %vm7910_vm9 = vcmp.ge.f32.partialorder %v5050_v15, %v5226_v18  ;;  %v4260_v18 = vceil.f32 %v1186_v17 }
 0x1c2   : > { %975 = vrot.lane.b32.xlu1 %v959_v10, %s4842_s14  ;;  %v7907_v21 = vsel %vm5629_vm4, 4294967295, %v7906_v21  ;;  %v4649_v10 = vunpack.i.h.bf16 %v5402_v29  ;;  %v714_v28 = vsel %vm5629_vm4, %v4624_v5, %v4644_v34  ;;  %v4255_v5 = vceil.f32 %v1185_v53 }
 0x1c3   : > { %v4256_v34 = vfloor.f32 %v1185_v53 }
 0x1c4   : > { %v716_v27 = vsel %vm5637_vm5, %v4629_v40, %v4649_v10  ;;  %v4653_v10 = vunpack.i.l.bf16 %v5392_v19 }
 0x1c5   : > { %v5680_v40 = vsel %vm5593_vm13, %v628_v63, %v716_v27  ;;  %vm601_vm13 = vcmp.ne.s32.totalorder %v5438_v35, 0  ;;  %v7930_v35 = vld [vmem:[#allocation20_spill] sm:$0xff] }
 0x1c6   : > { %7915 = vst [vmem:[#allocation65_spill] sm:$0xff] %v5680_v40  ;;  %v1190_v27 = vmul.f32 4.0, %v5680_v40 }
 0x1c8   : > { %v918_v51 = vpop.permute.xlu0 %917  ;;  %v5644_v55 = vpop.permute.xlu2 %947 }
 0x1c9   : > { %v5607_v59 = vpop.permute.xlu1 %939  ;;  %v962_v11 = vsel %vm7739_vm1, %v918_v51, %v5568_v60  ;;  %v4261_v51 = vfloor.f32 %v1186_v17 }
 0x1ca   : > { %v961_v52 = vsel %vm7737_vm0, %v916_v44, %v5607_v59  ;;  %981 = vrot.lane.b32.xlu1 %v962_v11, %s4842_s14  ;;  %vm557_vm0 = vcmp.ge.f32.partialorder %v5050_v15, %v5222_v16  ;;  %v7908_v44 = vmov 0  ;;  %v626_v16 = vsel %vm7739_vm1, 0.0, %v4850_v43 }
 0x1cb   : > { %979 = vrot.lane.b32.xlu0 %v961_v52, %s4842_s14  ;;  %v7909_v44 = vsel %vm5637_vm5, 4294967295, %v7908_v44  ;;  %vm5654_vm2 = vmand %vm7910_vm9, %vm557_vm0  ;;  %vm7913_vm1 = vcmp.gt.f32.partialorder %v5044_v13, 0.0  ;;  %v5671_v11 = vsel %vm5586_vm6, %v626_v16, %v714_v28  ;;  %vm553_vm9 = vcmp.ge.f32.partialorder %v5002_v3, %v5253_v25 }
 0x1cc   : > { %v7912_v58 = vsel %vm5654_vm2, 4294967295, %v7911_v58  ;;  %7914 = vst [vmem:[#allocation64_spill] sm:$0xff] %v5671_v11  ;;  %vm573_vm0 = vmxor %vm5654_vm2, %vm7741_vm11  ;;  %v4633_v16 = vunpack.i.l.bf16 %v5390_v32  ;;  %v1188_v28 = vmul.f32 4.0, %v5671_v11  ;;  %v4262_v63 = vsel %vm4259_vm12, %v4260_v18, %v4261_v51 }
 0x1cd   : > { %vm7918_vm11 = vcmp.gt.f32.partialorder %v5044_v13, 0.0  ;;  %vm7922_vm12 = vcmp.gt.f32.partialorder %v5020_v7, 0.0 }
 0x1ce   : > { %v629_v25 = vsel %vm7918_vm11, 0.0, %v4850_v43  ;;  %vm4269_vm11 = vcmp.lt.s32.totalorder %v1188_v28, 0 }
 0x1d0   : > { %v924_v38 = vpop.permute.xlu0 %923 }
 0x1d1   : > { %v5664_v14 = vpop.permute.xlu1 %945  ;;  %v965_v15 = vsel %vm7913_vm1, %v924_v38, %v5644_v55  ;;  %vm4254_vm1 = vcmp.lt.s32.totalorder %v1185_v53, 0  ;;  %v7920_v38 = vmov 0 }
 0x1d2   : > { %v964_v52 = vsel %vm7740_vm3, %v5518_v56, %v5664_v14  ;;  %987 = vrot.lane.b32.xlu1 %v965_v15, %s4842_s14  ;;  %vm5690_vm3 = vmand %vm573_vm0, %vm605_vm14  ;;  %v7916_v56 = vmov 0  ;;  %v4257_v53 = vsel %vm4254_vm1, %v4255_v5, %v4256_v34  ;;  %vm7919_vm14 = vcmp.ge.f32.partialorder %v5002_v3, %v5182_v54 }
 0x1d3   : > { %985 = vrot.lane.b32.xlu0 %v964_v52, %s4842_s14  ;;  %v7917_v56 = vsel %vm5690_vm3, 4294967295, %v7916_v56  ;;  %v717_v61 = vsel %vm5690_vm3, %v4633_v16, %v4653_v10  ;;  %vm5707_vm0 = vmand %vm7919_vm14, %vm553_vm9  ;;  %v4263_v15 = vcvt.f32.s32 %v4262_v63  ;;  %v4258_v51 = vcvt.f32.s32 %v4257_v53  ;;  %v7927_v16 = vld [vmem:[#allocation26_spill] sm:$0xff] }
 0x1d4   : > { %v7921_v38 = vsel %vm5707_vm0, 4294967295, %v7920_v38  ;;  %v4270_v52 = vceil.f32 %v1188_v28  ;;  %v4271_v5 = vfloor.f32 %v1188_v28  ;;  %v5720_v3 = vsel %vm5654_vm2, %v629_v25, %v717_v61  ;;  %v7928_v63 = vld [vmem:[#allocation14_spill] sm:$0xff] }
 0x1d5   : > { %7923 = vst [vmem:[#allocation66_spill] sm:$0xff] %v5720_v3  ;;  %v4280_v54 = vceil.f32 %v1190_v27  ;;  %v4281_v34 = vfloor.f32 %v1190_v27  ;;  %vm7924_vm1 = vmmov 1   ;;  %vm4279_vm14 = vcmp.lt.s32.totalorder %v1190_v27, 0 }
 0x1d6   : > { %vm569_vm9 = vmxor %vm5707_vm0, %vm7924_vm1  ;;  %v7925_v10 = vmov 0  ;;  %vm555_vm5 = vcmp.ge.f32.partialorder %v7928_v63, %v7927_v16  ;;  %v4623_v28 = vunpack.i.l.bf16 %v5308_v50  ;;  %v1191_v53 = vmul.f32 4.0, %v5720_v3 }
 0x1d7   : > { %v4272_v25 = vsel %vm4269_vm11, %v4270_v52, %v4271_v5  ;;  %v4282_v61 = vsel %vm4279_vm14, %v4280_v54, %v4281_v34  ;;  %vm7929_vm2 = vcmp.gt.f32.partialorder %v4993_v0, 0.0  ;;  %vm7935_vm11 = vcmp.gt.f32.partialorder %v4999_v2, 0.0 }
 0x1d8   : > { %v5712_v17 = vpop.permute.xlu0 %937  ;;  %v625_v27 = vsel %vm7929_vm2, 0.0, %v4850_v43  ;;  %v4283_v5 = vcvt.f32.s32 %v4282_v61  ;;  %v4285_v54 = vceil.f32 %v1191_v53  ;;  %v4286_v34 = vfloor.f32 %v1191_v53 }
 0x1d9   : > { %v960_v18 = vsel %vm7922_vm12, %v5520_v47, %v5712_v17  ;;  %v4643_v47 = vunpack.i.l.bf16 %v5275_v31  ;;  %vm5729_vm12 = vmand %vm569_vm9, %vm601_vm13  ;;  %vm7931_vm13 = vcmp.ge.f32.partialorder %v7928_v63, %v7930_v35  ;;  %v4628_v16 = vunpack.i.l.bf16 %v5244_v22  ;;  %v7939_v63 = vld [vmem:[#allocation29_spill] sm:$0xff] }
 0x1da   : > { %977 = vrot.lane.b32.xlu2 %v960_v18, %s4842_s14  ;;  %1205 = vperm.xlu1 %4656, %v4263_v15   ;;  %v7926_v10 = vsel %vm5729_vm12, 4294967295, %v7925_v10  ;;  %vm5745_vm9 = vmand %vm7931_vm13, %vm555_vm5  ;;  %v7934_v18 = vld [vmem:[#allocation56_spill] sm:$0xff]  ;;  %vm4284_vm5 = vcmp.lt.s32.totalorder %v1191_v53, 0  ;;  %v627_v53 = vsel %vm7935_vm11, 0.0, %v4850_v43  ;;  %v7941_v22 = vld [vmem:[#allocation21_spill] sm:$0xff]  ;;  %v7943_v35 = vmov 0 }
 0x1db   : > { %1202 = vperm.xlu0 %4655, %v4258_v51   ;;  %v713_v31 = vsel %vm5729_vm12, %v4623_v28, %v4643_v47  ;;  %vm603_vm3 = vcmp.ne.s32.totalorder %v7934_v18, 0  ;;  %v4273_v51 = vcvt.f32.s32 %v4272_v25  ;;  %vm571_vm2 = vmxor %vm5745_vm9, %vm7924_vm1  ;;  %v7940_v28 = vld [vmem:[#allocation19_spill] sm:$0xff]  ;;  %v4648_v25 = vunpack.i.l.bf16 %v5402_v29 }
 0x1dc   : > { %v5758_v47 = vsel %vm5707_vm0, %v625_v27, %v713_v31  ;;  %vm5765_vm14 = vmand %vm571_vm2, %vm603_vm3  ;;  %vm558_vm13 = vcmp.ge.f32.partialorder %v7940_v28, %v7939_v63  ;;  %v4287_v27 = vsel %vm4284_vm5, %v4285_v54, %v4286_v34  ;;  %vm7942_vm3 = vcmp.ge.f32.partialorder %v7940_v28, %v7941_v22 }
 0x1dd   : > { %7936 = vst [vmem:[#allocation26_spill] sm:$0xff] %v5758_v47  ;;  %v1187_v61 = vmul.f32 4.0, %v5758_v47  ;;  %v715_v31 = vsel %vm5765_vm14, %v4628_v16, %v4648_v25  ;;  %vm5781_vm2 = vmand %vm7942_vm3, %vm558_vm13  ;;  %v4288_v29 = vcvt.f32.s32 %v4287_v27  ;;  %vm7946_vm5 = vcmp.gt.f32.partialorder %v5041_v12, 0.0  ;;  %v7965_v47 = vld [vmem:[#allocation34_spill] sm:$0xff] }
 0x1de   : > { %v7944_v35 = vsel %vm5781_vm2, 4294967295, %v7943_v35  ;;  %v5794_v34 = vsel %vm5745_vm9, %v627_v53, %v715_v31  ;;  %v7948_v16 = vmov 0  ;;  %v4634_v63 = vunpack.i.h.bf16 %v5390_v32 }
 0x1df   : > { %v4266_v54 = vfloor.f32 %v1187_v61  ;;  %7947 = vst [vmem:[#allocation14_spill] sm:$0xff] %v5794_v34  ;;  %vm4264_vm13 = vcmp.lt.s32.totalorder %v1187_v61, 0  ;;  %v1189_v28 = vmul.f32 4.0, %v5794_v34  ;;  %v630_v27 = vsel %vm7946_vm5, 0.0, %v4850_v43  ;;  %v7963_v34 = vld [vmem:[#allocation27_spill] sm:$0xff] }
 0x1e0   : > { %v5750_v50 = vpop.permute.xlu0 %943 }
 0x1e1   : > { %v963_v52 = vsel %vm7935_vm11, %v5524_v62, %v5750_v50  ;;  %vm574_vm11 = vmxor %vm5781_vm2, %vm7924_vm1  ;;  %v4275_v31 = vceil.f32 %v1189_v28  ;;  %v4276_v22 = vfloor.f32 %v1189_v28 }
 0x1e2   : > { %983 = vrot.lane.b32.xlu2 %v963_v52, %s4842_s14  ;;  %1211 = vperm.xlu1 %4656, %v4273_v51   ;;  %v7945_v51 = vld [vmem:[#allocation57_spill] sm:$0xff] }
 0x1e3   : > { %1217 = vperm.xlu0 %4655, %v4283_v5   ;;  %vm606_vm0 = vcmp.ne.s32.totalorder %v7945_v51, 0  ;;  %v4265_v5 = vceil.f32 %v1187_v61 }
 0x1e4   : > { %vm5800_vm3 = vmand %vm574_vm11, %vm606_vm0  ;;  %vm4274_vm0 = vcmp.lt.s32.totalorder %v1189_v28, 0 }
 0x1e5   : > { %v7949_v16 = vsel %vm5800_vm3, 4294967295, %v7948_v16  ;;  %v4267_v25 = vsel %vm4264_vm13, %v4265_v5, %v4266_v54 }
 0x1e6   : > { %v4268_v53 = vcvt.f32.s32 %v4267_v25  ;;  %v7953_v25 = vld [vmem:[#allocation32_spill] sm:$0xff] }
 0x1e7   : > { %vm7954_vm11 = vcmp.gt.f32.partialorder %v7953_v25, 0.0 }
 0x1e8   : > { %v5785_v18 = vpop.permute.xlu0 %949  ;;  %v538_v28 = vsel %vm7954_vm11, %v7953_v25, 1.0  ;;  %vm7964_vm11 = vcmp.gt.f32.partialorder %v7963_v34, 0.0 }
 0x1e9   : > { %v966_v52 = vsel %vm7946_vm5, %v5547_v26, %v5785_v18  ;;  %v4654_v26 = vunpack.i.h.bf16 %v5392_v19  ;;  %v4277_v19 = vsel %vm4274_vm0, %v4275_v31, %v4276_v22 }
 0x1ea   : > { %989 = vrot.lane.b32.xlu2 %v966_v52, %s4842_s14  ;;  %1220 = vperm.xlu1 %4656, %v4288_v29   ;;  %v4278_v51 = vcvt.f32.s32 %v4277_v19  ;;  %v7957_v19 = vld [vmem:[#allocation33_spill] sm:$0xff]  ;;  %s4249_s14 = sshll.u32 %s4934_s21, 6  ;;  %s3858_s21 = scalar_lea.sflag [#allocation5], %s412_s12 }
 0x1eb   : > { %v718_v61 = vsel %vm5800_vm3, %v4634_v63, %v4654_v26  ;;  %v7951_v26 = vld [vmem:[#allocation22_spill] sm:$0xff]  ;;  %vm7958_vm0 = vcmp.gt.f32.partialorder %v7957_v19, 0.0  ;;  %s3869_s22 = scalar_lea.hbm %s7675_s11, %s4249_s14  ;;  %s4786_s14 = scalar_lea.hbm %s7675_s11, 128 }
 0x1ec   : > { %v5814_v29 = vsel %vm5781_vm2, %v630_v27, %v718_v61  ;;  %vm7952_vm13 = vcmp.gt.f32.partialorder %v7951_v26, 0.0  ;;  %v7955_v27 = vld [vmem:[#allocation23_spill] sm:$0xff]  ;;  %vm1065_vm2 = vweird.f32 %v538_v28  ;;  %s3872_s25 = sshll.u32 %s3869_s22, 4  ;;  %s3873_s25 = int_to_ptr.hbm [resolvable:$true] %s3872_s25 }
 0x1ed   : > { %7950 = vst [vmem:[#allocation20_spill] sm:$0xff] %v5814_v29  ;;  %v1192_v32 = vmul.f32 4.0, %v5814_v29  ;;  %v535_v63 = vsel %vm7952_vm13, %v7951_v26, 1.0  ;;  %vm7956_vm5 = vcmp.gt.f32.partialorder %v7955_v27, 0.0  ;;  %v7961_v26 = vld [vmem:[#allocation30_spill] sm:$0xff]  ;;  %s4780_s30 = sshra.s32 %s3873_s25, 4  ;;  %s4781_s30 = int_to_ptr.hbm [resolvable:$true] %s4780_s30 }
 0x1ee   : > { %4682 = vrcp.f32 %v535_v63  ;;  %v5826_v61 = vsel %vm7956_vm5, %v7955_v27, 1.0  ;;  %vm7962_vm13 = vcmp.gt.f32.partialorder %v7961_v26, 0.0  ;;  %s4782_s19 = scalar_lea.hbm %s4781_s30, 64  ;;  %p4787_p3 = scmp.lt.s32.totalorder %s4781_s30, %s7675_s11 }
 0x1ef   : > { %v4290_v52 = vceil.f32 %v1192_v32  ;;  %v4291_v5 = vfloor.f32 %v1192_v32  ;;  %vm4289_vm1 = vcmp.lt.s32.totalorder %v1192_v32, 0  ;;  %4684 = vrcp.f32 %v538_v28  ;;  %p4783_p0 = scmp.ne.s32.totalorder %s4781_s30, %s4782_s19  ;;  %p4788_p4 = scmp.lt.s32.totalorder %s4786_s14, %s4782_s19 }
 0x1f0   : > { %4686 = vrcp.f32 %v5826_v61  ;;  %v5848_v25 = vsel %vm7962_vm13, %v7961_v26, 1.0  ;;  %v5862_v26 = vsel %vm7964_vm11, %v7963_v34, 1.0  ;;  %v1026_v34 = vand.u32 2147483648, %v535_v63 }
 0x1f1   : > { %v4292_v43 = vsel %vm4289_vm1, %v4290_v52, %v4291_v5  ;;  %v7959_v5 = vld [vmem:[#allocation28_spill] sm:$0xff]  ;;  %v1041_v24 = vand.u32 2147483648, %v5826_v61  ;;  %v1054_v46 = vand.u32 2147483647, %v5848_v25  ;;  %p4784_p1 = pnand %p4783_p0, %p4951_p5  ;;  %p4789_p7 = por %p4788_p4, %p4787_p3 }
 0x1f2   : > { %1208 = vperm.xlu2 %4657, %v4268_v53   ;;  %v4293_v54 = vcvt.f32.s32 %v4292_v43  ;;  %vm7960_vm1 = vcmp.gt.f32.partialorder %v7959_v5, 0.0  ;;  %v1027_v6 = vor.u32 1.1754944e-38, %v1026_v34 }
 0x1f3   : > { %v5842_v43 = vsel %vm7960_vm1, %v7959_v5, 1.0  ;;  %v1024_v5 = vand.u32 2147483647, %v535_v63  ;;  %vm1020_vm1 = vweird.f32 %v535_v63  ;;  %p4785_p2 = pneg %p4784_p1 }
 0x1f4   : > { %v4683_v53 = vpop.eup %4682 }
 0x1f5   : > { %v5829_v31 = vpop.eup %4684  ;;  %v1016_v22 = vmul.f32 %v4683_v53, %v535_v63  ;;  %vm1021_vm5 = vweird.f32 %v4683_v53  ;;  %vm5874_vm13 = vcmp.eq.f32.partialorder %v1024_v5, 8.507059e+37  ;;  %v1071_v63 = vand.u32 2147483648, %v538_v28  ;;  %p4790_p8 = pnand %p4789_p7, %p4785_p2 }
 0x1f6   : > { %v5831_v32 = vpop.eup %4686  ;;  %v1061_v52 = vmul.f32 %v5829_v31, %v538_v28  ;;  %vm5881_vm11 = vmor %vm1020_vm1, %vm1021_vm5 }
 0x1f7   : > { %v1031_v27 = vmul.f32 %v5831_v32, %v5826_v61  ;;  %vm1036_vm5 = vweird.f32 %v5831_v32 }
 0x1f9   : > { %v1032_v29 = vsub.f32 1.0, %v1031_v27 }
 0x1fa   : > { %1214 = vperm.xlu2 %4657, %v4278_v51   ;;  %v5836_v51 = vsel %vm7958_vm0, %v7957_v19, 1.0  ;;  %v1062_v19 = vsub.f32 1.0, %v1061_v52  ;;  %vm7966_vm0 = vcmp.gt.f32.partialorder %v7965_v47, 0.0 }
 0x1fb   : > { %4688 = vrcp.f32 %v5836_v51  ;;  %v1033_v52 = vmul.f32 %v5831_v32, %v1032_v29  ;;  %v1116_v12 = vand.u32 2147483648, %v5836_v51  ;;  %v1114_v34 = vand.u32 2147483647, %v5836_v51 }
 0x1fc   : > { %4690 = vrcp.f32 %v5842_v43 }
 0x1fd   : > { %4692 = vrcp.f32 %v5848_v25  ;;  %v1034_v8 = vadd.f32 %v5831_v32, %v1033_v52 }
 0x1fe   : > { %4694 = vrcp.f32 %v5862_v26 }
 0x201   : > { %v5854_v11 = vpop.eup %4688 }
 0x202   : > { %1223 = vperm.xlu2 %4657, %v4293_v54   ;;  %v1017_v54 = vsub.f32 1.0, %v1016_v22  ;;  %v1063_v22 = vmul.f32 %v5829_v31, %v1062_v19  ;;  %v5857_v40 = vpop.eup %4690  ;;  %v1106_v19 = vmul.f32 %v5854_v11, %v5836_v51 }
 0x203   : > { %v5870_v27 = vpop.eup %4692  ;;  %v1076_v29 = vmul.f32 %v5857_v40, %v5842_v43 }
 0x204   : > { %v1018_v3 = vmul.f32 %v4683_v53, %v1017_v54  ;;  %v5868_v54 = vsel %vm7966_vm0, %v7965_v47, 1.0  ;;  %v1064_v13 = vadd.f32 %v5829_v31, %v1063_v22  ;;  %vm1066_vm0 = vweird.f32 %v5829_v31 }
 0x205   : > { %4696 = vrcp.f32 %v5868_v54  ;;  %v1046_v41 = vmul.f32 %v5870_v27, %v5848_v25  ;;  %v1107_v49 = vsub.f32 1.0, %v1106_v19  ;;  %v1039_v22 = vand.u32 2147483647, %v5826_v61  ;;  %vm5897_vm1 = vmor %vm1065_vm2, %vm1066_vm0 }
 0x206   : > { %v1019_v37 = vadd.f32 %v4683_v53, %v1018_v3  ;;  %v1069_v3 = vand.u32 2147483647, %v538_v28  ;;  %v1068_v28 = vsel %vm5897_vm1, %v5829_v31, %v1064_v13  ;;  %v1072_v19 = vor.u32 1.1754944e-38, %v1071_v63 }
 0x207   : > { %vm1110_vm2 = vweird.f32 %v5836_v51  ;;  %vm1111_vm0 = vweird.f32 %v5854_v11  ;;  %v5921_v31 = vor.u32 1.1754944e-38, %v1116_v12  ;;  %vm1051_vm1 = vweird.f32 %v5870_v27 }
 0x208   : > { %v1023_v5 = vsel %vm5881_vm11, %v4683_v53, %v1019_v37  ;;  %v1077_v37 = vsub.f32 1.0, %v1076_v29  ;;  %vm1035_vm11 = vweird.f32 %v5826_v61  ;;  %vm1070_vm3 = vcmp.eq.f32.partialorder %v1069_v3, 8.507059e+37  ;;  %v5915_v29 = vpop.eup %4694 }
 0x209   : > { %vm5905_vm12 = vmor %vm1035_vm11, %vm1036_vm5  ;;  %v5911_v52 = vsel %vm5874_vm13, %v1027_v6, %v1023_v5  ;;  %v1047_v61 = vsub.f32 1.0, %v1046_v41  ;;  %vm1040_vm13 = vcmp.eq.f32.partialorder %v1039_v22, 8.507059e+37  ;;  %v1042_v6 = vor.u32 1.1754944e-38, %v1041_v24 }
 0x20a   : > { %7975 = vst [vmem:[#allocation56_spill] sm:$0xff] %v5911_v52  ;;  %v1038_v13 = vsel %vm5905_vm12, %v5831_v32, %v1034_v8  ;;  %v5925_v9 = vsel %vm1070_vm3, %v1072_v19, %v1068_v28  ;;  %v1108_v5 = vmul.f32 %v5854_v11, %v1107_v49  ;;  %v1078_v41 = vmul.f32 %v5857_v40, %v1077_v37  ;;  %vm5966_vm11 = vmor %vm1110_vm2, %vm1111_vm0 }
 0x20b   : > { %v5923_v3 = vpop.eup %4696  ;;  %v1091_v24 = vmul.f32 %v5915_v29, %v5862_v26  ;;  %v5938_v32 = vsel %vm1040_vm13, %v1042_v6, %v1038_v13  ;;  %v1048_v37 = vmul.f32 %v5870_v27, %v1047_v61  ;;  %v1084_v13 = vand.u32 2147483647, %v5842_v43 }
 0x20c   : > { %v1121_v28 = vmul.f32 %v5923_v3, %v5868_v54  ;;  %v1086_v6 = vand.u32 2147483648, %v5842_v43  ;;  %vm1081_vm12 = vweird.f32 %v5857_v40  ;;  %vm1080_vm3 = vweird.f32 %v5842_v43 }
 0x20d   : > { %vm5975_vm13 = vmor %vm1080_vm3, %vm1081_vm12  ;;  %vm5979_vm5 = vcmp.eq.f32.partialorder %v1084_v13, 8.507059e+37  ;;  %vm5987_vm2 = vcmp.eq.f32.partialorder %v1054_v46, 8.507059e+37  ;;  %vm5994_vm0 = vcmp.eq.f32.partialorder %v1114_v34, 8.507059e+37  ;;  %vm7988_vm12 = vweird.f32 %v5848_v25 }
 0x20e   : > { %v1087_v13 = vor.u32 1.1754944e-38, %v1086_v6  ;;  %vm6005_vm3 = vmor %vm7988_vm12, %vm1051_vm1  ;;  %vm1096_vm1 = vweird.f32 %v5915_v29  ;;  %vm1125_vm12 = vweird.f32 %v5868_v54 }
 0x234   : > { %v976_v63 = vpop.permute.xlu1 %975  ;;  %v978_v47 = vpop.permute.xlu2 %977 }
 0x235   : > { %v999_v8 = vsel %vm5572_vm8, %v976_v63, %v5526_v20  ;;  %v1000_v12 = vsel %vm5557_vm7, %v978_v47, %v5712_v17  ;;  %v5954_v63 = vadd.f32 %v5854_v11, %v1108_v5 }
 0x236   : > { %v1007_v49 = vsel %vm5543_vm10, %v5526_v20, %v999_v8  ;;  %v1008_v22 = vsel %vm5535_vm15, %v5712_v17, %v1000_v12  ;;  %v1056_v20 = vand.u32 2147483648, %v5848_v25  ;;  %v1079_v17 = vadd.f32 %v5857_v40, %v1078_v41 }
 0x237   : > { %v1151_v53 = vmul.f32 %v5911_v52, %v1007_v49  ;;  %v1152_v19 = vmul.f32 %v5938_v32, %v1008_v22  ;;  %v1092_v8 = vsub.f32 1.0, %v1091_v24  ;;  %v1122_v12 = vsub.f32 1.0, %v1121_v28 }
 0x238   : > { %v1049_v41 = vadd.f32 %v5870_v27, %v1048_v37  ;;  %v1113_v51 = vsel %vm5966_vm11, %v5854_v11, %v5954_v63  ;;  %v1057_v37 = vor.u32 1.1754944e-38, %v1056_v20  ;;  %vm7991_vm11 = vnez %v7926_v10  ;;  %v8022_v10 = vld [vmem:[#allocation56_spill] sm:$0xff] }
 0x239   : > { %v1159_v61 = vadd.f32 1.0, %v1151_v53  ;;  %v1160_v47 = vadd.f32 1.0, %v1152_v19  ;;  %v1093_v63 = vmul.f32 %v5915_v29, %v1092_v8  ;;  %v1101_v8 = vand.u32 2147483648, %v5862_v26 }
 0x23a   : > { %v1053_v25 = vsel %vm6005_vm3, %v5870_v27, %v1049_v41  ;;  %v1131_v28 = vand.u32 2147483648, %v5868_v54 }
 0x23b   : > { %v5971_v49 = vmul.f32 0.5, %v1159_v61  ;;  %v5973_v24 = vmul.f32 0.5, %v1160_v47  ;;  %v1083_v61 = vsel %vm5975_vm13, %v5857_v40, %v1079_v17  ;;  %v1099_v40 = vand.u32 2147483647, %v5862_v26 }
 0x23c   : > { %v982_v53 = vpop.permute.xlu1 %981  ;;  %v984_v19 = vpop.permute.xlu2 %983  ;;  %v1123_v17 = vmul.f32 %v5923_v3, %v1122_v12  ;;  %v6025_v43 = vsel %vm5979_vm5, %v1087_v13, %v1083_v61  ;;  %vm7992_vm5 = vnez %v7921_v38  ;;  %vm7996_vm13 = vnez %v7917_v56  ;;  %v8027_v38 = vld [vmem:[#allocation52_spill] sm:$0xff] }
 0x23d   : > { %7978 = vst [vmem:[#allocation29_spill] sm:$0xff] %v5971_v49  ;;  %v1233_v52 = vmul.f32 4.0, %v5971_v49  ;;  %v1234_v11 = vmul.f32 4.0, %v5973_v24  ;;  %v980_v46 = vpop.permute.xlu0 %979  ;;  %v1002_v34 = vsel %vm5629_vm4, %v982_v53, %v5568_v60  ;;  %v1003_v6 = vsel %vm5765_vm14, %v984_v19, %v5750_v50 }
 0x23e   : > { %7979 = vst [vmem:[#allocation19_spill] sm:$0xff] %v5973_v24  ;;  %v1010_v53 = vsel %vm5586_vm6, %v5568_v60, %v1002_v34  ;;  %v1011_v12 = vsel %vm5745_vm9, %v5750_v50, %v1003_v6  ;;  %v1001_v41 = vsel %vm7991_vm11, %v980_v46, %v5607_v59  ;;  %v1094_v60 = vadd.f32 %v5915_v29, %v1093_v63 }
 0x23f   : > { %v6021_v5 = vadd.f32 -0.5, %v1234_v11  ;;  %v6027_v24 = vadd.f32 -0.5, %v1233_v52  ;;  %v1155_v27 = vmul.f32 %v6025_v43, %v1011_v12  ;;  %v6045_v52 = vsel %vm5987_vm2, %v1057_v37, %v1053_v25 }
 0x240   : > { %v1154_v19 = vmul.f32 %v5925_v9, %v1010_v53  ;;  %v1009_v50 = vsel %vm7992_vm5, %v5607_v59, %v1001_v41  ;;  %v1124_v61 = vadd.f32 %v5923_v3, %v1123_v17  ;;  %vm1095_vm2 = vweird.f32 %v5862_v26 }
 0x241   : > { %v6041_v22 = vfloor.f32 %v6021_v5  ;;  %v1163_v13 = vadd.f32 1.0, %v1155_v27  ;;  %v1153_v11 = vmul.f32 %v6045_v52, %v1009_v50  ;;  %v6059_v46 = vfloor.f32 %v6027_v24  ;;  %vm6063_vm3 = vmor %vm1095_vm2, %vm1096_vm1 }
 0x242   : > { %vm7997_vm6 = vweird.f32 %v5923_v3  ;;  %v1129_v53 = vand.u32 2147483647, %v5868_v54  ;;  %v6083_v12 = vsel %vm5994_vm0, %v5921_v31, %v1113_v51  ;;  %v1162_v27 = vadd.f32 1.0, %v1154_v19 }
 0x243   : > { %v6067_v63 = vmul.f32 0.5, %v1163_v13  ;;  %v1161_v20 = vadd.f32 1.0, %v1153_v11  ;;  %v1266_v26 = vmax.f32 %v6041_v22, 0.0  ;;  %vm6075_vm4 = vmor %vm1125_vm12, %vm7997_vm6  ;;  %8000 = vst [vmem:[#allocation57_spill] sm:$0xff] %v6083_v12  ;;  %vm8001_vm1 = vnez %v7912_v58 }
 0x244   : > { %v988_v37 = vpop.permute.xlu1 %987  ;;  %v990_v6 = vpop.permute.xlu2 %989  ;;  %v1128_v50 = vsel %vm6075_vm4, %v5923_v3, %v1124_v61  ;;  %v1098_v13 = vsel %vm6063_vm3, %v5915_v29, %v1094_v60  ;;  %vm1100_vm6 = vcmp.eq.f32.partialorder %v1099_v40, 8.507059e+37  ;;  %v1102_v54 = vor.u32 1.1754944e-38, %v1101_v8 }
 0x245   : > { %7995 = vst [vmem:[#allocation21_spill] sm:$0xff] %v6067_v63  ;;  %v1005_v34 = vsel %vm7996_vm13, %v988_v37, %v5644_v55  ;;  %v986_v17 = vpop.permute.xlu0 %985  ;;  %v6094_v11 = vmul.f32 0.5, %v1161_v20  ;;  %vm8003_vm0 = vnez %v7949_v16  ;;  %vm8004_vm12 = vnez %v7909_v44  ;;  %v8040_v16 = vld [vmem:[#allocation46_spill] sm:$0xff] }
 0x246   : > { %v1013_v41 = vsel %vm8001_vm1, %v5644_v55, %v1005_v34  ;;  %v1006_v51 = vsel %vm8003_vm0, %v990_v6, %v5785_v18  ;;  %v1004_v55 = vsel %vm8004_vm12, %v986_v17, %v5664_v14  ;;  %v1132_v47 = vor.u32 1.1754944e-38, %v1131_v28 }
 0x247   : > { %8002 = vst [vmem:[#allocation22_spill] sm:$0xff] %v6094_v11  ;;  %v1157_v31 = vmul.f32 %v6083_v12, %v1013_v41  ;;  %v1237_v3 = vmul.f32 4.0, %v6067_v63  ;;  %v1274_v19 = vmin.f32 %v1266_v26, 3.0  ;;  %v1265_v29 = vmax.f32 %v6059_v46, 0.0 }
 0x248   : > { %vm1130_vm4 = vcmp.eq.f32.partialorder %v1129_v53, 8.507059e+37  ;;  %v6105_v40 = vsel %vm1100_vm6, %v1102_v54, %v1098_v13  ;;  %v6107_v8 = vmul.f32 0.5, %v1162_v27  ;;  %v1235_v60 = vmul.f32 4.0, %v6094_v11 }
 0x249   : > { %v6110_v61 = vsel %vm1130_vm4, %v1132_v47, %v1128_v50  ;;  %v1165_v37 = vadd.f32 1.0, %v1157_v31  ;;  %vm8006_vm2 = vnez %v7944_v35  ;;  %vm8007_vm3 = vnez %v7903_v36 }
 0x24a   : > { %8005 = vst [vmem:[#allocation32_spill] sm:$0xff] %v6107_v8  ;;  %v1014_v59 = vsel %vm8006_vm2, %v5785_v18, %v1006_v51  ;;  %v1012_v28 = vsel %vm8007_vm3, %v5664_v14, %v1004_v55  ;;  %v3978_v20 = vadd.f32 -0.5, %v1235_v60  ;;  %v6120_v17 = vadd.f32 -0.5, %v1237_v3 }
 0x24b   : > { %v1158_v34 = vmul.f32 %v6110_v61, %v1014_v59  ;;  %v1156_v6 = vmul.f32 %v6105_v40, %v1012_v28  ;;  %v6122_v26 = vmul.f32 0.5, %v1165_v37  ;;  %v4297_v25 = vcvt.f32.s32 %v1274_v19 }
 0x24c   : > { %v1273_v53 = vmin.f32 %v1265_v29, 3.0  ;;  %v1236_v27 = vmul.f32 4.0, %v6107_v8  ;;  %v1251_v31 = vfloor.f32 %v3978_v20  ;;  %v6131_v51 = vfloor.f32 %v6120_v17 }
 0x24d   : > { %v1166_v41 = vadd.f32 1.0, %v1158_v34  ;;  %v1164_v50 = vadd.f32 1.0, %v1156_v6  ;;  %1325 = vperm.xlu1 %4656, %v4297_v25   ;;  %v1239_v13 = vmul.f32 4.0, %v6122_v26  ;;  %v1289_v49 = vadd.f32 1.0, %v6059_v46 }
 0x24e   : > { %v4295_v18 = vcvt.f32.s32 %v1273_v53  ;;  %v3979_v55 = vadd.f32 -0.5, %v1236_v27  ;;  %v1267_v19 = vmax.f32 %v1251_v31, 0.0  ;;  %v1269_v29 = vmax.f32 %v6131_v51, 0.0 }
 0x24f   : > { %v6126_v14 = vmul.f32 0.5, %v1166_v41  ;;  %v6128_v54 = vmul.f32 0.5, %v1164_v50  ;;  %v3982_v60 = vadd.f32 -0.5, %v1239_v13 }
 0x250   : > { %1322 = vperm.xlu0 %4655, %v4295_v18   ;;  %v1275_v28 = vmin.f32 %v1267_v19, 3.0  ;;  %v1277_v34 = vmin.f32 %v1269_v29, 3.0  ;;  %v1252_v6 = vfloor.f32 %v3979_v55 }
 0x251   : > { %8008 = vst [vmem:[#allocation23_spill] sm:$0xff] %v6128_v54  ;;  %v1240_v47 = vmul.f32 4.0, %v6126_v14  ;;  %v1238_v3 = vmul.f32 4.0, %v6128_v54  ;;  %v1255_v18 = vfloor.f32 %v3982_v60 }
 0x252   : > { %v4299_v25 = vcvt.f32.s32 %v1275_v28  ;;  %v4303_v53 = vcvt.f32.s32 %v1277_v34  ;;  %v1268_v50 = vmax.f32 %v1252_v6, 0.0 }
 0x253   : > { %v6136_v37 = vadd.f32 -0.5, %v1240_v47  ;;  %v3981_v59 = vadd.f32 -0.5, %v1238_v3  ;;  %v1271_v3 = vmax.f32 %v1255_v18, 0.0 }
 0x254   : > { %1328 = vperm.xlu2 %4657, %v4299_v25   ;;  %v1276_v47 = vmin.f32 %v1268_v50, 3.0  ;;  %v6147_v25 = vsub.f32 %v6027_v24, %v6059_v46 }
 0x255   : > { %v6138_v41 = vfloor.f32 %v3981_v59  ;;  %v6141_v27 = vfloor.f32 %v6136_v37  ;;  %1334 = vperm.xlu1 %4656, %v4303_v53   ;;  %v1279_v11 = vmin.f32 %v1271_v3, 3.0  ;;  %v6149_v53 = vsub.f32 %v3978_v20, %v1251_v31 }
 0x256   : > { %v4301_v63 = vcvt.f32.s32 %v1276_v47  ;;  %v1292_v47 = vadd.f32 1.0, %v1252_v6 }
 0x257   : > { %v1270_v54 = vmax.f32 %v6138_v41, 0.0  ;;  %v1272_v13 = vmax.f32 %v6141_v27, 0.0  ;;  %v4307_v8 = vcvt.f32.s32 %v1279_v11  ;;  %v1371_v50 = vsub.f32 1.0, %v6149_v53 }
 0x258   : > { %1331 = vperm.xlu0 %4655, %v4301_v63   ;;  %v6156_v63 = vsub.f32 %v6021_v5, %v6041_v22  ;;  %v6158_v11 = vsub.f32 %v3979_v55, %v1252_v6  ;;  %v6161_v24 = vsub.f32 %v3981_v59, %v6138_v41  ;;  %v1300_v59 = vmax.f32 %v1292_v47, 0.0 }
 0x259   : > { %v1278_v19 = vmin.f32 %v1270_v54, 3.0  ;;  %v1280_v29 = vmin.f32 %v1272_v13, 3.0  ;;  %v1369_v54 = vsub.f32 1.0, %v6147_v25  ;;  %v1297_v13 = vmax.f32 %v1289_v49, 0.0 }
 0x25a   : > { %v1370_v20 = vsub.f32 1.0, %v6156_v63  ;;  %v1372_v3 = vsub.f32 1.0, %v6158_v11  ;;  %v1374_v5 = vsub.f32 1.0, %v6161_v24  ;;  %v6169_v49 = vsub.f32 %v6120_v17, %v6131_v51 }
 0x25b   : > { %v4305_v28 = vcvt.f32.s32 %v1278_v19  ;;  %v4309_v34 = vcvt.f32.s32 %v1280_v29  ;;  %v1305_v46 = vmin.f32 %v1297_v13, 3.0  ;;  %v1295_v6 = vadd.f32 1.0, %v1255_v18 }
 0x25c   : > { %v6178_v47 = vsub.f32 %v6136_v37, %v6141_v27 }
 0x25d   : > { %1337 = vperm.xlu2 %4657, %v4305_v28   ;;  %1343 = vperm.xlu1 %4656, %v4309_v34   ;;  %v4311_v55 = vceil.f32 %v1305_v46  ;;  %v4312_v19 = vfloor.f32 %v1305_v46  ;;  %vm4310_vm6 = vcmp.lt.s32.totalorder %v1305_v46, 0  ;;  %v1291_v28 = vadd.f32 1.0, %v1251_v31 }
 0x25e   : > { %v6171_v34 = vsub.f32 %v3982_v60, %v1255_v18  ;;  %v1303_v60 = vmax.f32 %v1295_v6, 0.0 }
 0x25f   : > { %v1299_v17 = vmax.f32 %v1291_v28, 0.0 }
 0x260   : > { %1340 = vperm.xlu0 %4655, %v4307_v8   ;;  %v1290_v8 = vadd.f32 1.0, %v6041_v22  ;;  %8009 = vst [vmem:[#allocation33_spill] sm:$0xff] %v6171_v34  ;;  %v1293_v22 = vadd.f32 1.0, %v6131_v51  ;;  %v1375_v12 = vsub.f32 1.0, %v6171_v34  ;;  %v1311_v37 = vmin.f32 %v1303_v60, 3.0 }
 0x262   : > { %v1298_v29 = vmax.f32 %v1290_v8, 0.0  ;;  %v1301_v31 = vmax.f32 %v1293_v22, 0.0  ;;  %v1296_v22 = vadd.f32 1.0, %v6141_v27  ;;  %v4342_v34 = vfloor.f32 %v1311_v37 }
 0x264   : > { %v1306_v13 = vmin.f32 %v1298_v29, 3.0  ;;  %v1309_v29 = vmin.f32 %v1301_v31, 3.0 }
 0x265   : > { %1379 = vperm.xlu2 %4657, %v1369_v54   ;;  %1389 = vperm.xlu1 %4656, %v1371_v50   ;;  %v1373_v54 = vsub.f32 1.0, %v6169_v49  ;;  %v4313_v50 = vsel %vm4310_vm6, %v4311_v55, %v4312_v19  ;;  %v1294_v55 = vadd.f32 1.0, %v6138_v41  ;;  %v1376_v19 = vsub.f32 1.0, %v6178_v47 }
 0x266   : > { %v4314_v8 = vcvt.f32.s32 %v4313_v50  ;;  %v4316_v46 = vceil.f32 %v1306_v13  ;;  %vm4315_vm4 = vcmp.lt.s32.totalorder %v1306_v13, 0  ;;  %v1304_v41 = vmax.f32 %v1296_v22, 0.0 }
 0x267   : > { %v1302_v50 = vmax.f32 %v1294_v55, 0.0 }
 0x268   : > { %1384 = vperm.xlu0 %4655, %v1370_v20   ;;  %v1308_v20 = vmin.f32 %v1300_v59, 3.0 }
 0x269   : > { %v1310_v60 = vmin.f32 %v1302_v50, 3.0  ;;  %v8011_v50 = vld [vmem:[#allocation44_spill] sm:$0xff] }
 0x26a   : > { %v4326_v51 = vceil.f32 %v1308_v20  ;;  %v4327_v18 = vfloor.f32 %v1308_v20  ;;  %vm4325_vm6 = vcmp.lt.s32.totalorder %v1308_v20, 0  ;;  %v4332_v20 = vfloor.f32 %v1309_v29 }
 0x26b   : > { %vm4335_vm13 = vcmp.lt.s32.totalorder %v1310_v60, 0 }
 0x26c   : > { %v4328_v28 = vsel %vm4325_vm6, %v4326_v51, %v4327_v18  ;;  %vm4340_vm6 = vcmp.lt.s32.totalorder %v1311_v37, 0  ;;  %v1312_v51 = vmin.f32 %v1304_v41, 3.0  ;;  %v4336_v18 = vceil.f32 %v1310_v60  ;;  %v8013_v41 = vld [vmem:[#allocation49_spill] sm:$0xff] }
 0x26d   : > { %1394 = vperm.xlu2 %4657, %v1372_v3   ;;  %1404 = vperm.xlu1 %4656, %v1374_v5   ;;  %v4317_v3 = vfloor.f32 %v1306_v13  ;;  %v1307_v5 = vmin.f32 %v1299_v17, 3.0  ;;  %v4331_v13 = vceil.f32 %v1309_v29  ;;  %v4341_v17 = vceil.f32 %v1311_v37 }
 0x26f   : > { %v4318_v59 = vsel %vm4315_vm4, %v4316_v46, %v4317_v3  ;;  %v4321_v6 = vceil.f32 %v1307_v5  ;;  %vm4320_vm1 = vcmp.lt.s32.totalorder %v1307_v5, 0  ;;  %vm4330_vm4 = vcmp.lt.s32.totalorder %v1309_v29, 0  ;;  %v4698_v29 = vld [vmem:[%s4990_s13 + $0x8] sm:$0xff] }
 0x270   : > { %1399 = vperm.xlu0 %4655, %v1373_v54   ;;  %v4322_v54 = vfloor.f32 %v1307_v5  ;;  %v4333_v27 = vsel %vm4330_vm4, %v4331_v13, %v4332_v20  ;;  %v4343_v3 = vsel %vm4340_vm6, %v4341_v17, %v4342_v34  ;;  %v4337_v5 = vfloor.f32 %v1310_v60  ;;  %v4699_v20 = vld [vmem:[%s4990_s13] sm:$0xff] }
 0x271   : > { %v4334_v55 = vcvt.f32.s32 %v4333_v27  ;;  %v896_v34 = vsel %vm5557_vm7, %v4698_v29, %v5504_v42  ;;  %vm8012_vm4 = vcmp.gt.f32.partialorder %v5020_v7, 0.0  ;;  %v895_v42 = vsel %vm5572_vm8, %v4699_v20, %v5508_v45  ;;  %v8014_v7 = vld [vmem:[#allocation31_spill] sm:$0xff]  ;;  %v4700_v60 = vld [vmem:[%s4990_s13 + $0x20] sm:$0xff] }
 0x272   : > { %v4323_v31 = vsel %vm4320_vm1, %v4321_v6, %v4322_v54  ;;  %v4338_v22 = vsel %vm4335_vm13, %v4336_v18, %v4337_v5  ;;  %vm4345_vm1 = vcmp.lt.s32.totalorder %v1312_v51, 0  ;;  %v8010_v54 = vld [vmem:[#allocation45_spill] sm:$0xff]  ;;  %v2940_v17 = vmul.f32 16.0, %v6122_v26  ;;  %v8017_v27 = vld [vmem:[#allocation47_spill] sm:$0xff]  ;;  %v6224_v18 = vpop.permute.xlu2 %1208 }
 0x273   : > { %v4324_v46 = vcvt.f32.s32 %v4323_v31  ;;  %v4339_v37 = vcvt.f32.s32 %v4338_v22  ;;  %vm8015_vm7 = vcmp.gt.f32.partialorder %v4996_v1, 0.0  ;;  %v8016_v1 = vld [vmem:[#allocation48_spill] sm:$0xff]  ;;  %vm8025_vm8 = vnez %v7907_v21  ;;  %v8028_v29 = vld [vmem:[#allocation39_spill] sm:$0xff] }
 0x274   : > { %v799_v31 = vsel %vm8015_vm7, %v8014_v7, %v8013_v41  ;;  %v4126_v62 = vadd.f32 -0.5, %v2940_v17  ;;  %v8041_v17 = vld [vmem:[#allocation16_spill] sm:$0xff]  ;;  %vm8046_vm13 = vnez %v7917_v56 }
 0x275   : > { %1409 = vperm.xlu2 %4657, %v1375_v12   ;;  %1426 = vperm.xlu1 %4656, %v4314_v8   ;;  %v4319_v12 = vcvt.f32.s32 %v4318_v59  ;;  %v4329_v8 = vcvt.f32.s32 %v4328_v28  ;;  %v4346_v59 = vceil.f32 %v1312_v51  ;;  %v4347_v28 = vfloor.f32 %v1312_v51  ;;  %v8020_v51 = vld [vmem:[#allocation43_spill] sm:$0xff] }
 0x276   : > { %v903_v23 = vsel %vm5543_vm10, %v799_v31, %v895_v42  ;;  %vm8018_vm10 = vcmp.gt.f32.partialorder %v4999_v2, 0.0  ;;  %v6241_v22 = vfloor.f32 %v4126_v62  ;;  %v8039_v42 = vld [vmem:[#allocation55_spill] sm:$0xff] }
 0x277   : > { %v4348_v6 = vsel %vm4345_vm1, %v4346_v59, %v4347_v28  ;;  %v803_v57 = vsel %vm8018_vm10, %v8017_v27, %v8016_v1 }
 0x278   : > { %1414 = vperm.xlu0 %4655, %v1376_v19   ;;  %v4344_v19 = vcvt.f32.s32 %v4343_v3  ;;  %v4349_v13 = vcvt.f32.s32 %v4348_v6  ;;  %v8019_v3 = vld [vmem:[#allocation53_spill] sm:$0xff]  ;;  %8026 = vst [vmem:[#allocation30_spill] sm:$0xff] %v6241_v22  ;;  %v6270_v31 = vsub.f32 %v4126_v62, %v6241_v22 }
 0x279   : > { %v4703_v6 = vld [vmem:[%s4990_s13 + $0x38] sm:$0xff] }
 0x27a   : > { %8043 = vst [vmem:[#allocation34_spill] sm:$0xff] %v6270_v31  ;;  %v8077_v22 = vld [vmem:[#allocation65_spill] sm:$0xff] }
 0x27d   : > { %1429 = vperm.xlu2 %4657, %v4319_v12   ;;  %1435 = vperm.xlu1 %4656, %v4329_v8   ;;  %v800_v12 = vsel %vm8012_vm4, %v8011_v50, %v8010_v54  ;;  %v8032_v54 = vld [vmem:[#allocation58_spill] sm:$0xff] }
 0x27e   : > { %v904_v8 = vsel %vm5535_vm15, %v800_v12, %v896_v34  ;;  %vm8021_vm15 = vcmp.gt.f32.partialorder %v4993_v0, 0.0  ;;  %v4702_v0 = vld [vmem:[%s4990_s13 + $0x18] sm:$0xff]  ;;  %v8029_v34 = vld [vmem:[#allocation15_spill] sm:$0xff]  ;;  %v902_v21 = vsel %vm8003_vm0, %v4703_v6, %v8032_v54 }
 0x27f   : > { %v1044_v4 = vmul.f32 %v5938_v32, %v904_v8  ;;  %v899_v32 = vsel %vm5765_vm14, %v4700_v60, %v5506_v39  ;;  %v801_v39 = vsel %vm8021_vm15, %v8020_v51, %v8019_v3  ;;  %vm8031_vm14 = vnez %v7900_v33  ;;  %v4704_v50 = vld [vmem:[%s4990_s13 + $0x28] sm:$0xff] }
 0x280   : > { %1432 = vperm.xlu0 %4655, %v4324_v46   ;;  %v2941_v46 = vmul.f32 16.0, %v6126_v14  ;;  %v907_v5 = vsel %vm5745_vm9, %v803_v57, %v899_v32  ;;  %vm8030_vm9 = vcmp.gt.f32.partialorder %v8029_v34, 0.0  ;;  %v8034_v12 = vld [vmem:[#allocation51_spill] sm:$0xff]  ;;  %v8035_v8 = vld [vmem:[#allocation50_spill] sm:$0xff] }
 0x281   : > { %v1136_v30 = vadd.f32 1.0, %v1044_v4  ;;  %v1089_v28 = vmul.f32 %v6025_v43, %v907_v5  ;;  %v8033_v43 = vld [vmem:[#allocation61_spill] sm:$0xff]  ;;  %v8050_v57 = vld [vmem:[#allocation54_spill] sm:$0xff]  ;;  %v8062_v34 = vld [vmem:[#allocation35_spill] sm:$0xff] }
 0x282   : > { %v4127_v59 = vadd.f32 -0.5, %v2941_v46  ;;  %v8052_v3 = vld [vmem:[#allocation18_spill] sm:$0xff] }
 0x283   : > { %v6233_v2 = vmul.f32 0.5, %v1136_v30  ;;  %v1139_v7 = vadd.f32 1.0, %v1089_v28  ;;  %v8045_v30 = vld [vmem:[#allocation60_spill] sm:$0xff]  ;;  %vm8053_vm0 = vcmp.gt.f32.partialorder %v8052_v3, 0.0 }
 0x284   : > { %v6263_v33 = vfloor.f32 %v4127_v59 }
 0x285   : > { %1438 = vperm.xlu2 %4657, %v4334_v55   ;;  %1444 = vperm.xlu1 %4656, %v4344_v19   ;;  %8023 = vst [vmem:[#allocation28_spill] sm:$0xff] %v6233_v2  ;;  %v8024_v55 = vld [vmem:[#allocation59_spill] sm:$0xff]  ;;  %v1578_v20 = vmul.f32 4.0, %v6233_v2  ;;  %v6292_v35 = vmul.f32 0.5, %v1139_v7 }
 0x286   : > { %v898_v19 = vsel %vm8025_vm8, %v4702_v0, %v8024_v55  ;;  %8038 = vst [vmem:[#allocation27_spill] sm:$0xff] %v6263_v33 }
 0x287   : > { %v6287_v1 = vadd.f32 -0.5, %v1578_v20  ;;  %8048 = vst [vmem:[#allocation49_spill] sm:$0xff] %v6292_v35 }
 0x288   : > { %1441 = vperm.xlu0 %4655, %v4339_v37  }
 0x28d   : > { %1447 = vperm.xlu2 %4657, %v4349_v13   ;;  %1480 = vperm.xlu1 %4656, %v6156_v63   ;;  %v4701_v63 = vld [vmem:[%s4990_s13 + $0x10] sm:$0xff]  ;;  %v8036_v13 = vld [vmem:[#allocation17_spill] sm:$0xff] }
 0x28e   : > { %v897_v45 = vsel %vm7991_vm11, %v4701_v63, %v5516_v48  ;;  %v1029_v48 = vmul.f32 %v8022_v10, %v903_v23  ;;  %vm8037_vm11 = vcmp.gt.f32.partialorder %v8036_v13, 0.0  ;;  %v6279_v63 = vpop.permute.xlu2 %1214  ;;  %v6305_v10 = vpop.permute.xlu1 %1205  ;;  %v8067_v13 = vld [vmem:[#allocation37_spill] sm:$0xff] }
 0x28f   : > { %v806_v4 = vsel %vm8037_vm11, %v8035_v8, %v8034_v12  ;;  %v8066_v8 = vld [vmem:[#allocation38_spill] sm:$0xff] }
 0x290   : > { %1475 = vperm.xlu0 %4655, %v6147_v25   ;;  %v905_v25 = vsel %vm7992_vm5, %v801_v39, %v897_v45  ;;  %vm8042_vm5 = vcmp.gt.f32.partialorder %v8041_v17, 0.0  ;;  %v910_v32 = vsel %vm8006_vm2, %v806_v4, %v902_v21  ;;  %v4705_v45 = vld [vmem:[%s4990_s13 + $0x30] sm:$0xff]  ;;  %v8068_v4 = vpack.i.bf16 %v8066_v8, %v8067_v13  ;;  %v8076_v13 = vld [vmem:[#allocation14_spill] sm:$0xff]  ;;  %s7612_s13 = scalar_lea.vmem [#allocation8], %s3965_s29 }
 0x291   : > { %v1059_v15 = vmul.f32 %v6045_v52, %v905_v25  ;;  %v900_v52 = vsel %vm8004_vm12, %v4704_v50, %v8033_v43  ;;  %v804_v41 = vsel %vm8042_vm5, %v8040_v16, %v8039_v42  ;;  %v901_v46 = vsel %vm8046_vm13, %v4705_v45, %v8045_v30  ;;  %v8071_v45 = vld [vmem:[#allocation40_spill] sm:$0xff]  ;;  %s3870_s24 = sshll.u32 %s7612_s13, 4  ;;  %s3871_s24 = int_to_ptr.vmem [resolvable:$true] %s3870_s24 }
 0x292   : > { %v1134_v36 = vmul.f32 %v6110_v61, %v910_v32  ;;  %vm8054_vm12 = vnez %v7912_v58  ;;  %v6309_v61 = vfloor.f32 %v6287_v1  ;;  %v8058_v58 = vld [vmem:[#allocation24_spill] sm:$0xff]  ;;  %vm1933_vm2 = vcmask 1043456  }
 0x293   : > { %v1137_v44 = vadd.f32 1.0, %v1059_v15  ;;  %v8059_v15 = vld [vmem:[#allocation25_spill] sm:$0xff]  ;;  %vm1920_vm13 = vcmask 195584  }
 0x294   : > { %v1142_v5 = vadd.f32 1.0, %v1134_v36 }
 0x295   : > { %1485 = vperm.xlu2 %4657, %v6149_v53   ;;  %1495 = vperm.xlu1 %4656, %v6169_v49   ;;  %v802_v53 = vsel %vm8030_vm9, %v8028_v29, %v8027_v38  ;;  %v1135_v49 = vadd.f32 1.0, %v1029_v48  ;;  %v6295_v27 = vmul.f32 0.5, %v1137_v44  ;;  %v8055_v48 = vld [vmem:[#allocation33_spill] sm:$0xff]  ;;  %v8060_v38 = vpack.i.bf16 %v8058_v58, %v8059_v15  ;;  %v8061_v29 = vld [vmem:[#allocation36_spill] sm:$0xff] }
 0x296   : > { %v906_v37 = vsel %vm8031_vm14, %v802_v53, %v898_v19  ;;  %v8057_v19 = vld [vmem:[#allocation57_spill] sm:$0xff]  ;;  %v8063_v53 = vpack.i.bf16 %v8061_v29, %v8062_v34  ;;  %v6327_v54 = vpop.permute.xlu2 %1223  ;;  %v6339_v17 = vpop.permute.xlu1 %1211 }
 0x297   : > { %v6272_v23 = vmul.f32 0.5, %v1135_v49  ;;  %v1074_v60 = vmul.f32 %v5925_v9, %v906_v37  ;;  %v6290_v9 = vsub.f32 %v4127_v59, %v6263_v33  ;;  %8049 = vst [vmem:[#allocation31_spill] sm:$0xff] %v6295_v27  ;;  %v1579_v25 = vmul.f32 4.0, %v6295_v27 }
 0x298   : > { %1490 = vperm.xlu0 %4655, %v6158_v11   ;;  %v908_v11 = vsel %vm8007_vm3, %v804_v41, %v900_v52  ;;  %v1610_v49 = vmax.f32 %v6309_v61, 0.0  ;;  %v6323_v37 = vmul.f32 0.5, %v1142_v5 }
 0x299   : > { %8044 = vst [vmem:[#allocation45_spill] sm:$0xff] %v6272_v23  ;;  %v1577_v56 = vmul.f32 4.0, %v6272_v23  ;;  %v1138_v39 = vadd.f32 1.0, %v1074_v60  ;;  %v4002_v21 = vadd.f32 -0.5, %v1579_v25 }
 0x29a   : > { %8047 = vst [vmem:[#allocation44_spill] sm:$0xff] %v6290_v9  ;;  %v1618_v20 = vmin.f32 %v1610_v49, 3.0  ;;  %v1584_v42 = vmul.f32 4.0, %v6323_v37  ;;  %v6476_v9 = vmul.f32 8.0, %v8076_v13 }
 0x29b   : > { %v6313_v55 = vmul.f32 0.5, %v1138_v39  ;;  %v4000_v28 = vadd.f32 -0.5, %v1577_v56  ;;  %8064 = vst [vmem:[#allocation47_spill] sm:$0xff] %v6323_v37  ;;  %v6341_v41 = vfloor.f32 %v4002_v21 }
 0x29c   : > { %vm4370_vm10 = vcmp.lt.s32.totalorder %v6476_v9, 0 }
 0x29d   : > { %1500 = vperm.xlu2 %4657, %v6161_v24   ;;  %1510 = vperm.xlu1 %4656, %v6178_v47   ;;  %v1104_v24 = vmul.f32 %v6105_v40, %v908_v11  ;;  %v8051_v47 = vld [vmem:[#allocation42_spill] sm:$0xff]  ;;  %v1581_v40 = vmul.f32 4.0, %v6292_v35  ;;  %8056 = vst [vmem:[#allocation48_spill] sm:$0xff] %v6313_v55  ;;  %v1580_v43 = vmul.f32 4.0, %v6313_v55  ;;  %v6332_v12 = vfloor.f32 %v4000_v28  ;;  %v8070_v11 = vld [vmem:[#allocation41_spill] sm:$0xff] }
 0x29e   : > { %v805_v51 = vsel %vm8053_vm0, %v8051_v47, %v8050_v57  ;;  %v8072_v30 = vpack.i.bf16 %v8070_v11, %v8071_v45  ;;  %v1626_v11 = vadd.f32 1.0, %v6309_v61 }
 0x29f   : > { %v909_v62 = vsel %vm8054_vm12, %v805_v51, %v901_v46  ;;  %v1140_v0 = vadd.f32 1.0, %v1104_v24  ;;  %v6329_v50 = vadd.f32 -0.5, %v1581_v40  ;;  %v1609_v60 = vmax.f32 %v6332_v12, 0.0  ;;  %v6359_v51 = vpop.permute.xlu0 %1202 }
 0x2a0   : > { %1505 = vperm.xlu0 %4655, %v8055_v48   ;;  %v1119_v59 = vmul.f32 %v8057_v19, %v909_v62  ;;  %v4003_v32 = vadd.f32 -0.5, %v1580_v43  ;;  %v6352_v46 = vadd.f32 -0.5, %v1584_v42  ;;  %v1611_v24 = vmax.f32 %v6341_v41, 0.0  ;;  %v6366_v19 = vpop.permute.xlu1 %1220 }
 0x2a1   : > { %v6325_v6 = vmul.f32 0.5, %v1140_v0  ;;  %v6344_v7 = vfloor.f32 %v6329_v50  ;;  %v1617_v56 = vmin.f32 %v1609_v60, 3.0 }
 0x2a2   : > { %v1141_v52 = vadd.f32 1.0, %v1119_v59  ;;  %v1596_v39 = vfloor.f32 %v4003_v32  ;;  %v1619_v62 = vmin.f32 %v1611_v24, 3.0  ;;  %v6364_v5 = vfloor.f32 %v6352_v46 }
 0x2a3   : > { %8065 = vst [vmem:[#allocation53_spill] sm:$0xff] %v6325_v6  ;;  %v1582_v16 = vmul.f32 4.0, %v6325_v6  ;;  %v1613_v57 = vmax.f32 %v6344_v7, 0.0  ;;  %v6382_v24 = vsub.f32 %v4002_v21, %v6341_v41  ;;  %v1629_v8 = vadd.f32 1.0, %v6344_v7 }
 0x2a4   : > { %v6346_v44 = vmul.f32 0.5, %v1141_v52  ;;  %v1612_v25 = vmax.f32 %v1596_v39, 0.0  ;;  %v6396_v21 = vsub.f32 %v4003_v32, %v1596_v39  ;;  %v1628_v45 = vadd.f32 1.0, %v1596_v39 }
 0x2a5   : > { %4659 = vperm.xlu2 %4657, %v8060_v38   ;;  %4669 = vperm.xlu1 %4656, %v8063_v53   ;;  %v4005_v47 = vadd.f32 -0.5, %v1582_v16  ;;  %v1621_v48 = vmin.f32 %v1613_v57, 3.0  ;;  %v1616_v53 = vmax.f32 %v6364_v5, 0.0  ;;  %v4371_v6 = vceil.f32 %v6476_v9 }
 0x2a6   : > { %8069 = vst [vmem:[#allocation43_spill] sm:$0xff] %v6346_v44  ;;  %v1583_v3 = vmul.f32 4.0, %v6346_v44  ;;  %v1620_v49 = vmin.f32 %v1612_v25, 3.0 }
 0x2a7   : > { %v6361_v40 = vfloor.f32 %v4005_v47  ;;  %v6372_v52 = vpop.permute.xlu0 %1217 }
 0x2a8   : > { %4664 = vperm.xlu0 %4655, %v8068_v4   ;;  %v4006_v0 = vadd.f32 -0.5, %v1583_v3 }
 0x2a9   : > { %v1614_v38 = vmax.f32 %v6361_v40, 0.0 }
 0x2aa   : > { %v1599_v43 = vfloor.f32 %v4006_v0 }
 0x2ab   : > { %v1622_v4 = vmin.f32 %v1614_v38, 3.0  ;;  %v6399_v38 = vsub.f32 %v4005_v47, %v6361_v40 }
 0x2ac   : > { %v1615_v42 = vmax.f32 %v1599_v43, 0.0  ;;  %v1631_v29 = vadd.f32 1.0, %v1599_v43 }
 0x2ad   : > { %4674 = vperm.xlu2 %4657, %v8072_v30   ;;  %1678 = vperm.xlu1 %4656, %v1618_v20   ;;  %v1624_v20 = vmin.f32 %v1616_v53, 3.0  ;;  %v6379_v30 = vsub.f32 %v4000_v28, %v6332_v12 }
 0x2ae   : > { %v6354_v36 = vpop.permute.xlu2 %1328  ;;  %v1623_v57 = vmin.f32 %v1615_v42, 3.0  ;;  %v6409_v42 = vsub.f32 %v6329_v50, %v6344_v7  ;;  %v1632_v7 = vadd.f32 1.0, %v6364_v5 }
 0x2b0   : > { %1673 = vperm.xlu0 %4655, %v1617_v56   ;;  %v1735_v56 = vsub.f32 1.0, %v6379_v30 }
 0x2b5   : > { %1683 = vperm.xlu2 %4657, %v1619_v62   ;;  %1693 = vperm.xlu1 %4656, %v1621_v48   ;;  %v1737_v62 = vsub.f32 1.0, %v6382_v24  ;;  %v6390_v48 = vsub.f32 %v6287_v1, %v6309_v61  ;;  %v1625_v1 = vadd.f32 1.0, %v6332_v12 }
 0x2b7   : > { %v6368_v59 = vpop.permute.xlu2 %1337  ;;  %v1736_v53 = vsub.f32 1.0, %v6390_v48 }
 0x2b8   : > { %1688 = vperm.xlu0 %4655, %v1620_v49   ;;  %v1738_v49 = vsub.f32 1.0, %v6396_v21 }
 0x2bd   : > { %1698 = vperm.xlu2 %4657, %v1622_v4   ;;  %1708 = vperm.xlu1 %4656, %v1624_v20   ;;  %v1740_v4 = vsub.f32 1.0, %v6399_v38 }
 0x2bf   : > { %v6374_v16 = vpop.permute.xlu1 %1325  ;;  %v6376_v60 = vpop.permute.xlu2 %1379 }
 0x2c0   : > { %1703 = vperm.xlu0 %4655, %v1623_v57   ;;  %v6415_v57 = vsub.f32 %v4006_v0, %v1599_v43 }
 0x2c2   : > { %v6384_v3 = vpop.permute.xlu0 %1322  ;;  %v1741_v12 = vsub.f32 1.0, %v6415_v57 }
 0x2c5   : > { %1745 = vperm.xlu2 %4657, %v1735_v56   ;;  %1755 = vperm.xlu1 %4656, %v1737_v62   ;;  %v1633_v56 = vmax.f32 %v1625_v1, 0.0  ;;  %v1739_v62 = vsub.f32 1.0, %v6409_v42  ;;  %v1634_v1 = vmax.f32 %v1626_v11, 0.0  ;;  %v1637_v11 = vmax.f32 %v1629_v8, 0.0 }
 0x2c7   : > { %v6392_v25 = vpop.permute.xlu2 %1394  ;;  %v6394_v28 = vpop.permute.xlu1 %1334  ;;  %v1642_v61 = vmin.f32 %v1634_v1, 3.0 }
 0x2c8   : > { %1750 = vperm.xlu0 %4655, %v1736_v53   ;;  %v1641_v53 = vmin.f32 %v1633_v56, 3.0  ;;  %v1627_v56 = vadd.f32 1.0, %v6341_v41  ;;  %v1630_v41 = vadd.f32 1.0, %v6361_v40 }
 0x2ca   : > { %v6405_v20 = vpop.permute.xlu0 %1331 }
 0x2cd   : > { %1760 = vperm.xlu2 %4657, %v1738_v49   ;;  %1770 = vperm.xlu1 %4656, %v1740_v4   ;;  %v6424_v49 = vsub.f32 %v6352_v46, %v6364_v5 }
 0x2cf   : > { %v6411_v32 = vpop.permute.xlu2 %1409  ;;  %v6413_v47 = vpop.permute.xlu1 %1343  ;;  %v1742_v34 = vsub.f32 1.0, %v6424_v49 }
 0x2d0   : > { %1765 = vperm.xlu0 %4655, %v1739_v62   ;;  %v1636_v62 = vmax.f32 %v1628_v45, 0.0  ;;  %v1639_v45 = vmax.f32 %v1631_v29, 0.0  ;;  %v1664_v29 = vld [vmem:[%s7665_s1 + $0x8] sm:$0xf] }
 0x2d2   : > { %v6420_v50 = vpop.permute.xlu0 %1340  ;;  %v1644_v39 = vmin.f32 %v1636_v62, 3.0  ;;  %v1647_v1 = vmin.f32 %v1639_v45, 3.0  ;;  %v1638_v62 = vmax.f32 %v1630_v41, 0.0 }
 0x2d4   : > { %v1646_v8 = vmin.f32 %v1638_v62, 3.0 }
 0x2d5   : > { %1775 = vperm.xlu2 %4657, %v1741_v12   ;;  %1793 = vperm.xlu1 %4656, %v1641_v53   ;;  %v1635_v12 = vmax.f32 %v1627_v56, 0.0 }
 0x2d7   : > { %v6426_v0 = vpop.permute.xlu2 %1429  ;;  %v6428_v4 = vpop.permute.xlu1 %1389  ;;  %v1643_v15 = vmin.f32 %v1635_v12, 3.0 }
 0x2d8   : > { %1780 = vperm.xlu0 %4655, %v1742_v34   ;;  %v1645_v34 = vmin.f32 %v1637_v11, 3.0 }
 0x2da   : > { %v6433_v46 = vpop.permute.xlu0 %1384 }
 0x2dd   : > { %1798 = vperm.xlu2 %4657, %v1642_v61   ;;  %1808 = vperm.xlu1 %4656, %v1644_v39   ;;  %v1640_v39 = vmax.f32 %v1632_v7, 0.0  ;;  %v8073_v7 = vld [vmem:[#allocation62_spill] sm:$0xff] }
 0x2de   : > { %v2048_v62 = vmul.f32 8.0, %v8073_v7 }
 0x2df   : > { %v6435_v53 = vpop.permute.xlu2 %1438  ;;  %v6437_v58 = vpop.permute.xlu1 %1404  ;;  %v1648_v40 = vmin.f32 %v1640_v39, 3.0  ;;  %v8074_v39 = vld [vmem:[#allocation26_spill] sm:$0xff] }
 0x2e0   : > { %1803 = vperm.xlu0 %4655, %v1643_v15   ;;  %v1916_v15 = vunpack.c.l.b16 %v1664_v29  ;;  %vm4355_vm3 = vcmp.lt.s32.totalorder %v2048_v62, 0 }
 0x2e2   : > { %v6441_v43 = vpop.permute.xlu0 %1399  ;;  %v1918_v12 = vpack.c.b16 %v1916_v15, %v1916_v15  ;;  %v8075_v15 = vld [vmem:[#allocation63_spill] sm:$0xff] }
 0x2e4   : > { %v1935_v11 = vsel %vm1933_vm2, %v1918_v12, 0 }
 0x2e5   : > { %1813 = vperm.xlu2 %4657, %v1645_v34   ;;  %1823 = vperm.xlu1 %4656, %v1647_v1   ;;  %v4229_v34 = vld [vmem:[%s7665_s1] sm:$0xff]  ;;  %v1183_v1 = vlaneseq }
 0x2e6   : > { %1943 = vmatpush.bf16.msra.mxu0 %v1935_v11  ;;  %4250 = vmatpush.bf16.msra.mxu2 %v1935_v11 }
 0x2e7   : > { %v6443_v56 = vpop.permute.xlu2 %1447  ;;  %v6445_v61 = vpop.permute.xlu1 %1426  ;;  %v6468_v29 = vand.u32 127, %v1183_v1 }
 0x2e8   : > { %1818 = vperm.xlu0 %4655, %v1646_v8   ;;  %v2049_v8 = vmul.f32 8.0, %v8074_v39  ;;  %v8078_v39 = vld [vmem:[#allocation64_spill] sm:$0xff] }
 0x2e9   : > { %v6483_v7 = vmul.f32 8.0, %v8078_v39 }
 0x2ea   : > { %v6450_v5 = vpop.permute.xlu0 %1414  ;;  %1944 = vmatpush.bf16.msra.mxu0 %v4229_v34  ;;  %4251 = vmatpush.bf16.msra.mxu2 %v4229_v34  ;;  %v4357_v34 = vfloor.f32 %v2048_v62  ;;  %v4361_v31 = vceil.f32 %v2049_v8  ;;  %v4362_v33 = vfloor.f32 %v2049_v8  ;;  %vm4360_vm6 = vcmp.lt.s32.totalorder %v2049_v8, 0 }
 0x2eb   : > { %vm4365_vm14 = vcmp.lt.s32.totalorder %v6483_v7, 0 }
 0x2ed   : > { %1828 = vperm.xlu2 %4657, %v1648_v40   ;;  %1862 = vperm.xlu1 %4656, %v6390_v48   ;;  %v2047_v40 = vmul.f32 8.0, %v8075_v15 }
 0x2ef   : > { %v6454_v45 = vpop.permute.xlu2 %1485  ;;  %v6456_v41 = vpop.permute.xlu1 %1435  ;;  %v4351_v1 = vceil.f32 %v2047_v40  ;;  %v4352_v15 = vfloor.f32 %v2047_v40  ;;  %vm4350_vm4 = vcmp.lt.s32.totalorder %v2047_v40, 0 }
 0x2f0   : > { %1857 = vperm.xlu0 %4655, %v6379_v30   ;;  %v4356_v30 = vceil.f32 %v2048_v62  ;;  %v8079_v62 = vld [vmem:[#allocation29_spill] sm:$0xff] }
 0x2f2   : > { %v6463_v48 = vpop.permute.xlu0 %1432  ;;  %v6488_v44 = vsel %vm4355_vm3, %v4356_v30, %v4357_v34  ;;  %v4372_v30 = vfloor.f32 %v6476_v9  ;;  %v2102_v9 = vmul.f32 8.0, %v6126_v14 }
 0x2f5   : > { %1867 = vperm.xlu2 %4657, %v6382_v24   ;;  %1877 = vperm.xlu1 %4656, %v6409_v42   ;;  %v2052_v24 = vmul.f32 8.0, %v8077_v22  ;;  %v1226_v42 = vsub.s32 %v6468_v29, %v6305_v10  ;;  %v2095_v22 = vmul.f32 8.0, %v8079_v62  ;;  %v1225_v10 = vsub.s32 %v6468_v29, %v6359_v51 }
 0x2f6   : > { %v8080_v62 = vmov 0.0  }
 0x2f7   : > { %v6471_v12 = vpop.permute.xlu2 %1500  ;;  %v6473_v11 = vpop.permute.xlu1 %1444  ;;  %vm1450_vm1 = vcmp.eq.s32.totalorder %v1226_v42, %v6426_v0  ;;  %vm1346_vm7 = vcmp.eq.s32.totalorder %v1226_v42, %v6374_v16  ;;  %v4376_v8 = vceil.f32 %v2052_v24  ;;  %v4377_v39 = vfloor.f32 %v2052_v24  ;;  %v8082_v0 = vld [vmem:[#allocation66_spill] sm:$0xff]  ;;  %v8083_v16 = vld [vmem:[#allocation32_spill] sm:$0xff] }
 0x2f8   : > { %1872 = vperm.xlu0 %4655, %v6396_v21   ;;  %v4363_v21 = vsel %vm4360_vm6, %v4361_v31, %v4362_v33  ;;  %vm1345_vm15 = vcmp.eq.s32.totalorder %v1225_v10, %v6384_v3  ;;  %v3993_v51 = vsel %vm1450_vm1, 1.0, %v8080_v62  ;;  %vm4375_vm8 = vcmp.lt.s32.totalorder %v2052_v24, 0  ;;  %v8081_v33 = vld [vmem:[#allocation20_spill] sm:$0xff] }
 0x2f9   : > { %v2054_v31 = vmul.f32 8.0, %v8081_v33  ;;  %v4364_v27 = vcvt.f32.s32 %v4363_v21  ;;  %v6508_v35 = vadd.f32 -0.5, %v2095_v22  ;;  %vm1449_vm9 = vcmp.eq.s32.totalorder %v1225_v10, %v6445_v61 }
 0x2fa   : > { %v6486_v13 = vpop.permute.xlu0 %1441  ;;  %v2053_v40 = vmul.f32 8.0, %v8082_v0  ;;  %v2098_v42 = vmul.f32 8.0, %v8083_v16  ;;  %v4366_v22 = vceil.f32 %v6483_v7  ;;  %v4367_v21 = vfloor.f32 %v6483_v7  ;;  %v8088_v7 = vld [vmem:[#allocation21_spill] sm:$0xff] }
 0x2fb   : > { %v3992_v61 = vsel %vm1449_vm9, 1.0, %v8080_v62  ;;  %v4387_v33 = vfloor.f32 %v2054_v31  ;;  %vm4385_vm5 = vcmp.lt.s32.totalorder %v2054_v31, 0 }
 0x2fc   : > { %vm4380_vm11 = vcmp.lt.s32.totalorder %v2053_v40, 0 }
 0x2fd   : > { %1882 = vperm.xlu2 %4657, %v6399_v38   ;;  %1892 = vperm.xlu1 %4656, %v6424_v49   ;;  %v4353_v38 = vsel %vm4350_vm4, %v4351_v1, %v4352_v15  ;;  %v3985_v49 = vsel %vm1346_vm7, 1.0, %v8080_v62  ;;  %v3984_v15 = vsel %vm1345_vm15, 1.0, %v8080_v62  ;;  %v4378_v1 = vsel %vm4375_vm8, %v4376_v8, %v4377_v39 }
 0x2fe   : > { %v1418_v3 = vmul.f32 %v3985_v49, %v6433_v46  ;;  %v4354_v24 = vcvt.f32.s32 %v4353_v38  ;;  %v8084_v46 = vld [vmem:[#allocation19_spill] sm:$0xff]  ;;  %v4386_v49 = vceil.f32 %v2054_v31  ;;  %v1417_v0 = vmul.f32 %v3984_v15, %v6376_v60 }
 0x2ff   : > { %v4660_v34 = vpop.permute.xlu2 %4659  ;;  %v1481_v37 = vpop.permute.xlu1 %1480  ;;  %v4381_v39 = vceil.f32 %v2053_v40  ;;  %v4382_v8 = vfloor.f32 %v2053_v40  ;;  %v6527_v38 = vadd.f32 -0.5, %v2098_v42 }
 0x300   : > { %v1514_v55 = vmul.f32 %v3993_v51, %v1481_v37  ;;  %1887 = vperm.xlu0 %4655, %v6415_v57   ;;  %v2096_v51 = vmul.f32 8.0, %v8084_v46  ;;  %v6522_v23 = vunpack.i.h.bf16 %v4660_v34 }
 0x302   : > { %v1522_v37 = vadd.f32 %v1514_v55, %v1418_v3  ;;  %v1476_v10 = vpop.permute.xlu0 %1475  ;;  %8085 = vst [vmem:[#allocation56_spill] sm:$0xff] %v6522_v23  ;;  %v6525_v55 = vfloor.f32 %v6508_v35  ;;  %v6529_v3 = vunpack.i.l.bf16 %v4660_v34  ;;  %v6539_v31 = vadd.f32 -0.5, %v2096_v51 }
 0x303   : > { %v1513_v57 = vmul.f32 %v3992_v61, %v1476_v10  ;;  %v4368_v61 = vsel %vm4365_vm14, %v4366_v22, %v4367_v21  ;;  %v4373_v10 = vsel %vm4370_vm10, %v4371_v6, %v4372_v30  ;;  %v6551_v30 = vfloor.f32 %v6527_v38 }
 0x304   : > { %8086 = vst [vmem:[#allocation59_spill] sm:$0xff] %v6529_v3  ;;  %v1570_v46 = vmul.f32 %v6522_v23, %v1522_v37  ;;  %v2127_v42 = vmax.f32 %v6525_v55, 0.0  ;;  %v6543_v37 = vsel %vm4385_vm5, %v4386_v49, %v4387_v33  ;;  %v2101_v23 = vmul.f32 8.0, %v6122_v26 }
 0x305   : > { %2070 = vperm.xlu1 %4656, %v4364_v27   ;;  %2064 = vperm.xlu2 %4657, %v4354_v24   ;;  %v1521_v16 = vadd.f32 %v1513_v57, %v1417_v0  ;;  %v4359_v27 = vcvt.f32.s32 %v6488_v44  ;;  %v4379_v24 = vcvt.f32.s32 %v4378_v1  ;;  %v8087_v0 = vld [vmem:[#allocation22_spill] sm:$0xff]  ;;  %v4383_v44 = vsel %vm4380_vm11, %v4381_v39, %v4382_v8 }
 0x306   : > { %v2097_v57 = vmul.f32 8.0, %v8087_v0  ;;  %v2099_v1 = vmul.f32 8.0, %v8088_v7  ;;  %v1230_v33 = vsub.s32 %v6468_v29, %v6372_v52  ;;  %v4369_v26 = vcvt.f32.s32 %v4368_v61 }
 0x307   : > { %v6532_v60 = vpop.permute.xlu2 %4674  ;;  %v1496_v15 = vpop.permute.xlu1 %1495  ;;  %v1569_v34 = vmul.f32 %v6529_v3, %v1521_v16  ;;  %v8089_v16 = vld [vmem:[#allocation23_spill] sm:$0xff]  ;;  %v4374_v51 = vcvt.f32.s32 %v4373_v10  ;;  %v2135_v40 = vmin.f32 %v2127_v42, 7.0  ;;  %v4384_v49 = vcvt.f32.s32 %v4383_v44 }
 0x308   : > { %2067 = vperm.xlu0 %4655, %v4359_v27   ;;  %v2100_v22 = vmul.f32 8.0, %v8089_v16  ;;  %v4389_v14 = vcvt.f32.s32 %v6543_v37  ;;  %v6563_v39 = vadd.f32 -0.5, %v2097_v57  ;;  %v6565_v8 = vadd.f32 -0.5, %v2101_v23 }
 0x309   : > { %v1649_v6 = vpack.c.bf16 %v1570_v46, %v1569_v34  ;;  %v6561_v46 = vfloor.f32 %v6539_v31  ;;  %v1229_v52 = vsub.s32 %v6468_v29, %v6279_v63  ;;  %vm1454_vm0 = vcmp.eq.s32.totalorder %v1230_v33, %v6486_v13 }
 0x30a   : > { %v6556_v21 = vpop.permute.xlu0 %1490  ;;  %v6570_v27 = vadd.f32 -0.5, %v2099_v1  ;;  %v1227_v61 = vsub.s32 %v6468_v29, %v6224_v18  ;;  %v2130_v23 = vmax.f32 %v6551_v30, 0.0  ;;  %v6581_v42 = vadd.f32 -0.5, %v2100_v22 }
 0x30b   : > { %4028 = vmatmul.msk.bf16.vlgmr.msra.gmra.mxu0 %vm1920_vm13, %v1649_v6  ;;  %v1228_v63 = vsub.s32 %v6468_v29, %v6339_v17  ;;  %v6587_v13 = vsub.s32 %v6468_v29, %v6327_v54  ;;  %vm1453_vm12 = vcmp.eq.s32.totalorder %v1229_v52, %v6435_v53  ;;  %v6592_v18 = vsub.s32 %v6468_v29, %v6366_v19 }
 0x30c   : > { %v3997_v37 = vsel %vm1454_vm0, 1.0, %v8080_v62  ;;  %v4391_v57 = vcvt.f32.s32 %v2135_v40  ;;  %v2128_v44 = vmax.f32 %v6561_v46, 0.0  ;;  %vm1350_vm3 = vcmp.eq.s32.totalorder %v1230_v33, %v6368_v59 }
 0x30d   : > { %2079 = vperm.xlu1 %4656, %v4379_v24   ;;  %2073 = vperm.xlu2 %4657, %v4369_v26   ;;  %v6572_v24 = vadd.f32 -0.5, %v2102_v9  ;;  %vm1349_vm6 = vcmp.eq.s32.totalorder %v1229_v52, %v6394_v28  ;;  %v6599_v17 = vfloor.f32 %v6563_v39  ;;  %v6602_v54 = vfloor.f32 %v6565_v8 }
 0x30e   : > { %vm1451_vm1 = vcmp.eq.s32.totalorder %v1227_v61, %v6463_v48  ;;  %v3996_v19 = vsel %vm1453_vm12, 1.0, %v8080_v62  ;;  %v2138_v53 = vmin.f32 %v2130_v23, 7.0  ;;  %v6607_v1 = vfloor.f32 %v6570_v27 }
 0x30f   : > { %v6576_v10 = vpop.permute.xlu2 %1683  ;;  %v6578_v34 = vpop.permute.xlu1 %1510  ;;  %vm1348_vm4 = vcmp.eq.s32.totalorder %v1228_v63, %v6405_v20  ;;  %vm1452_vm7 = vcmp.eq.s32.totalorder %v1228_v63, %v6456_v41  ;;  %v1518_v59 = vmul.f32 %v3997_v37, %v6471_v12  ;;  %v1517_v28 = vmul.f32 %v3996_v19, %v1496_v15 }
 0x310   : > { %2076 = vperm.xlu0 %4655, %v4374_v51   ;;  %v3989_v6 = vsel %vm1350_vm3, 1.0, %v8080_v62  ;;  %v3988_v22 = vsel %vm1349_vm6, 1.0, %v8080_v62  ;;  %v2136_v33 = vmin.f32 %v2128_v44, 7.0  ;;  %v6615_v26 = vfloor.f32 %v6581_v42 }
 0x311   : > { %v1422_v51 = vmul.f32 %v3989_v6, %v6437_v58  ;;  %v1421_v40 = vmul.f32 %v3988_v22, %v6441_v43  ;;  %v3994_v52 = vsel %vm1451_vm1, 1.0, %v8080_v62  ;;  %v2129_v12 = vmax.f32 %v6599_v17, 0.0 }
 0x312   : > { %v1506_v9 = vpop.permute.xlu0 %1505  ;;  %vm1347_vm10 = vcmp.eq.s32.totalorder %v1227_v61, %v6354_v36  ;;  %v3987_v15 = vsel %vm1348_vm4, 1.0, %v8080_v62  ;;  %v3995_v23 = vsel %vm1452_vm7, 1.0, %v8080_v62  ;;  %v2133_v37 = vmax.f32 %v6602_v54, 0.0 }
 0x313   : > { %v1526_v48 = vadd.f32 %v1518_v59, %v1422_v51  ;;  %v1515_v36 = vmul.f32 %v3994_v52, %v6454_v45  ;;  %v1516_v20 = vmul.f32 %v3995_v23, %v6556_v21  ;;  %v4397_v61 = vcvt.f32.s32 %v2138_v53 }
 0x314   : > { %v2131_v19 = vmax.f32 %v6607_v1, 0.0  ;;  %v3986_v41 = vsel %vm1347_vm10, 1.0, %v8080_v62  ;;  %v2132_v59 = vmax.f32 %v6615_v26, 0.0  ;;  %vm1351_vm15 = vcmp.eq.s32.totalorder %v6592_v18, %v6420_v50 }
 0x315   : > { %2184 = vperm.xlu1 %4656, %v4391_v57   ;;  %2082 = vperm.xlu2 %4657, %v4384_v49   ;;  %v1525_v57 = vadd.f32 %v1517_v28, %v1421_v40  ;;  %v1420_v28 = vmul.f32 %v3987_v15, %v6392_v25  ;;  %v1419_v45 = vmul.f32 %v3986_v41, %v6428_v4  ;;  %v4393_v21 = vcvt.f32.s32 %v2136_v33 }
 0x316   : > { %vm1456_vm8 = vcmp.eq.s32.totalorder %v6587_v13, %v6443_v56  ;;  %vm1455_vm9 = vcmp.eq.s32.totalorder %v6592_v18, %v6473_v11  ;;  %v2137_v53 = vmin.f32 %v2129_v12, 7.0  ;;  %vm1352_vm14 = vcmp.eq.s32.totalorder %v6587_v13, %v6413_v47 }
 0x317   : > { %v6630_v58 = vpop.permute.xlu2 %1698  ;;  %v4670_v43 = vpop.permute.xlu1 %4669  ;;  %v1523_v51 = vadd.f32 %v1515_v36, %v1419_v45  ;;  %v1524_v40 = vadd.f32 %v1516_v20, %v1420_v28  ;;  %v3990_v50 = vsel %vm1351_vm15, 1.0, %v8080_v62  ;;  %v2141_v4 = vmin.f32 %v2133_v37, 7.0 }
 0x318   : > { %v6633_v49 = vunpack.i.h.bf16 %v4670_v43  ;;  %v6635_v44 = vunpack.i.l.bf16 %v4670_v43  ;;  %2085 = vperm.xlu0 %4655, %v4389_v14   ;;  %v6661_v33 = vfloor.f32 %v6572_v24  ;;  %v3999_v12 = vsel %vm1456_vm8, 1.0, %v8080_v62 }
 0x319   : > { %v3998_v15 = vsel %vm1455_vm9, 1.0, %v8080_v62  ;;  %v4395_v20 = vcvt.f32.s32 %v2137_v53  ;;  %v3991_v56 = vsel %vm1352_vm14, 1.0, %v8080_v62  ;;  %v1423_v18 = vmul.f32 %v3990_v50, %v6411_v32 }
 0x31a   : > { %8090 = vst [vmem:[#allocation52_spill] sm:$0xff] %v6633_v49  ;;  %v1573_v63 = vmul.f32 %v6635_v44, %v1525_v57  ;;  %v1574_v6 = vmul.f32 %v6633_v49, %v1526_v48  ;;  %v4665_v14 = vpop.permute.xlu0 %4664  ;;  %v1520_v57 = vmul.f32 %v3999_v12, %v6578_v34  ;;  %v1519_v36 = vmul.f32 %v3998_v15, %v1506_v9 }
 0x31b   : > { %8091 = vst [vmem:[#allocation39_spill] sm:$0xff] %v6635_v44  ;;  %v6652_v52 = vunpack.i.h.bf16 %v4665_v14  ;;  %v6654_v25 = vunpack.i.l.bf16 %v4665_v14  ;;  %v1424_v41 = vmul.f32 %v3991_v56, %v6450_v5  ;;  %v2134_v45 = vmax.f32 %v6661_v33, 0.0 }
 0x31c   : > { %v1651_v22 = vpack.c.bf16 %v1574_v6, %v1573_v63  ;;  %v4403_v63 = vcvt.f32.s32 %v2141_v4  ;;  %v2140_v6 = vmin.f32 %v2132_v59, 7.0  ;;  %v1527_v34 = vadd.f32 %v1519_v36, %v1423_v18 }
 0x31d   : > { %8092 = vst [vmem:[#allocation15_spill] sm:$0xff] %v6652_v52  ;;  %2193 = vperm.xlu1 %4656, %v4397_v61   ;;  %2187 = vperm.xlu2 %4657, %v4393_v21   ;;  %v1571_v23 = vmul.f32 %v6654_v25, %v1523_v51  ;;  %v1572_v43 = vmul.f32 %v6652_v52, %v1524_v40  ;;  %v2139_v61 = vmin.f32 %v2131_v19, 7.0  ;;  %v6689_v47 = vunpack.i.h.bf16 %v6532_v60 }
 0x31e   : > { %8093 = vst [vmem:[#allocation58_spill] sm:$0xff] %v6654_v25  ;;  %4030 = vmatmul.msk.bf16.vlgmr.msra.gmra.mxu2 %vm1920_vm13, %v1651_v22  ;;  %v1528_v28 = vadd.f32 %v1520_v57, %v1424_v41  ;;  %v6692_v32 = vunpack.i.l.bf16 %v6532_v60  ;;  %v6700_v59 = vsub.f32 %v6539_v31, %v6561_v46  ;;  %v4401_v53 = vcvt.f32.s32 %v2140_v6 }
 0x31f   : > { %v6673_v48 = vpop.permute.xlu2 %1745  ;;  %v6675_v37 = vpop.permute.xlu1 %1678  ;;  %v1650_v11 = vpack.c.bf16 %v1572_v43, %v1571_v23  ;;  %v4399_v19 = vcvt.f32.s32 %v2139_v61  ;;  %8094 = vst [vmem:[#allocation61_spill] sm:$0xff] %v6689_v47  ;;  %v2142_v22 = vmin.f32 %v2134_v45, 7.0  ;;  %v6709_v50 = vsub.f32 %v6508_v35, %v6525_v55 }
 0x320   : > { %2190 = vperm.xlu0 %4655, %v4395_v20   ;;  %8095 = vst [vmem:[#allocation51_spill] sm:$0xff] %v6692_v32  ;;  %v1576_v21 = vmul.f32 %v6689_v47, %v1528_v28  ;;  %v1575_v14 = vmul.f32 %v6692_v32, %v1527_v34  ;;  %v2232_v51 = vsub.f32 1.0, %v6700_v59  ;;  %v6718_v15 = vsub.f32 %v6570_v27, %v6607_v1 }
 0x321   : > { %4029 = vmatmul.msk.bf16.gmra.mxu0 %vm1920_vm13, %v1650_v11  ;;  %v4405_v40 = vcvt.f32.s32 %v2142_v22  ;;  %v2231_v23 = vsub.f32 1.0, %v6709_v50  ;;  %v6723_v43 = vsub.f32 %v6563_v39, %v6599_v17  ;;  %v2153_v35 = vadd.f32 1.0, %v6599_v17 }
 0x322   : > { %v6685_v9 = vpop.permute.xlu0 %1673  ;;  %v1652_v4 = vpack.c.bf16 %v1576_v21, %v1575_v14  ;;  %v2151_v57 = vadd.f32 1.0, %v6525_v55  ;;  %v2235_v36 = vsub.f32 1.0, %v6718_v15  ;;  %v6733_v27 = vsub.f32 %v6527_v38, %v6551_v30 }
 0x323   : > { %v2233_v61 = vsub.f32 1.0, %v6723_v43  ;;  %v2161_v56 = vmax.f32 %v2153_v35, 0.0  ;;  %v2152_v11 = vadd.f32 1.0, %v6561_v46  ;;  %v6742_v18 = vsub.f32 %v6572_v24, %v6661_v33 }
 0x324   : > { %v2159_v39 = vmax.f32 %v2151_v57, 0.0  ;;  %v6746_v41 = vsub.f32 %v6581_v42, %v6615_v26  ;;  %v2234_v38 = vsub.f32 1.0, %v6733_v27  ;;  %v2156_v46 = vadd.f32 1.0, %v6615_v26 }
 0x325   : > { %2202 = vperm.xlu1 %4656, %v4403_v63   ;;  %2196 = vperm.xlu2 %4657, %v4399_v19   ;;  %v2169_v63 = vmin.f32 %v2161_v56, 7.0  ;;  %v2160_v6 = vmax.f32 %v2152_v11, 0.0  ;;  %v2154_v34 = vadd.f32 1.0, %v6551_v30  ;;  %v2238_v19 = vsub.f32 1.0, %v6742_v18 }
 0x326   : > { %v2167_v28 = vmin.f32 %v2159_v39, 7.0  ;;  %v2236_v45 = vsub.f32 1.0, %v6746_v41  ;;  %v6755_v24 = vsub.f32 %v6565_v8, %v6602_v54  ;;  %v2155_v42 = vadd.f32 1.0, %v6607_v1 }
 0x327   : > { %v6694_v5 = vpop.permute.xlu2 %1760  ;;  %v6696_v13 = vpop.permute.xlu1 %1693  ;;  %v4417_v14 = vceil.f32 %v2169_v63  ;;  %v2168_v22 = vmin.f32 %v2160_v6, 7.0  ;;  %v2164_v26 = vmax.f32 %v2156_v46, 0.0  ;;  %vm4416_vm11 = vcmp.lt.s32.totalorder %v2169_v63, 0 }
 0x328   : > { %2199 = vperm.xlu0 %4655, %v4401_v53   ;;  %v4418_v53 = vfloor.f32 %v2169_v63  ;;  %v4407_v30 = vceil.f32 %v2167_v28  ;;  %vm4406_vm5 = vcmp.lt.s32.totalorder %v2167_v28, 0  ;;  %v2163_v8 = vmax.f32 %v2155_v42, 0.0 }
 0x329   : > { %v2237_v1 = vsub.f32 1.0, %v6755_v24  ;;  %v2172_v57 = vmin.f32 %v2164_v26, 7.0  ;;  %v4412_v56 = vceil.f32 %v2168_v22  ;;  %v4413_v11 = vfloor.f32 %v2168_v22 }
 0x32a   : > { %v6705_v60 = vpop.permute.xlu0 %1688  ;;  %v4419_v35 = vsel %vm4416_vm11, %v4417_v14, %v4418_v53  ;;  %vm4411_vm0 = vcmp.lt.s32.totalorder %v2168_v22, 0  ;;  %v2171_v63 = vmin.f32 %v2163_v8, 7.0  ;;  %v2158_v6 = vadd.f32 1.0, %v6661_v33 }
 0x32b   : > { %v4414_v42 = vsel %vm4411_vm0, %v4412_v56, %v4413_v11  ;;  %vm4431_vm12 = vcmp.lt.s32.totalorder %v2172_v57, 0 }
 0x32c   : > { %v4415_v26 = vcvt.f32.s32 %v4414_v42  ;;  %v4427_v33 = vceil.f32 %v2171_v63  ;;  %vm4426_vm6 = vcmp.lt.s32.totalorder %v2171_v63, 0 }
 0x32d   : > { %2246 = vperm.xlu1 %4656, %v2232_v51   ;;  %2205 = vperm.xlu2 %4657, %v4405_v40   ;;  %v4408_v51 = vfloor.f32 %v2167_v28  ;;  %v2162_v40 = vmax.f32 %v2154_v34, 0.0  ;;  %v4432_v34 = vceil.f32 %v2172_v57 }
 0x32e   : > { %4031 = vmatmul.msk.bf16.gmra.mxu2 %vm1920_vm13, %v1652_v4 }
 0x32f   : > { %v6712_v31 = vpop.permute.xlu2 %1775  ;;  %v6714_v12 = vpop.permute.xlu1 %1708  ;;  %v2170_v39 = vmin.f32 %v2162_v40, 7.0  ;;  %v4428_v40 = vfloor.f32 %v2171_v63 }
 0x330   : > { %8096 = vst [vmem:[#allocation50_spill] sm:$0xff] %v6712_v31  ;;  %2241 = vperm.xlu0 %4655, %v2231_v23  }
 0x331   : > { %v4423_v14 = vfloor.f32 %v2170_v39  ;;  %vm4421_vm3 = vcmp.lt.s32.totalorder %v2170_v39, 0 }
 0x332   : > { %v6728_v20 = vpop.permute.xlu0 %1703 }
 0x335   : > { %2261 = vperm.xlu1 %4656, %v2235_v36   ;;  %2251 = vperm.xlu2 %4657, %v2233_v61   ;;  %v2157_v36 = vadd.f32 1.0, %v6602_v54  ;;  %v4409_v61 = vsel %vm4406_vm5, %v4407_v30, %v4408_v51  ;;  %v4422_v54 = vceil.f32 %v2170_v39 }
 0x336   : > { %v4410_v28 = vcvt.f32.s32 %v4409_v61  ;;  %v4429_v61 = vsel %vm4426_vm6, %v4427_v33, %v4428_v40  ;;  %v2400_v33 = vmul.f32 8.0, %v6233_v2 }
 0x337   : > { %v6736_v17 = vpop.permute.xlu2 %1798  ;;  %v6738_v55 = vpop.permute.xlu1 %1755  ;;  %v4424_v51 = vsel %vm4421_vm3, %v4422_v54, %v4423_v14 }
 0x338   : > { %2256 = vperm.xlu0 %4655, %v2234_v38   ;;  %v4420_v38 = vcvt.f32.s32 %v4419_v35  ;;  %v6791_v40 = vadd.f32 -0.5, %v2400_v33  ;;  %v8104_v33 = vld [vmem:[#allocation47_spill] sm:$0xff] }
 0x33a   : > { %v6758_v21 = vpop.permute.xlu0 %1750 }
 0x33d   : > { %2276 = vperm.xlu1 %4656, %v2238_v19   ;;  %2266 = vperm.xlu2 %4657, %v2236_v45   ;;  %v4433_v19 = vfloor.f32 %v2172_v57  ;;  %v2165_v45 = vmax.f32 %v2157_v36, 0.0  ;;  %v4425_v57 = vcvt.f32.s32 %v4424_v51 }
 0x33f   : > { %v6760_v4 = vpop.permute.xlu2 %1813  ;;  %v6762_v23 = vpop.permute.xlu1 %1770  ;;  %v4434_v30 = vsel %vm4431_vm12, %v4432_v34, %v4433_v19  ;;  %v2173_v8 = vmin.f32 %v2165_v45, 7.0  ;;  %v4430_v34 = vcvt.f32.s32 %v4429_v61  ;;  %v8100_v61 = vld [vmem:[#allocation49_spill] sm:$0xff] }
 0x340   : > { %2271 = vperm.xlu0 %4655, %v2237_v1   ;;  %v2166_v1 = vmax.f32 %v2158_v6, 0.0  ;;  %v4435_v35 = vcvt.f32.s32 %v4434_v30 }
 0x341   : > { %v4437_v56 = vceil.f32 %v2173_v8  ;;  %v4438_v11 = vfloor.f32 %v2173_v8  ;;  %vm4436_vm1 = vcmp.lt.s32.totalorder %v2173_v8, 0  ;;  %v8098_v8 = vld [vmem:[#allocation45_spill] sm:$0xff] }
 0x342   : > { %v6767_v46 = vpop.permute.xlu0 %1765  ;;  %v2174_v39 = vmin.f32 %v2166_v1, 7.0 }
 0x343   : > { %v4439_v19 = vsel %vm4436_vm1, %v4437_v56, %v4438_v11  ;;  %v2403_v56 = vmul.f32 8.0, %v8100_v61  ;;  %v6803_v11 = vfloor.f32 %v6791_v40 }
 0x344   : > { %v4442_v6 = vceil.f32 %v2174_v39  ;;  %v4443_v45 = vfloor.f32 %v2174_v39  ;;  %vm4441_vm4 = vcmp.lt.s32.totalorder %v2174_v39, 0  ;;  %v4440_v42 = vcvt.f32.s32 %v4439_v19 }
 0x345   : > { %2294 = vperm.xlu1 %4656, %v4420_v38   ;;  %2288 = vperm.xlu2 %4657, %v4410_v28  }
 0x346   : > { %v4444_v54 = vsel %vm4441_vm4, %v4442_v6, %v4443_v45  ;;  %v8102_v45 = vld [vmem:[#allocation48_spill] sm:$0xff] }
 0x347   : > { %v6769_v53 = vpop.permute.xlu2 %1828  ;;  %v6771_v22 = vpop.permute.xlu1 %1793  ;;  %v4445_v30 = vcvt.f32.s32 %v4444_v54 }
 0x348   : > { %2291 = vperm.xlu0 %4655, %v4415_v26  }
 0x34a   : > { %v6773_v36 = vpop.permute.xlu0 %1780 }
 0x34b   : > { %8097 = vst [vmem:[#allocation17_spill] sm:$0xff] %v6773_v36 }
 0x34d   : > { %2303 = vperm.xlu1 %4656, %v4435_v35   ;;  %2297 = vperm.xlu2 %4657, %v4425_v57  }
 0x34f   : > { %v6775_v38 = vpop.permute.xlu2 %1867  ;;  %v6777_v28 = vpop.permute.xlu1 %1808 }
 0x350   : > { %2300 = vperm.xlu0 %4655, %v4430_v34   ;;  %v6810_v34 = vadd.f32 -0.5, %v2403_v56 }
 0x352   : > { %v6779_v63 = vpop.permute.xlu0 %1803  ;;  %v6825_v56 = vfloor.f32 %v6810_v34 }
 0x355   : > { %2337 = vperm.xlu1 %4656, %v6709_v50   ;;  %2306 = vperm.xlu2 %4657, %v4440_v42   ;;  %v2399_v50 = vmul.f32 8.0, %v8098_v8  ;;  %v2402_v42 = vmul.f32 8.0, %v8102_v45 }
 0x357   : > { %v6782_v14 = vpop.permute.xlu2 %1882  ;;  %v6784_v26 = vpop.permute.xlu1 %1823  ;;  %v6799_v57 = vadd.f32 -0.5, %v2399_v50  ;;  %v6827_v61 = vadd.f32 -0.5, %v2402_v42  ;;  %v2435_v42 = vmax.f32 %v6825_v56, 0.0 }
 0x358   : > { %2309 = vperm.xlu0 %4655, %v4445_v30  }
 0x359   : > { %v6816_v6 = vfloor.f32 %v6799_v57 }
 0x35a   : > { %v6787_v51 = vpop.permute.xlu0 %1818 }
 0x35d   : > { %2352 = vperm.xlu1 %4656, %v6733_v27   ;;  %2342 = vperm.xlu2 %4657, %v6700_v59   ;;  %v8101_v27 = vld [vmem:[#allocation31_spill] sm:$0xff] }
 0x35e   : > { %v2401_v39 = vmul.f32 8.0, %v8101_v27  ;;  %v8105_v27 = vld [vmem:[#allocation53_spill] sm:$0xff] }
 0x35f   : > { %v6794_v1 = vpop.permute.xlu1 %1862  ;;  %v6796_v35 = vpop.permute.xlu2 %2064  ;;  %v2404_v8 = vmul.f32 8.0, %v8105_v27 }
 0x360   : > { %8099 = vst [vmem:[#allocation55_spill] sm:$0xff] %v6796_v35  ;;  %2347 = vperm.xlu0 %4655, %v6723_v43   ;;  %v2432_v43 = vmax.f32 %v6803_v11, 0.0  ;;  %v4066_v54 = vadd.f32 -0.5, %v2401_v39  ;;  %v1667_v39 = vld [vmem:[#allocation3 + $0x8] sm:$0xf] }
 0x361   : > { %v4069_v49 = vadd.f32 -0.5, %v2404_v8 }
 0x362   : > { %v6806_v59 = vpop.permute.xlu0 %1857  ;;  %v2440_v50 = vmin.f32 %v2432_v43, 7.0  ;;  %v6832_v45 = vfloor.f32 %v4066_v54  ;;  %v8106_v43 = vld [vmem:[#allocation43_spill] sm:$0xff] }
 0x363   : > { %v2405_v47 = vmul.f32 8.0, %v8106_v43  ;;  %v6856_v7 = vfloor.f32 %v4069_v49 }
 0x364   : > { %v2433_v25 = vmax.f32 %v6832_v45, 0.0 }
 0x365   : > { %2367 = vperm.xlu1 %4656, %v6755_v24   ;;  %2357 = vperm.xlu2 %4657, %v6718_v15   ;;  %v2406_v24 = vmul.f32 8.0, %v8104_v33  ;;  %v2431_v15 = vmax.f32 %v6816_v6, 0.0 }
 0x366   : > { %v2441_v43 = vmin.f32 %v2433_v25, 7.0 }
 0x367   : > { %v6812_v19 = vpop.permute.xlu1 %1877  ;;  %v6819_v30 = vpop.permute.xlu2 %2073  ;;  %v6835_v33 = vadd.f32 -0.5, %v2406_v24  ;;  %v2439_v32 = vmin.f32 %v2431_v15, 7.0  ;;  %v2443_v24 = vmin.f32 %v2435_v42, 7.0  ;;  %v6851_v15 = vadd.f32 -0.5, %v2405_v47 }
 0x368   : > { %8103 = vst [vmem:[#allocation46_spill] sm:$0xff] %v6819_v30  ;;  %2362 = vperm.xlu0 %4655, %v6746_v41   ;;  %v1983_v41 = vunpack.c.l.b16 %v1667_v39  ;;  %v2436_v47 = vmax.f32 %v6856_v7, 0.0 }
 0x369   : > { %v6849_v39 = vfloor.f32 %v6835_v33  ;;  %v6865_v25 = vfloor.f32 %v6851_v15 }
 0x36a   : > { %v6830_v2 = vpop.permute.xlu0 %1872  ;;  %v1985_v52 = vpack.c.b16 %v1983_v41, %v1983_v41  ;;  %v4230_v41 = vld [vmem:[#allocation3] sm:$0xff] }
 0x36d   : > { %2506 = vperm.xlu1 %4656, %v2440_v50   ;;  %2372 = vperm.xlu2 %4657, %v6742_v18   ;;  %v6845_v50 = vfloor.f32 %v6827_v61  ;;  %v2000_v18 = vsel %vm1933_vm2, %v1985_v52, 0  ;;  %v2438_v52 = vmax.f32 %v6849_v39, 0.0 }
 0x36e   : > { %2008 = vmatpush.bf16.msra.mxu1 %v2000_v18  ;;  %4252 = vmatpush.bf16.msra.mxu3 %v2000_v18 }
 0x36f   : > { %v6838_v44 = vpop.permute.xlu1 %1892  ;;  %v6841_v27 = vpop.permute.xlu2 %2082  ;;  %v2434_v16 = vmax.f32 %v6845_v50, 0.0  ;;  %v2446_v3 = vmin.f32 %v2438_v52, 7.0 }
 0x370   : > { %2501 = vperm.xlu0 %4655, %v2439_v32  }
 0x371   : > { %v2442_v42 = vmin.f32 %v2434_v16, 7.0  ;;  %v6873_v16 = vsub.f32 %v4066_v54, %v6832_v45  ;;  %v6892_v54 = vld [vmem:[%s7667_s3] ss:$0 sm:$0xff] }
 0x372   : > { %v6853_v8 = vpop.permute.xlu0 %1887  ;;  %2009 = vmatpush.bf16.msra.mxu1 %v4230_v41  ;;  %4253 = vmatpush.bf16.msra.mxu3 %v4230_v41  ;;  %vm1711_vm2 = vcmp.eq.f32.partialorder %v6892_v54, %v6685_v9  ;;  %vm1832_vm7 = vcmp.eq.f32.partialorder %v6892_v54, %v6736_v17  ;;  %vm1831_vm10 = vcmp.eq.f32.partialorder %v6892_v54, %v6771_v22 }
 0x373   : > { %8110 = vst [vmem:[#allocation42_spill] sm:$0xff] %v6873_v16  ;;  %v2565_v52 = vsub.f32 1.0, %v6873_v16  ;;  %vm1712_vm15 = vcmp.eq.f32.partialorder %v6892_v54, %v6675_v37  ;;  %v4008_v9 = vsel %vm1711_vm2, 1.0, %v8080_v62  ;;  %v4017_v17 = vsel %vm1832_vm7, 1.0, %v8080_v62 }
 0x374   : > { %v1896_v35 = vmul.f32 %v4017_v17, %v6794_v1  ;;  %v6939_v1 = vsub.f32 %v6851_v15, %v6865_v25  ;;  %v6949_v15 = vsub.f32 %v6835_v33, %v6849_v39  ;;  %vm1833_vm14 = vcmp.eq.f32.partialorder %v6892_v54, %v6779_v63 }
 0x375   : > { %2521 = vperm.xlu1 %4656, %v2443_v24   ;;  %2511 = vperm.xlu2 %4657, %v2441_v43   ;;  %v2444_v24 = vmin.f32 %v2436_v47, 7.0  ;;  %v2437_v43 = vmax.f32 %v6865_v25, 0.0  ;;  %v6887_v47 = vsub.f32 %v6791_v40, %v6803_v11  ;;  %v6904_v40 = vsub.f32 %v6827_v61, %v6845_v50 }
 0x376   : > { %v6917_v61 = vsub.f32 %v6810_v34, %v6825_v56  ;;  %v2569_v17 = vsub.f32 1.0, %v6939_v1  ;;  %vm1836_vm5 = vcmp.eq.f32.partialorder %v6892_v54, %v6787_v51  ;;  %vm1714_vm0 = vcmp.eq.f32.partialorder %v6892_v54, %v6705_v60 }
 0x377   : > { %v6858_v32 = vpop.permute.xlu1 %2070  ;;  %v6861_v18 = vpop.permute.xlu2 %2187  ;;  %v2445_v41 = vmin.f32 %v2437_v43, 7.0  ;;  %v2564_v43 = vsub.f32 1.0, %v6887_v47  ;;  %8113 = vst [vmem:[#allocation57_spill] sm:$0xff] %v6904_v40  ;;  %vm1834_vm12 = vcmp.eq.f32.partialorder %v6892_v54, %v6777_v28  ;;  %vm1835_vm3 = vcmp.eq.f32.partialorder %v6892_v54, %v6760_v4 }
 0x378   : > { %8107 = vst [vmem:[#allocation16_spill] sm:$0xff] %v6858_v32  ;;  %2516 = vperm.xlu0 %4655, %v2442_v42   ;;  %vm1713_vm6 = vcmp.eq.f32.partialorder %v6892_v54, %v6576_v10  ;;  %vm1716_vm1 = vcmp.eq.f32.partialorder %v6892_v54, %v6630_v58  ;;  %vm1715_vm4 = vcmp.eq.f32.partialorder %v6892_v54, %v6696_v13  ;;  %v4019_v10 = vsel %vm1834_vm12, 1.0, %v8080_v62 }
 0x379   : > { %8108 = vst [vmem:[#allocation60_spill] sm:$0xff] %v6861_v18  ;;  %v6879_v18 = vsub.f32 %v6799_v57, %v6816_v6  ;;  %v4012_v4 = vsel %vm1715_vm4, 1.0, %v8080_v62  ;;  %vm1717_vm7 = vcmp.eq.f32.partialorder %v6892_v54, %v6728_v20 }
 0x37a   : > { %v6867_v0 = vpop.permute.xlu0 %2067  ;;  %v4014_v20 = vsel %vm1717_vm7, 1.0, %v8080_v62 }
 0x37b   : > { %8109 = vst [vmem:[#allocation54_spill] sm:$0xff] %v6867_v0 }
 0x37d   : > { %2536 = vperm.xlu1 %4656, %v2446_v3   ;;  %2526 = vperm.xlu2 %4657, %v2444_v24   ;;  %v2563_v3 = vsub.f32 1.0, %v6879_v18  ;;  %v6897_v24 = vsub.f32 %v4069_v49, %v6856_v7 }
 0x37f   : > { %v6870_v32 = vpop.permute.xlu1 %2079  ;;  %v6875_v30 = vpop.permute.xlu2 %2196  ;;  %8112 = vst [vmem:[#allocation33_spill] sm:$0xff] %v6897_v24 }
 0x380   : > { %2531 = vperm.xlu0 %4655, %v2445_v41  }
 0x382   : > { %v6882_v42 = vpop.permute.xlu0 %2076 }
 0x385   : > { %2583 = vperm.xlu1 %4656, %v2565_v52   ;;  %2573 = vperm.xlu2 %4657, %v2563_v3   ;;  %v2568_v52 = vsub.f32 1.0, %v6897_v24  ;;  %v2447_v3 = vadd.f32 1.0, %v6816_v6  ;;  %v4009_v24 = vsel %vm1712_vm15, 1.0, %v8080_v62  ;;  %v1783_v6 = vmul.f32 %v4008_v9, %v6673_v48 }
 0x386   : > { %v1784_v0 = vmul.f32 %v4009_v24, %v6758_v21  ;;  %vm1837_vm15 = vcmp.eq.f32.partialorder %v6892_v54, %v6784_v26 }
 0x387   : > { %v6894_v57 = vpop.permute.xlu1 %2184  ;;  %v6900_v41 = vpop.permute.xlu2 %2205  ;;  %v2455_v36 = vmax.f32 %v2447_v3, 0.0  ;;  %v2450_v3 = vadd.f32 1.0, %v6845_v50  ;;  %v4022_v26 = vsel %vm1837_vm15, 1.0, %v8080_v62 }
 0x388   : > { %8111 = vst [vmem:[#allocation18_spill] sm:$0xff] %v6894_v57  ;;  %2578 = vperm.xlu0 %4655, %v2564_v43   ;;  %v1946_v49 = vpop.f32.mrf.mxu0  ;;  %v4016_v57 = vsel %vm1831_vm10, 1.0, %v8080_v62  ;;  %v2566_v43 = vsub.f32 1.0, %v6904_v40  ;;  %v2567_v40 = vsub.f32 1.0, %v6917_v61  ;;  %vm1838_vm10 = vcmp.eq.f32.partialorder %v6892_v54, %v6769_v53 }
 0x389   : > { %v1895_v37 = vmul.f32 %v4016_v57, %v6806_v59  ;;  %v1904_v57 = vadd.f32 %v1896_v35, %v1784_v0  ;;  %v2463_v24 = vmin.f32 %v2455_v36, 7.0  ;;  %v2448_v0 = vadd.f32 1.0, %v6803_v11 }
 0x38a   : > { %v2086_v22 = vpop.permute.xlu0 %2085  ;;  %v2458_v50 = vmax.f32 %v2450_v3, 0.0  ;;  %v2449_v11 = vadd.f32 1.0, %v6832_v45  ;;  %v4023_v53 = vsel %vm1838_vm10, 1.0, %v8080_v62 }
 0x38b   : > { %v6928_v34 = vsub.s32 %v6468_v29, %v2086_v22  ;;  %v1903_v59 = vadd.f32 %v1895_v37, %v1783_v6  ;;  %v2456_v22 = vmax.f32 %v2448_v0, 0.0  ;;  %v6967_v37 = vsub.s32 %v6468_v29, %v6870_v32 }
 0x38c   : > { %v2466_v6 = vmin.f32 %v2458_v50, 7.0  ;;  %v2454_v32 = vadd.f32 1.0, %v6849_v39  ;;  %v6990_v39 = vsub.s32 %v6468_v29, %v6882_v42  ;;  %v4011_v42 = vsel %vm1714_vm0, 1.0, %v8080_v62 }
 0x38d   : > { %2598 = vperm.xlu1 %4656, %v2568_v52   ;;  %2588 = vperm.xlu2 %4657, %v2566_v43   ;;  %vm2214_vm8 = vcmp.eq.s32.totalorder %v6928_v34, %v6900_v41  ;;  %v1966_v48 = vmul.f32 %v1946_v49, %v1903_v59  ;;  %v2570_v49 = vsub.f32 1.0, %v6949_v15  ;;  %v2453_v43 = vadd.f32 1.0, %v6865_v25  ;;  %v4231_v41 = vld [vmem:[%s7668_s4] sm:$0xff] }
 0x38e   : > { %vm2211_vm2 = vcmp.eq.s32.totalorder %v6990_v39, %v6875_v30 }
 0x38f   : > { %v6932_v16 = vpop.permute.xlu1 %2193  ;;  %v6935_v31 = vpop.permute.xlu2 %2251  ;;  %v2461_v45 = vmax.f32 %v2453_v43, 0.0  ;;  %v4010_v43 = vsel %vm1713_vm6, 1.0, %v8080_v62 }
 0x390   : > { %2593 = vperm.xlu0 %4655, %v2567_v40   ;;  %v1948_v52 = vpop.f32.mrf.mxu0  ;;  %v6954_v40 = vsub.s32 %v6468_v29, %v6841_v27  ;;  %v2451_v27 = vadd.f32 1.0, %v6825_v56  ;;  %v1785_v28 = vmul.f32 %v4010_v43, %v6738_v55  ;;  %v4052_v55 = vsel %vm2211_vm2, 1.0, %v8080_v62 }
 0x391   : > { %v1967_v21 = vmul.f32 %v1948_v52, %v1904_v57  ;;  %v2464_v57 = vmin.f32 %v2456_v22, 7.0  ;;  %v2457_v52 = vmax.f32 %v2449_v11, 0.0  ;;  %v2469_v50 = vmin.f32 %v2461_v45, 7.0 }
 0x392   : > { %v6944_v9 = vpop.permute.xlu0 %2190  ;;  %v1898_v22 = vmul.f32 %v4019_v10, %v6830_v2  ;;  %v4013_v2 = vsel %vm1716_vm1, 1.0, %v8080_v62 }
 0x393   : > { %v1974_v35 = vpack.c.bf16 %v1967_v21, %v1966_v48  ;;  %v2459_v48 = vmax.f32 %v2451_v27, 0.0  ;;  %v2452_v21 = vadd.f32 1.0, %v6856_v7  ;;  %v4021_v7 = vsel %vm1836_vm5, 1.0, %v8080_v62 }
 0x394   : > { %v1900_v60 = vmul.f32 %v4021_v7, %v6782_v14  ;;  %v1788_v14 = vmul.f32 %v4013_v2, %v6762_v23  ;;  %v8116_v2 = vld [vmem:[#allocation42_spill] sm:$0xff] }
 0x395   : > { %2621 = vperm.xlu1 %4656, %v2463_v24   ;;  %2603 = vperm.xlu2 %4657, %v2569_v17   ;;  %v4018_v24 = vsel %vm1833_vm14, 1.0, %v8080_v62  ;;  %v2465_v17 = vmin.f32 %v2457_v52, 7.0  ;;  %v2460_v11 = vmax.f32 %v2452_v21, 0.0 }
 0x396   : > { %4036 = vmatmul.msk.bf16.vlgmr.msra.gmra.mxu1 %vm1920_vm13, %v1974_v35  ;;  %v1897_v51 = vmul.f32 %v4018_v24, %v6775_v38  ;;  %v1786_v38 = vmul.f32 %v4011_v42, %v6694_v5  ;;  %v1908_v13 = vadd.f32 %v1900_v60, %v1788_v14  ;;  %v8114_v60 = vld [vmem:[#allocation50_spill] sm:$0xff] }
 0x397   : > { %v6957_v36 = vpop.permute.xlu1 %2202  ;;  %v2267_v33 = vpop.permute.xlu2 %2266  ;;  %v2468_v45 = vmin.f32 %v2460_v11, 7.0  ;;  %v1901_v11 = vmul.f32 %v4022_v26, %v6853_v8 }
 0x398   : > { %vm2213_vm9 = vcmp.eq.s32.totalorder %v6954_v40, %v6957_v36  ;;  %2608 = vperm.xlu0 %4655, %v2570_v49   ;;  %v2467_v49 = vmin.f32 %v2459_v48, 7.0  ;;  %v1905_v30 = vadd.f32 %v1897_v51, %v1785_v28  ;;  %v1906_v5 = vadd.f32 %v1898_v22, %v1786_v38  ;;  %v8115_v38 = vld [vmem:[#allocation17_spill] sm:$0xff]  ;;  %v8119_v36 = vld [vmem:[#allocation63_spill] sm:$0xff] }
 0x399   : > { %v1902_v22 = vmul.f32 %v4023_v53, %v6838_v44  ;;  %v8117_v44 = vld [vmem:[#allocation62_spill] sm:$0xff] }
 0x39a   : > { %v2200_v59 = vpop.permute.xlu0 %2199  ;;  %v2887_v8 = vmul.f32 16.0, %v8117_v44 }
 0x39b   : > { %vm2212_vm11 = vcmp.eq.s32.totalorder %v6967_v37, %v2200_v59 }
 0x39c   : > { %v4053_v56 = vsel %vm2212_vm11, 1.0, %v8080_v62  ;;  %vm4451_vm11 = vcmp.lt.s32.totalorder %v2887_v8, 0 }
 0x39d   : > { %2636 = vperm.xlu1 %4656, %v2466_v6   ;;  %2626 = vperm.xlu2 %4657, %v2464_v57   ;;  %v6980_v63 = vmul.f32 %v4053_v56, %v2267_v33  ;;  %v4020_v33 = vsel %vm1835_vm3, 1.0, %v8080_v62  ;;  %v2462_v57 = vmax.f32 %v2454_v32, 0.0 }
 0x39e   : > { %v1951_v3 = vpop.f32.mrf.mxu0  ;;  %v1899_v27 = vmul.f32 %v4020_v33, %v6812_v19  ;;  %v1787_v19 = vmul.f32 %v4012_v4, %v6767_v46  ;;  %v4233_v46 = vld [vmem:[%s7668_s4 + $0x10] sm:$0xff]  ;;  %v4232_v33 = vld [vmem:[%s7668_s4 + $0x8] sm:$0xff] }
 0x39f   : > { %v6982_v25 = vpop.permute.xlu1 %2246  ;;  %v6992_v0 = vpop.permute.xlu2 %2288  ;;  %v1968_v21 = vmul.f32 %v1951_v3, %v1905_v30  ;;  %2775 = vmatpush.bf16.msrb.mxu2 %v4233_v46  ;;  %v2470_v42 = vmin.f32 %v2462_v57, 7.0  ;;  %v8118_v4 = vld [vmem:[#allocation26_spill] sm:$0xff]  ;;  %v2886_v30 = vmul.f32 16.0, %v8119_v36 }
 0x3a0   : > { %2631 = vperm.xlu0 %4655, %v2465_v17   ;;  %v1907_v52 = vadd.f32 %v1899_v27, %v1787_v19  ;;  %v1789_v27 = vmul.f32 %v4014_v20, %v8114_v60  ;;  %v2888_v14 = vmul.f32 16.0, %v8118_v4  ;;  %v8124_v20 = vld [vmem:[#allocation64_spill] sm:$0xff] }
 0x3a1   : > { %v1956_v35 = vpop.f32.mrf.mxu2  ;;  %v2889_v53 = vmul.f32 16.0, %v8124_v20  ;;  %vm4446_vm14 = vcmp.lt.s32.totalorder %v2886_v30, 0 }
 0x3a2   : > { %v7021_v6 = vpop.permute.xlu0 %2241  ;;  %v1970_v17 = vmul.f32 %v1956_v35, %v1907_v52  ;;  %v4055_v35 = vsel %vm2214_vm8, 1.0, %v8080_v62  ;;  %vm1718_vm8 = vcmp.eq.f32.partialorder %v6892_v54, %v6714_v12  ;;  %v4054_v12 = vsel %vm2213_vm9, 1.0, %v8080_v62 }
 0x3a3   : > { %2776 = vmatpush.bf16.msrb.mxu2 %v4232_v33  ;;  %v4015_v54 = vsel %vm1718_vm8, 1.0, %v8080_v62  ;;  %v4458_v46 = vfloor.f32 %v2888_v14  ;;  %v4448_v33 = vfloor.f32 %v2886_v30  ;;  %vm4456_vm9 = vcmp.lt.s32.totalorder %v2888_v14, 0 }
 0x3a4   : > { %v1790_v28 = vmul.f32 %v4015_v54, %v8115_v38  ;;  %v4463_v4 = vfloor.f32 %v2889_v53  ;;  %vm4461_vm3 = vcmp.lt.s32.totalorder %v2889_v53, 0  ;;  %vm2757_vm8 = vcmask 392192  }
 0x3a5   : > { %2651 = vperm.xlu1 %4656, %v2469_v50   ;;  %2641 = vperm.xlu2 %4657, %v2467_v49  }
 0x3a6   : > { %v1953_v58 = vpop.f32.mrf.mxu0 }
 0x3a7   : > { %v2262_v59 = vpop.permute.xlu1 %2261  ;;  %v7040_v56 = vpop.permute.xlu2 %2297  ;;  %v1969_v24 = vmul.f32 %v1953_v58, %v1906_v5  ;;  %2777 = vmatpush.bf16.msrb.mxu2 %v4231_v41  ;;  %v1909_v5 = vadd.f32 %v1901_v11, %v1789_v27  ;;  %v8121_v58 = vld [vmem:[#allocation65_spill] sm:$0xff] }
 0x3a8   : > { %v7038_v48 = vmul.f32 %v4052_v55, %v2262_v59  ;;  %2646 = vperm.xlu0 %4655, %v2468_v45   ;;  %v1910_v55 = vadd.f32 %v1902_v22, %v1790_v28  ;;  %v2891_v45 = vmul.f32 16.0, %v8121_v58  ;;  %v8126_v41 = vld [vmem:[#allocation33_spill] sm:$0xff] }
 0x3a9   : > { %v1958_v23 = vpop.f32.mrf.mxu2  ;;  %v1975_v50 = vpack.c.bf16 %v1969_v24, %v1968_v21  ;;  %v8122_v21 = vld [vmem:[#allocation57_spill] sm:$0xff] }
 0x3aa   : > { %v1971_v7 = vmul.f32 %v1958_v23, %v1908_v13  ;;  %v7045_v32 = vpop.permute.xlu0 %2256  ;;  %v4457_v23 = vceil.f32 %v2888_v14  ;;  %v8127_v22 = vld [vmem:[#allocation29_spill] sm:$0xff]  ;;  %v4472_v28 = vceil.f32 %v2891_v45  ;;  %v4473_v44 = vfloor.f32 %v2891_v45  ;;  %v8128_v14 = vld [vmem:[#allocation55_spill] sm:$0xff] }
 0x3ab   : > { %4037 = vmatmul.msk.bf16.gmra.mxu1 %vm1920_vm13, %v1975_v50  ;;  %v8123_v50 = vld [vmem:[#allocation54_spill] sm:$0xff]  ;;  %v2934_v11 = vmul.f32 16.0, %v8127_v22  ;;  %v2087_v36 = vsub.s32 %v6468_v29, %v8128_v14  ;;  %vm4471_vm12 = vcmp.lt.s32.totalorder %v2891_v45, 0  ;;  %v8136_v14 = vld [vmem:[#allocation56_spill] sm:$0xff] }
 0x3ac   : > { %v1976_v49 = vpack.c.bf16 %v1971_v7, %v1970_v17  ;;  %v4452_v17 = vceil.f32 %v2887_v8  ;;  %v4453_v7 = vfloor.f32 %v2887_v8  ;;  %v4462_v8 = vceil.f32 %v2889_v53 }
 0x3ad   : > { %2690 = vperm.xlu1 %4656, %v6887_v47   ;;  %2656 = vperm.xlu2 %4657, %v2470_v42   ;;  %vm2311_vm1 = vcmp.eq.s32.totalorder %v2087_v36, %v6992_v0 }
 0x3ae   : > { %4038 = vmatmul.msk.bf16.vlgmr.msra.gmra.mxu3 %vm1920_vm13, %v1976_v49  ;;  %v2088_v49 = vsub.s32 %v6468_v29, %v8123_v50  ;;  %v4454_v38 = vsel %vm4451_vm11, %v4452_v17, %v4453_v7  ;;  %v4464_v45 = vsel %vm4461_vm3, %v4462_v8, %v4463_v4  ;;  %v8132_v7 = vld [vmem:[#allocation32_spill] sm:$0xff]  ;;  %v8135_v8 = vld [vmem:[#allocation22_spill] sm:$0xff] }
 0x3af   : > { %v2277_v3 = vpop.permute.xlu1 %2276  ;;  %v7062_v47 = vpop.permute.xlu2 %2306  ;;  %v4455_v58 = vcvt.f32.s32 %v4454_v38  ;;  %v2937_v50 = vmul.f32 16.0, %v8132_v7  ;;  %v2936_v4 = vmul.f32 16.0, %v8135_v8 }
 0x3b0   : > { %v7060_v10 = vmul.f32 %v4055_v35, %v2277_v3  ;;  %2685 = vperm.xlu0 %4655, %v6879_v18   ;;  %v4447_v35 = vceil.f32 %v2886_v30  ;;  %v8129_v30 = vld [vmem:[#allocation60_spill] sm:$0xff] }
 0x3b1   : > { %v1961_v51 = vpop.f32.mrf.mxu2 }
 0x3b2   : > { %v2272_v18 = vpop.permute.xlu0 %2271  ;;  %v1972_v13 = vmul.f32 %v1961_v51, %v1909_v5  ;;  %v8125_v51 = vld [vmem:[#allocation66_spill] sm:$0xff]  ;;  %v4449_v27 = vsel %vm4446_vm14, %v4447_v35, %v4448_v33  ;;  %v8130_v5 = vld [vmem:[#allocation20_spill] sm:$0xff] }
 0x3b3   : > { %v7083_v43 = vmul.f32 %v4054_v12, %v2272_v18  ;;  %v7102_v26 = vmul.f32 16.0, %v8125_v51 }
 0x3b5   : > { %2705 = vperm.xlu1 %4656, %v6917_v61   ;;  %2695 = vperm.xlu2 %4657, %v8116_v2   ;;  %v8120_v61 = vld [vmem:[#allocation14_spill] sm:$0xff]  ;;  %vm4476_vm4 = vcmp.lt.s32.totalorder %v7102_v26, 0 }
 0x3b6   : > { %v2890_v52 = vmul.f32 16.0, %v8120_v61 }
 0x3b7   : > { %v7091_v19 = vpop.permute.xlu1 %2294  ;;  %v2343_v59 = vpop.permute.xlu2 %2342 }
 0x3b8   : > { %2700 = vperm.xlu0 %4655, %v8122_v21   ;;  %vm4466_vm0 = vcmp.lt.s32.totalorder %v2890_v52, 0  ;;  %v4467_v18 = vceil.f32 %v2890_v52  ;;  %v4468_v54 = vfloor.f32 %v2890_v52  ;;  %v4056_v52 = vsel %vm2311_vm1, 1.0, %v8080_v62 }
 0x3b9   : > { %v1963_v57 = vpop.f32.mrf.mxu2 }
 0x3ba   : > { %v1973_v24 = vmul.f32 %v1963_v57, %v1910_v55  ;;  %v2292_v42 = vpop.permute.xlu0 %2291  ;;  %v7117_v55 = vmul.f32 16.0, %v8130_v5  ;;  %v7119_v57 = vadd.f32 -0.5, %v2934_v11  ;;  %v4469_v17 = vsel %vm4466_vm0, %v4467_v18, %v4468_v54 }
 0x3bb   : > { %vm2312_vm5 = vcmp.eq.s32.totalorder %v2088_v49, %v2292_v42  ;;  %v4477_v42 = vceil.f32 %v7102_v26  ;;  %v4465_v18 = vcvt.f32.s32 %v4464_v45  ;;  %v4470_v54 = vcvt.f32.s32 %v4469_v17 }
 0x3bc   : > { %v1977_v3 = vpack.c.bf16 %v1973_v24, %v1972_v13  ;;  %v4057_v2 = vsel %vm2312_vm5, 1.0, %v8080_v62  ;;  %v8131_v13 = vld [vmem:[#allocation18_spill] sm:$0xff]  ;;  %v7139_v53 = vfloor.f32 %v7119_v57  ;;  %vm4481_vm2 = vcmp.lt.s32.totalorder %v7117_v55, 0 }
 0x3bd   : > { %2720 = vperm.xlu1 %4656, %v6949_v15   ;;  %2710 = vperm.xlu2 %4657, %v8126_v41   ;;  %v4459_v15 = vsel %vm4456_vm9, %v4457_v23, %v4458_v46  ;;  %vm2207_vm6 = vcmp.eq.s32.totalorder %v2087_v36, %v8131_v13  ;;  %v2376_v21 = vmul.f32 %v4057_v2, %v2343_v59  ;;  %v4450_v23 = vcvt.f32.s32 %v4449_v27  ;;  %v8133_v59 = vld [vmem:[#allocation19_spill] sm:$0xff]  ;;  %v8134_v27 = vld [vmem:[#allocation46_spill] sm:$0xff] }
 0x3be   : > { %4039 = vmatmul.msk.bf16.gmra.mxu3 %vm1920_vm13, %v1977_v3  ;;  %vm2208_vm13 = vcmp.eq.s32.totalorder %v2088_v49, %v8129_v30  ;;  %v4460_v61 = vcvt.f32.s32 %v4459_v15  ;;  %v4478_v3 = vfloor.f32 %v7102_v26  ;;  %v2935_v35 = vmul.f32 16.0, %v8133_v59  ;;  %v8137_v30 = vld [vmem:[#allocation59_spill] sm:$0xff] }
 0x3bf   : > { %v7107_v12 = vpop.permute.xlu1 %2303  ;;  %v7109_v60 = vpop.permute.xlu2 %2357  ;;  %v4049_v46 = vsel %vm2208_vm13, 1.0, %v8080_v62  ;;  %v4048_v33 = vsel %vm2207_vm6, 1.0, %v8080_v62  ;;  %v7144_v15 = vadd.f32 -0.5, %v2937_v50  ;;  %v2090_v0 = vsub.s32 %v6468_v29, %v8134_v27 }
 0x3c0   : > { %2715 = vperm.xlu0 %4655, %v6939_v1   ;;  %v4474_v1 = vsel %vm4471_vm12, %v4472_v28, %v4473_v44  ;;  %v2280_v49 = vmul.f32 %v4049_v46, %v6982_v25  ;;  %v2279_v25 = vmul.f32 %v4048_v33, %v7021_v6  ;;  %v4482_v28 = vceil.f32 %v7117_v55 }
 0x3c1   : > { %v4475_v11 = vcvt.f32.s32 %v4474_v1  ;;  %v7149_v6 = vadd.f32 -0.5, %v2935_v35  ;;  %v2966_v2 = vmax.f32 %v7139_v53, 0.0  ;;  %v4479_v44 = vsel %vm4476_vm4, %v4477_v42, %v4478_v3 }
 0x3c2   : > { %v7123_v24 = vpop.permute.xlu0 %2300  ;;  %v2384_v51 = vadd.f32 %v2376_v21, %v2280_v49  ;;  %v4483_v26 = vfloor.f32 %v7117_v55  ;;  %vm2314_vm7 = vcmp.eq.s32.totalorder %v2090_v0, %v7040_v56  ;;  %vm2210_vm10 = vcmp.eq.s32.totalorder %v2090_v0, %v6932_v16  ;;  %v8139_v21 = vld [vmem:[#allocation21_spill] sm:$0xff] }
 0x3c3   : > { %v7164_v45 = vfloor.f32 %v7144_v15  ;;  %v4059_v16 = vsel %vm2314_vm7, 1.0, %v8080_v62  ;;  %v7170_v50 = vadd.f32 -0.5, %v2936_v4  ;;  %v4051_v49 = vsel %vm2210_vm10, 1.0, %v8080_v62 }
 0x3c4   : > { %v2392_v36 = vmul.f32 %v8136_v14, %v2384_v51  ;;  %v7177_v59 = vfloor.f32 %v7149_v6  ;;  %v2282_v35 = vmul.f32 %v4051_v49, %v7045_v32  ;;  %v4484_v33 = vsel %vm4481_vm2, %v4482_v28, %v4483_v26 }
 0x3c5   : > { %2909 = vperm.xlu1 %4656, %v4460_v61   ;;  %2903 = vperm.xlu2 %4657, %v4450_v23   ;;  %v2938_v23 = vmul.f32 16.0, %v8139_v21  ;;  %vm2315_vm11 = vcmp.eq.s32.totalorder %v6990_v39, %v7123_v24  ;;  %vm2317_vm5 = vcmp.eq.s32.totalorder %v6954_v40, %v7062_v47  ;;  %v4485_v24 = vcvt.f32.s32 %v4484_v33  ;;  %v8141_v40 = vld [vmem:[#allocation15_spill] sm:$0xff] }
 0x3c6   : > { %v4060_v39 = vsel %vm2315_vm11, 1.0, %v8080_v62  ;;  %v4062_v28 = vsel %vm2317_vm5, 1.0, %v8080_v62  ;;  %vm2316_vm0 = vcmp.eq.s32.totalorder %v6967_v37, %v7107_v12 }
 0x3c7   : > { %v2338_v20 = vpop.permute.xlu1 %2337  ;;  %v2373_v22 = vpop.permute.xlu2 %2372 }
 0x3c8   : > { %v2375_v41 = vmul.f32 %v4056_v52, %v2338_v20  ;;  %2906 = vperm.xlu0 %4655, %v4455_v58   ;;  %v8138_v58 = vld [vmem:[#allocation16_spill] sm:$0xff]  ;;  %v7186_v20 = vadd.f32 -0.5, %v2938_v23  ;;  %v8140_v52 = vld [vmem:[#allocation23_spill] sm:$0xff]  ;;  %v8143_v23 = vld [vmem:[#allocation30_spill] sm:$0xff] }
 0x3c9   : > { %v2089_v13 = vsub.s32 %v6468_v29, %v8138_v58 }
 0x3ca   : > { %v2383_v38 = vadd.f32 %v2375_v41, %v2279_v25  ;;  %v2310_v61 = vpop.permute.xlu0 %2309  ;;  %v2939_v25 = vmul.f32 16.0, %v8140_v52  ;;  %v4480_v41 = vcvt.f32.s32 %v4479_v44  ;;  %v7205_v27 = vfloor.f32 %v7186_v20 }
 0x3cb   : > { %vm2318_vm15 = vcmp.eq.s32.totalorder %v6928_v34, %v2310_v61  ;;  %vm2209_vm9 = vcmp.eq.s32.totalorder %v2089_v13, %v6944_v9  ;;  %v2974_v34 = vmin.f32 %v2966_v2, 15.0  ;;  %vm2313_vm14 = vcmp.eq.s32.totalorder %v2089_v13, %v7091_v19 }
 0x3cc   : > { %v2391_v5 = vmul.f32 %v8137_v30, %v2383_v38  ;;  %v4063_v1 = vsel %vm2318_vm15, 1.0, %v8080_v62  ;;  %v4050_v51 = vsel %vm2209_vm9, 1.0, %v8080_v62  ;;  %v4058_v55 = vsel %vm2313_vm14, 1.0, %v8080_v62 }
 0x3cd   : > { %2918 = vperm.xlu1 %4656, %v4475_v11   ;;  %2912 = vperm.xlu2 %4657, %v4465_v18   ;;  %v2382_v17 = vmul.f32 %v4063_v1, %v2373_v22  ;;  %v4487_v19 = vcvt.f32.s32 %v2974_v34  ;;  %v2967_v11 = vmax.f32 %v7177_v59, 0.0  ;;  %v7200_v9 = vfloor.f32 %v7170_v50 }
 0x3ce   : > { %v2471_v46 = vpack.c.bf16 %v2392_v36, %v2391_v5  ;;  %v2281_v18 = vmul.f32 %v4050_v51, %v6935_v31  ;;  %v7209_v44 = vadd.f32 -0.5, %v2939_v25  ;;  %v2379_v36 = vmul.f32 %v4060_v39, %v7109_v60  ;;  %v8142_v5 = vld [vmem:[#allocation58_spill] sm:$0xff]  ;;  %v8144_v51 = vld [vmem:[#allocation52_spill] sm:$0xff] }
 0x3cf   : > { %v2353_v7 = vpop.permute.xlu1 %2352  ;;  %v7173_v3 = vpop.permute.xlu2 %2511  ;;  %v7182_v56 = vadd.f32 %v2382_v17, %v7060_v10  ;;  %v2969_v10 = vmax.f32 %v7164_v45, 0.0  ;;  %v2975_v8 = vmin.f32 %v2967_v11, 15.0  ;;  %v2968_v4 = vmax.f32 %v7200_v9, 0.0 }
 0x3d0   : > { %v2378_v42 = vmul.f32 %v4059_v16, %v2353_v7  ;;  %4100 = vmatmul.msk.bf16.vlgmr.msrb.gmra.mxu2 %vm2757_vm8, %v2471_v46  ;;  %2915 = vperm.xlu0 %4655, %v4470_v54   ;;  %v2972_v46 = vmax.f32 %v8143_v23, 0.0  ;;  %v2970_v1 = vmax.f32 %v7205_v27, 0.0  ;;  %v4061_v17 = vsel %vm2316_vm0, 1.0, %v8080_v62 }
 0x3d1   : > { %v2977_v2 = vmin.f32 %v2969_v10, 15.0  ;;  %v4489_v16 = vcvt.f32.s32 %v2975_v8  ;;  %v2976_v34 = vmin.f32 %v2968_v4, 15.0  ;;  %v7223_v37 = vfloor.f32 %v7209_v44  ;;  %v8146_v10 = vld [vmem:[#allocation51_spill] sm:$0xff] }
 0x3d2   : > { %v2386_v32 = vadd.f32 %v2378_v42, %v2282_v35  ;;  %v2348_v22 = vpop.permute.xlu0 %2347  ;;  %v2387_v12 = vadd.f32 %v2379_v36, %v7038_v48  ;;  %v2980_v42 = vmin.f32 %v2972_v46, 15.0  ;;  %v2978_v52 = vmin.f32 %v2970_v1, 15.0 }
 0x3d3   : > { %v2377_v54 = vmul.f32 %v4058_v55, %v2348_v22  ;;  %v4493_v13 = vcvt.f32.s32 %v2977_v2  ;;  %v4491_v35 = vcvt.f32.s32 %v2976_v34  ;;  %v2971_v25 = vmax.f32 %v7223_v37, 0.0 }
 0x3d4   : > { %v2394_v47 = vmul.f32 %v8141_v40, %v2386_v32  ;;  %v8145_v32 = vld [vmem:[#allocation39_spill] sm:$0xff]  ;;  %v2990_v48 = vadd.f32 1.0, %v7139_v53  ;;  %v4499_v22 = vcvt.f32.s32 %v2980_v42  ;;  %v7256_v36 = vsub.f32 %v7149_v6, %v7177_v59 }
 0x3d5   : > { %3023 = vperm.xlu1 %4656, %v4487_v19   ;;  %2921 = vperm.xlu2 %4657, %v4480_v41   ;;  %v2385_v0 = vadd.f32 %v2377_v54, %v2281_v18  ;;  %v2395_v19 = vmul.f32 %v8145_v32, %v2387_v12  ;;  %v4495_v54 = vcvt.f32.s32 %v2978_v52  ;;  %v2979_v39 = vmin.f32 %v2971_v25, 15.0 }
 0x3d6   : > { %v2958_v34 = vsub.f32 %v7119_v57, %v7139_v53 }
 0x3d7   : > { %v2368_v38 = vpop.permute.xlu1 %2367  ;;  %v7211_v31 = vpop.permute.xlu2 %2526  ;;  %v2393_v61 = vmul.f32 %v8142_v5, %v2385_v0  ;;  %v2998_v0 = vmax.f32 %v2990_v48, 0.0 }
 0x3d8   : > { %v2381_v26 = vmul.f32 %v4062_v28, %v2368_v38  ;;  %2924 = vperm.xlu0 %4655, %v4485_v24   ;;  %v8147_v24 = vld [vmem:[#allocation27_spill] sm:$0xff]  ;;  %v2991_v38 = vadd.f32 1.0, %v7177_v59  ;;  %v8148_v28 = vld [vmem:[#allocation61_spill] sm:$0xff]  ;;  %v2992_v59 = vadd.f32 1.0, %v7200_v9  ;;  %v3070_v52 = vsub.f32 1.0, %v2958_v34 }
 0x3d9   : > { %v2472_v21 = vpack.c.bf16 %v2394_v47, %v2393_v61  ;;  %v2973_v47 = vmax.f32 %v8147_v24, 0.0  ;;  %v7247_v2 = vmul.f32 %v8148_v28, %v7182_v56  ;;  %v2993_v56 = vadd.f32 1.0, %v7164_v45 }
 0x3da   : > { %v2389_v58 = vadd.f32 %v2381_v26, %v7083_v43  ;;  %v2363_v7 = vpop.permute.xlu0 %2362  ;;  %v3006_v46 = vmin.f32 %v2998_v0, 15.0  ;;  %v2999_v1 = vmax.f32 %v2991_v38, 0.0  ;;  %v3000_v48 = vmax.f32 %v2992_v59, 0.0 }
 0x3db   : > { %v2380_v60 = vmul.f32 %v4061_v17, %v2363_v7  ;;  %v3071_v17 = vsub.f32 1.0, %v7256_v36  ;;  %v3001_v6 = vmax.f32 %v2993_v56, 0.0 }
 0x3dc   : > { %v7240_v55 = vmul.f32 %v8146_v10, %v2389_v58  ;;  %v4497_v58 = vcvt.f32.s32 %v2979_v39  ;;  %v4503_v12 = vceil.f32 %v3006_v46  ;;  %vm4502_vm3 = vcmp.lt.s32.totalorder %v3006_v46, 0 }
 0x3dd   : > { %3032 = vperm.xlu1 %4656, %v4493_v13   ;;  %3026 = vperm.xlu2 %4657, %v4489_v16   ;;  %v2388_v43 = vadd.f32 %v2380_v60, %v6980_v63  ;;  %v7237_v63 = vld [vmem:[%s7670_s6] ss:$0 sm:$0xff]  ;;  %v4504_v60 = vfloor.f32 %v3006_v46  ;;  %v3009_v57 = vmin.f32 %v3001_v6, 15.0  ;;  %v2995_v46 = vadd.f32 1.0, %v7223_v37 }
 0x3de   : > { %v2474_v61 = vpack.c.bf16 %v7247_v2, %v7240_v55  ;;  %vm2541_vm1 = vcmp.eq.f32.partialorder %v7237_v63, %v7173_v3  ;;  %vm2544_vm15 = vcmp.eq.f32.partialorder %v7237_v63, %v7211_v31  ;;  %v2960_v31 = vsub.f32 %v7170_v50, %v7200_v9 }
 0x3df   : > { %v7227_v49 = vpop.permute.xlu1 %2506  ;;  %v2574_v33 = vpop.permute.xlu2 %2573  ;;  %v2396_v41 = vmul.f32 %v8144_v51, %v2388_v43  ;;  %v3007_v43 = vmin.f32 %v2999_v1, 15.0  ;;  %v4505_v53 = vsel %vm4502_vm3, %v4503_v12, %v4504_v60  ;;  %v4519_v39 = vfloor.f32 %v3009_v57 }
 0x3e0   : > { %4101 = vmatmul.msk.bf16.gmra.mxu2 %vm2757_vm8, %v2472_v21  ;;  %3029 = vperm.xlu0 %4655, %v4491_v35   ;;  %v2981_v21 = vmin.f32 %v2973_v47, 15.0  ;;  %vm4517_vm2 = vcmp.lt.s32.totalorder %v3009_v57, 0  ;;  %vm2540_vm7 = vcmp.eq.f32.partialorder %v7237_v63, %v7227_v49  ;;  %v3003_v6 = vmax.f32 %v2995_v46, 0.0 }
 0x3e1   : > { %v2473_v11 = vpack.c.bf16 %v2396_v41, %v2395_v19  ;;  %v4508_v41 = vceil.f32 %v3007_v43  ;;  %v4509_v19 = vfloor.f32 %v3007_v43  ;;  %vm4507_vm6 = vcmp.lt.s32.totalorder %v3007_v43, 0 }
 0x3e2   : > { %v2502_v18 = vpop.permute.xlu0 %2501  ;;  %v4501_v16 = vcvt.f32.s32 %v2981_v21  ;;  %v2994_v60 = vadd.f32 1.0, %v7205_v27  ;;  %v4077_v43 = vsel %vm2544_vm15, 1.0, %v8080_v62  ;;  %v2962_v46 = vsub.f32 %v7186_v20, %v7205_v27 }
 0x3e3   : > { %vm2539_vm13 = vcmp.eq.f32.partialorder %v7237_v63, %v2502_v18  ;;  %v4506_v18 = vcvt.f32.s32 %v4505_v53  ;;  %v4510_v47 = vsel %vm4507_vm6, %v4508_v41, %v4509_v19  ;;  %v2961_v53 = vsub.f32 %v7144_v15, %v7164_v45 }
 0x3e4   : > { %v4072_v26 = vsel %vm2539_vm13, 1.0, %v8080_v62  ;;  %v2997_v15 = vadd.f32 1.0, %v8147_v24 }
 0x3e5   : > { %3041 = vperm.xlu1 %4656, %v4499_v22   ;;  %3035 = vperm.xlu2 %4657, %v4495_v54   ;;  %v7250_v8 = vmul.f32 %v4072_v26, %v2574_v33  ;;  %v4518_v54 = vceil.f32 %v3009_v57  ;;  %v3011_v57 = vmin.f32 %v3003_v6, 15.0 }
 0x3e7   : > { %v7252_v4 = vpop.permute.xlu1 %2521  ;;  %v2589_v13 = vpop.permute.xlu2 %2588  ;;  %v4520_v56 = vsel %vm4517_vm2, %v4518_v54, %v4519_v39  ;;  %v4529_v55 = vfloor.f32 %v3011_v57  ;;  %vm4527_vm14 = vcmp.lt.s32.totalorder %v3011_v57, 0 }
 0x3e8   : > { %3038 = vperm.xlu0 %4655, %v4497_v58   ;;  %v4074_v58 = vsel %vm2541_vm1, 1.0, %v8080_v62  ;;  %vm2543_vm9 = vcmp.eq.f32.partialorder %v7237_v63, %v7252_v4  ;;  %v3073_v4 = vsub.f32 1.0, %v2961_v53 }
 0x3e9   : > { %v4076_v41 = vsel %vm2543_vm9, 1.0, %v8080_v62 }
 0x3ea   : > { %v2517_v7 = vpop.permute.xlu0 %2516 }
 0x3eb   : > { %vm2542_vm12 = vcmp.eq.f32.partialorder %v7237_v63, %v2517_v7  ;;  %v4521_v7 = vcvt.f32.s32 %v4520_v56 }
 0x3ec   : > { %v4075_v42 = vsel %vm2542_vm12, 1.0, %v8080_v62 }
 0x3ed   : > { %3085 = vperm.xlu1 %4656, %v3071_v17   ;;  %3044 = vperm.xlu2 %4657, %v4501_v16   ;;  %v7267_v35 = vmul.f32 %v4075_v42, %v2589_v13  ;;  %v4511_v13 = vcvt.f32.s32 %v4510_v47  ;;  %v4073_v16 = vsel %vm2540_vm7, 1.0, %v8080_v62 }
 0x3ef   : > { %v7269_v33 = vpop.permute.xlu1 %2536  ;;  %v2604_v25 = vpop.permute.xlu2 %2603 }
 0x3f0   : > { %4102 = vmatmul.msk.bf16.gmra.mxu2 %vm2757_vm8, %v2473_v11  ;;  %3080 = vperm.xlu0 %4655, %v3070_v52   ;;  %v3008_v11 = vmin.f32 %v3000_v48, 15.0  ;;  %v3072_v48 = vsub.f32 1.0, %v2960_v31  ;;  %vm2546_vm11 = vcmp.eq.f32.partialorder %v7237_v63, %v7269_v33 }
 0x3f1   : > { %v4079_v47 = vsel %vm2546_vm11, 1.0, %v8080_v62 }
 0x3f2   : > { %v2532_v22 = vpop.permute.xlu0 %2531  ;;  %v4513_v1 = vceil.f32 %v3008_v11  ;;  %v4514_v17 = vfloor.f32 %v3008_v11  ;;  %vm4512_vm10 = vcmp.lt.s32.totalorder %v3008_v11, 0 }
 0x3f3   : > { %vm2545_vm4 = vcmp.eq.f32.partialorder %v7237_v63, %v2532_v22  ;;  %v4528_v22 = vceil.f32 %v3011_v57 }
 0x3f4   : > { %v4078_v0 = vsel %vm2545_vm4, 1.0, %v8080_v62  ;;  %v4515_v12 = vsel %vm4512_vm10, %v4513_v1, %v4514_v17 }
 0x3f5   : > { %3176 = vperm.xlu1 %4656, %v2958_v34   ;;  %3127 = vperm.xlu2 %4657, %v4506_v18   ;;  %v7276_v38 = vmul.f32 %v4078_v0, %v2604_v25  ;;  %v4516_v42 = vcvt.f32.s32 %v4515_v12  ;;  %v4530_v18 = vsel %vm4527_vm14, %v4528_v22, %v4529_v55  ;;  %v3005_v0 = vmax.f32 %v2997_v15, 0.0 }
 0x3f6   : > { %v4531_v39 = vcvt.f32.s32 %v4530_v18 }
 0x3f7   : > { %v2584_v26 = vpop.permute.xlu1 %2583  ;;  %v7281_v21 = vpop.permute.xlu2 %2626  ;;  %v3013_v1 = vmin.f32 %v3005_v0, 15.0 }
 0x3f8   : > { %v7279_v3 = vmul.f32 %v4074_v58, %v2584_v26  ;;  %3130 = vperm.xlu0 %4655, %v4511_v13   ;;  %v2996_v13 = vadd.f32 1.0, %v8143_v23  ;;  %vm2660_vm7 = vcmp.eq.f32.partialorder %v7237_v63, %v7281_v21 }
 0x3f9   : > { %v4538_v6 = vceil.f32 %v3013_v1  ;;  %v4539_v12 = vfloor.f32 %v3013_v1  ;;  %vm4537_vm13 = vcmp.lt.s32.totalorder %v3013_v1, 0 }
 0x3fa   : > { %v2579_v34 = vpop.permute.xlu0 %2578  ;;  %v3004_v17 = vmax.f32 %v2996_v13, 0.0 }
 0x3fb   : > { %v7289_v59 = vmul.f32 %v4073_v16, %v2579_v34  ;;  %v3074_v16 = vsub.f32 1.0, %v2962_v46  ;;  %v2963_v34 = vsub.f32 %v7209_v44, %v7223_v37  ;;  %v8149_v44 = vld [vmem:[#allocation28_spill] sm:$0xff] }
 0x3fc   : > { %v3012_v23 = vmin.f32 %v3004_v17, 15.0  ;;  %v3239_v37 = vmul.f32 16.0, %v8149_v44 }
 0x3fd   : > { %3136 = vperm.xlu1 %4656, %v4521_v7   ;;  %3181 = vperm.xlu2 %4657, %v7256_v36   ;;  %v3002_v36 = vmax.f32 %v2994_v60, 0.0  ;;  %v3075_v27 = vsub.f32 1.0, %v2963_v34 }
 0x3fe   : > { %v4534_v57 = vfloor.f32 %v3012_v23  ;;  %vm4532_vm12 = vcmp.lt.s32.totalorder %v3012_v23, 0 }
 0x3ff   : > { %v2599_v49 = vpop.permute.xlu1 %2598  ;;  %v7296_v25 = vpop.permute.xlu2 %2641  ;;  %v3010_v50 = vmin.f32 %v3002_v36, 15.0 }
 0x400   : > { %v7294_v52 = vmul.f32 %v4077_v43, %v2599_v49  ;;  %4103 = vmatmul.msk.bf16.gmra.mxu2 %vm2757_vm8, %v2474_v61  ;;  %3133 = vperm.xlu0 %4655, %v4516_v42   ;;  %v4540_v42 = vsel %vm4537_vm13, %v4538_v6, %v4539_v12  ;;  %vm2663_vm6 = vcmp.eq.f32.partialorder %v7237_v63, %v7296_v25  ;;  %v8153_v6 = vld [vmem:[#allocation31_spill] sm:$0xff] }
 0x401   : > { %v4523_v45 = vceil.f32 %v3010_v50  ;;  %v4524_v54 = vfloor.f32 %v3010_v50  ;;  %vm4522_vm5 = vcmp.lt.s32.totalorder %v3010_v50, 0  ;;  %v4541_v36 = vcvt.f32.s32 %v4540_v42  ;;  %v8150_v50 = vld [vmem:[#allocation45_spill] sm:$0xff] }
 0x402   : > { %v2594_v19 = vpop.permute.xlu0 %2593  ;;  %v3240_v12 = vmul.f32 16.0, %v8153_v6  ;;  %v4235_v6 = vld [vmem:[#allocation6 + $0x8] sm:$0xff] }
 0x403   : > { %v7309_v2 = vmul.f32 %v4076_v41, %v2594_v19  ;;  %v4525_v58 = vsel %vm4522_vm5, %v4523_v45, %v4524_v54  ;;  %vm3626_vm5 = vcmask 785408  }
 0x404   : > { %v4526_v56 = vcvt.f32.s32 %v4525_v58  ;;  %v4084_v58 = vsel %vm2663_vm6, 1.0, %v8080_v62 }
 0x405   : > { %3186 = vperm.xlu1 %4656, %v2960_v31   ;;  %3090 = vperm.xlu2 %4657, %v3072_v48   ;;  %v4533_v31 = vceil.f32 %v3012_v23  ;;  %v7335_v48 = vadd.f32 -0.5, %v3239_v37  ;;  %v7370_v37 = vadd.f32 -0.5, %v3240_v12 }
 0x407   : > { %v7311_v9 = vpop.permute.xlu1 %2621  ;;  %v7313_v61 = vpop.permute.xlu2 %2656  ;;  %v4535_v41 = vsel %vm4532_vm12, %v4533_v31, %v4534_v57  ;;  %v3255_v45 = vfloor.f32 %v7335_v48 }
 0x408   : > { %3095 = vperm.xlu0 %4655, %v3073_v4   ;;  %v3238_v4 = vmul.f32 16.0, %v8150_v50  ;;  %v4536_v18 = vcvt.f32.s32 %v4535_v41  ;;  %vm2666_vm1 = vcmp.eq.f32.partialorder %v7237_v63, %v7313_v61  ;;  %vm2659_vm4 = vcmp.eq.f32.partialorder %v7237_v63, %v7311_v9 }
 0x409   : > { %v3271_v13 = vmax.f32 %v3255_v45, 0.0  ;;  %v4080_v42 = vsel %vm2659_vm4, 1.0, %v8080_v62 }
 0x40a   : > { %v2609_v11 = vpop.permute.xlu0 %2608  ;;  %v4144_v54 = vadd.f32 -0.5, %v3238_v4 }
 0x40b   : > { %v7319_v26 = vmul.f32 %v4079_v47, %v2609_v11  ;;  %v8151_v47 = vld [vmem:[#allocation34_spill] sm:$0xff] }
 0x40c   : > { %v3076_v11 = vsub.f32 1.0, %v8151_v47  ;;  %v3254_v17 = vfloor.f32 %v4144_v54 }
 0x40d   : > { %3142 = vperm.xlu1 %4656, %v4531_v39   ;;  %3191 = vperm.xlu2 %4657, %v2961_v53  }
 0x40f   : > { %v7322_v24 = vpop.permute.xlu1 %2636  ;;  %v2696_v33 = vpop.permute.xlu2 %2695 }
 0x410   : > { %3139 = vperm.xlu0 %4655, %v4526_v56   ;;  %v8152_v56 = vld [vmem:[#allocation44_spill] sm:$0xff]  ;;  %vm2662_vm10 = vcmp.eq.f32.partialorder %v7237_v63, %v7322_v24 }
 0x412   : > { %v2632_v7 = vpop.permute.xlu0 %2631 }
 0x413   : > { %vm2661_vm0 = vcmp.eq.f32.partialorder %v7237_v63, %v2632_v7  ;;  %v3279_v7 = vmin.f32 %v3271_v13, 15.0 }
 0x414   : > { %v4082_v60 = vsel %vm2661_vm0, 1.0, %v8080_v62 }
 0x415   : > { %3196 = vperm.xlu1 %4656, %v2962_v46   ;;  %3100 = vperm.xlu2 %4657, %v3074_v16   ;;  %v7330_v49 = vmul.f32 %v4082_v60, %v2696_v33  ;;  %v3077_v33 = vsub.f32 1.0, %v8152_v56  ;;  %v3270_v16 = vmax.f32 %v3254_v17, 0.0  ;;  %v4087_v60 = vsel %vm2666_vm1, 1.0, %v8080_v62 }
 0x417   : > { %v2652_v20 = vpop.permute.xlu1 %2651  ;;  %v2711_v43 = vpop.permute.xlu2 %2710  ;;  %v3278_v61 = vmin.f32 %v3270_v16, 15.0 }
 0x418   : > { %3105 = vperm.xlu0 %4655, %v3075_v27   ;;  %v3262_v27 = vsub.f32 %v4144_v54, %v3254_v17  ;;  %vm2665_vm2 = vcmp.eq.f32.partialorder %v7237_v63, %v2652_v20  ;;  %v4242_v20 = vld [vmem:[%s7671_s7 + $0x28] sm:$0xff]  ;;  %v4236_v54 = vld [vmem:[#allocation6 + $0x10] sm:$0xff] }
 0x419   : > { %3641 = vmatpush.bf16.msrb.mxu0 %v4242_v20  ;;  %2846 = vmatpush.bf16.msrb.mxu3 %v4236_v54 }
 0x41a   : > { %v2647_v53 = vpop.permute.xlu0 %2646 }
 0x41b   : > { %vm2664_vm3 = vcmp.eq.f32.partialorder %v7237_v63, %v2647_v53  ;;  %v4086_v53 = vsel %vm2665_vm2, 1.0, %v8080_v62 }
 0x41c   : > { %v4085_v19 = vsel %vm2664_vm3, 1.0, %v8080_v62 }
 0x41d   : > { %3148 = vperm.xlu1 %4656, %v4541_v36   ;;  %3201 = vperm.xlu2 %4657, %v2963_v34   ;;  %v7337_v22 = vmul.f32 %v4085_v19, %v2711_v43  ;;  %v3286_v34 = vadd.f32 1.0, %v3254_v17  ;;  %v3287_v43 = vadd.f32 1.0, %v3255_v45  ;;  %v3414_v36 = vsub.f32 1.0, %v3262_v27 }
 0x41e   : > { %2847 = vmatpush.bf16.msrb.mxu3 %v4235_v6 }
 0x41f   : > { %v7339_v55 = vpop.permute.xlu1 %2690  ;;  %v7342_v15 = vpop.permute.xlu2 %2903  ;;  %v3294_v44 = vmax.f32 %v3286_v34, 0.0  ;;  %v3295_v50 = vmax.f32 %v3287_v43, 0.0  ;;  %v4241_v34 = vld [vmem:[%s7671_s7 + $0x20] sm:$0xff] }
 0x420   : > { %3145 = vperm.xlu0 %4655, %v4536_v18   ;;  %3642 = vmatpush.bf16.msrb.mxu0 %v4241_v34 }
 0x421   : > { %v3302_v19 = vmin.f32 %v3294_v44, 15.0 }
 0x422   : > { %v2686_v39 = vpop.permute.xlu0 %2685 }
 0x423   : > { %v2723_v9 = vmul.f32 %v4080_v42, %v2686_v39 }
 0x425   : > { %3206 = vperm.xlu1 %4656, %v8151_v47   ;;  %3110 = vperm.xlu2 %4657, %v3076_v11   ;;  %v7381_v18 = vadd.f32 %v2723_v9, %v7250_v8  ;;  %v3256_v47 = vfloor.f32 %v7370_v37  ;;  %v8154_v11 = vld [vmem:[#allocation48_spill] sm:$0xff] }
 0x426   : > { %v3241_v21 = vmul.f32 16.0, %v8154_v11 }
 0x427   : > { %v2706_v0 = vpop.permute.xlu1 %2705  ;;  %v7353_v1 = vpop.permute.xlu2 %2912  ;;  %v3272_v43 = vmax.f32 %v3256_v47, 0.0 }
 0x428   : > { %v7351_v46 = vmul.f32 %v4084_v58, %v2706_v0  ;;  %3115 = vperm.xlu0 %4655, %v3077_v33   ;;  %v4081_v0 = vsel %vm2660_vm7, 1.0, %v8080_v62  ;;  %v3303_v58 = vmin.f32 %v3295_v50, 15.0  ;;  %v3288_v33 = vadd.f32 1.0, %v3256_v47  ;;  %v8156_v50 = vld [vmem:[#allocation53_spill] sm:$0xff] }
 0x429   : > { %v2724_v8 = vmul.f32 %v4081_v0, %v7339_v55  ;;  %v4147_v17 = vadd.f32 -0.5, %v3241_v21  ;;  %v3243_v20 = vmul.f32 16.0, %v8156_v50 }
 0x42a   : > { %v7357_v25 = vpop.permute.xlu0 %2700 }
 0x42b   : > { %v7398_v12 = vadd.f32 %v2724_v8, %v7289_v59  ;;  %v3257_v42 = vfloor.f32 %v4147_v17 }
 0x42d   : > { %3357 = vperm.xlu1 %4656, %v3279_v7   ;;  %3211 = vperm.xlu2 %4657, %v8152_v56   ;;  %v3263_v56 = vsub.f32 %v7335_v48, %v3255_v45  ;;  %v7402_v48 = vadd.f32 %v7330_v49, %v7279_v3  ;;  %v3296_v45 = vmax.f32 %v3288_v33, 0.0  ;;  %v3280_v49 = vmin.f32 %v3272_v43, 15.0 }
 0x42e   : > { %v3265_v11 = vsub.f32 %v4147_v17, %v3257_v42  ;;  %v4083_v17 = vsel %vm2662_vm10, 1.0, %v8080_v62 }
 0x42f   : > { %v2721_v23 = vpop.permute.xlu1 %2720  ;;  %v7367_v57 = vpop.permute.xlu2 %2921  ;;  %v3415_v16 = vsub.f32 1.0, %v3263_v56  ;;  %v3304_v9 = vmin.f32 %v3296_v45, 15.0  ;;  %v2726_v34 = vmul.f32 %v4083_v17, %v7357_v25  ;;  %v7443_v25 = vadd.f32 %v7351_v46, %v7309_v2 }
 0x430   : > { %v7365_v31 = vmul.f32 %v4087_v60, %v2721_v23  ;;  %3352 = vperm.xlu0 %4655, %v3278_v61   ;;  %v4234_v23 = vld [vmem:[#allocation6] sm:$0xff]  ;;  %v4240_v60 = vld [vmem:[%s7671_s7 + $0x18] sm:$0xff] }
 0x431   : > { %v8155_v61 = vld [vmem:[#allocation49_spill] sm:$0xff]  ;;  %2848 = vmatpush.bf16.msrb.mxu3 %v4234_v23  ;;  %3643 = vmatpush.bf16.msrb.mxu0 %v4240_v60 }
 0x432   : > { %v2716_v41 = vpop.permute.xlu0 %2715  ;;  %v3242_v44 = vmul.f32 16.0, %v8155_v61  ;;  %v4237_v61 = vld [vmem:[%s7671_s7] sm:$0xff] }
 0x433   : > { %v7375_v4 = vmul.f32 %v4086_v53, %v2716_v41  ;;  %v3289_v53 = vadd.f32 1.0, %v3257_v42  ;;  %v4239_v41 = vld [vmem:[%s7671_s7 + $0x10] sm:$0xff] }
 0x435   : > { %3424 = vperm.xlu1 %4656, %v3414_v36   ;;  %3472 = vperm.xlu2 %4657, %v3302_v19   ;;  %v3273_v36 = vmax.f32 %v3257_v42, 0.0  ;;  %v4148_v19 = vadd.f32 -0.5, %v3242_v44  ;;  %v3297_v0 = vmax.f32 %v3289_v53, 0.0  ;;  %v4238_v42 = vld [vmem:[%s7671_s7 + $0x8] sm:$0xff] }
 0x436   : > { %3644 = vmatpush.bf16.msrb.mxu0 %v4239_v41 }
 0x437   : > { %v7383_v39 = vpop.permute.xlu1 %2909  ;;  %v7388_v13 = vpop.permute.xlu2 %3026  ;;  %v3281_v21 = vmin.f32 %v3273_v36, 15.0  ;;  %v3258_v8 = vfloor.f32 %v4148_v19 }
 0x438   : > { %3477 = vperm.xlu0 %4655, %v3303_v58   ;;  %v4149_v58 = vadd.f32 -0.5, %v3243_v20 }
 0x439   : > { %v3274_v45 = vmax.f32 %v3258_v8, 0.0  ;;  %v3290_v53 = vadd.f32 1.0, %v3258_v8 }
 0x43a   : > { %v7392_v7 = vpop.permute.xlu0 %2906  ;;  %v3259_v23 = vfloor.f32 %v4149_v58  ;;  %3645 = vmatpush.bf16.msrb.mxu0 %v4238_v42  ;;  %v2926_v42 = vsub.s32 %v6468_v29, %v7342_v15 }
 0x43b   : > { %v3282_v60 = vmin.f32 %v3274_v45, 15.0  ;;  %v3298_v20 = vmax.f32 %v3290_v53, 0.0 }
 0x43c   : > { %v3291_v43 = vadd.f32 1.0, %v3259_v23  ;;  %v3275_v36 = vmax.f32 %v3259_v23, 0.0 }
 0x43d   : > { %3541 = vperm.xlu1 %4656, %v3263_v56   ;;  %3429 = vperm.xlu2 %4657, %v3415_v16   ;;  %v3417_v56 = vsub.f32 1.0, %v3265_v11  ;;  %v3264_v16 = vsub.f32 %v7370_v37, %v3256_v47  ;;  %v2734_v37 = vadd.f32 %v2726_v34, %v7267_v35  ;;  %v8157_v35 = vld [vmem:[#allocation47_spill] sm:$0xff] }
 0x43e   : > { %3646 = vmatpush.bf16.msrb.mxu0 %v4237_v61  ;;  %v3245_v41 = vmul.f32 16.0, %v8157_v35  ;;  %v3283_v46 = vmin.f32 %v3275_v36, 15.0  ;;  %v8158_v34 = vld [vmem:[#allocation43_spill] sm:$0xff]  ;;  %v2927_v61 = vsub.s32 %v6468_v29, %v7392_v7 }
 0x43f   : > { %v7404_v55 = vpop.permute.xlu1 %2918  ;;  %v7409_v59 = vpop.permute.xlu2 %3035  ;;  %v3416_v63 = vsub.f32 1.0, %v3264_v16  ;;  %v3244_v45 = vmul.f32 16.0, %v8158_v34 }
 0x440   : > { %3536 = vperm.xlu0 %4655, %v3262_v27   ;;  %v7419_v27 = vadd.f32 %v7337_v22, %v7294_v52  ;;  %v3305_v22 = vmin.f32 %v3297_v0, 15.0  ;;  %v7463_v17 = vadd.f32 -0.5, %v3245_v41  ;;  %vm3047_vm14 = vcmp.eq.s32.totalorder %v2927_v61, %v7388_v13 }
 0x442   : > { %v7412_v3 = vpop.permute.xlu0 %2915 }
 0x445   : > { %3482 = vperm.xlu1 %4656, %v3304_v9   ;;  %3362 = vperm.xlu2 %4657, %v3280_v49   ;;  %v3299_v49 = vmax.f32 %v3291_v43, 0.0  ;;  %v3267_v43 = vsub.f32 %v4149_v58, %v3259_v23 }
 0x447   : > { %v7422_v54 = vpop.permute.xlu1 %3023  ;;  %v7426_v33 = vpop.permute.xlu2 %3044  ;;  %v3307_v2 = vmin.f32 %v3299_v49, 15.0  ;;  %v3419_v36 = vsub.f32 1.0, %v3267_v43 }
 0x448   : > { %3367 = vperm.xlu0 %4655, %v3281_v21   ;;  %vm3046_vm9 = vcmp.eq.s32.totalorder %v2926_v42, %v7422_v54  ;;  %v4129_v54 = vsel %vm3047_vm14, 1.0, %v8080_v62 }
 0x449   : > { %v4128_v7 = vsel %vm3046_vm9, 1.0, %v8080_v62 }
 0x44a   : > { %v7428_v52 = vpop.permute.xlu0 %2924 }
 0x44d   : > { %3439 = vperm.xlu1 %4656, %v3417_v56   ;;  %3487 = vperm.xlu2 %4657, %v3305_v22   ;;  %v7457_v22 = vadd.f32 %v7375_v4, %v7276_v38  ;;  %v4150_v38 = vadd.f32 -0.5, %v3244_v45 }
 0x44f   : > { %v7433_v6 = vpop.permute.xlu1 %3032  ;;  %v3128_v44 = vpop.permute.xlu2 %3127 }
 0x450   : > { %3434 = vperm.xlu0 %4655, %v3416_v63   ;;  %vm3150_vm15 = vcmp.eq.s32.totalorder %v2926_v42, %v3128_v44 }
 0x451   : > { %v4136_v58 = vsel %vm3150_vm15, 1.0, %v8080_v62 }
 0x452   : > { %v7439_v47 = vpop.permute.xlu0 %3029 }
 0x453   : > { %v2779_v24 = vpop.f32.mrf.mxu2 }
 0x454   : > { %v2799_v21 = vmul.f32 %v2779_v24, %v7381_v18  ;;  %v3306_v24 = vmin.f32 %v3298_v20, 15.0 }
 0x455   : > { %3372 = vperm.xlu1 %4656, %v3282_v60   ;;  %3546 = vperm.xlu2 %4657, %v3264_v16   ;;  %v7461_v16 = vadd.f32 %v7365_v31, %v7319_v26  ;;  %v7468_v60 = vfloor.f32 %v7463_v17 }
 0x457   : > { %v7448_v9 = vpop.permute.xlu1 %3041  ;;  %v3182_v63 = vpop.permute.xlu2 %3181 }
 0x458   : > { %3551 = vperm.xlu0 %4655, %v3265_v11  }
 0x45a   : > { %v7452_v0 = vpop.permute.xlu0 %3038 }
 0x45b   : > { %v2781_v50 = vpop.f32.mrf.mxu2 }
 0x45c   : > { %v2800_v56 = vmul.f32 %v2781_v50, %v7398_v12  ;;  %v3266_v12 = vsub.f32 %v4148_v19, %v3258_v8  ;;  %v3277_v19 = vmax.f32 %v7468_v60, 0.0  ;;  %v3260_v8 = vfloor.f32 %v4150_v38 }
 0x45d   : > { %3497 = vperm.xlu1 %4656, %v3307_v2   ;;  %3377 = vperm.xlu2 %4657, %v3283_v46  }
 0x45e   : > { %v2807_v11 = vpack.c.bf16 %v2800_v56, %v2799_v21  ;;  %v3418_v31 = vsub.f32 1.0, %v3266_v12  ;;  %v3285_v35 = vmin.f32 %v3277_v19, 15.0  ;;  %v3276_v41 = vmax.f32 %v3260_v8, 0.0 }
 0x45f   : > { %v3086_v18 = vpop.permute.xlu1 %3085  ;;  %v3091_v53 = vpop.permute.xlu2 %3090  ;;  %v3292_v46 = vadd.f32 1.0, %v3260_v8  ;;  %v2929_v19 = vsub.s32 %v6468_v29, %v7353_v1 }
 0x460   : > { %4116 = vmatmul.msk.bf16.vlgmr.msrb.gmra.mxu3 %vm2757_vm8, %v2807_v11  ;;  %3492 = vperm.xlu0 %4655, %v3306_v24   ;;  %v3119_v13 = vmul.f32 %v4129_v54, %v3086_v18  ;;  %v3268_v24 = vsub.f32 %v4150_v38, %v3260_v8 }
 0x461   : > { %vm3049_vm3 = vcmp.eq.s32.totalorder %v2929_v19, %v7433_v6 }
 0x462   : > { %v3081_v26 = vpop.permute.xlu0 %3080  ;;  %v3420_v42 = vsub.f32 1.0, %v3268_v24 }
 0x463   : > { %v2784_v4 = vpop.f32.mrf.mxu2  ;;  %v3118_v20 = vmul.f32 %v4128_v7, %v3081_v26  ;;  %v2928_v26 = vsub.s32 %v6468_v29, %v7383_v39 }
 0x464   : > { %v2801_v44 = vmul.f32 %v2784_v4, %v7402_v48  ;;  %v3300_v48 = vmax.f32 %v3292_v46, 0.0 }
 0x465   : > { %3556 = vperm.xlu1 %4656, %v3266_v12   ;;  %3444 = vperm.xlu2 %4657, %v3418_v31   ;;  %v3284_v12 = vmin.f32 %v3276_v41, 15.0  ;;  %vm3048_vm13 = vcmp.eq.s32.totalorder %v2928_v26, %v7439_v47  ;;  %v4131_v41 = vsel %vm3049_vm3, 1.0, %v8080_v62 }
 0x466   : > { %v3308_v38 = vmin.f32 %v3300_v48, 15.0  ;;  %v4130_v1 = vsel %vm3048_vm13, 1.0, %v8080_v62 }
 0x467   : > { %v3177_v49 = vpop.permute.xlu1 %3176 }
 0x468   : > { %3449 = vperm.xlu0 %4655, %v3419_v36   ;;  %v3214_v15 = vmul.f32 %v4136_v58, %v3177_v49  ;;  %v3269_v36 = vsub.f32 %v7463_v17, %v7468_v60 }
 0x46a   : > { %v3131_v50 = vpop.permute.xlu0 %3130  ;;  %v3222_v11 = vadd.f32 %v3214_v15, %v3118_v20 }
 0x46b   : > { %v2786_v23 = vpop.f32.mrf.mxu2  ;;  %vm3151_vm11 = vcmp.eq.s32.totalorder %v2927_v61, %v3131_v50  ;;  %v3421_v50 = vsub.f32 1.0, %v3269_v36 }
 0x46c   : > { %v2802_v2 = vmul.f32 %v2786_v23, %v2734_v37  ;;  %v4137_v21 = vsel %vm3151_vm11, 1.0, %v8080_v62  ;;  %v3293_v37 = vadd.f32 1.0, %v7468_v60  ;;  %v3230_v31 = vmul.f32 %v8137_v30, %v3222_v11  ;;  %v8160_v11 = vld [vmem:[#allocation25_spill] sm:$0xff] }
 0x46d   : > { %3387 = vperm.xlu1 %4656, %v3285_v35   ;;  %3561 = vperm.xlu2 %4657, %v3267_v43   ;;  %v3215_v34 = vmul.f32 %v4137_v21, %v3182_v63  ;;  %v3192_v63 = vpop.permute.xlu2 %3191  ;;  %v3120_v23 = vmul.f32 %v4130_v1, %v3091_v53  ;;  %v8164_v1 = vld [vmem:[#allocation35_spill] sm:$0xff] }
 0x46e   : > { %v2808_v56 = vpack.c.bf16 %v2802_v2, %v2801_v44  ;;  %v3301_v49 = vmax.f32 %v3293_v37, 0.0 }
 0x46f   : > { %v3137_v45 = vpop.permute.xlu1 %3136  ;;  %v3223_v4 = vadd.f32 %v3215_v34, %v3119_v13  ;;  %v3781_v34 = vsub.f32 1.0, %v8160_v11  ;;  %v4247_v11 = vld [vmem:[%s7672_s8 + $0x20] sm:$0xff] }
 0x470   : > { %4117 = vmatmul.msk.bf16.gmra.mxu3 %vm2757_vm8, %v2808_v56  ;;  %3382 = vperm.xlu0 %4655, %v3284_v12   ;;  %vm3153_vm12 = vcmp.eq.s32.totalorder %v2929_v19, %v3137_v45  ;;  %v3309_v30 = vmin.f32 %v3301_v49, 15.0  ;;  %v2931_v12 = vsub.s32 %v6468_v29, %v7404_v55 }
 0x471   : > { %v3231_v43 = vmul.f32 %v8136_v14, %v3223_v4  ;;  %v4139_v15 = vsel %vm3153_vm12, 1.0, %v8080_v62 }
 0x472   : > { %v3134_v61 = vpop.permute.xlu0 %3133  ;;  %v3217_v2 = vmul.f32 %v4139_v15, %v3192_v63  ;;  %vm3051_vm2 = vcmp.eq.s32.totalorder %v2931_v12, %v7452_v0  ;;  %v8163_v63 = vld [vmem:[#allocation38_spill] sm:$0xff]  ;;  %v3785_v15 = vsub.f32 1.0, %v8164_v1 }
 0x473   : > { %v2789_v18 = vpop.f32.mrf.mxu2  ;;  %vm3152_vm0 = vcmp.eq.s32.totalorder %v2928_v26, %v3134_v61  ;;  %v3310_v8 = vpack.c.bf16 %v3231_v43, %v3230_v31  ;;  %v8162_v31 = vld [vmem:[#allocation36_spill] sm:$0xff]  ;;  %v3784_v61 = vsub.f32 1.0, %v8163_v63  ;;  %v4133_v49 = vsel %vm3051_vm2, 1.0, %v8080_v62 }
 0x474   : > { %v4138_v39 = vsel %vm3152_vm0, 1.0, %v8080_v62  ;;  %v2803_v35 = vmul.f32 %v2789_v18, %v7443_v25  ;;  %v2930_v25 = vsub.s32 %v6468_v29, %v7412_v3  ;;  %v8161_v3 = vld [vmem:[#allocation24_spill] sm:$0xff]  ;;  %v3786_v43 = vsub.f32 1.0, %v8162_v31 }
 0x475   : > { %3454 = vperm.xlu1 %4656, %v3420_v42   ;;  %3502 = vperm.xlu2 %4657, %v3308_v38   ;;  %v3101_v6 = vpop.permute.xlu2 %3100 }
 0x476   : > { %4192 = vmatmul.msk.bf16.vlgmr.msrb.gmra.mxu0 %vm3626_vm5, %v3310_v8  ;;  %vm3050_vm6 = vcmp.eq.s32.totalorder %v2930_v25, %v7409_v59 }
 0x477   : > { %v3187_v14 = vpop.permute.xlu1 %3186  ;;  %v4132_v37 = vsel %vm3050_vm6, 1.0, %v8080_v62 }
 0x478   : > { %v3216_v58 = vmul.f32 %v4138_v39, %v3187_v14  ;;  %3507 = vperm.xlu0 %4655, %v3309_v30   ;;  %v3122_v55 = vmul.f32 %v4132_v37, %v3101_v6 }
 0x47a   : > { %v3096_v7 = vpop.permute.xlu0 %3095  ;;  %v3224_v17 = vadd.f32 %v3216_v58, %v3120_v23 }
 0x47b   : > { %v2791_v47 = vpop.f32.mrf.mxu2  ;;  %v3121_v60 = vmul.f32 %v4131_v41, %v3096_v7 }
 0x47c   : > { %v2804_v44 = vmul.f32 %v2791_v47, %v7419_v27  ;;  %v3232_v53 = vmul.f32 %v8142_v5, %v3224_v17  ;;  %v8159_v27 = vld [vmem:[#allocation37_spill] sm:$0xff] }
 0x47d   : > { %3571 = vperm.xlu1 %4656, %v3269_v36   ;;  %3459 = vperm.xlu2 %4657, %v3421_v50   ;;  %v3225_v20 = vadd.f32 %v3217_v2, %v3121_v60  ;;  %v3783_v56 = vsub.f32 1.0, %v8159_v27  ;;  %v3202_v4 = vpop.permute.xlu2 %3201  ;;  %v8166_v50 = vld [vmem:[#allocation41_spill] sm:$0xff] }
 0x47e   : > { %v2809_v46 = vpack.c.bf16 %v2804_v44, %v2803_v35  ;;  %v8165_v35 = vld [vmem:[#allocation40_spill] sm:$0xff]  ;;  %v3788_v2 = vsub.f32 1.0, %v8166_v50 }
 0x47f   : > { %v3143_v54 = vpop.permute.xlu1 %3142  ;;  %v3233_v21 = vmul.f32 %v8141_v40, %v3225_v20  ;;  %v3787_v41 = vsub.f32 1.0, %v8165_v35 }
 0x480   : > { %4118 = vmatmul.msk.bf16.gmra.mxu3 %vm2757_vm8, %v2809_v46  ;;  %3566 = vperm.xlu0 %4655, %v3268_v24   ;;  %vm3155_vm4 = vcmp.eq.s32.totalorder %v2931_v12, %v3143_v54  ;;  %v3782_v24 = vsub.f32 1.0, %v8161_v3  ;;  %v4243_v3 = vld [vmem:[%s7672_s8] sm:$0xff] }
 0x481   : > { %v3311_v48 = vpack.c.bf16 %v3233_v21, %v3232_v53  ;;  %v4141_v59 = vsel %vm3155_vm4, 1.0, %v8080_v62 }
 0x482   : > { %v3140_v45 = vpop.permute.xlu0 %3139  ;;  %v3219_v14 = vmul.f32 %v4141_v59, %v3202_v4 }
 0x483   : > { %v2794_v13 = vpop.f32.mrf.mxu2  ;;  %vm3154_vm1 = vcmp.eq.s32.totalorder %v2930_v25, %v3140_v45  ;;  %v4245_v45 = vld [vmem:[%s7672_s8 + $0x10] sm:$0xff] }
 0x484   : > { %v4140_v5 = vsel %vm3154_vm1, 1.0, %v8080_v62  ;;  %v2805_v38 = vmul.f32 %v2794_v13, %v7457_v22 }
 0x485   : > { %3802 = vperm.xlu1 %4656, %v3783_v56   ;;  %3792 = vperm.xlu2 %4657, %v3781_v34   ;;  %v3111_v23 = vpop.permute.xlu2 %3110 }
 0x486   : > { %4193 = vmatmul.msk.bf16.gmra.mxu0 %vm3626_vm5, %v3311_v48 }
 0x487   : > { %v3197_v40 = vpop.permute.xlu1 %3196 }
 0x488   : > { %v3218_v26 = vmul.f32 %v4140_v5, %v3197_v40  ;;  %3797 = vperm.xlu0 %4655, %v3782_v24   ;;  %v4244_v5 = vld [vmem:[%s7672_s8 + $0x8] sm:$0xff] }
 0x48a   : > { %v3226_v18 = vadd.f32 %v3218_v26, %v3122_v55  ;;  %v3106_v19 = vpop.permute.xlu0 %3105 }
 0x48b   : > { %v2796_v42 = vpop.f32.mrf.mxu2  ;;  %v3123_v30 = vmul.f32 %v4133_v49, %v3106_v19 }
 0x48c   : > { %v2806_v8 = vmul.f32 %v2796_v42, %v7461_v16  ;;  %v3234_v39 = vmul.f32 %v8145_v32, %v3226_v18  ;;  %v2932_v16 = vsub.s32 %v6468_v29, %v7367_v57  ;;  %v2933_v32 = vsub.s32 %v6468_v29, %v7428_v52 }
 0x48d   : > { %3817 = vperm.xlu1 %4656, %v3786_v43   ;;  %3807 = vperm.xlu2 %4657, %v3784_v61   ;;  %v3227_v36 = vadd.f32 %v3219_v14, %v3123_v30  ;;  %v7563_v43 = vld [vmem:[%s7673_s9] ss:$0 sm:$0xff] }
 0x48e   : > { %v2810_v0 = vpack.c.bf16 %v2806_v8, %v2805_v38  ;;  %vm3052_vm7 = vcmp.eq.s32.totalorder %v2932_v16, %v7448_v9  ;;  %v3212_v9 = vpop.permute.xlu2 %3211 }
 0x48f   : > { %v3149_v58 = vpop.permute.xlu1 %3148  ;;  %v3235_v22 = vmul.f32 %v8144_v51, %v3227_v36  ;;  %v4134_v57 = vsel %vm3052_vm7, 1.0, %v8080_v62 }
 0x490   : > { %4119 = vmatmul.msk.bf16.gmra.mxu3 %vm2757_vm8, %v2810_v0  ;;  %3812 = vperm.xlu0 %4655, %v3785_v15   ;;  %vm3157_vm15 = vcmp.eq.s32.totalorder %v2933_v32, %v3149_v58  ;;  %v3124_v60 = vmul.f32 %v4134_v57, %v3111_v23  ;;  %vm3053_vm8 = vcmp.eq.s32.totalorder %v2933_v32, %v7426_v33  ;;  %v4248_v33 = vld [vmem:[%s7672_s8 + $0x28] sm:$0xff] }
 0x491   : > { %v3312_v47 = vpack.c.bf16 %v3235_v22, %v3234_v39  ;;  %v4143_v29 = vsel %vm3157_vm15, 1.0, %v8080_v62  ;;  %v4135_v6 = vsel %vm3053_vm8, 1.0, %v8080_v62  ;;  %3730 = vmatpush.bf16.msrb.mxu1 %v4248_v33 }
 0x492   : > { %v3146_v7 = vpop.permute.xlu0 %3145  ;;  %v3221_v20 = vmul.f32 %v4143_v29, %v3212_v9 }
 0x493   : > { %vm3156_vm10 = vcmp.eq.s32.totalorder %v2932_v16, %v3146_v7 }
 0x494   : > { %v4142_v44 = vsel %vm3156_vm10, 1.0, %v8080_v62 }
 0x495   : > { %3822 = vperm.xlu2 %4657, %v3787_v41   ;;  %3731 = vmatpush.bf16.msrb.mxu1 %v4247_v11 }
 0x496   : > { %4194 = vmatmul.msk.bf16.gmra.mxu0 %vm3626_vm5, %v3312_v47  ;;  %v3473_v12 = vpop.permute.xlu2 %3472 }
 0x497   : > { %v3207_v51 = vpop.permute.xlu1 %3206  ;;  %vm3510_vm9 = vcmp.eq.f32.partialorder %v7563_v43, %v3473_v12 }
 0x498   : > { %v3220_v17 = vmul.f32 %v4142_v44, %v3207_v51  ;;  %3827 = vperm.xlu0 %4655, %v3788_v2   ;;  %v4160_v19 = vsel %vm3510_vm9, 1.0, %v8080_v62 }
 0x49a   : > { %v3228_v52 = vadd.f32 %v3220_v17, %v3124_v60  ;;  %v3116_v46 = vpop.permute.xlu0 %3115 }
 0x49b   : > { %v3125_v54 = vmul.f32 %v4135_v6, %v3116_v46 }
 0x49c   : > { %v3236_v25 = vmul.f32 %v8146_v10, %v3228_v52  ;;  %v4246_v10 = vld [vmem:[%s7672_s8 + $0x18] sm:$0xff] }
 0x49d   : > { %v3229_v53 = vadd.f32 %v3221_v20, %v3125_v54  ;;  %3732 = vmatpush.bf16.msrb.mxu1 %v4246_v10 }
 0x49e   : > { %v3430_v24 = vpop.permute.xlu2 %3429 }
 0x49f   : > { %v3237_v21 = vmul.f32 %v8148_v28, %v3229_v53  ;;  %v3358_v56 = vpop.permute.xlu1 %3357 }
 0x4a0   : > { %vm3391_vm14 = vcmp.eq.f32.partialorder %v7563_v43, %v3358_v56 }
 0x4a1   : > { %v3313_v27 = vpack.c.bf16 %v3237_v21, %v3236_v25  ;;  %3733 = vmatpush.bf16.msrb.mxu1 %v4245_v45  ;;  %v4153_v61 = vsel %vm3391_vm14, 1.0, %v8080_v62 }
 0x4a2   : > { %v3353_v13 = vpop.permute.xlu0 %3352  ;;  %v3463_v0 = vmul.f32 %v4153_v61, %v3430_v24 }
 0x4a3   : > { %vm3390_vm0 = vcmp.eq.f32.partialorder %v7563_v43, %v3353_v13 }
 0x4a4   : > { %v4152_v30 = vsel %vm3390_vm0, 1.0, %v8080_v62 }
 0x4a5   : > { %3734 = vmatpush.bf16.msrb.mxu1 %v4244_v5 }
 0x4a6   : > { %4195 = vmatmul.msk.bf16.gmra.mxu0 %vm3626_vm5, %v3313_v27  ;;  %v3363_v26 = vpop.permute.xlu2 %3362 }
 0x4a7   : > { %v3425_v28 = vpop.permute.xlu1 %3424  ;;  %vm3392_vm13 = vcmp.eq.f32.partialorder %v7563_v43, %v3363_v26 }
 0x4a8   : > { %v3462_v39 = vmul.f32 %v4152_v30, %v3425_v28  ;;  %v4154_v51 = vsel %vm3392_vm13, 1.0, %v8080_v62 }
 0x4a9   : > { %3735 = vmatpush.bf16.msrb.mxu1 %v4243_v3 }
 0x4aa   : > { %v3478_v34 = vpop.permute.xlu0 %3477 }
 0x4ab   : > { %vm3511_vm11 = vcmp.eq.f32.partialorder %v7563_v43, %v3478_v34 }
 0x4ac   : > { %v4161_v38 = vsel %vm3511_vm11, 1.0, %v8080_v62 }
 0x4ae   : > { %v3488_v31 = vpop.permute.xlu2 %3487 }
 0x4af   : > { %v3542_v48 = vpop.permute.xlu1 %3541  ;;  %vm3513_vm12 = vcmp.eq.f32.partialorder %v7563_v43, %v3488_v31 }
 0x4b0   : > { %v3575_v8 = vmul.f32 %v4161_v38, %v3542_v48  ;;  %v4163_v44 = vsel %vm3513_vm12, 1.0, %v8080_v62 }
 0x4b2   : > { %v3537_v40 = vpop.permute.xlu0 %3536  ;;  %v3583_v1 = vadd.f32 %v3575_v8, %v3463_v0 }
 0x4b3   : > { %v3574_v14 = vmul.f32 %v4160_v19, %v3537_v40 }
 0x4b5   : > { %v3582_v58 = vadd.f32 %v3574_v14, %v3462_v39 }
 0x4b6   : > { %v3547_v49 = vpop.permute.xlu2 %3546 }
 0x4b7   : > { %v3483_v37 = vpop.permute.xlu1 %3482 }
 0x4b8   : > { %vm3512_vm3 = vcmp.eq.f32.partialorder %v7563_v43, %v3483_v37 }
 0x4b9   : > { %v4162_v32 = vsel %vm3512_vm3, 1.0, %v8080_v62 }
 0x4ba   : > { %v3368_v4 = vpop.permute.xlu0 %3367  ;;  %v3576_v60 = vmul.f32 %v4162_v32, %v3547_v49 }
 0x4bb   : > { %vm3393_vm6 = vcmp.eq.f32.partialorder %v7563_v43, %v3368_v4 }
 0x4bc   : > { %v4155_v17 = vsel %vm3393_vm6, 1.0, %v8080_v62 }
 0x4be   : > { %v3378_v35 = vpop.permute.xlu2 %3377 }
 0x4bf   : > { %v3440_v55 = vpop.permute.xlu1 %3439  ;;  %vm3395_vm1 = vcmp.eq.f32.partialorder %v7563_v43, %v3378_v35 }
 0x4c0   : > { %v3465_v29 = vmul.f32 %v4155_v17, %v3440_v55  ;;  %v4157_v10 = vsel %vm3395_vm1, 1.0, %v8080_v62 }
 0x4c2   : > { %v3435_v59 = vpop.permute.xlu0 %3434 }
 0x4c3   : > { %v3464_v2 = vmul.f32 %v4154_v51, %v3435_v59  ;;  %v7607_v51 = vld [vmem:[%s7674_s10] ss:$0 sm:$0xff] }
 0x4c5   : > { %v3584_v9 = vadd.f32 %v3576_v60, %v3464_v2 }
 0x4c6   : > { %v3445_v52 = vpop.permute.xlu2 %3444 }
 0x4c7   : > { %v3373_v18 = vpop.permute.xlu1 %3372 }
 0x4c8   : > { %vm3394_vm4 = vcmp.eq.f32.partialorder %v7563_v43, %v3373_v18 }
 0x4c9   : > { %v4156_v56 = vsel %vm3394_vm4, 1.0, %v8080_v62 }
 0x4ca   : > { %v3552_v42 = vpop.permute.xlu0 %3551  ;;  %v3466_v45 = vmul.f32 %v4156_v56, %v3445_v52 }
 0x4cb   : > { %v3577_v57 = vmul.f32 %v4163_v44, %v3552_v42 }
 0x4cd   : > { %v3585_v6 = vadd.f32 %v3577_v57, %v3465_v29 }
 0x4ce   : > { %v3562_v27 = vpop.permute.xlu2 %3561 }
 0x4cf   : > { %v3498_v36 = vpop.permute.xlu1 %3497 }
 0x4d0   : > { %vm3515_vm2 = vcmp.eq.f32.partialorder %v7563_v43, %v3498_v36 }
 0x4d1   : > { %v4165_v13 = vsel %vm3515_vm2, 1.0, %v8080_v62 }
 0x4d2   : > { %v3493_v15 = vpop.permute.xlu0 %3492  ;;  %v3579_v12 = vmul.f32 %v4165_v13, %v3562_v27 }
 0x4d3   : > { %vm3514_vm7 = vcmp.eq.f32.partialorder %v7563_v43, %v3493_v15  ;;  %v2021_v15 = vpop.f32.mrf.mxu3 }
 0x4d4   : > { %v4164_v11 = vsel %vm3514_vm7, 1.0, %v8080_v62 }
 0x4d6   : > { %v3503_v26 = vpop.permute.xlu2 %3502 }
 0x4d7   : > { %v3557_v7 = vpop.permute.xlu1 %3556  ;;  %vm3516_vm10 = vcmp.eq.f32.partialorder %v7563_v43, %v3503_v26 }
 0x4d8   : > { %v3578_v28 = vmul.f32 %v4164_v11, %v3557_v7  ;;  %v4166_v61 = vsel %vm3516_vm10, 1.0, %v8080_v62 }
 0x4da   : > { %v3450_v50 = vpop.permute.xlu0 %3449  ;;  %v3586_v5 = vadd.f32 %v3578_v28, %v3466_v45 }
 0x4db   : > { %v3467_v34 = vmul.f32 %v4157_v10, %v3450_v50 }
 0x4dd   : > { %v3587_v3 = vadd.f32 %v3579_v12, %v3467_v34 }
 0x4de   : > { %v3460_v19 = vpop.permute.xlu2 %3459 }
 0x4df   : > { %v3388_v25 = vpop.permute.xlu1 %3387 }
 0x4e0   : > { %vm3397_vm15 = vcmp.eq.f32.partialorder %v7563_v43, %v3388_v25 }
 0x4e1   : > { %v4159_v42 = vsel %vm3397_vm15, 1.0, %v8080_v62 }
 0x4e2   : > { %v3383_v21 = vpop.permute.xlu0 %3382  ;;  %v3469_v14 = vmul.f32 %v4159_v42, %v3460_v19 }
 0x4e3   : > { %vm3396_vm9 = vcmp.eq.f32.partialorder %v7563_v43, %v3383_v21 }
 0x4e4   : > { %v4158_v8 = vsel %vm3396_vm9, 1.0, %v8080_v62 }
 0x4e6   : > { %v3793_v44 = vpop.permute.xlu2 %3792 }
 0x4e7   : > { %v3455_v48 = vpop.permute.xlu1 %3454  ;;  %v3833_v57 = vmul.f32 %v7607_v51, %v3793_v44 }
 0x4e8   : > { %v3468_v30 = vmul.f32 %v4158_v8, %v3455_v48 }
 0x4ea   : > { %v3508_v40 = vpop.permute.xlu0 %3507 }
 0x4eb   : > { %vm3517_vm8 = vcmp.eq.f32.partialorder %v7563_v43, %v3508_v40 }
 0x4ee   : > { %v3808_v11 = vpop.permute.xlu2 %3807 }
 0x4ef   : > { %v3572_v59 = vpop.permute.xlu1 %3571  ;;  %v3836_v45 = vmul.f32 %v7607_v51, %v3808_v11 }
 0x4f2   : > { %v3567_v31 = vpop.permute.xlu0 %3566 }
 0x4f3   : > { %v3648_v63 = vpop.f32.mrf.mxu0  ;;  %v3580_v49 = vmul.f32 %v4166_v61, %v3567_v31 }
 0x4f4   : > { %v3668_v23 = vmul.f32 %v3648_v63, %v3582_v58  ;;  %v4167_v63 = vsel %vm3517_vm8, 1.0, %v8080_v62 }
 0x4f5   : > { %v3581_v38 = vmul.f32 %v4167_v63, %v3572_v59  ;;  %v3588_v0 = vadd.f32 %v3580_v49, %v3468_v30 }
 0x4f7   : > { %v3589_v39 = vadd.f32 %v3581_v38, %v3469_v14  ;;  %v3823_v38 = vpop.permute.xlu2 %3822 }
 0x4f8   : > { %v3839_v8 = vmul.f32 %v7607_v51, %v3823_v38 }
 0x4fa   : > { %v3798_v52 = vpop.permute.xlu0 %3797 }
 0x4fb   : > { %v3650_v22 = vpop.f32.mrf.mxu0 }
 0x4fc   : > { %v3669_v16 = vmul.f32 %v3650_v22, %v3583_v1  ;;  %v2023_v22 = vpop.f32.mrf.mxu3 }
 0x4fe   : > { %v3676_v47 = vpack.c.bf16 %v3669_v16, %v3668_v23  ;;  %v2011_v23 = vpop.f32.mrf.mxu1 }
 0x500   : > { %4220 = vmatmul.msk.bf16.vlgmr.msrb.gmra.mxu1 %vm3626_vm5, %v3676_v47 }
 0x502   : > { %v3813_v40 = vpop.permute.xlu0 %3812 }
 0x503   : > { %v3653_v41 = vpop.f32.mrf.mxu0 }
 0x504   : > { %v3670_v20 = vmul.f32 %v3653_v41, %v3584_v9  ;;  %v2026_v16 = vpop.f32.mrf.mxu3 }
 0x506   : > { %v2013_v47 = vpop.f32.mrf.mxu1 }
 0x50b   : > { %v3655_v46 = vpop.f32.mrf.mxu0 }
 0x50c   : > { %v3671_v54 = vmul.f32 %v3655_v46, %v3585_v6  ;;  %v7601_v35 = vpop.f32.mrf.mxu3  ;;  %v3834_v46 = vmul.f32 %v7607_v51, %v3798_v52 }
 0x50e   : > { %v3677_v53 = vpack.c.bf16 %v3671_v54, %v3670_v20  ;;  %v2016_v62 = vpop.f32.mrf.mxu1 }
 0x510   : > { %4221 = vmatmul.msk.bf16.gmra.mxu1 %vm3626_vm5, %v3677_v53  ;;  %v3803_v53 = vpop.permute.xlu1 %3802 }
 0x513   : > { %v3658_v33 = vpop.f32.mrf.mxu0 }
 0x514   : > { %v3672_v37 = vmul.f32 %v3658_v33, %v3586_v5  ;;  %v2850_v41 = vpop.f32.mrf.mxu3  ;;  %v3835_v33 = vmul.f32 %v7607_v51, %v3803_v53 }
 0x515   : > { %v2870_v50 = vadd.f32 %v2850_v41, %v2011_v23 }
 0x516   : > { %v2018_v7 = vpop.f32.mrf.mxu1 }
 0x51b   : > { %v3660_v24 = vpop.f32.mrf.mxu0 }
 0x51c   : > { %v3673_v4 = vmul.f32 %v3660_v24, %v3587_v3  ;;  %v2852_v32 = vpop.f32.mrf.mxu3 }
 0x51d   : > { %v2871_v9 = vadd.f32 %v2852_v32, %v2013_v47 }
 0x51e   : > { %v3678_v55 = vpack.c.bf16 %v3673_v4, %v3672_v37  ;;  %v3837_v37 = vmul.f32 %v7607_v51, %v3813_v40 }
 0x520   : > { %4222 = vmatmul.msk.bf16.gmra.mxu1 %vm3626_vm5, %v3678_v55  ;;  %v3818_v55 = vpop.permute.xlu1 %3817 }
 0x523   : > { %v3663_v18 = vpop.f32.mrf.mxu0 }
 0x524   : > { %v3674_v58 = vmul.f32 %v3663_v18, %v3588_v0  ;;  %v2855_v60 = vpop.f32.mrf.mxu3  ;;  %v3838_v18 = vmul.f32 %v7607_v51, %v3818_v55 }
 0x525   : > { %v2872_v21 = vadd.f32 %v2855_v60, %v2016_v62 }
 0x52b   : > { %v3665_v36 = vpop.f32.mrf.mxu0 }
 0x52c   : > { %v3675_v1 = vmul.f32 %v3665_v36, %v3589_v39  ;;  %v2857_v25 = vpop.f32.mrf.mxu3  ;;  %v3828_v39 = vpop.permute.xlu0 %3827 }
 0x52d   : > { %v2873_v28 = vadd.f32 %v2857_v25, %v2018_v7 }
 0x52e   : > { %v3679_v43 = vpack.c.bf16 %v3675_v1, %v3674_v58  ;;  %v3840_v1 = vmul.f32 %v7607_v51, %v3828_v39 }
 0x530   : > { %4223 = vmatmul.msk.bf16.gmra.mxu1 %vm3626_vm5, %v3679_v43 }
 0x534   : > { %v2860_v10 = vpop.f32.mrf.mxu3 }
 0x535   : > { %v2874_v5 = vadd.f32 %v2860_v10, %v2021_v15 }
 0x53c   : > { %v2862_v3 = vpop.f32.mrf.mxu3 }
 0x53d   : > { %v2875_v59 = vadd.f32 %v2862_v3, %v2023_v22 }
 0x544   : > { %v2865_v63 = vpop.f32.mrf.mxu3 }
 0x545   : > { %v2876_v49 = vadd.f32 %v2865_v63, %v2026_v16 }
 0x54c   : > { %v2867_v0 = vpop.f32.mrf.mxu3 }
 0x54d   : > { %v2877_v36 = vadd.f32 %v2867_v0, %v7601_v35 }
 0x57d   : > { %v3737_v2 = vpop.f32.mrf.mxu1 }
 0x57e   : > { %v3757_v17 = vadd.f32 %v3737_v2, %v2870_v50 }
 0x580   : > { %v3841_v29 = vadd.f32 %v3833_v57, %v3757_v17 }
 0x582   : > { %3849 = vst [vmem:[%s7612_s13] sm:$0xff] %v3841_v29 }
 0x585   : > { %v3739_v6 = vpop.f32.mrf.mxu1 }
 0x586   : > { %v3758_v20 = vadd.f32 %v3739_v6, %v2871_v9 }
 0x588   : > { %v3842_v54 = vadd.f32 %v3834_v46, %v3758_v20 }
 0x58a   : > { %3850 = vst [vmem:[%s7612_s13 + $0x8] sm:$0xff] %v3842_v54 }
 0x58d   : > { %v3742_v27 = vpop.f32.mrf.mxu1 }
 0x58e   : > { %v3759_v56 = vadd.f32 %v3742_v27, %v2872_v21 }
 0x590   : > { %v3843_v13 = vadd.f32 %v3835_v33, %v3759_v56 }
 0x592   : > { %3851 = vst [vmem:[%s7612_s13 + $0x10] sm:$0xff] %v3843_v13 }
 0x595   : > { %v3744_v34 = vpop.f32.mrf.mxu1 }
 0x596   : > { %v3760_v12 = vadd.f32 %v3744_v34, %v2873_v28 }
 0x598   : > { %v3844_v48 = vadd.f32 %v3836_v45, %v3760_v12 }
 0x59a   : > { %3852 = vst [vmem:[%s7612_s13 + $0x18] sm:$0xff] %v3844_v48 }
 0x59d   : > { %v3747_v24 = vpop.f32.mrf.mxu1 }
 0x59e   : > { %v3761_v4 = vadd.f32 %v3747_v24, %v2874_v5 }
 0x5a0   : > { %v3845_v26 = vadd.f32 %v3837_v37, %v3761_v4 }
 0x5a2   : > { %3853 = vst [vmem:[%s7612_s13 + $0x20] sm:$0xff] %v3845_v26 }
 0x5a5   : > { %v3749_v31 = vpop.f32.mrf.mxu1 }
 0x5a6   : > { %v3762_v42 = vadd.f32 %v3749_v31, %v2875_v59 }
 0x5a8   : > { %v3846_v61 = vadd.f32 %v3838_v18, %v3762_v42 }
 0x5aa   : > { %3854 = vst [vmem:[%s7612_s13 + $0x28] sm:$0xff] %v3846_v61 }
 0x5ad   : > { %v3752_v19 = vpop.f32.mrf.mxu1 }
 0x5ae   : > { %v3763_v14 = vadd.f32 %v3752_v19, %v2876_v49 }
 0x5b0   : > { %v3847_v30 = vadd.f32 %v3839_v8, %v3763_v14 }
 0x5b2   : > { %3855 = vst [vmem:[%s7612_s13 + $0x30] sm:$0xff] %v3847_v30 }
 0x5b5   : > { %v3754_v58 = vpop.f32.mrf.mxu1 }
 0x5b6   : > { %v3764_v43 = vadd.f32 %v3754_v58, %v2877_v36 }
 0x5b8   : > { %v3848_v15 = vadd.f32 %v3840_v1, %v3764_v43 }
 0x5ba   : > { %3856 = vst [vmem:[%s7612_s13 + $0x38] sm:$0xff] %v3848_v15 }
 0x5bb   : > { %4793 = shalt.err (!%p4790_p8)
}
 0x5bc   : > { %s4851_s12 = smov 128   ;;  %s4852_s13 = smov 8  }
 0x5bd   : > { %4550 = dma.vmem_to_hbm [thread:$0]  (%p4951_p5), %s3871_s24, 1024, %s3873_s25, %s3858_s21, %s4851_s12, %s4851_s12, %s4852_s13  }
 0x5be PF: > { %p4567_p9 = scmp.ge.s32.totalorder %s4836_s20, 2  ;;  %s3887_s22 = sand.u32 1, %s4824_s17  }
 0x5bf   : > { %s3888_s26 = scalar_lea.sflag [#allocation5], %s3887_s22 }
 0x5c0   : > { %p4560_p10 = pnand %p4567_p9, %p4955_p6 }
 0x5c2   : > { %p4561_p11 = pneg %p4560_p10 }
 0x5c4   : > { %4819 = dma.done.wait (%p4561_p11), %s3888_s26, 1024  }
 0x5c5   : > { %4821 = vsyncadd (%p4561_p11), %s3888_s26, 4294966272  ;;  %s8167_s30 = sld [smem:[#allocation12_spill]]  ;;  %p23_p12 = scmp.ge.s32.totalorder %s4938_s23, 4  }
 0x5c6   : > { %s8168_s19 = sld [smem:[#allocation13_spill]]  ;;  %s8169_s17 = smov %s4828_s18 }
 0x5c7   : > { %s8171_s20 = smov %s4938_s23  ;;  %25 = sbr.rel (!%p23_p12) target bundleno = 5 (0x5), region = 108 }
 0x5cb   : > { %s8170_s18 = smov %s8167_s30 }
 0x5cc   :  { %3894 = vsyncpa [#allocation4], 1 }
 0x5cd   :  { %3896 = vsyncpa [#allocation4 + $0x1], 1 }
 0x5ce   :  { %3897 = vsyncpa [#allocation7], 1 }
 0x5cf   :  { %3898 = vsyncpa [#allocation5], 1 }
 0x5d0   :  { %3900 = vsyncpa [#allocation5 + $0x1], 1 }

</bundles_post_ra>
